<compile_context>
chip_gen: v5e
topology: v5e:2x2
jax: 0.10.0
libtpu: 0.0.40
codegen_flags: <defaults>
</compile_context>

<pallas_src>
import functools

import jax
import jax.numpy as jnp
from jax.experimental import pallas as pl
from jax.experimental.pallas import tpu as pltpu

NUM_BLOCKS = 4     # Encoder4 = 4 x CVResblock
F_DIM = 32         # in_features of every CVLinear / CVLayerNorm
EPS = 1e-5         # nn.LayerNorm default eps


# ----------------------------- kernel helpers -----------------------------

def _packed_layernorm(y, avg, gamma, beta):
    """Per-(logical-row, part) LayerNorm on a (tn, W) packed array.

    `avg` is the (W, W) block-diagonal averaging matrix (blocks of F_DIM), so y @ avg broadcasts
    each F_DIM-feature group's mean to every lane of that group (one-pass mean / mean-of-sq)."""
    mu = jnp.dot(y, avg, preferred_element_type=jnp.float32)
    ms = jnp.dot(y * y, avg, preferred_element_type=jnp.float32)
    var = ms - mu * mu
    inv = jax.lax.rsqrt(var + EPS)
    return (y - mu) * (inv * gamma) + beta


def _packed_soft_threshold(y, theta, half):
    """Complex soft-threshold on a (tn, W) packed array.

    The complex partner of every lane sits exactly `half` lanes away, so one XLU roll gives
    |z|^2 broadcast to both the real and imag lane of each element (numerically exact, no MXU)."""
    y2 = y * y
    sq = y2 + pltpu.roll(y2, half, axis=1)
    scale = jnp.maximum(1.0 - theta * jax.lax.rsqrt(sq), 0.0)
    return y * scale


# ------------------------------- the kernel -------------------------------

def encoder4_kernel(theta_ref,   # SMEM (2*NUM_BLOCKS,) f32 [inner0, outer0, inner1, ...]
                    x_ref,       # VMEM (tn, W) packed activations (f32)
                    w_ref,       # VMEM (NUM_BLOCKS, 2, W, W) packed complex weights (bf16 or f32)
                    ln_ref,      # VMEM (NUM_BLOCKS, 4, W) [g1, b1, g2, b2] packed (f32)
                    avg_ref,     # VMEM (W, W) constant block-diag averaging matrix (f32)
                    o_ref):      # VMEM (tn, W) f32
    y = x_ref[...]
    avg = avg_ref[...]
    half = y.shape[-1] // 2      # static: complex-partner lane offset

    for b in range(NUM_BLOCKS):            # static unroll over the 4 resblocks
        identity = y

        # CVLinear -> CVLayerNorm -> CVSoftThreshold
        z = jnp.dot(y.astype(w_ref.dtype), w_ref[b, 0], preferred_element_type=jnp.float32)
        z = _packed_layernorm(z, avg, ln_ref[b, 0], ln_ref[b, 1])
        z = _packed_soft_threshold(z, theta_ref[2 * b], half)

        # CVLinear -> CVLayerNorm
        z = jnp.dot(z.astype(w_ref.dtype), w_ref[b, 1], preferred_element_type=jnp.float32)
        z = _packed_layernorm(z, avg, ln_ref[b, 2], ln_ref[b, 3])

        # residual add + outer threshold (residual stays f32)
        y = _packed_soft_threshold(z + identity, theta_ref[2 * b + 1], half)

    o_ref[...] = y


# ------------------------------ host wrapper -------------------------------

def _pack_params(w_raw, ln_raw, theta, pack, w_dtype):
    """w_raw: (NB, 2, 2, F, F) nn.Linear-style (out,in) weights, axis2 = (real, imag).
       ln_raw: (NB, 8, F) = [g1r, b1r, g1i, b1i, g2r, b2r, g2i, b2i].
       theta:  (NB, 2) = [inner, outer]."""
    nb = w_raw.shape[0]
    f = F_DIM

    wr_t = jnp.swapaxes(w_raw[:, :, 0], -1, -2)          # (NB, 2, F, F): y = x @ Wr^T
    wi_t = jnp.swapaxes(w_raw[:, :, 1], -1, -2)

    eye_p = jnp.eye(pack, dtype=jnp.float32)

    def block_diag(w):                                   # kron(I_pack, w) on trailing 2 dims
        out = jnp.einsum('pq,abij->abpiqj', eye_p, w)
        return out.reshape(nb, 2, pack * f, pack * f)

    wr_bd = block_diag(wr_t)
    wi_bd = block_diag(wi_t)
    top = jnp.concatenate([wr_bd, wi_bd], axis=-1)       # (NB, 2, pack*F, W)
    bot = jnp.concatenate([-wi_bd, wr_bd], axis=-1)
    w_pk = jnp.concatenate([top, bot], axis=-2).astype(w_dtype)   # (NB, 2, W, W)

    def packed_ln(v_r, v_i):                             # (NB, F) x2 -> (NB, W)
        return jnp.concatenate([jnp.tile(v_r, (1, pack)), jnp.tile(v_i, (1, pack))], axis=-1)

    g1 = packed_ln(ln_raw[:, 0], ln_raw[:, 2])
    b1 = packed_ln(ln_raw[:, 1], ln_raw[:, 3])
    g2 = packed_ln(ln_raw[:, 4], ln_raw[:, 6])
    b2 = packed_ln(ln_raw[:, 5], ln_raw[:, 7])
    ln_pk = jnp.stack([g1, b1, g2, b2], axis=1).astype(jnp.float32)   # (NB, 4, W)

    width = 2 * pack * f
    blk = jnp.arange(width) // f
    avg = jnp.where(blk[:, None] == blk[None, :], 1.0 / f, 0.0).astype(jnp.float32)

    return w_pk, ln_pk, avg, theta.reshape(-1).astype(jnp.float32)


def _choose_tile(n_packed, tn_max, min_steps=2):
    """Largest multiple-of-8 divisor of n_packed that is <= tn_max and leaves >= min_steps grid
    steps (so v7x's two TensorCores both get work); falls back to a single full block."""
    best = None
    for t in range(8, min(tn_max, n_packed) + 1, 8):
        if n_packed % t == 0 and n_packed // t >= min_steps:
            best = t
    return best if best is not None else n_packed


@functools.partial(jax.jit, static_argnames=("tn", "pack", "use_bf16"))
def encoder4_pallas(xr, xi, w_raw, ln_raw, theta, *, tn=2048, pack=2, use_bf16=True):
    """pack=2 -> 128-lane rows (all gens, best for v5e); pack=4 -> 256-lane rows (v6e/v7x MXU).
    use_bf16 casts only the two CVLinear weight matmuls to bf16 (f32 accumulation + f32 stats)."""
    n, f = xr.shape
    assert f == F_DIM
    assert n % pack == 0, "batch must be divisible by the row-packing factor"
    n_p = n // pack                       # packed (physical) rows
    half = pack * F_DIM                   # complex-partner lane offset
    width = 2 * half                      # packed lane width (128 for pack=2)
    assert n_p % 8 == 0, "packed row count must be a multiple of 8"

    tn_p = _choose_tile(n_p, tn)
    grid = (n_p // tn_p,)

    # Free row-major reshapes + one lane concat: packed row m =
    #   [ xr[pack*m] .. xr[pack*m+pack-1] | xi[pack*m] .. xi[pack*m+pack-1] ]
    x_pk = jnp.concatenate(
        [xr.reshape(n_p, half), xi.reshape(n_p, half)], axis=-1).astype(jnp.float32)

    w_dtype = jnp.bfloat16 if use_bf16 else jnp.float32
    w_pk, ln_pk, avg, theta_flat = _pack_params(w_raw, ln_raw, theta, pack, w_dtype)

    act_spec = pl.BlockSpec((tn_p, width), lambda i: (i, 0))
    out_pk = pl.pallas_call(
        encoder4_kernel,
        out_shape=jax.ShapeDtypeStruct((n_p, width), jnp.float32),
        grid_spec=pltpu.PrefetchScalarGridSpec(
            num_scalar_prefetch=0,
            grid=grid,
            in_specs=[
                pl.BlockSpec(memory_space=pltpu.MemorySpace.SMEM),                     # theta
                act_spec,                                                              # packed x
                pl.BlockSpec((NUM_BLOCKS, 2, width, width), lambda i: (0, 0, 0, 0)),   # weights
                pl.BlockSpec((NUM_BLOCKS, 4, width), lambda i: (0, 0, 0)),             # LN params
                pl.BlockSpec((width, width), lambda i: (0, 0)),                        # avg matrix
            ],
            out_specs=act_spec,
        ),
        compiler_params=pltpu.CompilerParams(
            dimension_semantics=("parallel",),
            vmem_limit_bytes=32 * 1024 * 1024),
    )(theta_flat, x_pk, w_pk, ln_pk, avg)

    out_r = out_pk[:, :half].reshape(n, F_DIM)
    out_i = out_pk[:, half:].reshape(n, F_DIM)
    return out_r, out_i


# --------------------------- pure-JAX reference ----------------------------

def encoder4_ref(xr, xi, w_raw, ln_raw, theta):
    """PyTorch-faithful reference (two-pass LayerNorm, divide-form soft threshold)."""
    def linear(x, w):            # nn.Linear(bias=False): y = x @ W^T
        return x @ w.T

    def layernorm(x, g, b):
        mu = jnp.mean(x, axis=-1, keepdims=True)
        var = jnp.mean((x - mu) ** 2, axis=-1, keepdims=True)
        return (x - mu) / jnp.sqrt(var + EPS) * g + b

    def soft_threshold(ar, ai, t):
        a = jnp.sqrt(ar * ar + ai * ai)
        amp = jnp.maximum(a - t, 0.0)
        return ar / a * amp, ai / a * amp

    for b in range(NUM_BLOCKS):
        id_r, id_i = xr, xi
        wr1, wi1 = w_raw[b, 0, 0], w_raw[b, 0, 1]
        wr2, wi2 = w_raw[b, 1, 0], w_raw[b, 1, 1]
        yr = linear(xr, wr1) - linear(xi, wi1)
        yi = linear(xr, wi1) + linear(xi, wr1)
        yr = layernorm(yr, ln_raw[b, 0], ln_raw[b, 1])
        yi = layernorm(yi, ln_raw[b, 2], ln_raw[b, 3])
        yr, yi = soft_threshold(yr, yi, theta[b, 0])
        zr = linear(yr, wr2) - linear(yi, wi2)
        zi = linear(yr, wi2) + linear(yi, wr2)
        zr = layernorm(zr, ln_raw[b, 4], ln_raw[b, 5])
        zi = layernorm(zi, ln_raw[b, 6], ln_raw[b, 7])
        xr, xi = soft_threshold(zr + id_r, zi + id_i, theta[b, 1])
    return xr, xi


# ---------------------------------- main -----------------------------------

if __name__ == "__main__":
    key = jax.random.PRNGKey(0)
    k_xr, k_xi, k_w, k_g, k_b, k_t = jax.random.split(key, 6)

    N = 512   # batch of complex vectors, each of length F_DIM = 32

    xr = jax.random.normal(k_xr, (N, F_DIM), jnp.float32)
    xi = jax.random.normal(k_xi, (N, F_DIM), jnp.float32)

    # Parameters mirroring the PyTorch module:
    #   per block, per linear: real & imag weights of shape (out=F, in=F) (nn.Linear layout).
    bound = 1.0 / jnp.sqrt(float(F_DIM))
    w_raw = jax.random.uniform(k_w, (NUM_BLOCKS, 2, 2, F_DIM, F_DIM),
                               jnp.float32, -bound, bound)
    # LayerNorm params per block: [g1r, b1r, g1i, b1i, g2r, b2r, g2i, b2i].
    gammas = 1.0 + 0.05 * jax.random.normal(k_g, (NUM_BLOCKS, 8, F_DIM), jnp.float32)
    betas = 0.05 * jax.random.normal(k_b, (NUM_BLOCKS, 8, F_DIM), jnp.float32)
    ln_raw = jnp.where(jnp.arange(8)[None, :, None] % 2 == 0, gammas, betas)
    # Soft-threshold thetas: [inner, outer] per block (small positive values).
    theta = 0.05 * jnp.abs(jax.random.normal(k_t, (NUM_BLOCKS, 2), jnp.float32))

    ref_r, ref_i = encoder4_ref(xr, xi, w_raw, ln_raw, theta)

    # Exact-semantics path (f32 weight matmuls): tight tolerance vs. the PyTorch-faithful ref.
    out_r, out_i = encoder4_pallas(xr, xi, w_raw, ln_raw, theta, pack=2, use_bf16=False)
    jax.block_until_ready((out_r, out_i))
    assert jnp.allclose(out_r, ref_r, atol=1e-3, rtol=1e-3), \
        float(jnp.max(jnp.abs(out_r - ref_r)))
    assert jnp.allclose(out_i, ref_i, atol=1e-3, rtol=1e-3), \
        float(jnp.max(jnp.abs(out_i - ref_i)))

    # Fast path (bf16 CVLinear weight matmuls, f32 stats / accumulation / residual):
    # mixed-precision tolerance over 8 bf16 matmuls + 4 residual blocks.
    fr, fi = encoder4_pallas(xr, xi, w_raw, ln_raw, theta, pack=2, use_bf16=True)
    jax.block_until_ready((fr, fi))
    assert jnp.allclose(fr, ref_r, atol=7.5e-2, rtol=7.5e-2), \
        float(jnp.max(jnp.abs(fr - ref_r)))
    assert jnp.allclose(fi, ref_i, atol=7.5e-2, rtol=7.5e-2), \
        float(jnp.max(jnp.abs(fi - ref_i)))

    print("KERNEL_OK")
</pallas_src>

<mosaic_0001>
module attributes {stable_mosaic.version = 11 : i64} {
  func.func @encoder4_kernel(%arg0: i32, %arg1: memref<8xf32, #tpu.memory_space<smem>>, %arg2: memref<128x128xf32, #tpu.memory_space<vmem>>, %arg3: memref<4x2x128x128xf32, #tpu.memory_space<vmem>>, %arg4: memref<4x4x128xf32, #tpu.memory_space<vmem>>, %arg5: memref<128x128xf32, #tpu.memory_space<vmem>>, %arg6: memref<128x128xf32, #tpu.memory_space<vmem>>) attributes {dimension_semantics = [#tpu.dimension_semantics<parallel>], iteration_bounds = array<i64: 2>, scalar_prefetch = 0 : i64, scratch_operands = 0 : i64, tpu.core_type = #tpu.core_type<tc>, window_params = [{transform_indices = @transform_0, window_bounds = array<i64: 8>}, {transform_indices = @transform_1, window_bounds = array<i64: 128, 128>}, {pipeline_mode = #tpu.pipeline_mode<synchronous>, transform_indices = @transform_2, window_bounds = array<i64: 4, 2, 128, 128>}, {pipeline_mode = #tpu.pipeline_mode<synchronous>, transform_indices = @transform_3, window_bounds = array<i64: 4, 4, 128>}, {pipeline_mode = #tpu.pipeline_mode<synchronous>, transform_indices = @transform_4, window_bounds = array<i64: 128, 128>}, {transform_indices = @transform_5, window_bounds = array<i64: 128, 128>}]} {
    %c0 = arith.constant 0 : index
    %c0_0 = arith.constant 0 : index
    %0 = vector.load %arg2[%c0, %c0_0] : memref<128x128xf32, #tpu.memory_space<vmem>>, vector<128x128xf32>
    %c0_1 = arith.constant 0 : index
    %c0_2 = arith.constant 0 : index
    %1 = vector.load %arg5[%c0_1, %c0_2] : memref<128x128xf32, #tpu.memory_space<vmem>>, vector<128x128xf32>
    %c0_3 = arith.constant 0 : index
    %c0_4 = arith.constant 0 : index
    %c0_5 = arith.constant 0 : index
    %c0_6 = arith.constant 0 : index
    %2 = vector.load %arg3[%c0_3, %c0_4, %c0_5, %c0_6] : memref<4x2x128x128xf32, #tpu.memory_space<vmem>>, vector<1x1x128x128xf32>
    %3 = vector.shape_cast %2 : vector<1x1x128x128xf32> to vector<128x128xf32>
    %cst = arith.constant dense<0.000000e+00> : vector<128x128xf32>
    %4 = tpu.matmul %0, %3, %cst {dimension_numbers = #tpu.dot_dimension_numbers<[1], [0], [0], [1], [0, 0, 1, 1], [], []>} : vector<128x128xf32>, vector<128x128xf32>, vector<128x128xf32> -> vector<128x128xf32>
    %c0_7 = arith.constant 0 : index
    %c0_8 = arith.constant 0 : index
    %c0_9 = arith.constant 0 : index
    %5 = vector.load %arg4[%c0_7, %c0_8, %c0_9] : memref<4x4x128xf32, #tpu.memory_space<vmem>>, vector<1x1x128xf32>
    %6 = vector.shape_cast %5 : vector<1x1x128xf32> to vector<128xf32>
    %c0_10 = arith.constant 0 : index
    %c1 = arith.constant 1 : index
    %c0_11 = arith.constant 0 : index
    %7 = vector.load %arg4[%c0_10, %c1, %c0_11] : memref<4x4x128xf32, #tpu.memory_space<vmem>>, vector<1x1x128xf32>
    %8 = vector.shape_cast %7 : vector<1x1x128xf32> to vector<128xf32>
    %cst_12 = arith.constant dense<0.000000e+00> : vector<128x128xf32>
    %9 = tpu.matmul %4, %1, %cst_12 {dimension_numbers = #tpu.dot_dimension_numbers<[1], [0], [0], [1], [0, 0, 1, 1], [], []>} : vector<128x128xf32>, vector<128x128xf32>, vector<128x128xf32> -> vector<128x128xf32>
    %10 = arith.mulf %4, %4 : vector<128x128xf32>
    %cst_13 = arith.constant dense<0.000000e+00> : vector<128x128xf32>
    %11 = tpu.matmul %10, %1, %cst_13 {dimension_numbers = #tpu.dot_dimension_numbers<[1], [0], [0], [1], [0, 0, 1, 1], [], []>} : vector<128x128xf32>, vector<128x128xf32>, vector<128x128xf32> -> vector<128x128xf32>
    %12 = arith.mulf %9, %9 : vector<128x128xf32>
    %13 = arith.subf %11, %12 : vector<128x128xf32>
    %cst_14 = arith.constant 9.99999974E-6 : f32
    %14 = vector.broadcast %cst_14 : f32 to vector<128x128xf32>
    %15 = arith.addf %13, %14 : vector<128x128xf32>
    %16 = math.rsqrt %15 : vector<128x128xf32>
    %17 = arith.subf %4, %9 : vector<128x128xf32>
    %18 = vector.shape_cast %6 : vector<128xf32> to vector<1x128xf32>
    %19 = vector.broadcast %18 : vector<1x128xf32> to vector<128x128xf32>
    %20 = arith.mulf %16, %19 : vector<128x128xf32>
    %21 = arith.mulf %17, %20 : vector<128x128xf32>
    %22 = vector.shape_cast %8 : vector<128xf32> to vector<1x128xf32>
    %23 = vector.broadcast %22 : vector<1x128xf32> to vector<128x128xf32>
    %24 = arith.addf %21, %23 : vector<128x128xf32>
    %c0_15 = arith.constant 0 : index
    %25 = memref.load %arg1[%c0_15] : memref<8xf32, #tpu.memory_space<smem>>
    %26 = arith.mulf %24, %24 : vector<128x128xf32>
    %c64_i32 = arith.constant 64 : i32
    %27 = tpu.dynamic_rotate %26 by %c64_i32 dim 1 : vector<128x128xf32>, i32 -> vector<128x128xf32>
    %28 = arith.addf %26, %27 : vector<128x128xf32>
    %29 = math.rsqrt %28 : vector<128x128xf32>
    %30 = vector.broadcast %25 : f32 to vector<128x128xf32>
    %31 = arith.mulf %30, %29 : vector<128x128xf32>
    %cst_16 = arith.constant 1.000000e+00 : f32
    %32 = vector.broadcast %cst_16 : f32 to vector<128x128xf32>
    %33 = arith.subf %32, %31 : vector<128x128xf32>
    %cst_17 = arith.constant 0.000000e+00 : f32
    %34 = vector.broadcast %cst_17 : f32 to vector<128x128xf32>
    %35 = arith.maximumf %33, %34 : vector<128x128xf32>
    %36 = arith.mulf %24, %35 : vector<128x128xf32>
    %c0_18 = arith.constant 0 : index
    %c1_19 = arith.constant 1 : index
    %c0_20 = arith.constant 0 : index
    %c0_21 = arith.constant 0 : index
    %37 = vector.load %arg3[%c0_18, %c1_19, %c0_20, %c0_21] : memref<4x2x128x128xf32, #tpu.memory_space<vmem>>, vector<1x1x128x128xf32>
    %38 = vector.shape_cast %37 : vector<1x1x128x128xf32> to vector<128x128xf32>
    %cst_22 = arith.constant dense<0.000000e+00> : vector<128x128xf32>
    %39 = tpu.matmul %36, %38, %cst_22 {dimension_numbers = #tpu.dot_dimension_numbers<[1], [0], [0], [1], [0, 0, 1, 1], [], []>} : vector<128x128xf32>, vector<128x128xf32>, vector<128x128xf32> -> vector<128x128xf32>
    %c0_23 = arith.constant 0 : index
    %c2 = arith.constant 2 : index
    %c0_24 = arith.constant 0 : index
    %40 = vector.load %arg4[%c0_23, %c2, %c0_24] : memref<4x4x128xf32, #tpu.memory_space<vmem>>, vector<1x1x128xf32>
    %41 = vector.shape_cast %40 : vector<1x1x128xf32> to vector<128xf32>
    %c0_25 = arith.constant 0 : index
    %c3 = arith.constant 3 : index
    %c0_26 = arith.constant 0 : index
    %42 = vector.load %arg4[%c0_25, %c3, %c0_26] : memref<4x4x128xf32, #tpu.memory_space<vmem>>, vector<1x1x128xf32>
    %43 = vector.shape_cast %42 : vector<1x1x128xf32> to vector<128xf32>
    %cst_27 = arith.constant dense<0.000000e+00> : vector<128x128xf32>
    %44 = tpu.matmul %39, %1, %cst_27 {dimension_numbers = #tpu.dot_dimension_numbers<[1], [0], [0], [1], [0, 0, 1, 1], [], []>} : vector<128x128xf32>, vector<128x128xf32>, vector<128x128xf32> -> vector<128x128xf32>
    %45 = arith.mulf %39, %39 : vector<128x128xf32>
    %cst_28 = arith.constant dense<0.000000e+00> : vector<128x128xf32>
    %46 = tpu.matmul %45, %1, %cst_28 {dimension_numbers = #tpu.dot_dimension_numbers<[1], [0], [0], [1], [0, 0, 1, 1], [], []>} : vector<128x128xf32>, vector<128x128xf32>, vector<128x128xf32> -> vector<128x128xf32>
    %47 = arith.mulf %44, %44 : vector<128x128xf32>
    %48 = arith.subf %46, %47 : vector<128x128xf32>
    %cst_29 = arith.constant 9.99999974E-6 : f32
    %49 = vector.broadcast %cst_29 : f32 to vector<128x128xf32>
    %50 = arith.addf %48, %49 : vector<128x128xf32>
    %51 = math.rsqrt %50 : vector<128x128xf32>
    %52 = arith.subf %39, %44 : vector<128x128xf32>
    %53 = vector.shape_cast %41 : vector<128xf32> to vector<1x128xf32>
    %54 = vector.broadcast %53 : vector<1x128xf32> to vector<128x128xf32>
    %55 = arith.mulf %51, %54 : vector<128x128xf32>
    %56 = arith.mulf %52, %55 : vector<128x128xf32>
    %57 = vector.shape_cast %43 : vector<128xf32> to vector<1x128xf32>
    %58 = vector.broadcast %57 : vector<1x128xf32> to vector<128x128xf32>
    %59 = arith.addf %56, %58 : vector<128x128xf32>
    %60 = arith.addf %59, %0 : vector<128x128xf32>
    %c1_30 = arith.constant 1 : index
    %61 = memref.load %arg1[%c1_30] : memref<8xf32, #tpu.memory_space<smem>>
    %62 = arith.mulf %60, %60 : vector<128x128xf32>
    %c64_i32_31 = arith.constant 64 : i32
    %63 = tpu.dynamic_rotate %62 by %c64_i32_31 dim 1 : vector<128x128xf32>, i32 -> vector<128x128xf32>
    %64 = arith.addf %62, %63 : vector<128x128xf32>
    %65 = math.rsqrt %64 : vector<128x128xf32>
    %66 = vector.broadcast %61 : f32 to vector<128x128xf32>
    %67 = arith.mulf %66, %65 : vector<128x128xf32>
    %cst_32 = arith.constant 1.000000e+00 : f32
    %68 = vector.broadcast %cst_32 : f32 to vector<128x128xf32>
    %69 = arith.subf %68, %67 : vector<128x128xf32>
    %cst_33 = arith.constant 0.000000e+00 : f32
    %70 = vector.broadcast %cst_33 : f32 to vector<128x128xf32>
    %71 = arith.maximumf %69, %70 : vector<128x128xf32>
    %72 = arith.mulf %60, %71 : vector<128x128xf32>
    %c1_34 = arith.constant 1 : index
    %c0_35 = arith.constant 0 : index
    %c0_36 = arith.constant 0 : index
    %c0_37 = arith.constant 0 : index
    %73 = vector.load %arg3[%c1_34, %c0_35, %c0_36, %c0_37] : memref<4x2x128x128xf32, #tpu.memory_space<vmem>>, vector<1x1x128x128xf32>
    %74 = vector.shape_cast %73 : vector<1x1x128x128xf32> to vector<128x128xf32>
    %cst_38 = arith.constant dense<0.000000e+00> : vector<128x128xf32>
    %75 = tpu.matmul %72, %74, %cst_38 {dimension_numbers = #tpu.dot_dimension_numbers<[1], [0], [0], [1], [0, 0, 1, 1], [], []>} : vector<128x128xf32>, vector<128x128xf32>, vector<128x128xf32> -> vector<128x128xf32>
    %c1_39 = arith.constant 1 : index
    %c0_40 = arith.constant 0 : index
    %c0_41 = arith.constant 0 : index
    %76 = vector.load %arg4[%c1_39, %c0_40, %c0_41] : memref<4x4x128xf32, #tpu.memory_space<vmem>>, vector<1x1x128xf32>
    %77 = vector.shape_cast %76 : vector<1x1x128xf32> to vector<128xf32>
    %c1_42 = arith.constant 1 : index
    %c1_43 = arith.constant 1 : index
    %c0_44 = arith.constant 0 : index
    %78 = vector.load %arg4[%c1_42, %c1_43, %c0_44] : memref<4x4x128xf32, #tpu.memory_space<vmem>>, vector<1x1x128xf32>
    %79 = vector.shape_cast %78 : vector<1x1x128xf32> to vector<128xf32>
    %cst_45 = arith.constant dense<0.000000e+00> : vector<128x128xf32>
    %80 = tpu.matmul %75, %1, %cst_45 {dimension_numbers = #tpu.dot_dimension_numbers<[1], [0], [0], [1], [0, 0, 1, 1], [], []>} : vector<128x128xf32>, vector<128x128xf32>, vector<128x128xf32> -> vector<128x128xf32>
    %81 = arith.mulf %75, %75 : vector<128x128xf32>
    %cst_46 = arith.constant dense<0.000000e+00> : vector<128x128xf32>
    %82 = tpu.matmul %81, %1, %cst_46 {dimension_numbers = #tpu.dot_dimension_numbers<[1], [0], [0], [1], [0, 0, 1, 1], [], []>} : vector<128x128xf32>, vector<128x128xf32>, vector<128x128xf32> -> vector<128x128xf32>
    %83 = arith.mulf %80, %80 : vector<128x128xf32>
    %84 = arith.subf %82, %83 : vector<128x128xf32>
    %cst_47 = arith.constant 9.99999974E-6 : f32
    %85 = vector.broadcast %cst_47 : f32 to vector<128x128xf32>
    %86 = arith.addf %84, %85 : vector<128x128xf32>
    %87 = math.rsqrt %86 : vector<128x128xf32>
    %88 = arith.subf %75, %80 : vector<128x128xf32>
    %89 = vector.shape_cast %77 : vector<128xf32> to vector<1x128xf32>
    %90 = vector.broadcast %89 : vector<1x128xf32> to vector<128x128xf32>
    %91 = arith.mulf %87, %90 : vector<128x128xf32>
    %92 = arith.mulf %88, %91 : vector<128x128xf32>
    %93 = vector.shape_cast %79 : vector<128xf32> to vector<1x128xf32>
    %94 = vector.broadcast %93 : vector<1x128xf32> to vector<128x128xf32>
    %95 = arith.addf %92, %94 : vector<128x128xf32>
    %c2_48 = arith.constant 2 : index
    %96 = memref.load %arg1[%c2_48] : memref<8xf32, #tpu.memory_space<smem>>
    %97 = arith.mulf %95, %95 : vector<128x128xf32>
    %c64_i32_49 = arith.constant 64 : i32
    %98 = tpu.dynamic_rotate %97 by %c64_i32_49 dim 1 : vector<128x128xf32>, i32 -> vector<128x128xf32>
    %99 = arith.addf %97, %98 : vector<128x128xf32>
    %100 = math.rsqrt %99 : vector<128x128xf32>
    %101 = vector.broadcast %96 : f32 to vector<128x128xf32>
    %102 = arith.mulf %101, %100 : vector<128x128xf32>
    %cst_50 = arith.constant 1.000000e+00 : f32
    %103 = vector.broadcast %cst_50 : f32 to vector<128x128xf32>
    %104 = arith.subf %103, %102 : vector<128x128xf32>
    %cst_51 = arith.constant 0.000000e+00 : f32
    %105 = vector.broadcast %cst_51 : f32 to vector<128x128xf32>
    %106 = arith.maximumf %104, %105 : vector<128x128xf32>
    %107 = arith.mulf %95, %106 : vector<128x128xf32>
    %c1_52 = arith.constant 1 : index
    %c1_53 = arith.constant 1 : index
    %c0_54 = arith.constant 0 : index
    %c0_55 = arith.constant 0 : index
    %108 = vector.load %arg3[%c1_52, %c1_53, %c0_54, %c0_55] : memref<4x2x128x128xf32, #tpu.memory_space<vmem>>, vector<1x1x128x128xf32>
    %109 = vector.shape_cast %108 : vector<1x1x128x128xf32> to vector<128x128xf32>
    %cst_56 = arith.constant dense<0.000000e+00> : vector<128x128xf32>
    %110 = tpu.matmul %107, %109, %cst_56 {dimension_numbers = #tpu.dot_dimension_numbers<[1], [0], [0], [1], [0, 0, 1, 1], [], []>} : vector<128x128xf32>, vector<128x128xf32>, vector<128x128xf32> -> vector<128x128xf32>
    %c1_57 = arith.constant 1 : index
    %c2_58 = arith.constant 2 : index
    %c0_59 = arith.constant 0 : index
    %111 = vector.load %arg4[%c1_57, %c2_58, %c0_59] : memref<4x4x128xf32, #tpu.memory_space<vmem>>, vector<1x1x128xf32>
    %112 = vector.shape_cast %111 : vector<1x1x128xf32> to vector<128xf32>
    %c1_60 = arith.constant 1 : index
    %c3_61 = arith.constant 3 : index
    %c0_62 = arith.constant 0 : index
    %113 = vector.load %arg4[%c1_60, %c3_61, %c0_62] : memref<4x4x128xf32, #tpu.memory_space<vmem>>, vector<1x1x128xf32>
    %114 = vector.shape_cast %113 : vector<1x1x128xf32> to vector<128xf32>
    %cst_63 = arith.constant dense<0.000000e+00> : vector<128x128xf32>
    %115 = tpu.matmul %110, %1, %cst_63 {dimension_numbers = #tpu.dot_dimension_numbers<[1], [0], [0], [1], [0, 0, 1, 1], [], []>} : vector<128x128xf32>, vector<128x128xf32>, vector<128x128xf32> -> vector<128x128xf32>
    %116 = arith.mulf %110, %110 : vector<128x128xf32>
    %cst_64 = arith.constant dense<0.000000e+00> : vector<128x128xf32>
    %117 = tpu.matmul %116, %1, %cst_64 {dimension_numbers = #tpu.dot_dimension_numbers<[1], [0], [0], [1], [0, 0, 1, 1], [], []>} : vector<128x128xf32>, vector<128x128xf32>, vector<128x128xf32> -> vector<128x128xf32>
    %118 = arith.mulf %115, %115 : vector<128x128xf32>
    %119 = arith.subf %117, %118 : vector<128x128xf32>
    %cst_65 = arith.constant 9.99999974E-6 : f32
    %120 = vector.broadcast %cst_65 : f32 to vector<128x128xf32>
    %121 = arith.addf %119, %120 : vector<128x128xf32>
    %122 = math.rsqrt %121 : vector<128x128xf32>
    %123 = arith.subf %110, %115 : vector<128x128xf32>
    %124 = vector.shape_cast %112 : vector<128xf32> to vector<1x128xf32>
    %125 = vector.broadcast %124 : vector<1x128xf32> to vector<128x128xf32>
    %126 = arith.mulf %122, %125 : vector<128x128xf32>
    %127 = arith.mulf %123, %126 : vector<128x128xf32>
    %128 = vector.shape_cast %114 : vector<128xf32> to vector<1x128xf32>
    %129 = vector.broadcast %128 : vector<1x128xf32> to vector<128x128xf32>
    %130 = arith.addf %127, %129 : vector<128x128xf32>
    %131 = arith.addf %130, %72 : vector<128x128xf32>
    %c3_66 = arith.constant 3 : index
    %132 = memref.load %arg1[%c3_66] : memref<8xf32, #tpu.memory_space<smem>>
    %133 = arith.mulf %131, %131 : vector<128x128xf32>
    %c64_i32_67 = arith.constant 64 : i32
    %134 = tpu.dynamic_rotate %133 by %c64_i32_67 dim 1 : vector<128x128xf32>, i32 -> vector<128x128xf32>
    %135 = arith.addf %133, %134 : vector<128x128xf32>
    %136 = math.rsqrt %135 : vector<128x128xf32>
    %137 = vector.broadcast %132 : f32 to vector<128x128xf32>
    %138 = arith.mulf %137, %136 : vector<128x128xf32>
    %cst_68 = arith.constant 1.000000e+00 : f32
    %139 = vector.broadcast %cst_68 : f32 to vector<128x128xf32>
    %140 = arith.subf %139, %138 : vector<128x128xf32>
    %cst_69 = arith.constant 0.000000e+00 : f32
    %141 = vector.broadcast %cst_69 : f32 to vector<128x128xf32>
    %142 = arith.maximumf %140, %141 : vector<128x128xf32>
    %143 = arith.mulf %131, %142 : vector<128x128xf32>
    %c2_70 = arith.constant 2 : index
    %c0_71 = arith.constant 0 : index
    %c0_72 = arith.constant 0 : index
    %c0_73 = arith.constant 0 : index
    %144 = vector.load %arg3[%c2_70, %c0_71, %c0_72, %c0_73] : memref<4x2x128x128xf32, #tpu.memory_space<vmem>>, vector<1x1x128x128xf32>
    %145 = vector.shape_cast %144 : vector<1x1x128x128xf32> to vector<128x128xf32>
    %cst_74 = arith.constant dense<0.000000e+00> : vector<128x128xf32>
    %146 = tpu.matmul %143, %145, %cst_74 {dimension_numbers = #tpu.dot_dimension_numbers<[1], [0], [0], [1], [0, 0, 1, 1], [], []>} : vector<128x128xf32>, vector<128x128xf32>, vector<128x128xf32> -> vector<128x128xf32>
    %c2_75 = arith.constant 2 : index
    %c0_76 = arith.constant 0 : index
    %c0_77 = arith.constant 0 : index
    %147 = vector.load %arg4[%c2_75, %c0_76, %c0_77] : memref<4x4x128xf32, #tpu.memory_space<vmem>>, vector<1x1x128xf32>
    %148 = vector.shape_cast %147 : vector<1x1x128xf32> to vector<128xf32>
    %c2_78 = arith.constant 2 : index
    %c1_79 = arith.constant 1 : index
    %c0_80 = arith.constant 0 : index
    %149 = vector.load %arg4[%c2_78, %c1_79, %c0_80] : memref<4x4x128xf32, #tpu.memory_space<vmem>>, vector<1x1x128xf32>
    %150 = vector.shape_cast %149 : vector<1x1x128xf32> to vector<128xf32>
    %cst_81 = arith.constant dense<0.000000e+00> : vector<128x128xf32>
    %151 = tpu.matmul %146, %1, %cst_81 {dimension_numbers = #tpu.dot_dimension_numbers<[1], [0], [0], [1], [0, 0, 1, 1], [], []>} : vector<128x128xf32>, vector<128x128xf32>, vector<128x128xf32> -> vector<128x128xf32>
    %152 = arith.mulf %146, %146 : vector<128x128xf32>
    %cst_82 = arith.constant dense<0.000000e+00> : vector<128x128xf32>
    %153 = tpu.matmul %152, %1, %cst_82 {dimension_numbers = #tpu.dot_dimension_numbers<[1], [0], [0], [1], [0, 0, 1, 1], [], []>} : vector<128x128xf32>, vector<128x128xf32>, vector<128x128xf32> -> vector<128x128xf32>
    %154 = arith.mulf %151, %151 : vector<128x128xf32>
    %155 = arith.subf %153, %154 : vector<128x128xf32>
    %cst_83 = arith.constant 9.99999974E-6 : f32
    %156 = vector.broadcast %cst_83 : f32 to vector<128x128xf32>
    %157 = arith.addf %155, %156 : vector<128x128xf32>
    %158 = math.rsqrt %157 : vector<128x128xf32>
    %159 = arith.subf %146, %151 : vector<128x128xf32>
    %160 = vector.shape_cast %148 : vector<128xf32> to vector<1x128xf32>
    %161 = vector.broadcast %160 : vector<1x128xf32> to vector<128x128xf32>
    %162 = arith.mulf %158, %161 : vector<128x128xf32>
    %163 = arith.mulf %159, %162 : vector<128x128xf32>
    %164 = vector.shape_cast %150 : vector<128xf32> to vector<1x128xf32>
    %165 = vector.broadcast %164 : vector<1x128xf32> to vector<128x128xf32>
    %166 = arith.addf %163, %165 : vector<128x128xf32>
    %c4 = arith.constant 4 : index
    %167 = memref.load %arg1[%c4] : memref<8xf32, #tpu.memory_space<smem>>
    %168 = arith.mulf %166, %166 : vector<128x128xf32>
    %c64_i32_84 = arith.constant 64 : i32
    %169 = tpu.dynamic_rotate %168 by %c64_i32_84 dim 1 : vector<128x128xf32>, i32 -> vector<128x128xf32>
    %170 = arith.addf %168, %169 : vector<128x128xf32>
    %171 = math.rsqrt %170 : vector<128x128xf32>
    %172 = vector.broadcast %167 : f32 to vector<128x128xf32>
    %173 = arith.mulf %172, %171 : vector<128x128xf32>
    %cst_85 = arith.constant 1.000000e+00 : f32
    %174 = vector.broadcast %cst_85 : f32 to vector<128x128xf32>
    %175 = arith.subf %174, %173 : vector<128x128xf32>
    %cst_86 = arith.constant 0.000000e+00 : f32
    %176 = vector.broadcast %cst_86 : f32 to vector<128x128xf32>
    %177 = arith.maximumf %175, %176 : vector<128x128xf32>
    %178 = arith.mulf %166, %177 : vector<128x128xf32>
    %c2_87 = arith.constant 2 : index
    %c1_88 = arith.constant 1 : index
    %c0_89 = arith.constant 0 : index
    %c0_90 = arith.constant 0 : index
    %179 = vector.load %arg3[%c2_87, %c1_88, %c0_89, %c0_90] : memref<4x2x128x128xf32, #tpu.memory_space<vmem>>, vector<1x1x128x128xf32>
    %180 = vector.shape_cast %179 : vector<1x1x128x128xf32> to vector<128x128xf32>
    %cst_91 = arith.constant dense<0.000000e+00> : vector<128x128xf32>
    %181 = tpu.matmul %178, %180, %cst_91 {dimension_numbers = #tpu.dot_dimension_numbers<[1], [0], [0], [1], [0, 0, 1, 1], [], []>} : vector<128x128xf32>, vector<128x128xf32>, vector<128x128xf32> -> vector<128x128xf32>
    %c2_92 = arith.constant 2 : index
    %c2_93 = arith.constant 2 : index
    %c0_94 = arith.constant 0 : index
    %182 = vector.load %arg4[%c2_92, %c2_93, %c0_94] : memref<4x4x128xf32, #tpu.memory_space<vmem>>, vector<1x1x128xf32>
    %183 = vector.shape_cast %182 : vector<1x1x128xf32> to vector<128xf32>
    %c2_95 = arith.constant 2 : index
    %c3_96 = arith.constant 3 : index
    %c0_97 = arith.constant 0 : index
    %184 = vector.load %arg4[%c2_95, %c3_96, %c0_97] : memref<4x4x128xf32, #tpu.memory_space<vmem>>, vector<1x1x128xf32>
    %185 = vector.shape_cast %184 : vector<1x1x128xf32> to vector<128xf32>
    %cst_98 = arith.constant dense<0.000000e+00> : vector<128x128xf32>
    %186 = tpu.matmul %181, %1, %cst_98 {dimension_numbers = #tpu.dot_dimension_numbers<[1], [0], [0], [1], [0, 0, 1, 1], [], []>} : vector<128x128xf32>, vector<128x128xf32>, vector<128x128xf32> -> vector<128x128xf32>
    %187 = arith.mulf %181, %181 : vector<128x128xf32>
    %cst_99 = arith.constant dense<0.000000e+00> : vector<128x128xf32>
    %188 = tpu.matmul %187, %1, %cst_99 {dimension_numbers = #tpu.dot_dimension_numbers<[1], [0], [0], [1], [0, 0, 1, 1], [], []>} : vector<128x128xf32>, vector<128x128xf32>, vector<128x128xf32> -> vector<128x128xf32>
    %189 = arith.mulf %186, %186 : vector<128x128xf32>
    %190 = arith.subf %188, %189 : vector<128x128xf32>
    %cst_100 = arith.constant 9.99999974E-6 : f32
    %191 = vector.broadcast %cst_100 : f32 to vector<128x128xf32>
    %192 = arith.addf %190, %191 : vector<128x128xf32>
    %193 = math.rsqrt %192 : vector<128x128xf32>
    %194 = arith.subf %181, %186 : vector<128x128xf32>
    %195 = vector.shape_cast %183 : vector<128xf32> to vector<1x128xf32>
    %196 = vector.broadcast %195 : vector<1x128xf32> to vector<128x128xf32>
    %197 = arith.mulf %193, %196 : vector<128x128xf32>
    %198 = arith.mulf %194, %197 : vector<128x128xf32>
    %199 = vector.shape_cast %185 : vector<128xf32> to vector<1x128xf32>
    %200 = vector.broadcast %199 : vector<1x128xf32> to vector<128x128xf32>
    %201 = arith.addf %198, %200 : vector<128x128xf32>
    %202 = arith.addf %201, %143 : vector<128x128xf32>
    %c5 = arith.constant 5 : index
    %203 = memref.load %arg1[%c5] : memref<8xf32, #tpu.memory_space<smem>>
    %204 = arith.mulf %202, %202 : vector<128x128xf32>
    %c64_i32_101 = arith.constant 64 : i32
    %205 = tpu.dynamic_rotate %204 by %c64_i32_101 dim 1 : vector<128x128xf32>, i32 -> vector<128x128xf32>
    %206 = arith.addf %204, %205 : vector<128x128xf32>
    %207 = math.rsqrt %206 : vector<128x128xf32>
    %208 = vector.broadcast %203 : f32 to vector<128x128xf32>
    %209 = arith.mulf %208, %207 : vector<128x128xf32>
    %cst_102 = arith.constant 1.000000e+00 : f32
    %210 = vector.broadcast %cst_102 : f32 to vector<128x128xf32>
    %211 = arith.subf %210, %209 : vector<128x128xf32>
    %cst_103 = arith.constant 0.000000e+00 : f32
    %212 = vector.broadcast %cst_103 : f32 to vector<128x128xf32>
    %213 = arith.maximumf %211, %212 : vector<128x128xf32>
    %214 = arith.mulf %202, %213 : vector<128x128xf32>
    %c3_104 = arith.constant 3 : index
    %c0_105 = arith.constant 0 : index
    %c0_106 = arith.constant 0 : index
    %c0_107 = arith.constant 0 : index
    %215 = vector.load %arg3[%c3_104, %c0_105, %c0_106, %c0_107] : memref<4x2x128x128xf32, #tpu.memory_space<vmem>>, vector<1x1x128x128xf32>
    %216 = vector.shape_cast %215 : vector<1x1x128x128xf32> to vector<128x128xf32>
    %cst_108 = arith.constant dense<0.000000e+00> : vector<128x128xf32>
    %217 = tpu.matmul %214, %216, %cst_108 {dimension_numbers = #tpu.dot_dimension_numbers<[1], [0], [0], [1], [0, 0, 1, 1], [], []>} : vector<128x128xf32>, vector<128x128xf32>, vector<128x128xf32> -> vector<128x128xf32>
    %c3_109 = arith.constant 3 : index
    %c0_110 = arith.constant 0 : index
    %c0_111 = arith.constant 0 : index
    %218 = vector.load %arg4[%c3_109, %c0_110, %c0_111] : memref<4x4x128xf32, #tpu.memory_space<vmem>>, vector<1x1x128xf32>
    %219 = vector.shape_cast %218 : vector<1x1x128xf32> to vector<128xf32>
    %c3_112 = arith.constant 3 : index
    %c1_113 = arith.constant 1 : index
    %c0_114 = arith.constant 0 : index
    %220 = vector.load %arg4[%c3_112, %c1_113, %c0_114] : memref<4x4x128xf32, #tpu.memory_space<vmem>>, vector<1x1x128xf32>
    %221 = vector.shape_cast %220 : vector<1x1x128xf32> to vector<128xf32>
    %cst_115 = arith.constant dense<0.000000e+00> : vector<128x128xf32>
    %222 = tpu.matmul %217, %1, %cst_115 {dimension_numbers = #tpu.dot_dimension_numbers<[1], [0], [0], [1], [0, 0, 1, 1], [], []>} : vector<128x128xf32>, vector<128x128xf32>, vector<128x128xf32> -> vector<128x128xf32>
    %223 = arith.mulf %217, %217 : vector<128x128xf32>
    %cst_116 = arith.constant dense<0.000000e+00> : vector<128x128xf32>
    %224 = tpu.matmul %223, %1, %cst_116 {dimension_numbers = #tpu.dot_dimension_numbers<[1], [0], [0], [1], [0, 0, 1, 1], [], []>} : vector<128x128xf32>, vector<128x128xf32>, vector<128x128xf32> -> vector<128x128xf32>
    %225 = arith.mulf %222, %222 : vector<128x128xf32>
    %226 = arith.subf %224, %225 : vector<128x128xf32>
    %cst_117 = arith.constant 9.99999974E-6 : f32
    %227 = vector.broadcast %cst_117 : f32 to vector<128x128xf32>
    %228 = arith.addf %226, %227 : vector<128x128xf32>
    %229 = math.rsqrt %228 : vector<128x128xf32>
    %230 = arith.subf %217, %222 : vector<128x128xf32>
    %231 = vector.shape_cast %219 : vector<128xf32> to vector<1x128xf32>
    %232 = vector.broadcast %231 : vector<1x128xf32> to vector<128x128xf32>
    %233 = arith.mulf %229, %232 : vector<128x128xf32>
    %234 = arith.mulf %230, %233 : vector<128x128xf32>
    %235 = vector.shape_cast %221 : vector<128xf32> to vector<1x128xf32>
    %236 = vector.broadcast %235 : vector<1x128xf32> to vector<128x128xf32>
    %237 = arith.addf %234, %236 : vector<128x128xf32>
    %c6 = arith.constant 6 : index
    %238 = memref.load %arg1[%c6] : memref<8xf32, #tpu.memory_space<smem>>
    %239 = arith.mulf %237, %237 : vector<128x128xf32>
    %c64_i32_118 = arith.constant 64 : i32
    %240 = tpu.dynamic_rotate %239 by %c64_i32_118 dim 1 : vector<128x128xf32>, i32 -> vector<128x128xf32>
    %241 = arith.addf %239, %240 : vector<128x128xf32>
    %242 = math.rsqrt %241 : vector<128x128xf32>
    %243 = vector.broadcast %238 : f32 to vector<128x128xf32>
    %244 = arith.mulf %243, %242 : vector<128x128xf32>
    %cst_119 = arith.constant 1.000000e+00 : f32
    %245 = vector.broadcast %cst_119 : f32 to vector<128x128xf32>
    %246 = arith.subf %245, %244 : vector<128x128xf32>
    %cst_120 = arith.constant 0.000000e+00 : f32
    %247 = vector.broadcast %cst_120 : f32 to vector<128x128xf32>
    %248 = arith.maximumf %246, %247 : vector<128x128xf32>
    %249 = arith.mulf %237, %248 : vector<128x128xf32>
    %c3_121 = arith.constant 3 : index
    %c1_122 = arith.constant 1 : index
    %c0_123 = arith.constant 0 : index
    %c0_124 = arith.constant 0 : index
    %250 = vector.load %arg3[%c3_121, %c1_122, %c0_123, %c0_124] : memref<4x2x128x128xf32, #tpu.memory_space<vmem>>, vector<1x1x128x128xf32>
    %251 = vector.shape_cast %250 : vector<1x1x128x128xf32> to vector<128x128xf32>
    %cst_125 = arith.constant dense<0.000000e+00> : vector<128x128xf32>
    %252 = tpu.matmul %249, %251, %cst_125 {dimension_numbers = #tpu.dot_dimension_numbers<[1], [0], [0], [1], [0, 0, 1, 1], [], []>} : vector<128x128xf32>, vector<128x128xf32>, vector<128x128xf32> -> vector<128x128xf32>
    %c3_126 = arith.constant 3 : index
    %c2_127 = arith.constant 2 : index
    %c0_128 = arith.constant 0 : index
    %253 = vector.load %arg4[%c3_126, %c2_127, %c0_128] : memref<4x4x128xf32, #tpu.memory_space<vmem>>, vector<1x1x128xf32>
    %254 = vector.shape_cast %253 : vector<1x1x128xf32> to vector<128xf32>
    %c3_129 = arith.constant 3 : index
    %c3_130 = arith.constant 3 : index
    %c0_131 = arith.constant 0 : index
    %255 = vector.load %arg4[%c3_129, %c3_130, %c0_131] : memref<4x4x128xf32, #tpu.memory_space<vmem>>, vector<1x1x128xf32>
    %256 = vector.shape_cast %255 : vector<1x1x128xf32> to vector<128xf32>
    %cst_132 = arith.constant dense<0.000000e+00> : vector<128x128xf32>
    %257 = tpu.matmul %252, %1, %cst_132 {dimension_numbers = #tpu.dot_dimension_numbers<[1], [0], [0], [1], [0, 0, 1, 1], [], []>} : vector<128x128xf32>, vector<128x128xf32>, vector<128x128xf32> -> vector<128x128xf32>
    %258 = arith.mulf %252, %252 : vector<128x128xf32>
    %cst_133 = arith.constant dense<0.000000e+00> : vector<128x128xf32>
    %259 = tpu.matmul %258, %1, %cst_133 {dimension_numbers = #tpu.dot_dimension_numbers<[1], [0], [0], [1], [0, 0, 1, 1], [], []>} : vector<128x128xf32>, vector<128x128xf32>, vector<128x128xf32> -> vector<128x128xf32>
    %260 = arith.mulf %257, %257 : vector<128x128xf32>
    %261 = arith.subf %259, %260 : vector<128x128xf32>
    %cst_134 = arith.constant 9.99999974E-6 : f32
    %262 = vector.broadcast %cst_134 : f32 to vector<128x128xf32>
    %263 = arith.addf %261, %262 : vector<128x128xf32>
    %264 = math.rsqrt %263 : vector<128x128xf32>
    %265 = arith.subf %252, %257 : vector<128x128xf32>
    %266 = vector.shape_cast %254 : vector<128xf32> to vector<1x128xf32>
    %267 = vector.broadcast %266 : vector<1x128xf32> to vector<128x128xf32>
    %268 = arith.mulf %264, %267 : vector<128x128xf32>
    %269 = arith.mulf %265, %268 : vector<128x128xf32>
    %270 = vector.shape_cast %256 : vector<128xf32> to vector<1x128xf32>
    %271 = vector.broadcast %270 : vector<1x128xf32> to vector<128x128xf32>
    %272 = arith.addf %269, %271 : vector<128x128xf32>
    %273 = arith.addf %272, %214 : vector<128x128xf32>
    %c7 = arith.constant 7 : index
    %274 = memref.load %arg1[%c7] : memref<8xf32, #tpu.memory_space<smem>>
    %275 = arith.mulf %273, %273 : vector<128x128xf32>
    %c64_i32_135 = arith.constant 64 : i32
    %276 = tpu.dynamic_rotate %275 by %c64_i32_135 dim 1 : vector<128x128xf32>, i32 -> vector<128x128xf32>
    %277 = arith.addf %275, %276 : vector<128x128xf32>
    %278 = math.rsqrt %277 : vector<128x128xf32>
    %279 = vector.broadcast %274 : f32 to vector<128x128xf32>
    %280 = arith.mulf %279, %278 : vector<128x128xf32>
    %cst_136 = arith.constant 1.000000e+00 : f32
    %281 = vector.broadcast %cst_136 : f32 to vector<128x128xf32>
    %282 = arith.subf %281, %280 : vector<128x128xf32>
    %cst_137 = arith.constant 0.000000e+00 : f32
    %283 = vector.broadcast %cst_137 : f32 to vector<128x128xf32>
    %284 = arith.maximumf %282, %283 : vector<128x128xf32>
    %285 = arith.mulf %273, %284 : vector<128x128xf32>
    %c0_138 = arith.constant 0 : index
    %c0_139 = arith.constant 0 : index
    %286 = vector.load %arg6[%c0_138, %c0_139] : memref<128x128xf32, #tpu.memory_space<vmem>>, vector<128x128xf32>
    tpu.vector_store %arg6[%c0_138, %c0_139], %285 {strides = array<i32>} : memref<128x128xf32, #tpu.memory_space<vmem>>, vector<128x128xf32>,
    return
  }
  func.func @transform_0(%arg0: i32) -> i32 {
    %c0_i32 = arith.constant 0 : i32
    %c0_i32_0 = arith.constant 0 : i32
    return %c0_i32 : i32
  }
  func.func @transform_1(%arg0: i32) -> (i32, i32) {
    %c0_i32 = arith.constant 0 : i32
    %c0_i32_0 = arith.constant 0 : i32
    return %arg0, %c0_i32 : i32, i32
  }
  func.func @transform_2(%arg0: i32) -> (i32, i32, i32, i32) {
    %c0_i32 = arith.constant 0 : i32
    %c0_i32_0 = arith.constant 0 : i32
    %c0_i32_1 = arith.constant 0 : i32
    %c0_i32_2 = arith.constant 0 : i32
    %c0_i32_3 = arith.constant 0 : i32
    return %c0_i32, %c0_i32_0, %c0_i32_1, %c0_i32_2 : i32, i32, i32, i32
  }
  func.func @transform_3(%arg0: i32) -> (i32, i32, i32) {
    %c0_i32 = arith.constant 0 : i32
    %c0_i32_0 = arith.constant 0 : i32
    %c0_i32_1 = arith.constant 0 : i32
    %c0_i32_2 = arith.constant 0 : i32
    return %c0_i32, %c0_i32_0, %c0_i32_1 : i32, i32, i32
  }
  func.func @transform_4(%arg0: i32) -> (i32, i32) {
    %c0_i32 = arith.constant 0 : i32
    %c0_i32_0 = arith.constant 0 : i32
    %c0_i32_1 = arith.constant 0 : i32
    return %c0_i32, %c0_i32_0 : i32, i32
  }
  func.func @transform_5(%arg0: i32) -> (i32, i32) {
    %c0_i32 = arith.constant 0 : i32
    %c0_i32_0 = arith.constant 0 : i32
    return %arg0, %c0_i32 : i32, i32
  }
}

</mosaic_0001>

<bundles_post_ra>
// kernel: tile.43
= control target key start
LH: loop header
LB: loop body
LE: loop exit
PB: predicated region body
PF: predicated region fallthrough
CT: control target
= control target key end

     0   :  { %vm19_vm0 = vcmask 261120   ;;  %vm25_vm1 = vcmask 523520   ;;  %s63_s0 = inlined_call_operand.vmem [shape: f32[4,2,32], index: 0, kind: input, shape index: {}]   ;;  %s64_s1 = inlined_call_operand.vmem [shape: f32[4,64], index: 1, kind: output, shape index: {}]  }
   0x1   :  { %v33_v0 = vld [vmem:[%s63_s0 + $0x6] sm:$0x3]  ;;  %v34_v1 = vld [vmem:[%s63_s0 + $0x4] sm:$0x3]  ;;  %v35_v2 = vld [vmem:[%s63_s0 + $0x2] sm:$0x3] }
   0x2   :  { %7 = vst [vmem:[#allocation1 + $0x18] sm:$0x3] %v33_v0  ;;  %v16_v3 = vld [vmem:[%s63_s0] sm:$0x3]  ;;  %s37_s0 = smov 32  }
   0x3   :  { %11 = vst [vmem:[#allocation1 + $0x10] sm:$0x3] %v34_v1 }
   0x4   :  { %15 = vst [vmem:[#allocation1 + $0x8] sm:$0x3] %v35_v2 }
   0x5   :  { %17 = vst [vmem:[#allocation1] sm:$0x3] %v16_v3 }
   0xc   :  { %v22_v4 = vld [vmem:[#allocation1 + $0x1] ss:$8 sm:$0xf]   ;;  %v18_v5 = vld [vmem:[#allocation1] ss:$8 sm:$0xf]  }
   0xd   :  { %23 = vrot.lane.b32.xlu0 %v22_v4, %s37_s0  ;;  %20 = vst.msk [vmem:[#allocation0] sm:$0xf] %vm19_vm0, %v18_v5  }
  0x7f   :  { %v24_v6 = vpop.permute.xlu0 %23  }
  0x80   :  { %26 = vst.msk [vmem:[#allocation0] sm:$0xf] %vm25_vm1, %v24_v6  }
  0x87   :  { %v29_v7 = vld [vmem:[#allocation0] sm:$0xf] }
  0x88   :  { %32 = vst [vmem:[%s64_s1] sm:$0xf] %v29_v7 }

// kernel: neg.1
= control target key start
LH: loop header
LB: loop body
LE: loop exit
PB: predicated region body
PF: predicated region fallthrough
CT: control target
= control target key end

     0   :  { %s1032_s0 = inlined_call_operand.vmem [shape: f32[4,2,64,64], index: 0, kind: input, shape index: {}]   ;;  %s1033_s1 = inlined_call_operand.vmem [shape: f32[4,2,64,64], index: 1, kind: output, shape index: {}]  }
   0x1   :  { %v2_v0 = vld [vmem:[%s1032_s0] sm:$0xff]  ;;  %v526_v14 = vld [vmem:[%s1032_s0 + $0x8] sm:$0xff]  ;;  %v542_v30 = vld [vmem:[%s1032_s0 + $0x10] sm:$0xff] }
   0x2   :  { %v512_v1 = vld [vmem:[%s1032_s0 + $0x80] sm:$0xff]  ;;  %v5_v3 = vxor.u32 2147483648, %v2_v0  ;;  %v528_v16 = vld [vmem:[%s1032_s0 + $0x88] sm:$0xff]  ;;  %v68_v19 = vxor.u32 2147483648, %v526_v14  ;;  %v544_v32 = vld [vmem:[%s1032_s0 + $0x90] sm:$0xff]  ;;  %v132_v35 = vxor.u32 2147483648, %v542_v30 }
   0x3   :  { %v514_v2 = vld [vmem:[%s1032_s0 + $0x100] sm:$0xff]  ;;  %v12_v4 = vxor.u32 2147483648, %v512_v1  ;;  %v530_v18 = vld [vmem:[%s1032_s0 + $0x108] sm:$0xff]  ;;  %v76_v21 = vxor.u32 2147483648, %v528_v16  ;;  %v546_v34 = vld [vmem:[%s1032_s0 + $0x110] sm:$0xff]  ;;  %v140_v37 = vxor.u32 2147483648, %v544_v32 }
   0x4   :  { %v20_v5 = vxor.u32 2147483648, %v514_v2  ;;  %v516_v6 = vld [vmem:[%s1032_s0 + $0x180] sm:$0xff]  ;;  %7 = vst [vmem:[%s1033_s1] sm:$0xff] %v5_v3  ;;  %v532_v20 = vld [vmem:[%s1032_s0 + $0x188] sm:$0xff]  ;;  %v84_v23 = vxor.u32 2147483648, %v530_v18  ;;  %v548_v36 = vld [vmem:[%s1032_s0 + $0x190] sm:$0xff]  ;;  %v148_v39 = vxor.u32 2147483648, %v546_v34 }
   0x5   :  { %v518_v7 = vld [vmem:[%s1032_s0 + $0x40] sm:$0xff]  ;;  %v28_v9 = vxor.u32 2147483648, %v516_v6  ;;  %513 = vst [vmem:[%s1033_s1 + $0x80] sm:$0xff] %v12_v4  ;;  %v534_v22 = vld [vmem:[%s1032_s0 + $0x48] sm:$0xff]  ;;  %v92_v25 = vxor.u32 2147483648, %v532_v20  ;;  %v550_v38 = vld [vmem:[%s1032_s0 + $0x50] sm:$0xff] }
   0x6   :  { %v520_v8 = vld [vmem:[%s1032_s0 + $0xc0] sm:$0xff]  ;;  %v36_v11 = vxor.u32 2147483648, %v518_v7  ;;  %515 = vst [vmem:[%s1033_s1 + $0x100] sm:$0xff] %v20_v5  ;;  %v536_v24 = vld [vmem:[%s1032_s0 + $0xc8] sm:$0xff]  ;;  %v100_v27 = vxor.u32 2147483648, %v534_v22  ;;  %v552_v40 = vld [vmem:[%s1032_s0 + $0xd0] sm:$0xff] }
   0x7   :  { %v522_v10 = vld [vmem:[%s1032_s0 + $0x140] sm:$0xff]  ;;  %v44_v13 = vxor.u32 2147483648, %v520_v8  ;;  %517 = vst [vmem:[%s1033_s1 + $0x180] sm:$0xff] %v28_v9  ;;  %v538_v26 = vld [vmem:[%s1032_s0 + $0x148] sm:$0xff]  ;;  %v108_v29 = vxor.u32 2147483648, %v536_v24  ;;  %v156_v41 = vxor.u32 2147483648, %v548_v36 }
   0x8   :  { %v524_v12 = vld [vmem:[%s1032_s0 + $0x1c0] sm:$0xff]  ;;  %v52_v15 = vxor.u32 2147483648, %v522_v10  ;;  %519 = vst [vmem:[%s1033_s1 + $0x40] sm:$0xff] %v36_v11  ;;  %v540_v28 = vld [vmem:[%s1032_s0 + $0x1c8] sm:$0xff]  ;;  %v116_v31 = vxor.u32 2147483648, %v538_v26  ;;  %v554_v42 = vld [vmem:[%s1032_s0 + $0x150] sm:$0xff] }
   0x9   :  { %v60_v17 = vxor.u32 2147483648, %v524_v12  ;;  %521 = vst [vmem:[%s1033_s1 + $0xc0] sm:$0xff] %v44_v13  ;;  %v124_v33 = vxor.u32 2147483648, %v540_v28  ;;  %v164_v43 = vxor.u32 2147483648, %v550_v38  ;;  %v556_v44 = vld [vmem:[%s1032_s0 + $0x1d0] sm:$0xff]  ;;  %v172_v45 = vxor.u32 2147483648, %v552_v40 }
   0xa   :  { %523 = vst [vmem:[%s1033_s1 + $0x140] sm:$0xff] %v52_v15  ;;  %v558_v46 = vld [vmem:[%s1032_s0 + $0x18] sm:$0xff]  ;;  %v180_v47 = vxor.u32 2147483648, %v554_v42  ;;  %v188_v49 = vxor.u32 2147483648, %v556_v44  ;;  %v574_v62 = vld [vmem:[%s1032_s0 + $0x20] sm:$0xff]  ;;  %v590_v14 = vld [vmem:[%s1032_s0 + $0x28] sm:$0xff] }
   0xb   :  { %525 = vst [vmem:[%s1033_s1 + $0x1c0] sm:$0xff] %v60_v17  ;;  %v560_v48 = vld [vmem:[%s1032_s0 + $0x98] sm:$0xff]  ;;  %v196_v51 = vxor.u32 2147483648, %v558_v46  ;;  %v576_v0 = vld [vmem:[%s1032_s0 + $0xa0] sm:$0xff]  ;;  %v260_v3 = vxor.u32 2147483648, %v574_v62  ;;  %v592_v16 = vld [vmem:[%s1032_s0 + $0xa8] sm:$0xff] }
   0xc   :  { %527 = vst [vmem:[%s1033_s1 + $0x8] sm:$0xff] %v68_v19  ;;  %v562_v50 = vld [vmem:[%s1032_s0 + $0x118] sm:$0xff]  ;;  %v204_v53 = vxor.u32 2147483648, %v560_v48  ;;  %v578_v2 = vld [vmem:[%s1032_s0 + $0x120] sm:$0xff]  ;;  %v268_v5 = vxor.u32 2147483648, %v576_v0  ;;  %v594_v18 = vld [vmem:[%s1032_s0 + $0x128] sm:$0xff] }
   0xd   :  { %529 = vst [vmem:[%s1033_s1 + $0x88] sm:$0xff] %v76_v21  ;;  %v564_v52 = vld [vmem:[%s1032_s0 + $0x198] sm:$0xff]  ;;  %v212_v55 = vxor.u32 2147483648, %v562_v50  ;;  %v580_v4 = vld [vmem:[%s1032_s0 + $0x1a0] sm:$0xff]  ;;  %v276_v7 = vxor.u32 2147483648, %v578_v2  ;;  %v324_v19 = vxor.u32 2147483648, %v590_v14 }
   0xe   :  { %531 = vst [vmem:[%s1033_s1 + $0x108] sm:$0xff] %v84_v23  ;;  %v566_v54 = vld [vmem:[%s1032_s0 + $0x58] sm:$0xff]  ;;  %v220_v57 = vxor.u32 2147483648, %v564_v52  ;;  %v582_v6 = vld [vmem:[%s1032_s0 + $0x60] sm:$0xff]  ;;  %v284_v9 = vxor.u32 2147483648, %v580_v4  ;;  %v596_v20 = vld [vmem:[%s1032_s0 + $0x1a8] sm:$0xff] }
   0xf   :  { %533 = vst [vmem:[%s1033_s1 + $0x188] sm:$0xff] %v92_v25  ;;  %v568_v56 = vld [vmem:[%s1032_s0 + $0xd8] sm:$0xff]  ;;  %v228_v59 = vxor.u32 2147483648, %v566_v54  ;;  %v584_v8 = vld [vmem:[%s1032_s0 + $0xe0] sm:$0xff]  ;;  %v292_v11 = vxor.u32 2147483648, %v582_v6  ;;  %v332_v21 = vxor.u32 2147483648, %v592_v16 }
  0x10   :  { %535 = vst [vmem:[%s1033_s1 + $0x48] sm:$0xff] %v100_v27  ;;  %v570_v58 = vld [vmem:[%s1032_s0 + $0x158] sm:$0xff]  ;;  %v236_v61 = vxor.u32 2147483648, %v568_v56  ;;  %v586_v10 = vld [vmem:[%s1032_s0 + $0x160] sm:$0xff]  ;;  %v300_v13 = vxor.u32 2147483648, %v584_v8  ;;  %v598_v22 = vld [vmem:[%s1032_s0 + $0x68] sm:$0xff] }
  0x11   :  { %537 = vst [vmem:[%s1033_s1 + $0xc8] sm:$0xff] %v108_v29  ;;  %v572_v60 = vld [vmem:[%s1032_s0 + $0x1d8] sm:$0xff]  ;;  %v244_v63 = vxor.u32 2147483648, %v570_v58  ;;  %v588_v12 = vld [vmem:[%s1032_s0 + $0x1e0] sm:$0xff]  ;;  %v308_v15 = vxor.u32 2147483648, %v586_v10  ;;  %v340_v23 = vxor.u32 2147483648, %v594_v18 }
  0x12   :  { %539 = vst [vmem:[%s1033_s1 + $0x148] sm:$0xff] %v116_v31  ;;  %v252_v1 = vxor.u32 2147483648, %v572_v60  ;;  %v316_v17 = vxor.u32 2147483648, %v588_v12  ;;  %v600_v24 = vld [vmem:[%s1032_s0 + $0xe8] sm:$0xff]  ;;  %v348_v25 = vxor.u32 2147483648, %v596_v20  ;;  %v356_v27 = vxor.u32 2147483648, %v598_v22 }
  0x13   :  { %541 = vst [vmem:[%s1033_s1 + $0x1c8] sm:$0xff] %v124_v33  ;;  %v602_v26 = vld [vmem:[%s1032_s0 + $0x168] sm:$0xff]  ;;  %v364_v29 = vxor.u32 2147483648, %v600_v24  ;;  %v606_v30 = vld [vmem:[%s1032_s0 + $0x30] sm:$0xff]  ;;  %v622_v46 = vld [vmem:[%s1032_s0 + $0x38] sm:$0xff] }
  0x14   :  { %543 = vst [vmem:[%s1033_s1 + $0x10] sm:$0xff] %v132_v35  ;;  %v604_v28 = vld [vmem:[%s1032_s0 + $0x1e8] sm:$0xff]  ;;  %v372_v31 = vxor.u32 2147483648, %v602_v26  ;;  %v608_v32 = vld [vmem:[%s1032_s0 + $0xb0] sm:$0xff]  ;;  %v388_v35 = vxor.u32 2147483648, %v606_v30  ;;  %v624_v48 = vld [vmem:[%s1032_s0 + $0xb8] sm:$0xff] }
  0x15   :  { %545 = vst [vmem:[%s1033_s1 + $0x90] sm:$0xff] %v140_v37  ;;  %v380_v33 = vxor.u32 2147483648, %v604_v28  ;;  %v610_v34 = vld [vmem:[%s1032_s0 + $0x130] sm:$0xff]  ;;  %v396_v37 = vxor.u32 2147483648, %v608_v32  ;;  %v626_v50 = vld [vmem:[%s1032_s0 + $0x138] sm:$0xff] }
  0x16   :  { %547 = vst [vmem:[%s1033_s1 + $0x110] sm:$0xff] %v148_v39  ;;  %v612_v36 = vld [vmem:[%s1032_s0 + $0x1b0] sm:$0xff]  ;;  %v404_v39 = vxor.u32 2147483648, %v610_v34  ;;  %v628_v52 = vld [vmem:[%s1032_s0 + $0x1b8] sm:$0xff] }
  0x17   :  { %549 = vst [vmem:[%s1033_s1 + $0x190] sm:$0xff] %v156_v41  ;;  %v614_v38 = vld [vmem:[%s1032_s0 + $0x70] sm:$0xff]  ;;  %v412_v41 = vxor.u32 2147483648, %v612_v36  ;;  %v630_v54 = vld [vmem:[%s1032_s0 + $0x78] sm:$0xff] }
  0x18   :  { %551 = vst [vmem:[%s1033_s1 + $0x50] sm:$0xff] %v164_v43  ;;  %v616_v40 = vld [vmem:[%s1032_s0 + $0xf0] sm:$0xff]  ;;  %v420_v43 = vxor.u32 2147483648, %v614_v38  ;;  %v632_v56 = vld [vmem:[%s1032_s0 + $0xf8] sm:$0xff] }
  0x19   :  { %553 = vst [vmem:[%s1033_s1 + $0xd0] sm:$0xff] %v172_v45  ;;  %v618_v42 = vld [vmem:[%s1032_s0 + $0x170] sm:$0xff]  ;;  %v428_v45 = vxor.u32 2147483648, %v616_v40  ;;  %v634_v58 = vld [vmem:[%s1032_s0 + $0x178] sm:$0xff] }
  0x1a   :  { %555 = vst [vmem:[%s1033_s1 + $0x150] sm:$0xff] %v180_v47  ;;  %v620_v44 = vld [vmem:[%s1032_s0 + $0x1f0] sm:$0xff]  ;;  %v436_v47 = vxor.u32 2147483648, %v618_v42  ;;  %v636_v60 = vld [vmem:[%s1032_s0 + $0x1f8] sm:$0xff]  ;;  %v500_v62 = vxor.u32 2147483648, %v634_v58 }
  0x1b   :  { %557 = vst [vmem:[%s1033_s1 + $0x1d0] sm:$0xff] %v188_v49  ;;  %v444_v49 = vxor.u32 2147483648, %v620_v44 }
  0x1c   :  { %559 = vst [vmem:[%s1033_s1 + $0x18] sm:$0xff] %v196_v51  ;;  %v452_v51 = vxor.u32 2147483648, %v622_v46 }
  0x1d   :  { %561 = vst [vmem:[%s1033_s1 + $0x98] sm:$0xff] %v204_v53  ;;  %v460_v53 = vxor.u32 2147483648, %v624_v48 }
  0x1e   :  { %563 = vst [vmem:[%s1033_s1 + $0x118] sm:$0xff] %v212_v55  ;;  %v468_v55 = vxor.u32 2147483648, %v626_v50 }
  0x1f   :  { %565 = vst [vmem:[%s1033_s1 + $0x198] sm:$0xff] %v220_v57  ;;  %v476_v57 = vxor.u32 2147483648, %v628_v52 }
  0x20   :  { %567 = vst [vmem:[%s1033_s1 + $0x58] sm:$0xff] %v228_v59  ;;  %v484_v59 = vxor.u32 2147483648, %v630_v54 }
  0x21   :  { %569 = vst [vmem:[%s1033_s1 + $0xd8] sm:$0xff] %v236_v61  ;;  %v492_v61 = vxor.u32 2147483648, %v632_v56 }
  0x22   :  { %571 = vst [vmem:[%s1033_s1 + $0x158] sm:$0xff] %v244_v63  ;;  %v508_v63 = vxor.u32 2147483648, %v636_v60 }
  0x23   :  { %573 = vst [vmem:[%s1033_s1 + $0x1d8] sm:$0xff] %v252_v1 }
  0x24   :  { %575 = vst [vmem:[%s1033_s1 + $0x20] sm:$0xff] %v260_v3 }
  0x25   :  { %577 = vst [vmem:[%s1033_s1 + $0xa0] sm:$0xff] %v268_v5 }
  0x26   :  { %579 = vst [vmem:[%s1033_s1 + $0x120] sm:$0xff] %v276_v7 }
  0x27   :  { %581 = vst [vmem:[%s1033_s1 + $0x1a0] sm:$0xff] %v284_v9 }
  0x28   :  { %583 = vst [vmem:[%s1033_s1 + $0x60] sm:$0xff] %v292_v11 }
  0x29   :  { %585 = vst [vmem:[%s1033_s1 + $0xe0] sm:$0xff] %v300_v13 }
  0x2a   :  { %587 = vst [vmem:[%s1033_s1 + $0x160] sm:$0xff] %v308_v15 }
  0x2b   :  { %589 = vst [vmem:[%s1033_s1 + $0x1e0] sm:$0xff] %v316_v17 }
  0x2c   :  { %591 = vst [vmem:[%s1033_s1 + $0x28] sm:$0xff] %v324_v19 }
  0x2d   :  { %593 = vst [vmem:[%s1033_s1 + $0xa8] sm:$0xff] %v332_v21 }
  0x2e   :  { %595 = vst [vmem:[%s1033_s1 + $0x128] sm:$0xff] %v340_v23 }
  0x2f   :  { %597 = vst [vmem:[%s1033_s1 + $0x1a8] sm:$0xff] %v348_v25 }
  0x30   :  { %599 = vst [vmem:[%s1033_s1 + $0x68] sm:$0xff] %v356_v27 }
  0x31   :  { %601 = vst [vmem:[%s1033_s1 + $0xe8] sm:$0xff] %v364_v29 }
  0x32   :  { %603 = vst [vmem:[%s1033_s1 + $0x168] sm:$0xff] %v372_v31 }
  0x33   :  { %605 = vst [vmem:[%s1033_s1 + $0x1e8] sm:$0xff] %v380_v33 }
  0x34   :  { %607 = vst [vmem:[%s1033_s1 + $0x30] sm:$0xff] %v388_v35 }
  0x35   :  { %609 = vst [vmem:[%s1033_s1 + $0xb0] sm:$0xff] %v396_v37 }
  0x36   :  { %611 = vst [vmem:[%s1033_s1 + $0x130] sm:$0xff] %v404_v39 }
  0x37   :  { %613 = vst [vmem:[%s1033_s1 + $0x1b0] sm:$0xff] %v412_v41 }
  0x38   :  { %615 = vst [vmem:[%s1033_s1 + $0x70] sm:$0xff] %v420_v43 }
  0x39   :  { %617 = vst [vmem:[%s1033_s1 + $0xf0] sm:$0xff] %v428_v45 }
  0x3a   :  { %619 = vst [vmem:[%s1033_s1 + $0x170] sm:$0xff] %v436_v47 }
  0x3b   :  { %621 = vst [vmem:[%s1033_s1 + $0x1f0] sm:$0xff] %v444_v49 }
  0x3c   :  { %623 = vst [vmem:[%s1033_s1 + $0x38] sm:$0xff] %v452_v51 }
  0x3d   :  { %625 = vst [vmem:[%s1033_s1 + $0xb8] sm:$0xff] %v460_v53 }
  0x3e   :  { %627 = vst [vmem:[%s1033_s1 + $0x138] sm:$0xff] %v468_v55 }
  0x3f   :  { %629 = vst [vmem:[%s1033_s1 + $0x1b8] sm:$0xff] %v476_v57 }
  0x40   :  { %631 = vst [vmem:[%s1033_s1 + $0x78] sm:$0xff] %v484_v59 }
  0x41   :  { %633 = vst [vmem:[%s1033_s1 + $0xf8] sm:$0xff] %v492_v61 }
  0x42   :  { %635 = vst [vmem:[%s1033_s1 + $0x178] sm:$0xff] %v500_v62 }
  0x43   :  { %637 = vst [vmem:[%s1033_s1 + $0x1f8] sm:$0xff] %v508_v63 }

// kernel: encoder4_pallas.1
= control target key start
LH: loop header
LB: loop body
LE: loop exit
PB: predicated region body
PF: predicated region fallthrough
CT: control target
= control target key end

     0   :  { %10 = vsyncpa [#allocation3], 0  ;;  %s7639_s18 = smov 0   ;;  %s12389_s0 = inlined_call_operand.vmem [shape: f32[8], index: 0, kind: input, shape index: {}]   ;;  %s12390_s1 = inlined_call_operand.vmem [shape: f32[256,128], index: 1, kind: input, shape index: {}]   ;;  %s12391_s2 = inlined_call_operand.vmem [shape: f32[4,2,128,128], index: 2, kind: input, shape index: {}]   ;;  %s12392_s3 = inlined_call_operand.vmem [shape: f32[4,4,128], index: 3, kind: input, shape index: {}]   ;;  %s12393_s4 = inlined_call_operand.vmem [shape: f32[128,128], index: 4, kind: input, shape index: {}]   ;;  %s12394_s5 = inlined_call_operand.vmem [shape: f32[256,128], index: 5, kind: output, shape index: {}]  }
   0x1 LB: > { %s6776_s19 = sadd.s32 4294967295, %s7605_s18   ;;  %p6778_p0 = scmp.ge.s32.totalorder %s7605_s18, 1  ;;  %s7605_s18 = sphi %s7639_s18, %s16_s18  }
   0x2   : > { %p157_p1 = scmp.lt.s32.totalorder %s7605_s18, 3  ;;  %s169_s22 = sshll.u32 %s12389_s0, 4  ;;  %s170_s22 = int_to_ptr.vmem [resolvable:$true] %s169_s22 }
   0x3   : > { %p6928_p3 = scmp.eq.s32.totalorder %s6776_s19, 0  ;;  %s7607_s23 = smov [#allocation2]  }
   0x4   : > { %p158_p2 = pnand %p6778_p0, %p157_p1 }
   0x6   : > { %p6924_p4 = pneg %p158_p2  ;;  %200 = sbr.rel (%p158_p2) target bundleno = 3651 (0xe43), region = 40 }
   0x8   : > { %p6925_p5 = pnand %p6928_p3, %p6924_p4 }
   0xa   : > { %6927 = dma.vmem_to_smem (!%p6925_p5), %s170_s22, 16, %s7607_s23, [#allocation3]  }
   0xb   : > { %7600 = dma.done.wait (%p6928_p3), [#allocation3], 16  }
   0xc   : > { %7602 = vsyncadd (%p6928_p3), [#allocation3], 4294967280 }
   0xd   : > { %207 = sfence }
   0xe   : > { %v289_v0 = vld [vmem:[%s12391_s2 + $0x78] sm:$0xff]  ;;  %v288_v1 = vld [vmem:[%s12391_s2 + $0x70] sm:$0xff]  ;;  %v287_v2 = vld [vmem:[%s12391_s2 + $0x68] sm:$0xff]  ;;  %s6783_s15 = sshll.u32 %s6776_s19, 4  ;;  %s7608_s30 = smov 64  }
   0xf   : > { %290 = vmatpush.msra.mxu0 %v289_v0  ;;  %v286_v3 = vld [vmem:[%s12391_s2 + $0x60] sm:$0xff]  ;;  %v285_v4 = vld [vmem:[%s12391_s2 + $0x58] sm:$0xff]  ;;  %v284_v5 = vld [vmem:[%s12391_s2 + $0x50] sm:$0xff]  ;;  %p231_p6 = scmp.lt.s32.totalorder %s6783_s15, 31  ;;  %s777_s11 = sld [smem:[#allocation2]] }
  0x10   : > { %v283_v6 = vld [vmem:[%s12391_s2 + $0x48] sm:$0xff]  ;;  %v282_v7 = vld [vmem:[%s12391_s2 + $0x40] sm:$0xff]  ;;  %v281_v8 = vld [vmem:[%s12391_s2 + $0x38] sm:$0xff]  ;;  %s6803_s19 = sld [smem:[#allocation2 + $0x1]] }
  0x11   : > { %291 = vmatpush.msra.mxu0 %v288_v1  ;;  %v280_v9 = vld [vmem:[%s12391_s2 + $0x30] sm:$0xff]  ;;  %v279_v10 = vld [vmem:[%s12391_s2 + $0x28] sm:$0xff]  ;;  %s12473_s15 = smov (!%p231_p6, %s6783_s15), 31  ;;  %v278_v11 = vld [vmem:[%s12391_s2 + $0x20] sm:$0xff]  ;;  %s6822_s28 = sld [smem:[#allocation2 + $0x2]] }
  0x12   : > { %v277_v12 = vld [vmem:[%s12391_s2 + $0x18] sm:$0xff]  ;;  %s6784_s27 = sshll.u32 %s12473_s15, 3  ;;  %v276_v13 = vld [vmem:[%s12391_s2 + $0x10] sm:$0xff]  ;;  %v275_v14 = vld [vmem:[%s12391_s2 + $0x8] sm:$0xff]  ;;  %s10733_s17 = sld [smem:[#allocation2 + $0x4]] }
  0x13   : > { %292 = vmatpush.msra.mxu0 %v287_v2  ;;  %s7703_s9 = scalar_lea.vmem %s12390_s1, %s6784_s27  ;;  %v274_v15 = vld [vmem:[%s12391_s2] sm:$0xff]  ;;  %v7719_v24 = vld [vmem:[%s12393_s4 + $0x78] sm:$0xff]  ;;  %v7728_v26 = vld [vmem:[%s12393_s4 + $0x70] sm:$0xff]  ;;  %s11256_s24 = sld [smem:[#allocation2 + $0x5]] }
  0x14   : > { %v242_v16 = vld [vmem:[%s7703_s9] sm:$0xff]  ;;  %v243_v17 = vld [vmem:[%s7703_s9 + $0x8] sm:$0xff]  ;;  %v244_v18 = vld [vmem:[%s7703_s9 + $0x10] sm:$0xff]  ;;  %357 = vmatpush.msra.mxu1 %v7719_v24  ;;  %438 = vmatpush.msra.mxu2 %v7719_v24  ;;  %s12272_s26 = scalar_lea.vmem %s12394_s5, %s6784_s27 }
  0x15   : > { %293 = vmatpush.msra.mxu0 %v286_v3  ;;  %v245_v19 = vld [vmem:[%s7703_s9 + $0x18] sm:$0xff]  ;;  %v246_v20 = vld [vmem:[%s7703_s9 + $0x20] sm:$0xff]  ;;  %v247_v21 = vld [vmem:[%s7703_s9 + $0x28] sm:$0xff] }
  0x16   : > { %v248_v22 = vld [vmem:[%s7703_s9 + $0x30] sm:$0xff]  ;;  %v249_v23 = vld [vmem:[%s7703_s9 + $0x38] sm:$0xff]  ;;  %v250_v25 = vld [vmem:[%s7703_s9 + $0x40] sm:$0xff]  ;;  %358 = vmatpush.msra.mxu1 %v7728_v26  ;;  %439 = vmatpush.msra.mxu2 %v7728_v26 }
  0x17   : > { %294 = vmatpush.msra.mxu0 %v285_v4  ;;  %v7733_v27 = vld [vmem:[%s12393_s4 + $0x68] sm:$0xff]  ;;  %v7740_v28 = vld [vmem:[%s12393_s4 + $0x60] sm:$0xff]  ;;  %v7748_v29 = vld [vmem:[%s12393_s4 + $0x58] sm:$0xff] }
  0x18   : > { %359 = vmatpush.msra.mxu1 %v7733_v27  ;;  %440 = vmatpush.msra.mxu2 %v7733_v27  ;;  %v251_v30 = vld [vmem:[%s7703_s9 + $0x48] sm:$0xff]  ;;  %v7760_v31 = vld [vmem:[%s12393_s4 + $0x50] sm:$0xff]  ;;  %v7772_v33 = vld [vmem:[%s12393_s4 + $0x40] sm:$0xff] }
  0x19   : > { %295 = vmatpush.msra.mxu0 %v284_v5  ;;  %v7765_v32 = vld [vmem:[%s12393_s4 + $0x48] sm:$0xff]  ;;  %v7780_v34 = vld [vmem:[%s12393_s4 + $0x38] sm:$0xff]  ;;  %v252_v35 = vld [vmem:[%s7703_s9 + $0x50] sm:$0xff] }
  0x1a   : > { %360 = vmatpush.msra.mxu1 %v7740_v28  ;;  %441 = vmatpush.msra.mxu2 %v7740_v28  ;;  %v264_v36 = vld [vmem:[%s12393_s4 + $0x30] sm:$0xff]  ;;  %v7795_v37 = vld [vmem:[%s12393_s4 + $0x28] sm:$0xff]  ;;  %v7800_v38 = vld [vmem:[%s12393_s4 + $0x20] sm:$0xff] }
  0x1b   : > { %296 = vmatpush.msra.mxu0 %v283_v6  ;;  %v7808_v39 = vld [vmem:[%s12393_s4 + $0x18] sm:$0xff]  ;;  %v260_v41 = vld [vmem:[%s12393_s4 + $0x10] sm:$0xff]  ;;  %v259_v42 = vld [vmem:[%s12393_s4 + $0x8] sm:$0xff] }
  0x1c   : > { %361 = vmatpush.msra.mxu1 %v7748_v29  ;;  %442 = vmatpush.msra.mxu2 %v7748_v29  ;;  %v253_v40 = vld [vmem:[%s7703_s9 + $0x58] sm:$0xff]  ;;  %v258_v43 = vld [vmem:[%s12393_s4] sm:$0xff]  ;;  %v255_v45 = vld [vmem:[%s7703_s9 + $0x68] sm:$0xff] }
  0x1d   : > { %297 = vmatpush.msra.mxu0 %v282_v7  ;;  %v254_v44 = vld [vmem:[%s7703_s9 + $0x60] sm:$0xff]  ;;  %v256_v46 = vld [vmem:[%s7703_s9 + $0x70] sm:$0xff]  ;;  %v257_v47 = vld [vmem:[%s7703_s9 + $0x78] sm:$0xff] }
  0x1e   : > { %362 = vmatpush.msra.mxu1 %v7760_v31  ;;  %443 = vmatpush.msra.mxu2 %v7760_v31 }
  0x1f   : > { %298 = vmatpush.msra.mxu0 %v281_v8 }
  0x20   : > { %363 = vmatpush.msra.mxu1 %v7765_v32  ;;  %444 = vmatpush.msra.mxu2 %v7765_v32 }
  0x21   : > { %299 = vmatpush.msra.mxu0 %v280_v9 }
  0x22   : > { %364 = vmatpush.msra.mxu1 %v7772_v33  ;;  %445 = vmatpush.msra.mxu2 %v7772_v33 }
  0x23   : > { %300 = vmatpush.msra.mxu0 %v279_v10 }
  0x24   : > { %365 = vmatpush.msra.mxu1 %v7780_v34  ;;  %446 = vmatpush.msra.mxu2 %v7780_v34 }
  0x25   : > { %301 = vmatpush.msra.mxu0 %v278_v11 }
  0x26   : > { %366 = vmatpush.msra.mxu1 %v264_v36  ;;  %447 = vmatpush.msra.mxu2 %v264_v36 }
  0x27   : > { %302 = vmatpush.msra.mxu0 %v277_v12 }
  0x28   : > { %367 = vmatpush.msra.mxu1 %v7795_v37  ;;  %448 = vmatpush.msra.mxu2 %v7795_v37 }
  0x29   : > { %303 = vmatpush.msra.mxu0 %v276_v13 }
  0x2a   : > { %368 = vmatpush.msra.mxu1 %v7800_v38  ;;  %449 = vmatpush.msra.mxu2 %v7800_v38 }
  0x2b   : > { %304 = vmatpush.msra.mxu0 %v275_v14 }
  0x2c   : > { %369 = vmatpush.msra.mxu1 %v7808_v39  ;;  %450 = vmatpush.msra.mxu2 %v7808_v39 }
  0x2d   : > { %305 = vmatpush.msra.mxu0 %v274_v15 }
  0x2e   : > { %306 = vmatmul.f32.vlgmr.msra.gmra.mxu0 %v242_v16  ;;  %370 = vmatpush.msra.mxu1 %v260_v41 }
  0x2f   : > { %1151 = vmatpush.msrb.mxu0 %v7719_v24  ;;  %451 = vmatpush.msra.mxu2 %v260_v41 }
  0x30   : > { %371 = vmatpush.msra.mxu1 %v259_v42 }
  0x31   : > { %1152 = vmatpush.msrb.mxu0 %v7728_v26  ;;  %452 = vmatpush.msra.mxu2 %v259_v42 }
  0x32   : > { %372 = vmatpush.msra.mxu1 %v258_v43 }
  0x33   : > { %1153 = vmatpush.msrb.mxu0 %v7733_v27  ;;  %453 = vmatpush.msra.mxu2 %v258_v43 }
  0x34   : > { %1232 = vmatpush.msrb.mxu1 %v7719_v24 }
  0x35   : > { %1154 = vmatpush.msrb.mxu0 %v7740_v28 }
  0x36   : > { %309 = vmatmul.f32.gmra.mxu0 %v243_v17  ;;  %1233 = vmatpush.msrb.mxu1 %v7728_v26 }
  0x37   : > { %1155 = vmatpush.msrb.mxu0 %v7748_v29 }
  0x38   : > { %1234 = vmatpush.msrb.mxu1 %v7733_v27 }
  0x39   : > { %1156 = vmatpush.msrb.mxu0 %v7760_v31 }
  0x3a   : > { %1235 = vmatpush.msrb.mxu1 %v7740_v28 }
  0x3b   : > { %1157 = vmatpush.msrb.mxu0 %v7765_v32 }
  0x3c   : > { %1236 = vmatpush.msrb.mxu1 %v7748_v29 }
  0x3d   : > { %1158 = vmatpush.msrb.mxu0 %v7772_v33 }
  0x3e   : > { %312 = vmatmul.f32.gmra.mxu0 %v244_v18  ;;  %1237 = vmatpush.msrb.mxu1 %v7760_v31 }
  0x3f   : > { %1159 = vmatpush.msrb.mxu0 %v7780_v34 }
  0x40   : > { %1238 = vmatpush.msrb.mxu1 %v7765_v32 }
  0x41   : > { %1160 = vmatpush.msrb.mxu0 %v264_v36 }
  0x42   : > { %1239 = vmatpush.msrb.mxu1 %v7772_v33 }
  0x43   : > { %1161 = vmatpush.msrb.mxu0 %v7795_v37 }
  0x44   : > { %1240 = vmatpush.msrb.mxu1 %v7780_v34 }
  0x45   : > { %1162 = vmatpush.msrb.mxu0 %v7800_v38 }
  0x46   : > { %315 = vmatmul.f32.gmra.mxu0 %v245_v19  ;;  %1241 = vmatpush.msrb.mxu1 %v264_v36 }
  0x47   : > { %1163 = vmatpush.msrb.mxu0 %v7808_v39 }
  0x48   : > { %1242 = vmatpush.msrb.mxu1 %v7795_v37 }
  0x49   : > { %1164 = vmatpush.msrb.mxu0 %v260_v41 }
  0x4a   : > { %1243 = vmatpush.msrb.mxu1 %v7800_v38 }
  0x4b   : > { %1165 = vmatpush.msrb.mxu0 %v259_v42 }
  0x4c   : > { %1244 = vmatpush.msrb.mxu1 %v7808_v39 }
  0x4d   : > { %1166 = vmatpush.msrb.mxu0 %v258_v43 }
  0x4e   : > { %318 = vmatmul.f32.gmra.mxu0 %v246_v20  ;;  %1245 = vmatpush.msrb.mxu1 %v260_v41 }
  0x4f   : > { %2043 = vmatpush.msra.mxu0 %v7719_v24 }
  0x50   : > { %1246 = vmatpush.msrb.mxu1 %v259_v42 }
  0x51   : > { %2044 = vmatpush.msra.mxu0 %v7728_v26 }
  0x52   : > { %1247 = vmatpush.msrb.mxu1 %v258_v43 }
  0x53   : > { %2045 = vmatpush.msra.mxu0 %v7733_v27 }
  0x55   : > { %2046 = vmatpush.msra.mxu0 %v7740_v28 }
  0x56   : > { %321 = vmatmul.f32.gmra.mxu0 %v247_v21 }
  0x57   : > { %2047 = vmatpush.msra.mxu0 %v7748_v29 }
  0x59   : > { %2048 = vmatpush.msra.mxu0 %v7760_v31 }
  0x5b   : > { %2049 = vmatpush.msra.mxu0 %v7765_v32 }
  0x5d   : > { %2050 = vmatpush.msra.mxu0 %v7772_v33 }
  0x5e   : > { %324 = vmatmul.f32.gmra.mxu0 %v248_v22 }
  0x5f   : > { %2051 = vmatpush.msra.mxu0 %v7780_v34 }
  0x61   : > { %2052 = vmatpush.msra.mxu0 %v264_v36 }
  0x63   : > { %2053 = vmatpush.msra.mxu0 %v7795_v37 }
  0x65   : > { %2054 = vmatpush.msra.mxu0 %v7800_v38  ;;  %v7949_v38 = vld [vmem:[%s12392_s3] ss:$0 sm:$0xff] }
  0x66   : > { %327 = vmatmul.f32.gmra.mxu0 %v249_v23 }
  0x67   : > { %2055 = vmatpush.msra.mxu0 %v7808_v39 }
  0x69   : > { %2056 = vmatpush.msra.mxu0 %v260_v41 }
  0x6b   : > { %2057 = vmatpush.msra.mxu0 %v259_v42 }
  0x6d   : > { %2058 = vmatpush.msra.mxu0 %v258_v43 }
  0x6e   : > { %330 = vmatmul.f32.gmra.mxu0 %v250_v25 }
  0x76   : > { %333 = vmatmul.f32.gmra.mxu0 %v251_v30 }
  0x7e   : > { %336 = vmatmul.f32.gmra.mxu0 %v252_v35 }
  0x86   : > { %339 = vmatmul.f32.gmra.mxu0 %v253_v40 }
  0x8e   : > { %342 = vmatmul.f32.gmra.mxu0 %v254_v44 }
  0x96   : > { %345 = vmatmul.f32.gmra.mxu0 %v255_v45 }
  0x9e   : > { %348 = vmatmul.f32.gmra.mxu0 %v256_v46  ;;  %v7958_v46 = vld [vmem:[%s12392_s3 + $0x1] ss:$0 sm:$0xff] }
  0xa6   : > { %351 = vmatmul.f32.gmra.mxu0 %v257_v47 }
  0xab   : > { %v7854_v48 = vpop.f32.mrf.mxu0 }
  0xac   : > { %373 = vmatmul.f32.vlgmr.msra.gmra.mxu1 %v7854_v48  ;;  %v422_v49 = vmul.f32 %v7854_v48, %v7854_v48 }
  0xae   : > { %454 = vmatmul.f32.vlgmr.msra.gmra.mxu2 %v422_v49 }
  0xb3   : > { %v7861_v50 = vpop.f32.mrf.mxu0 }
  0xb4   : > { %376 = vmatmul.f32.gmra.mxu1 %v7861_v50  ;;  %v423_v51 = vmul.f32 %v7861_v50, %v7861_v50 }
  0xb6   : > { %457 = vmatmul.f32.gmra.mxu2 %v423_v51 }
  0xbb   : > { %v7866_v52 = vpop.f32.mrf.mxu0 }
  0xbc   : > { %379 = vmatmul.f32.gmra.mxu1 %v7866_v52  ;;  %v424_v53 = vmul.f32 %v7866_v52, %v7866_v52 }
  0xbe   : > { %460 = vmatmul.f32.gmra.mxu2 %v424_v53 }
  0xc3   : > { %v7871_v54 = vpop.f32.mrf.mxu0 }
  0xc4   : > { %382 = vmatmul.f32.gmra.mxu1 %v7871_v54  ;;  %v425_v55 = vmul.f32 %v7871_v54, %v7871_v54 }
  0xc6   : > { %463 = vmatmul.f32.gmra.mxu2 %v425_v55 }
  0xcb   : > { %v7876_v56 = vpop.f32.mrf.mxu0 }
  0xcc   : > { %385 = vmatmul.f32.gmra.mxu1 %v7876_v56  ;;  %v426_v57 = vmul.f32 %v7876_v56, %v7876_v56 }
  0xce   : > { %466 = vmatmul.f32.gmra.mxu2 %v426_v57 }
  0xd3   : > { %v7881_v58 = vpop.f32.mrf.mxu0 }
  0xd4   : > { %388 = vmatmul.f32.gmra.mxu1 %v7881_v58  ;;  %v427_v59 = vmul.f32 %v7881_v58, %v7881_v58 }
  0xd6   : > { %469 = vmatmul.f32.gmra.mxu2 %v427_v59 }
  0xdb   : > { %v7886_v60 = vpop.f32.mrf.mxu0 }
  0xdc   : > { %391 = vmatmul.f32.gmra.mxu1 %v7886_v60  ;;  %v428_v61 = vmul.f32 %v7886_v60, %v7886_v60 }
  0xde   : > { %472 = vmatmul.f32.gmra.mxu2 %v428_v61 }
  0xe3   : > { %v7891_v62 = vpop.f32.mrf.mxu0 }
  0xe4   : > { %394 = vmatmul.f32.gmra.mxu1 %v7891_v62  ;;  %v429_v63 = vmul.f32 %v7891_v62, %v7891_v62 }
  0xe6   : > { %475 = vmatmul.f32.gmra.mxu2 %v429_v63 }
  0xeb   : > { %v7896_v0 = vpop.f32.mrf.mxu0 }
  0xec   : > { %397 = vmatmul.f32.gmra.mxu1 %v7896_v0  ;;  %v430_v1 = vmul.f32 %v7896_v0, %v7896_v0 }
  0xee   : > { %478 = vmatmul.f32.gmra.mxu2 %v430_v1 }
  0xf3   : > { %v7901_v2 = vpop.f32.mrf.mxu0 }
  0xf4   : > { %400 = vmatmul.f32.gmra.mxu1 %v7901_v2  ;;  %v431_v3 = vmul.f32 %v7901_v2, %v7901_v2 }
  0xf6   : > { %481 = vmatmul.f32.gmra.mxu2 %v431_v3 }
  0xfb   : > { %v7906_v4 = vpop.f32.mrf.mxu0 }
  0xfc   : > { %403 = vmatmul.f32.gmra.mxu1 %v7906_v4  ;;  %v432_v5 = vmul.f32 %v7906_v4, %v7906_v4 }
  0xfe   : > { %484 = vmatmul.f32.gmra.mxu2 %v432_v5 }
 0x103   : > { %v7911_v6 = vpop.f32.mrf.mxu0 }
 0x104   : > { %406 = vmatmul.f32.gmra.mxu1 %v7911_v6  ;;  %v433_v7 = vmul.f32 %v7911_v6, %v7911_v6 }
 0x106   : > { %487 = vmatmul.f32.gmra.mxu2 %v433_v7 }
 0x10b   : > { %v7916_v8 = vpop.f32.mrf.mxu0 }
 0x10c   : > { %409 = vmatmul.f32.gmra.mxu1 %v7916_v8  ;;  %v434_v9 = vmul.f32 %v7916_v8, %v7916_v8 }
 0x10e   : > { %490 = vmatmul.f32.gmra.mxu2 %v434_v9 }
 0x113   : > { %v7921_v10 = vpop.f32.mrf.mxu0 }
 0x114   : > { %412 = vmatmul.f32.gmra.mxu1 %v7921_v10  ;;  %v435_v11 = vmul.f32 %v7921_v10, %v7921_v10 }
 0x116   : > { %493 = vmatmul.f32.gmra.mxu2 %v435_v11 }
 0x11b   : > { %v7926_v12 = vpop.f32.mrf.mxu0 }
 0x11c   : > { %415 = vmatmul.f32.gmra.mxu1 %v7926_v12  ;;  %v436_v13 = vmul.f32 %v7926_v12, %v7926_v12 }
 0x11e   : > { %496 = vmatmul.f32.gmra.mxu2 %v436_v13 }
 0x123   : > { %v7931_v14 = vpop.f32.mrf.mxu0 }
 0x124   : > { %418 = vmatmul.f32.gmra.mxu1 %v7931_v14  ;;  %v437_v15 = vmul.f32 %v7931_v14, %v7931_v14 }
 0x126   : > { %499 = vmatmul.f32.gmra.mxu2 %v437_v15 }
 0x129   : > { %v374_v16 = vpop.f32.mrf.mxu1 }
 0x12a   : > { %v503_v17 = vmul.f32 %v374_v16, %v374_v16  ;;  %v711_v43 = vsub.f32 %v7854_v48, %v374_v16 }
 0x131   : > { %v7936_v18 = vpop.f32.mrf.mxu1  ;;  %v455_v19 = vpop.f32.mrf.mxu2 }
 0x132   : > { %v519_v20 = vsub.f32 %v455_v19, %v503_v17  ;;  %v504_v22 = vmul.f32 %v7936_v18, %v7936_v18  ;;  %v712_v9 = vsub.f32 %v7861_v50, %v7936_v18 }
 0x134   : > { %v535_v21 = vadd.f32 1e-05, %v519_v20 }
 0x136   : > { %6956 = vrsqrt.f32 %v535_v21  ;;  %vm557_vm1 = vweird.f32 %v535_v21 }
 0x139   : > { %v7940_v23 = vpop.f32.mrf.mxu1  ;;  %v458_v24 = vpop.f32.mrf.mxu2 }
 0x13a   : > { %v520_v25 = vsub.f32 %v458_v24, %v504_v22  ;;  %v505_v30 = vmul.f32 %v7940_v23, %v7940_v23 }
 0x13c   : > { %v6957_v26 = vpop.eup %6956  ;;  %v536_v27 = vadd.f32 1e-05, %v520_v25 }
 0x13d   : > { %v552_v28 = vmul.f32 %v6957_v26, %v535_v21  ;;  %vm558_vm0 = vweird.f32 %v6957_v26 }
 0x13e   : > { %6958 = vrsqrt.f32 %v536_v27  ;;  %vm559_vm2 = vmor %vm557_vm1, %vm558_vm0  ;;  %vm567_vm4 = vweird.f32 %v536_v27 }
 0x13f   : > { %v553_v29 = vmul.f32 %v6957_v26, %v552_v28 }
 0x141   : > { %v554_v31 = vmul.f32 0.5, %v553_v29  ;;  %v7944_v32 = vpop.f32.mrf.mxu1  ;;  %v461_v33 = vpop.f32.mrf.mxu2  ;;  %v713_v29 = vsub.f32 %v7866_v52, %v7940_v23 }
 0x142   : > { %v521_v34 = vsub.f32 %v461_v33, %v505_v30  ;;  %v506_v44 = vmul.f32 %v7944_v32, %v7944_v32 }
 0x143   : > { %v555_v35 = vsub.f32 1.5, %v554_v31 }
 0x144   : > { %v6959_v36 = vpop.eup %6958  ;;  %v537_v37 = vadd.f32 1e-05, %v521_v34 }
 0x145   : > { %v556_v39 = vmul.f32 %v6957_v26, %v555_v35  ;;  %v562_v40 = vmul.f32 %v6959_v36, %v536_v27  ;;  %vm568_vm3 = vweird.f32 %v6959_v36 }
 0x146   : > { %6960 = vrsqrt.f32 %v537_v37  ;;  %vm569_vm5 = vmor %vm567_vm4, %vm568_vm3  ;;  %vm577_vm7 = vweird.f32 %v537_v37 }
 0x147   : > { %v563_v41 = vmul.f32 %v6959_v36, %v562_v40  ;;  %v560_v42 = vsel %vm559_vm2, %v6957_v26, %v556_v39 }
 0x148   : > { %v728_v45 = vmul.f32 %v7949_v38, %v560_v42 }
 0x149   : > { %v564_v47 = vmul.f32 0.5, %v563_v41  ;;  %v7960_v49 = vpop.f32.mrf.mxu1  ;;  %v464_v51 = vpop.f32.mrf.mxu2 }
 0x14a   : > { %v522_v53 = vsub.f32 %v464_v51, %v506_v44  ;;  %v744_v55 = vmul.f32 %v728_v45, %v711_v43  ;;  %v507_v11 = vmul.f32 %v7960_v49, %v7960_v49 }
 0x14b   : > { %v565_v57 = vsub.f32 1.5, %v564_v47  ;;  %v714_v47 = vsub.f32 %v7871_v54, %v7944_v32 }
 0x14c   : > { %v6961_v59 = vpop.eup %6960  ;;  %v538_v48 = vadd.f32 1e-05, %v522_v53  ;;  %v7963_v61 = vadd.f32 %v7958_v46, %v744_v55 }
 0x14d   : > { %v566_v63 = vmul.f32 %v6959_v36, %v565_v57  ;;  %v572_v1 = vmul.f32 %v6961_v59, %v537_v37  ;;  %vm578_vm6 = vweird.f32 %v6961_v59 }
 0x14e   : > { %6962 = vrsqrt.f32 %v538_v48  ;;  %v7967_v3 = vmul.f32 %v7963_v61, %v7963_v61  ;;  %vm579_vm8 = vmor %vm577_vm7, %vm578_vm6  ;;  %vm587_vm10 = vweird.f32 %v538_v48 }
 0x14f   : > { %v570_v5 = vsel %vm569_vm5, %v6959_v36, %v566_v63  ;;  %v573_v7 = vmul.f32 %v6961_v59, %v572_v1 }
 0x150   : > { %794 = vrot.lane.b32.xlu0 %v7967_v3, %s7608_s30  ;;  %v729_v13 = vmul.f32 %v7949_v38, %v570_v5 }
 0x151   : > { %v574_v15 = vmul.f32 0.5, %v573_v7  ;;  %v7976_v16 = vpop.f32.mrf.mxu1  ;;  %v467_v17 = vpop.f32.mrf.mxu2 }
 0x152   : > { %v523_v19 = vsub.f32 %v467_v17, %v507_v11  ;;  %v745_v20 = vmul.f32 %v729_v13, %v712_v9  ;;  %v508_v30 = vmul.f32 %v7976_v16, %v7976_v16  ;;  %v715_v17 = vsub.f32 %v7876_v56, %v7960_v49 }
 0x153   : > { %v575_v21 = vsub.f32 1.5, %v574_v15 }
 0x154   : > { %v6963_v22 = vpop.eup %6962  ;;  %v539_v24 = vadd.f32 1e-05, %v523_v19  ;;  %v7979_v50 = vadd.f32 %v7958_v46, %v745_v20 }
 0x155   : > { %v576_v18 = vmul.f32 %v6961_v59, %v575_v21  ;;  %v582_v25 = vmul.f32 %v6963_v22, %v538_v48  ;;  %vm588_vm9 = vweird.f32 %v6963_v22 }
 0x156   : > { %6964 = vrsqrt.f32 %v539_v24  ;;  %v7983_v26 = vmul.f32 %v7979_v50, %v7979_v50  ;;  %vm589_vm11 = vmor %vm587_vm10, %vm588_vm9  ;;  %vm597_vm13 = vweird.f32 %v539_v24 }
 0x157   : > { %v583_v27 = vmul.f32 %v6963_v22, %v582_v25  ;;  %v580_v28 = vsel %vm579_vm8, %v6961_v59, %v576_v18 }
 0x158   : > { %796 = vrot.lane.b32.xlu0 %v7983_v26, %s7608_s30  ;;  %v730_v31 = vmul.f32 %v7949_v38, %v580_v28 }
 0x159   : > { %v584_v33 = vmul.f32 0.5, %v583_v27  ;;  %v7992_v34 = vpop.f32.mrf.mxu1  ;;  %v470_v35 = vpop.f32.mrf.mxu2 }
 0x15a   : > { %v524_v36 = vsub.f32 %v470_v35, %v508_v30  ;;  %v746_v37 = vmul.f32 %v730_v31, %v713_v29  ;;  %v509_v51 = vmul.f32 %v7992_v34, %v7992_v34 }
 0x15b   : > { %v585_v39 = vsub.f32 1.5, %v584_v33 }
 0x15c   : > { %v6965_v40 = vpop.eup %6964  ;;  %v540_v41 = vadd.f32 1e-05, %v524_v36  ;;  %v7995_v52 = vadd.f32 %v7958_v46, %v746_v37  ;;  %v716_v36 = vsub.f32 %v7881_v58, %v7976_v16 }
 0x15d   : > { %v586_v23 = vmul.f32 %v6963_v22, %v585_v39  ;;  %v592_v42 = vmul.f32 %v6965_v40, %v539_v24  ;;  %vm598_vm12 = vweird.f32 %v6965_v40 }
 0x15e   : > { %6966 = vrsqrt.f32 %v540_v41  ;;  %v7999_v43 = vmul.f32 %v7995_v52, %v7995_v52  ;;  %vm599_vm14 = vmor %vm597_vm13, %vm598_vm12  ;;  %vm607_vm0 = vweird.f32 %v540_v41 }
 0x15f   : > { %v590_v44 = vsel %vm589_vm11, %v6963_v22, %v586_v23  ;;  %v593_v45 = vmul.f32 %v6965_v40, %v592_v42 }
 0x160   : > { %798 = vrot.lane.b32.xlu1 %v7999_v43, %s7608_s30  ;;  %v731_v53 = vmul.f32 %v7949_v38, %v590_v44 }
 0x161   : > { %v594_v55 = vmul.f32 0.5, %v593_v45  ;;  %v8008_v57 = vpop.f32.mrf.mxu1  ;;  %v473_v59 = vpop.f32.mrf.mxu2 }
 0x162   : > { %v525_v48 = vsub.f32 %v473_v59, %v509_v51  ;;  %v747_v63 = vmul.f32 %v731_v53, %v714_v47  ;;  %v510_v19 = vmul.f32 %v8008_v57, %v8008_v57 }
 0x163   : > { %v595_v1 = vsub.f32 1.5, %v594_v55 }
 0x164   : > { %v6967_v5 = vpop.eup %6966  ;;  %v541_v7 = vadd.f32 1e-05, %v525_v48  ;;  %v8011_v54 = vadd.f32 %v7958_v46, %v747_v63  ;;  %v717_v63 = vsub.f32 %v7886_v60, %v7992_v34 }
 0x165   : > { %v596_v32 = vmul.f32 %v6965_v40, %v595_v1  ;;  %v602_v9 = vmul.f32 %v6967_v5, %v540_v41  ;;  %vm608_vm15 = vweird.f32 %v6967_v5 }
 0x166   : > { %6968 = vrsqrt.f32 %v541_v7  ;;  %v8015_v11 = vmul.f32 %v8011_v54, %v8011_v54  ;;  %vm609_vm1 = vmor %vm607_vm0, %vm608_vm15  ;;  %vm617_vm3 = vweird.f32 %v541_v7 }
 0x167   : > { %v603_v13 = vmul.f32 %v6967_v5, %v602_v9  ;;  %v600_v15 = vsel %vm599_vm14, %v6965_v40, %v596_v32 }
 0x168   : > { %800 = vrot.lane.b32.xlu1 %v8015_v11, %s7608_s30  ;;  %v732_v20 = vmul.f32 %v7949_v38, %v600_v15 }
 0x169   : > { %v604_v21 = vmul.f32 0.5, %v603_v13  ;;  %v8024_v22 = vpop.f32.mrf.mxu1  ;;  %v476_v24 = vpop.f32.mrf.mxu2 }
 0x16a   : > { %v526_v18 = vsub.f32 %v476_v24, %v510_v19  ;;  %v748_v25 = vmul.f32 %v732_v20, %v715_v17  ;;  %v511_v37 = vmul.f32 %v8024_v22, %v8024_v22 }
 0x16b   : > { %v605_v27 = vsub.f32 1.5, %v604_v21 }
 0x16c   : > { %v6969_v28 = vpop.eup %6968  ;;  %v542_v29 = vadd.f32 1e-05, %v526_v18  ;;  %v8027_v56 = vadd.f32 %v7958_v46, %v748_v25 }
 0x16d   : > { %v606_v49 = vmul.f32 %v6967_v5, %v605_v27  ;;  %v612_v30 = vmul.f32 %v6969_v28, %v541_v7  ;;  %vm618_vm2 = vweird.f32 %v6969_v28  ;;  %v718_v27 = vsub.f32 %v7891_v62, %v8008_v57 }
 0x16e   : > { %6970 = vrsqrt.f32 %v542_v29  ;;  %v8031_v31 = vmul.f32 %v8027_v56, %v8027_v56  ;;  %vm619_vm4 = vmor %vm617_vm3, %vm618_vm2  ;;  %vm627_vm6 = vweird.f32 %v542_v29 }
 0x16f   : > { %v610_v33 = vsel %vm609_vm1, %v6967_v5, %v606_v49  ;;  %v613_v35 = vmul.f32 %v6969_v28, %v612_v30 }
 0x170   : > { %802 = vrot.lane.b32.xlu2 %v8031_v31, %s7608_s30  ;;  %v733_v39 = vmul.f32 %v7949_v38, %v610_v33 }
 0x171   : > { %v614_v40 = vmul.f32 0.5, %v613_v35  ;;  %v8040_v41 = vpop.f32.mrf.mxu1  ;;  %v479_v23 = vpop.f32.mrf.mxu2 }
 0x172   : > { %v527_v42 = vsub.f32 %v479_v23, %v511_v37  ;;  %v749_v44 = vmul.f32 %v733_v39, %v716_v36  ;;  %v512_v1 = vmul.f32 %v8040_v41, %v8040_v41 }
 0x173   : > { %v615_v45 = vsub.f32 1.5, %v614_v40 }
 0x174   : > { %v6971_v47 = vpop.eup %6970  ;;  %v543_v51 = vadd.f32 1e-05, %v527_v42  ;;  %v8043_v58 = vadd.f32 %v7958_v46, %v749_v44 }
 0x175   : > { %v616_v16 = vmul.f32 %v6969_v28, %v615_v45  ;;  %v622_v53 = vmul.f32 %v6971_v47, %v542_v29  ;;  %vm628_vm5 = vweird.f32 %v6971_v47 }
 0x176   : > { %6972 = vrsqrt.f32 %v543_v51  ;;  %v8047_v55 = vmul.f32 %v8043_v58, %v8043_v58  ;;  %vm629_vm7 = vmor %vm627_vm6, %vm628_vm5  ;;  %vm637_vm9 = vweird.f32 %v543_v51 }
 0x177   : > { %v620_v59 = vsel %vm619_vm4, %v6969_v28, %v616_v16  ;;  %v623_v48 = vmul.f32 %v6971_v47, %v622_v53 }
 0x178   : > { %804 = vrot.lane.b32.xlu2 %v8047_v55, %s7608_s30  ;;  %v734_v5 = vmul.f32 %v7949_v38, %v620_v59 }
 0x179   : > { %v624_v7 = vmul.f32 0.5, %v623_v48  ;;  %v8056_v32 = vpop.f32.mrf.mxu1  ;;  %v482_v9 = vpop.f32.mrf.mxu2 }
 0x17a   : > { %v528_v13 = vsub.f32 %v482_v9, %v512_v1  ;;  %v750_v15 = vmul.f32 %v734_v5, %v717_v63  ;;  %v513_v28 = vmul.f32 %v8056_v32, %v8056_v32 }
 0x17b   : > { %v625_v17 = vsub.f32 1.5, %v624_v7 }
 0x17c   : > { %v6973_v19 = vpop.eup %6972  ;;  %v544_v20 = vadd.f32 1e-05, %v528_v13  ;;  %v8059_v60 = vadd.f32 %v7958_v46, %v750_v15 }
 0x17d   : > { %v626_v34 = vmul.f32 %v6971_v47, %v625_v17  ;;  %v632_v21 = vmul.f32 %v6973_v19, %v543_v51  ;;  %vm638_vm8 = vweird.f32 %v6973_v19 }
 0x17e   : > { %6974 = vrsqrt.f32 %v544_v20  ;;  %v8063_v24 = vmul.f32 %v8059_v60, %v8059_v60  ;;  %vm639_vm10 = vmor %vm637_vm9, %vm638_vm8  ;;  %vm647_vm12 = vweird.f32 %v544_v20 }
 0x17f   : > { %v630_v18 = vsel %vm629_vm7, %v6971_v47, %v626_v34  ;;  %v633_v25 = vmul.f32 %v6973_v19, %v632_v21  ;;  %v719_v47 = vsub.f32 %v7896_v0, %v8024_v22  ;;  %v720_v34 = vsub.f32 %v7901_v2, %v8040_v41 }
 0x180   : > { %806 = vrot.lane.b32.xlu0 %v8063_v24, %s7608_s30  ;;  %v735_v29 = vmul.f32 %v7949_v38, %v630_v18 }
 0x181   : > { %v634_v49 = vmul.f32 0.5, %v633_v25  ;;  %v8072_v30 = vpop.f32.mrf.mxu1  ;;  %v485_v33 = vpop.f32.mrf.mxu2 }
 0x182   : > { %v529_v35 = vsub.f32 %v485_v33, %v513_v28  ;;  %v751_v36 = vmul.f32 %v735_v29, %v718_v27  ;;  %v514_v16 = vmul.f32 %v8072_v30, %v8072_v30 }
 0x183   : > { %v635_v37 = vsub.f32 1.5, %v634_v49 }
 0x184   : > { %v6975_v39 = vpop.eup %6974  ;;  %v545_v40 = vadd.f32 1e-05, %v529_v35  ;;  %v8075_v62 = vadd.f32 %v7958_v46, %v751_v36 }
 0x185   : > { %v636_v57 = vmul.f32 %v6973_v19, %v635_v37  ;;  %v642_v23 = vmul.f32 %v6975_v39, %v544_v20  ;;  %vm648_vm11 = vweird.f32 %v6975_v39 }
 0x186   : > { %6976 = vrsqrt.f32 %v545_v40  ;;  %v8079_v42 = vmul.f32 %v8075_v62, %v8075_v62  ;;  %vm649_vm13 = vmor %vm647_vm12, %vm648_vm11  ;;  %vm657_vm15 = vweird.f32 %v545_v40 }
 0x187   : > { %v640_v44 = vsel %vm639_vm10, %v6973_v19, %v636_v57  ;;  %v643_v45 = vmul.f32 %v6975_v39, %v642_v23 }
 0x188   : > { %808 = vrot.lane.b32.xlu1 %v8079_v42, %s7608_s30  ;;  %v736_v51 = vmul.f32 %v7949_v38, %v640_v44  ;;  %v721_v44 = vsub.f32 %v7906_v4, %v8056_v32 }
 0x189   : > { %v644_v53 = vmul.f32 0.5, %v643_v45  ;;  %v8088_v59 = vpop.f32.mrf.mxu1  ;;  %v488_v48 = vpop.f32.mrf.mxu2 }
 0x18a   : > { %v530_v63 = vsub.f32 %v488_v48, %v514_v16  ;;  %v752_v1 = vmul.f32 %v736_v51, %v719_v47  ;;  %v515_v21 = vmul.f32 %v8088_v59, %v8088_v59 }
 0x18b   : > { %v645_v5 = vsub.f32 1.5, %v644_v53 }
 0x18c   : > { %v6977_v7 = vpop.eup %6976  ;;  %v546_v9 = vadd.f32 1e-05, %v530_v63  ;;  %v8091_v0 = vadd.f32 %v7958_v46, %v752_v1 }
 0x18d   : > { %v646_v22 = vmul.f32 %v6975_v39, %v645_v5  ;;  %v652_v13 = vmul.f32 %v6977_v7, %v545_v40  ;;  %vm658_vm14 = vweird.f32 %v6977_v7 }
 0x18e   : > { %6978 = vrsqrt.f32 %v546_v9  ;;  %v8095_v15 = vmul.f32 %v8091_v0, %v8091_v0  ;;  %vm659_vm0 = vmor %vm657_vm15, %vm658_vm14  ;;  %vm667_vm2 = vweird.f32 %v546_v9 }
 0x18f   : > { %v650_v17 = vsel %vm649_vm13, %v6975_v39, %v646_v22  ;;  %v653_v19 = vmul.f32 %v6977_v7, %v652_v13 }
 0x190   : > { %810 = vrot.lane.b32.xlu2 %v8095_v15, %s7608_s30  ;;  %v737_v20 = vmul.f32 %v7949_v38, %v650_v17 }
 0x191   : > { %v654_v18 = vmul.f32 0.5, %v653_v19  ;;  %v8104_v25 = vpop.f32.mrf.mxu1  ;;  %v491_v27 = vpop.f32.mrf.mxu2  ;;  %v6802_v19 = vld [vmem:[%s12391_s2 + $0xf8] sm:$0xff] }
 0x192   : > { %v531_v28 = vsub.f32 %v491_v27, %v515_v21  ;;  %v753_v29 = vmul.f32 %v737_v20, %v720_v34  ;;  %v516_v37 = vmul.f32 %v8104_v25, %v8104_v25  ;;  %v722_v34 = vsub.f32 %v7911_v6, %v8072_v30  ;;  %1084 = vmatpush.msra.mxu3 %v6802_v19  ;;  %v6801_v21 = vld [vmem:[%s12391_s2 + $0xf0] sm:$0xff]  ;;  %v6800_v6 = vld [vmem:[%s12391_s2 + $0xe8] sm:$0xff] }
 0x193   : > { %v655_v49 = vsub.f32 1.5, %v654_v18 }
 0x194   : > { %v6979_v33 = vpop.eup %6978  ;;  %v547_v35 = vadd.f32 1e-05, %v531_v28  ;;  %v8107_v2 = vadd.f32 %v7958_v46, %v753_v29  ;;  %1085 = vmatpush.msra.mxu3 %v6801_v21 }
 0x195   : > { %v656_v41 = vmul.f32 %v6977_v7, %v655_v49  ;;  %v662_v36 = vmul.f32 %v6979_v33, %v546_v9  ;;  %vm668_vm1 = vweird.f32 %v6979_v33 }
 0x196   : > { %6980 = vrsqrt.f32 %v547_v35  ;;  %v8113_v39 = vmul.f32 %v8107_v2, %v8107_v2  ;;  %vm669_vm3 = vmor %vm667_vm2, %vm668_vm1  ;;  %1086 = vmatpush.msra.mxu3 %v6800_v6  ;;  %vm677_vm5 = vweird.f32 %v547_v35 }
 0x197   : > { %v660_v57 = vsel %vm659_vm0, %v6977_v7, %v656_v41  ;;  %v663_v23 = vmul.f32 %v6979_v33, %v662_v36 }
 0x198   : > { %812 = vrot.lane.b32.xlu0 %v8113_v39, %s7608_s30  ;;  %v738_v40 = vmul.f32 %v7949_v38, %v660_v57  ;;  %v6799_v57 = vld [vmem:[%s12391_s2 + $0xe0] sm:$0xff] }
 0x199   : > { %v664_v45 = vmul.f32 0.5, %v663_v23  ;;  %v494_v47 = vpop.f32.mrf.mxu2  ;;  %v8120_v48 = vpop.f32.mrf.mxu1  ;;  %1087 = vmatpush.msra.mxu3 %v6799_v57 }
 0x19a   : > { %v532_v16 = vsub.f32 %v494_v47, %v516_v37  ;;  %v754_v51 = vmul.f32 %v738_v40, %v721_v44  ;;  %v517_v32 = vmul.f32 %v8120_v48, %v8120_v48  ;;  %v723_v47 = vsub.f32 %v7916_v8, %v8088_v59 }
 0x19b   : > { %v665_v53 = vsub.f32 1.5, %v664_v45 }
 0x19c   : > { %v6981_v63 = vpop.eup %6980  ;;  %v548_v1 = vadd.f32 1e-05, %v532_v16  ;;  %v8123_v5 = vadd.f32 %v7958_v46, %v754_v51 }
 0x19d   : > { %v666_v7 = vmul.f32 %v6979_v33, %v665_v53  ;;  %v672_v4 = vmul.f32 %v6981_v63, %v547_v35  ;;  %vm678_vm4 = vweird.f32 %v6981_v63  ;;  %v6798_v35 = vld [vmem:[%s12391_s2 + $0xd8] sm:$0xff] }
 0x19e   : > { %6982 = vrsqrt.f32 %v548_v1  ;;  %v8129_v22 = vmul.f32 %v8123_v5, %v8123_v5  ;;  %vm679_vm6 = vmor %vm677_vm5, %vm678_vm4  ;;  %1088 = vmatpush.msra.mxu3 %v6798_v35  ;;  %vm687_vm7 = vweird.f32 %v548_v1 }
 0x19f   : > { %v670_v13 = vsel %vm669_vm3, %v6979_v33, %v666_v7  ;;  %v673_v17 = vmul.f32 %v6981_v63, %v672_v4 }
 0x1a0   : > { %814 = vrot.lane.b32.xlu1 %v8129_v22, %s7608_s30  ;;  %v739_v9 = vmul.f32 %v7949_v38, %v670_v13 }
 0x1a1   : > { %v674_v20 = vmul.f32 0.5, %v673_v17  ;;  %v497_v18 = vpop.f32.mrf.mxu2  ;;  %v8148_v37 = vpop.f32.mrf.mxu1 }
 0x1a2   : > { %v533_v27 = vsub.f32 %v497_v18, %v517_v32  ;;  %v755_v28 = vmul.f32 %v739_v9, %v722_v34  ;;  %v518_v23 = vmul.f32 %v8148_v37, %v8148_v37  ;;  %v6795_v9 = vld [vmem:[%s12391_s2 + $0xc0] sm:$0xff]  ;;  %v724_v18 = vsub.f32 %v7921_v10, %v8104_v25 }
 0x1a3   : > { %v675_v29 = vsub.f32 1.5, %v674_v20 }
 0x1a4   : > { %v6983_v30 = vpop.eup %6982  ;;  %v549_v49 = vadd.f32 1e-05, %v533_v27  ;;  %v8146_v33 = vadd.f32 %v7958_v46, %v755_v28  ;;  %v6794_v28 = vld [vmem:[%s12391_s2 + $0xb8] sm:$0xff] }
 0x1a5   : > { %v676_v41 = vmul.f32 %v6981_v63, %v675_v29  ;;  %v682_v36 = vmul.f32 %v6983_v30, %v548_v1  ;;  %vm688_vm8 = vweird.f32 %v6983_v30  ;;  %v6796_v1 = vld [vmem:[%s12391_s2 + $0xc8] sm:$0xff] }
 0x1a6   : > { %6984 = vrsqrt.f32 %v549_v49  ;;  %v8157_v44 = vmul.f32 %v8146_v33, %v8146_v33  ;;  %vm689_vm9 = vmor %vm687_vm7, %vm688_vm8  ;;  %vm697_vm10 = vweird.f32 %v549_v49 }
 0x1a7   : > { %v680_v40 = vsel %vm679_vm6, %v6981_v63, %v676_v41  ;;  %v683_v45 = vmul.f32 %v6983_v30, %v682_v36  ;;  %v6797_v63 = vld [vmem:[%s12391_s2 + $0xd0] sm:$0xff]  ;;  %v6792_v36 = vld [vmem:[%s12391_s2 + $0xa8] sm:$0xff] }
 0x1a8   : > { %816 = vrot.lane.b32.xlu2 %v8157_v44, %s7608_s30  ;;  %v740_v16 = vmul.f32 %v7949_v38, %v680_v40  ;;  %1089 = vmatpush.msra.mxu3 %v6797_v63  ;;  %v6791_v40 = vld [vmem:[%s12391_s2 + $0xa0] sm:$0xff] }
 0x1a9   : > { %v684_v51 = vmul.f32 0.5, %v683_v45  ;;  %v500_v53 = vpop.f32.mrf.mxu2 }
 0x1aa   : > { %v534_v7 = vsub.f32 %v500_v53, %v518_v23  ;;  %v756_v4 = vmul.f32 %v740_v16, %v723_v47  ;;  %1090 = vmatpush.msra.mxu3 %v6796_v1  ;;  %v725_v47 = vsub.f32 %v7926_v12, %v8120_v48  ;;  %v6788_v48 = vld [vmem:[%s12391_s2 + $0x88] sm:$0xff] }
 0x1ab   : > { %v685_v32 = vsub.f32 1.5, %v684_v51  ;;  %v6790_v51 = vld [vmem:[%s12391_s2 + $0x98] sm:$0xff] }
 0x1ac   : > { %v6985_v13 = vpop.eup %6984  ;;  %v550_v8 = vadd.f32 1e-05, %v534_v7  ;;  %v8171_v59 = vadd.f32 %v7958_v46, %v756_v4  ;;  %1091 = vmatpush.msra.mxu3 %v6795_v9  ;;  %v6789_v7 = vld [vmem:[%s12391_s2 + $0x90] sm:$0xff]  ;;  %v8239_v9 = vld [vmem:[%s12393_s4 + $0x78] sm:$0xff] }
 0x1ad   : > { %v686_v17 = vmul.f32 %v6983_v30, %v685_v32  ;;  %v692_v19 = vmul.f32 %v6985_v13, %v549_v49  ;;  %vm698_vm11 = vweird.f32 %v6985_v13 }
 0x1ae   : > { %6986 = vrsqrt.f32 %v550_v8  ;;  %v8178_v34 = vmul.f32 %v8171_v59, %v8171_v59  ;;  %1092 = vmatpush.msra.mxu3 %v6794_v28  ;;  %vm699_vm12 = vmor %vm697_vm10, %vm698_vm11  ;;  %vm707_vm13 = vweird.f32 %v550_v8  ;;  %v8265_v28 = vld [vmem:[%s12393_s4 + $0x60] sm:$0xff] }
 0x1af   : > { %v690_v21 = vsel %vm689_vm9, %v6983_v30, %v686_v17  ;;  %v693_v20 = vmul.f32 %v6985_v13, %v692_v19  ;;  %v6793_v30 = vld [vmem:[%s12391_s2 + $0xb0] sm:$0xff]  ;;  %v726_v17 = vsub.f32 %v7931_v14, %v8148_v37  ;;  %v8255_v37 = vld [vmem:[%s12393_s4 + $0x68] sm:$0xff] }
 0x1b0   : > { %818 = vrot.lane.b32.xlu0 %v8178_v34, %s7608_s30  ;;  %v741_v27 = vmul.f32 %v7949_v38, %v690_v21  ;;  %1093 = vmatpush.msra.mxu3 %v6793_v30 }
 0x1b1   : > { %v694_v29 = vmul.f32 0.5, %v693_v20 }
 0x1b2   : > { %v757_v6 = vmul.f32 %v741_v27, %v724_v18  ;;  %1094 = vmatpush.msra.mxu3 %v6792_v36  ;;  %v8245_v18 = vld [vmem:[%s12393_s4 + $0x70] sm:$0xff]  ;;  %v8286_v36 = vld [vmem:[%s12393_s4 + $0x48] sm:$0xff] }
 0x1b3   : > { %v695_v41 = vsub.f32 1.5, %v694_v29 }
 0x1b4   : > { %v6987_v10 = vpop.eup %6986  ;;  %v8195_v25 = vadd.f32 %v7958_v46, %v757_v6  ;;  %1095 = vmatpush.msra.mxu3 %v6791_v40  ;;  %v8279_v6 = vld [vmem:[%s12393_s4 + $0x50] sm:$0xff]  ;;  %v8295_v40 = vld [vmem:[%s12393_s4 + $0x40] sm:$0xff] }
 0x1b5   : > { %v696_v57 = vmul.f32 %v6985_v13, %v695_v41  ;;  %v702_v49 = vmul.f32 %v6987_v10, %v550_v8  ;;  %vm708_vm14 = vweird.f32 %v6987_v10  ;;  %v6787_v8 = vld [vmem:[%s12391_s2 + $0x80] sm:$0xff] }
 0x1b6   : > { %v8202_v23 = vmul.f32 %v8195_v25, %v8195_v25  ;;  %1096 = vmatpush.msra.mxu3 %v6790_v51  ;;  %vm709_vm15 = vmor %vm707_vm13, %vm708_vm14 }
 0x1b7   : > { %v700_v45 = vsel %vm699_vm12, %v6985_v13, %v696_v57  ;;  %v703_v35 = vmul.f32 %v6987_v10, %v702_v49 }
 0x1b8   : > { %820 = vrot.lane.b32.xlu1 %v8202_v23, %s7608_s30  ;;  %v742_v16 = vmul.f32 %v7949_v38, %v700_v45  ;;  %1097 = vmatpush.msra.mxu3 %v6789_v7  ;;  %v8301_v45 = vld [vmem:[%s12393_s4 + $0x38] sm:$0xff] }
 0x1b9   : > { %v704_v53 = vmul.f32 0.5, %v703_v35 }
 0x1ba   : > { %v758_v63 = vmul.f32 %v742_v16, %v725_v47  ;;  %1098 = vmatpush.msra.mxu3 %v6788_v48  ;;  %v8308_v47 = vld [vmem:[%s12393_s4 + $0x30] sm:$0xff]  ;;  %v8317_v48 = vld [vmem:[%s12393_s4 + $0x28] sm:$0xff] }
 0x1bb   : > { %v705_v4 = vsub.f32 1.5, %v704_v53 }
 0x1bc   : > { %v8219_v12 = vadd.f32 %v7958_v46, %v758_v63  ;;  %1099 = vmatpush.msra.mxu3 %v6787_v8 }
 0x1bd   : > { %v706_v32 = vmul.f32 %v6987_v10, %v705_v4  ;;  %v8312_v4 = vstv %s777_s11  ;;  %s6841_s11 = sld [smem:[#allocation2 + $0x3]] }
 0x1be   : > { %v8226_v13 = vmul.f32 %v8219_v12, %v8219_v12  ;;  %1962 = vmatpush.msrb.mxu3 %v8239_v9 }
 0x1bf   : > { %v710_v1 = vsel %vm709_vm15, %v6987_v10, %v706_v32 }
 0x1c0   : > { %822 = vrot.lane.b32.xlu2 %v8226_v13, %s7608_s30  ;;  %v743_v19 = vmul.f32 %v7949_v38, %v710_v1  ;;  %1963 = vmatpush.msrb.mxu3 %v8245_v18  ;;  %v8326_v1 = vld [vmem:[%s12393_s4 + $0x20] sm:$0xff] }
 0x1c2   : > { %v795_v21 = vpop.permute.xlu0 %794  ;;  %v759_v20 = vmul.f32 %v743_v19, %v726_v17  ;;  %1964 = vmatpush.msrb.mxu3 %v8255_v37 }
 0x1c3   : > { %v826_v14 = vadd.f32 %v795_v21, %v7967_v3 }
 0x1c4   : > { %v8250_v38 = vadd.f32 %v7958_v46, %v759_v20  ;;  %1965 = vmatpush.msrb.mxu3 %v8265_v28  ;;  %v8273_v46 = vld [vmem:[%s12393_s4 + $0x58] sm:$0xff] }
 0x1c5   : > { %6988 = vrsqrt.f32 %v826_v14  ;;  %vm848_vm1 = vweird.f32 %v826_v14  ;;  %v8335_v20 = vld [vmem:[%s12393_s4 + $0x18] sm:$0xff] }
 0x1c6   : > { %v8260_v27 = vmul.f32 %v8250_v38, %v8250_v38  ;;  %1966 = vmatpush.msrb.mxu3 %v8273_v46 }
 0x1c8   : > { %824 = vrot.lane.b32.xlu0 %v8260_v27, %s7608_s30  ;;  %1967 = vmatpush.msrb.mxu3 %v8279_v6 }
 0x1ca   : > { %v797_v3 = vpop.permute.xlu0 %796  ;;  %v803_v29 = vpop.permute.xlu2 %802  ;;  %1968 = vmatpush.msrb.mxu3 %v8286_v36 }
 0x1cb   : > { %v6989_v30 = vpop.eup %6988  ;;  %v827_v41 = vadd.f32 %v797_v3, %v7983_v26  ;;  %v8290_v49 = vadd.f32 %v803_v29, %v8031_v31  ;;  %v8342_v29 = vld [vmem:[%s12393_s4 + $0x10] sm:$0xff] }
 0x1cc   : > { %v843_v10 = vmul.f32 %v6989_v30, %v826_v14  ;;  %1969 = vmatpush.msrb.mxu3 %v8295_v40  ;;  %vm849_vm0 = vweird.f32 %v6989_v30 }
 0x1cd   : > { %6990 = vrsqrt.f32 %v827_v41  ;;  %vm850_vm2 = vmor %vm848_vm1, %vm849_vm0  ;;  %vm858_vm4 = vweird.f32 %v827_v41  ;;  %vm888_vm12 = vweird.f32 %v8290_v49 }
 0x1ce   : > { %v844_v57 = vmul.f32 %v6989_v30, %v843_v10  ;;  %1970 = vmatpush.msrb.mxu3 %v8301_v45  ;;  %6992 = vrsqrt.f32 %v8290_v49 }
 0x1d0   : > { %v845_v26 = vmul.f32 0.5, %v844_v57  ;;  %1971 = vmatpush.msrb.mxu3 %v8308_v47 }
 0x1d2   : > { %v846_v35 = vsub.f32 1.5, %v845_v26  ;;  %v799_v31 = vpop.permute.xlu1 %798  ;;  %v805_v53 = vpop.permute.xlu2 %804  ;;  %1972 = vmatpush.msrb.mxu3 %v8317_v48 }
 0x1d3   : > { %v6991_v16 = vpop.eup %6990  ;;  %v828_v51 = vadd.f32 %v799_v31, %v7999_v43  ;;  %v8321_v8 = vadd.f32 %v805_v53, %v8047_v55  ;;  %v8351_v53 = vld [vmem:[%s12393_s4 + $0x8] sm:$0xff] }
 0x1d4   : > { %v853_v63 = vmul.f32 %v6991_v16, %v827_v41  ;;  %v847_v7 = vmul.f32 %v6989_v30, %v846_v35  ;;  %1973 = vmatpush.msrb.mxu3 %v8326_v1  ;;  %v8330_v19 = vpop.eup %6992  ;;  %vm859_vm3 = vweird.f32 %v6991_v16 }
 0x1d5   : > { %6994 = vrsqrt.f32 %v828_v51  ;;  %v883_v10 = vmul.f32 %v8330_v19, %v8290_v49  ;;  %vm860_vm5 = vmor %vm858_vm4, %vm859_vm3  ;;  %vm868_vm7 = vweird.f32 %v828_v51  ;;  %vm889_vm10 = vweird.f32 %v8330_v19 }
 0x1d6   : > { %v854_v32 = vmul.f32 %v6991_v16, %v853_v63  ;;  %v851_v43 = vsel %vm850_vm2, %v6989_v30, %v847_v7  ;;  %1974 = vmatpush.msrb.mxu3 %v8335_v20  ;;  %6996 = vrsqrt.f32 %v8321_v8  ;;  %vm890_vm14 = vmor %vm888_vm12, %vm889_vm10  ;;  %vm898_vm0 = vweird.f32 %v8321_v8 }
 0x1d7   : > { %v1003_v17 = vmul.f32 %v8312_v4, %v851_v43  ;;  %v884_v41 = vmul.f32 %v8330_v19, %v883_v10 }
 0x1d8   : > { %v855_v21 = vmul.f32 0.5, %v854_v32  ;;  %1975 = vmatpush.msrb.mxu3 %v8342_v29 }
 0x1d9   : > { %v1019_v55 = vsub.f32 1.0, %v1003_v17 }
 0x1da   : > { %v856_v14 = vsub.f32 1.5, %v855_v21  ;;  %v801_v3 = vpop.permute.xlu1 %800  ;;  %1976 = vmatpush.msrb.mxu3 %v8351_v53 }
 0x1db   : > { %v6995_v30 = vpop.eup %6994  ;;  %v829_v57 = vadd.f32 %v801_v3, %v8015_v11  ;;  %v1035_v26 = vmax.f32 %v1019_v55, 0.0  ;;  %v8358_v11 = vld [vmem:[%s12393_s4] sm:$0xff] }
 0x1dc   : > { %v863_v35 = vmul.f32 %v6995_v30, %v828_v51  ;;  %v857_v31 = vmul.f32 %v6991_v16, %v856_v14  ;;  %1977 = vmatpush.msrb.mxu3 %v8358_v11  ;;  %v8363_v17 = vpop.eup %6996  ;;  %vm869_vm6 = vweird.f32 %v6995_v30  ;;  %v885_v14 = vmul.f32 0.5, %v884_v41 }
 0x1dd   : > { %6998 = vrsqrt.f32 %v829_v57  ;;  %v1051_v7 = vmul.f32 %v1035_v26, %v7963_v61  ;;  %v893_v3 = vmul.f32 %v8363_v17, %v8321_v8  ;;  %vm870_vm8 = vmor %vm868_vm7, %vm869_vm6  ;;  %vm878_vm11 = vweird.f32 %v829_v57 }
 0x1de   : > { %v864_v63 = vmul.f32 %v6995_v30, %v863_v35  ;;  %v861_v32 = vsel %vm860_vm5, %v6991_v16, %v857_v31  ;;  %vm899_vm15 = vweird.f32 %v8363_v17 }
 0x1df   : > { %v1004_v43 = vmul.f32 %v8312_v4, %v861_v32  ;;  %1100 = vmatmul.f32.vlgmr.msra.gmra.mxu3 %v1051_v7  ;;  %v886_v7 = vsub.f32 1.5, %v885_v14  ;;  %v894_v32 = vmul.f32 %v8363_v17, %v893_v3  ;;  %vm900_vm1 = vmor %vm898_vm0, %vm899_vm15 }
 0x1e0   : > { %v865_v21 = vmul.f32 0.5, %v864_v63  ;;  %2837 = vmatpush.msra.mxu3 %v8239_v9 }
 0x1e1   : > { %v1020_v55 = vsub.f32 1.0, %v1004_v43 }
 0x1e2   : > { %v866_v61 = vsub.f32 1.5, %v865_v21  ;;  %2838 = vmatpush.msra.mxu3 %v8245_v18 }
 0x1e3   : > { %v6999_v16 = vpop.eup %6998  ;;  %v1036_v26 = vmax.f32 %v1020_v55, 0.0 }
 0x1e4   : > { %v873_v10 = vmul.f32 %v6999_v16, %v829_v57  ;;  %v867_v35 = vmul.f32 %v6995_v30, %v866_v61  ;;  %2839 = vmatpush.msra.mxu3 %v8255_v37  ;;  %vm879_vm9 = vweird.f32 %v6999_v16 }
 0x1e5   : > { %v1052_v31 = vmul.f32 %v1036_v26, %v7979_v50  ;;  %v895_v50 = vmul.f32 0.5, %v894_v32  ;;  %vm880_vm13 = vmor %vm878_vm11, %vm879_vm9 }
 0x1e6   : > { %v874_v63 = vmul.f32 %v6999_v16, %v873_v10  ;;  %v871_v9 = vsel %vm870_vm8, %v6995_v30, %v867_v35  ;;  %2840 = vmatpush.msra.mxu3 %v8265_v28  ;;  %v887_v30 = vmul.f32 %v8330_v19, %v886_v7 }
 0x1e7   : > { %v1005_v41 = vmul.f32 %v8312_v4, %v871_v9  ;;  %1103 = vmatmul.f32.gmra.mxu3 %v1052_v31  ;;  %v896_v14 = vsub.f32 1.5, %v895_v50 }
 0x1e8   : > { %v875_v43 = vmul.f32 0.5, %v874_v63  ;;  %2841 = vmatpush.msra.mxu3 %v8273_v46  ;;  %v891_v26 = vsel %vm890_vm14, %v8330_v19, %v887_v30 }
 0x1e9   : > { %v1021_v18 = vsub.f32 1.0, %v1005_v41  ;;  %v897_v57 = vmul.f32 %v8363_v17, %v896_v14 }
 0x1ea   : > { %v876_v51 = vsub.f32 1.5, %v875_v43  ;;  %v811_v37 = vpop.permute.xlu2 %810  ;;  %2842 = vmatpush.msra.mxu3 %v8279_v6 }
 0x1eb   : > { %v1037_v21 = vmax.f32 %v1021_v18, 0.0  ;;  %v8382_v46 = vadd.f32 %v811_v37, %v8095_v15  ;;  %v901_v19 = vsel %vm900_vm1, %v8363_v17, %v897_v57 }
 0x1ec   : > { %v877_v55 = vmul.f32 %v6999_v16, %v876_v51  ;;  %2843 = vmatpush.msra.mxu3 %v8286_v36  ;;  %v1007_v36 = vmul.f32 %v8312_v4, %v891_v26 }
 0x1ed   : > { %v1053_v28 = vmul.f32 %v1037_v21, %v7995_v52  ;;  %7000 = vrsqrt.f32 %v8382_v46  ;;  %vm928_vm8 = vweird.f32 %v8382_v46 }
 0x1ee   : > { %v881_v61 = vsel %vm880_vm13, %v6999_v16, %v877_v55  ;;  %2844 = vmatpush.msra.mxu3 %v8295_v40 }
 0x1ef   : > { %v1006_v3 = vmul.f32 %v8312_v4, %v881_v61  ;;  %1106 = vmatmul.f32.gmra.mxu3 %v1053_v28 }
 0x1f0   : > { %2845 = vmatpush.msra.mxu3 %v8301_v45  ;;  %v1023_v45 = vsub.f32 1.0, %v1007_v36 }
 0x1f1   : > { %v1022_v6 = vsub.f32 1.0, %v1006_v3 }
 0x1f2   : > { %v807_v52 = vpop.permute.xlu0 %806  ;;  %2846 = vmatpush.msra.mxu3 %v8308_v47  ;;  %v1039_v10 = vmax.f32 %v1023_v45, 0.0  ;;  %v1008_v47 = vmul.f32 %v8312_v4, %v901_v19 }
 0x1f3   : > { %v832_v15 = vadd.f32 %v807_v52, %v8063_v24  ;;  %v1038_v49 = vmax.f32 %v1022_v6, 0.0  ;;  %v7001_v16 = vpop.eup %7000 }
 0x1f4   : > { %2847 = vmatpush.msra.mxu3 %v8317_v48  ;;  %v923_v35 = vmul.f32 %v7001_v16, %v8382_v46  ;;  %v1055_v17 = vmul.f32 %v1039_v10, %v8027_v56  ;;  %v1024_v31 = vsub.f32 1.0, %v1008_v47  ;;  %vm929_vm6 = vweird.f32 %v7001_v16 }
 0x1f5   : > { %7002 = vrsqrt.f32 %v832_v15  ;;  %v1054_v40 = vmul.f32 %v1038_v49, %v8011_v54  ;;  %vm908_vm3 = vweird.f32 %v832_v15  ;;  %vm930_vm10 = vmor %vm928_vm8, %vm929_vm6 }
 0x1f6   : > { %2848 = vmatpush.msra.mxu3 %v8326_v1  ;;  %v1040_v7 = vmax.f32 %v1024_v31, 0.0 }
 0x1f7   : > { %1109 = vmatmul.f32.gmra.mxu3 %v1054_v40 }
 0x1f8   : > { %2849 = vmatpush.msra.mxu3 %v8335_v20  ;;  %v924_v20 = vmul.f32 %v7001_v16, %v923_v35  ;;  %v1056_v56 = vmul.f32 %v1040_v7, %v8043_v58 }
 0x1fa   : > { %v809_v24 = vpop.permute.xlu1 %808  ;;  %2850 = vmatpush.msra.mxu3 %v8342_v29 }
 0x1fb   : > { %v7003_v8 = vpop.eup %7002  ;;  %v833_v54 = vadd.f32 %v809_v24, %v8079_v42  ;;  %v925_v42 = vmul.f32 0.5, %v924_v20 }
 0x1fc   : > { %v903_v48 = vmul.f32 %v7003_v8, %v832_v15  ;;  %2851 = vmatpush.msra.mxu3 %v8351_v53  ;;  %vm909_vm2 = vweird.f32 %v7003_v8 }
 0x1fd   : > { %7004 = vrsqrt.f32 %v833_v54  ;;  %vm910_vm4 = vmor %vm908_vm3, %vm909_vm2  ;;  %vm918_vm7 = vweird.f32 %v833_v54 }
 0x1fe   : > { %v904_v1 = vmul.f32 %v7003_v8, %v903_v48  ;;  %2852 = vmatpush.msra.mxu3 %v8358_v11  ;;  %v926_v11 = vsub.f32 1.5, %v925_v42 }
 0x1ff   : > { %1112 = vmatmul.f32.gmra.mxu3 %v1055_v17 }
 0x200   : > { %v905_v63 = vmul.f32 0.5, %v904_v1 }
 0x202   : > { %v906_v9 = vsub.f32 1.5, %v905_v63  ;;  %v817_v41 = vpop.permute.xlu2 %816 }
 0x203   : > { %v7005_v32 = vpop.eup %7004  ;;  %v8408_v18 = vadd.f32 %v817_v41, %v8157_v44  ;;  %v927_v44 = vmul.f32 %v7001_v16, %v926_v11 }
 0x204   : > { %v913_v29 = vmul.f32 %v7005_v32, %v833_v54  ;;  %v907_v43 = vmul.f32 %v7003_v8, %v906_v9  ;;  %vm919_vm5 = vweird.f32 %v7005_v32 }
 0x205   : > { %7006 = vrsqrt.f32 %v8408_v18  ;;  %vm920_vm9 = vmor %vm918_vm7, %vm919_vm5  ;;  %v931_v6 = vsel %vm930_vm10, %v7001_v16, %v927_v44  ;;  %vm958_vm1 = vweird.f32 %v8408_v18 }
 0x206   : > { %v914_v53 = vmul.f32 %v7005_v32, %v913_v29  ;;  %v911_v51 = vsel %vm910_vm4, %v7003_v8, %v907_v43 }
 0x207   : > { %v1009_v50 = vmul.f32 %v8312_v4, %v911_v51  ;;  %1115 = vmatmul.f32.gmra.mxu3 %v1056_v56 }
 0x208   : > { %v915_v37 = vmul.f32 0.5, %v914_v53 }
 0x209   : > { %v1025_v21 = vsub.f32 1.0, %v1009_v50 }
 0x20a   : > { %v916_v30 = vsub.f32 1.5, %v915_v37  ;;  %v813_v55 = vpop.permute.xlu0 %812 }
 0x20b   : > { %v835_v28 = vadd.f32 %v813_v55, %v8113_v39  ;;  %v1041_v61 = vmax.f32 %v1025_v21, 0.0  ;;  %v7007_v52 = vpop.eup %7006  ;;  %v1011_v39 = vmul.f32 %v8312_v4, %v931_v6 }
 0x20c   : > { %v917_v14 = vmul.f32 %v7005_v32, %v916_v30  ;;  %v953_v57 = vmul.f32 %v7007_v52, %v8408_v18  ;;  %vm959_vm15 = vweird.f32 %v7007_v52 }
 0x20d   : > { %7008 = vrsqrt.f32 %v835_v28  ;;  %v1057_v58 = vmul.f32 %v1041_v61, %v8059_v60  ;;  %v1027_v24 = vsub.f32 1.0, %v1011_v39  ;;  %vm938_vm12 = vweird.f32 %v835_v28  ;;  %vm960_vm3 = vmor %vm958_vm1, %vm959_vm15 }
 0x20e   : > { %v921_v3 = vsel %vm920_vm9, %v7005_v32, %v917_v14  ;;  %v954_v10 = vmul.f32 %v7007_v52, %v953_v57 }
 0x20f   : > { %v1010_v26 = vmul.f32 %v8312_v4, %v921_v3  ;;  %1118 = vmatmul.f32.gmra.mxu3 %v1057_v58  ;;  %v1043_v8 = vmax.f32 %v1027_v24, 0.0 }
 0x210   : > { %v955_v54 = vmul.f32 0.5, %v954_v10 }
 0x211   : > { %v1026_v36 = vsub.f32 1.0, %v1010_v26 }
 0x212   : > { %v815_v15 = vpop.permute.xlu1 %814  ;;  %v956_v63 = vsub.f32 1.5, %v955_v54 }
 0x213   : > { %v7009_v49 = vpop.eup %7008  ;;  %v836_v46 = vadd.f32 %v815_v15, %v8129_v22  ;;  %v1042_v40 = vmax.f32 %v1026_v36, 0.0 }
 0x214   : > { %v933_v45 = vmul.f32 %v7009_v49, %v835_v28  ;;  %vm939_vm11 = vweird.f32 %v7009_v49 }
 0x215   : > { %7010 = vrsqrt.f32 %v836_v46  ;;  %v1058_v60 = vmul.f32 %v1042_v40, %v8075_v62  ;;  %vm940_vm13 = vmor %vm938_vm12, %vm939_vm11  ;;  %v1059_v62 = vmul.f32 %v1043_v8, %v8091_v0  ;;  %vm948_vm0 = vweird.f32 %v836_v46 }
 0x216   : > { %v934_v19 = vmul.f32 %v7009_v49, %v933_v45 }
 0x217   : > { %1121 = vmatmul.f32.gmra.mxu3 %v1058_v60 }
 0x218   : > { %v935_v16 = vmul.f32 0.5, %v934_v19 }
 0x21a   : > { %v936_v47 = vsub.f32 1.5, %v935_v16  ;;  %v823_v48 = vpop.permute.xlu2 %822 }
 0x21b   : > { %v7011_v35 = vpop.eup %7010  ;;  %v8422_v31 = vadd.f32 %v823_v48, %v8226_v13  ;;  %v957_v13 = vmul.f32 %v7007_v52, %v956_v63 }
 0x21c   : > { %v943_v1 = vmul.f32 %v7011_v35, %v836_v46  ;;  %v937_v17 = vmul.f32 %v7009_v49, %v936_v47  ;;  %vm949_vm14 = vweird.f32 %v7011_v35 }
 0x21d   : > { %7012 = vrsqrt.f32 %v8422_v31  ;;  %vm950_vm2 = vmor %vm948_vm0, %vm949_vm14  ;;  %v961_v11 = vsel %vm960_vm3, %v7007_v52, %v957_v13  ;;  %vm988_vm10 = vweird.f32 %v8422_v31 }
 0x21e   : > { %v944_v22 = vmul.f32 %v7011_v35, %v943_v1  ;;  %v941_v20 = vsel %vm940_vm13, %v7009_v49, %v937_v17 }
 0x21f   : > { %v1012_v9 = vmul.f32 %v8312_v4, %v941_v20  ;;  %1124 = vmatmul.f32.gmra.mxu3 %v1059_v62 }
 0x220   : > { %v945_v7 = vmul.f32 0.5, %v944_v22 }
 0x221   : > { %v1028_v32 = vsub.f32 1.0, %v1012_v9 }
 0x222   : > { %v946_v42 = vsub.f32 1.5, %v945_v7  ;;  %v819_v41 = vpop.permute.xlu0 %818 }
 0x223   : > { %v838_v29 = vadd.f32 %v819_v41, %v8178_v34  ;;  %v1044_v43 = vmax.f32 %v1028_v32, 0.0  ;;  %v7013_v50 = vpop.eup %7012  ;;  %v1014_v34 = vmul.f32 %v8312_v4, %v961_v11 }
 0x224   : > { %v947_v53 = vmul.f32 %v7011_v35, %v946_v42  ;;  %v983_v55 = vmul.f32 %v7013_v50, %v8422_v31  ;;  %vm989_vm8 = vweird.f32 %v7013_v50 }
 0x225   : > { %7014 = vrsqrt.f32 %v838_v29  ;;  %v1060_v0 = vmul.f32 %v1044_v43, %v8107_v2  ;;  %v1030_v14 = vsub.f32 1.0, %v1014_v34  ;;  %vm968_vm5 = vweird.f32 %v838_v29  ;;  %vm990_vm12 = vmor %vm988_vm10, %vm989_vm8 }
 0x226   : > { %v951_v56 = vsel %vm950_vm2, %v7011_v35, %v947_v53  ;;  %v984_v58 = vmul.f32 %v7013_v50, %v983_v55 }
 0x227   : > { %v1013_v51 = vmul.f32 %v8312_v4, %v951_v56  ;;  %1127 = vmatmul.f32.gmra.mxu3 %v1060_v0  ;;  %v1046_v6 = vmax.f32 %v1030_v14, 0.0 }
 0x228   : > { %v985_v36 = vmul.f32 0.5, %v984_v58 }
 0x229   : > { %v1029_v37 = vsub.f32 1.0, %v1013_v51  ;;  %v1062_v49 = vmul.f32 %v1046_v6, %v8146_v33 }
 0x22a   : > { %v821_v21 = vpop.permute.xlu1 %820  ;;  %v986_v46 = vsub.f32 1.5, %v985_v36 }
 0x22b   : > { %v7015_v30 = vpop.eup %7014  ;;  %v839_v18 = vadd.f32 %v821_v21, %v8202_v23  ;;  %v1045_v28 = vmax.f32 %v1029_v37, 0.0 }
 0x22c   : > { %v963_v61 = vmul.f32 %v7015_v30, %v838_v29  ;;  %vm969_vm4 = vweird.f32 %v7015_v30  ;;  %v987_v16 = vmul.f32 %v7013_v50, %v986_v46 }
 0x22d   : > { %7016 = vrsqrt.f32 %v839_v18  ;;  %v1061_v2 = vmul.f32 %v1045_v28, %v8123_v5  ;;  %vm970_vm6 = vmor %vm968_vm5, %vm969_vm4  ;;  %vm978_vm9 = vweird.f32 %v839_v18 }
 0x22e   : > { %v964_v44 = vmul.f32 %v7015_v30, %v963_v61  ;;  %v991_v54 = vsel %vm990_vm12, %v7013_v50, %v987_v16 }
 0x22f   : > { %1130 = vmatmul.f32.gmra.mxu3 %v1061_v2  ;;  %v1017_v1 = vmul.f32 %v8312_v4, %v991_v54 }
 0x230   : > { %v965_v3 = vmul.f32 0.5, %v964_v44 }
 0x231   : > { %v1033_v31 = vsub.f32 1.0, %v1017_v1 }
 0x232   : > { %v966_v26 = vsub.f32 1.5, %v965_v3 }
 0x233   : > { %v7017_v52 = vpop.eup %7016 }
 0x234   : > { %v973_v15 = vmul.f32 %v7017_v52, %v839_v18  ;;  %v967_v39 = vmul.f32 %v7015_v30, %v966_v26  ;;  %vm979_vm7 = vweird.f32 %v7017_v52 }
 0x235   : > { %vm980_vm11 = vmor %vm978_vm9, %vm979_vm7 }
 0x236   : > { %v974_v23 = vmul.f32 %v7017_v52, %v973_v15  ;;  %v971_v57 = vsel %vm970_vm6, %v7015_v30, %v967_v39 }
 0x237   : > { %v1015_v5 = vmul.f32 %v8312_v4, %v971_v57  ;;  %1133 = vmatmul.f32.gmra.mxu3 %v1062_v49 }
 0x238   : > { %v975_v40 = vmul.f32 0.5, %v974_v23 }
 0x239   : > { %v1031_v45 = vsub.f32 1.0, %v1015_v5 }
 0x23a   : > { %v976_v60 = vsub.f32 1.5, %v975_v40  ;;  %v825_v19 = vpop.permute.xlu0 %824 }
 0x23b   : > { %v841_v24 = vadd.f32 %v825_v19, %v8260_v27  ;;  %v1047_v10 = vmax.f32 %v1031_v45, 0.0 }
 0x23c   : > { %v977_v47 = vmul.f32 %v7017_v52, %v976_v60 }
 0x23d   : > { %7018 = vrsqrt.f32 %v841_v24  ;;  %v1063_v33 = vmul.f32 %v1047_v10, %v8171_v59  ;;  %v1049_v59 = vmax.f32 %v1033_v31, 0.0  ;;  %vm998_vm14 = vweird.f32 %v841_v24 }
 0x23e   : > { %v981_v8 = vsel %vm980_vm11, %v7017_v52, %v977_v47 }
 0x23f   : > { %v1016_v35 = vmul.f32 %v8312_v4, %v981_v8  ;;  %1136 = vmatmul.f32.gmra.mxu3 %v1063_v33  ;;  %v1065_v32 = vmul.f32 %v1049_v59, %v8219_v12 }
 0x241   : > { %v1032_v48 = vsub.f32 1.0, %v1016_v35 }
 0x243   : > { %v7019_v27 = vpop.eup %7018  ;;  %v1048_v17 = vmax.f32 %v1032_v48, 0.0 }
 0x244   : > { %v993_v22 = vmul.f32 %v7019_v27, %v841_v24  ;;  %vm999_vm13 = vweird.f32 %v7019_v27 }
 0x245   : > { %v1064_v62 = vmul.f32 %v1048_v17, %v8195_v25  ;;  %vm1000_vm15 = vmor %vm998_vm14, %vm999_vm13 }
 0x246   : > { %v994_v20 = vmul.f32 %v7019_v27, %v993_v22 }
 0x247   : > { %1139 = vmatmul.f32.gmra.mxu3 %v1064_v62 }
 0x248   : > { %v995_v63 = vmul.f32 0.5, %v994_v20  ;;  %v8533_v20 = vld [vmem:[%s12392_s3 + $0x2] ss:$0 sm:$0xff] }
 0x24a   : > { %v996_v9 = vsub.f32 1.5, %v995_v63 }
 0x24c   : > { %v997_v7 = vmul.f32 %v7019_v27, %v996_v9 }
 0x24e   : > { %v1001_v42 = vsel %vm1000_vm15, %v7019_v27, %v997_v7 }
 0x24f   : > { %v1018_v41 = vmul.f32 %v8312_v4, %v1001_v42  ;;  %1142 = vmatmul.f32.gmra.mxu3 %v1065_v32 }
 0x251   : > { %v1034_v29 = vsub.f32 1.0, %v1018_v41 }
 0x253   : > { %v1050_v43 = vmax.f32 %v1034_v29, 0.0 }
 0x255   : > { %v1066_v25 = vmul.f32 %v1050_v43, %v8250_v38  ;;  %v8544_v43 = vld [vmem:[%s12392_s3 + $0x3] ss:$0 sm:$0xff] }
 0x257   : > { %1145 = vmatmul.f32.gmra.mxu3 %v1066_v25 }
 0x262   : > { %v8446_v13 = vpop.f32.mrf.mxu3 }
 0x263   : > { %1167 = vmatmul.f32.vlgmr.msrb.gmra.mxu0 %v8446_v13  ;;  %v1216_v53 = vmul.f32 %v8446_v13, %v8446_v13 }
 0x265   : > { %1248 = vmatmul.f32.vlgmr.msrb.gmra.mxu1 %v1216_v53 }
 0x26a   : > { %v8451_v0 = vpop.f32.mrf.mxu3 }
 0x26b   : > { %1170 = vmatmul.f32.gmra.mxu0 %v8451_v0  ;;  %v1217_v12 = vmul.f32 %v8451_v0, %v8451_v0 }
 0x26d   : > { %1251 = vmatmul.f32.gmra.mxu1 %v1217_v12 }
 0x272   : > { %v8456_v4 = vpop.f32.mrf.mxu3 }
 0x273   : > { %1173 = vmatmul.f32.gmra.mxu0 %v8456_v4  ;;  %v1218_v38 = vmul.f32 %v8456_v4, %v8456_v4 }
 0x275   : > { %1254 = vmatmul.f32.gmra.mxu1 %v1218_v38 }
 0x27a   : > { %v8461_v56 = vpop.f32.mrf.mxu3 }
 0x27b   : > { %1176 = vmatmul.f32.gmra.mxu0 %v8461_v56  ;;  %v1219_v51 = vmul.f32 %v8461_v56, %v8461_v56 }
 0x27d   : > { %1257 = vmatmul.f32.gmra.mxu1 %v1219_v51 }
 0x282   : > { %v8466_v11 = vpop.f32.mrf.mxu3 }
 0x283   : > { %1179 = vmatmul.f32.gmra.mxu0 %v8466_v11  ;;  %v1220_v50 = vmul.f32 %v8466_v11, %v8466_v11 }
 0x285   : > { %1260 = vmatmul.f32.gmra.mxu1 %v1220_v50 }
 0x28a   : > { %v8471_v37 = vpop.f32.mrf.mxu3 }
 0x28b   : > { %1182 = vmatmul.f32.gmra.mxu0 %v8471_v37  ;;  %v1221_v21 = vmul.f32 %v8471_v37, %v8471_v37 }
 0x28d   : > { %1263 = vmatmul.f32.gmra.mxu1 %v1221_v21 }
 0x292   : > { %v8476_v34 = vpop.f32.mrf.mxu3 }
 0x293   : > { %1185 = vmatmul.f32.gmra.mxu0 %v8476_v34  ;;  %v1222_v30 = vmul.f32 %v8476_v34, %v8476_v34 }
 0x295   : > { %1266 = vmatmul.f32.gmra.mxu1 %v1222_v30 }
 0x29a   : > { %v8481_v55 = vpop.f32.mrf.mxu3 }
 0x29b   : > { %1188 = vmatmul.f32.gmra.mxu0 %v8481_v55  ;;  %v1223_v18 = vmul.f32 %v8481_v55, %v8481_v55 }
 0x29d   : > { %1269 = vmatmul.f32.gmra.mxu1 %v1223_v18 }
 0x2a2   : > { %v8486_v28 = vpop.f32.mrf.mxu3 }
 0x2a3   : > { %1191 = vmatmul.f32.gmra.mxu0 %v8486_v28  ;;  %v1224_v61 = vmul.f32 %v8486_v28, %v8486_v28 }
 0x2a5   : > { %1272 = vmatmul.f32.gmra.mxu1 %v1224_v61  ;;  %v7484_v61 = vld [vmem:[%s7703_s9] sm:$0xff] }
 0x2aa   : > { %v8491_v2 = vpop.f32.mrf.mxu3 }
 0x2ab   : > { %1194 = vmatmul.f32.gmra.mxu0 %v8491_v2  ;;  %v1225_v44 = vmul.f32 %v8491_v2, %v8491_v2 }
 0x2ad   : > { %1275 = vmatmul.f32.gmra.mxu1 %v1225_v44 }
 0x2b2   : > { %v8496_v14 = vpop.f32.mrf.mxu3 }
 0x2b3   : > { %1197 = vmatmul.f32.gmra.mxu0 %v8496_v14  ;;  %v1226_v58 = vmul.f32 %v8496_v14, %v8496_v14 }
 0x2b5   : > { %1278 = vmatmul.f32.gmra.mxu1 %v1226_v58 }
 0x2ba   : > { %v8501_v3 = vpop.f32.mrf.mxu3 }
 0x2bb   : > { %1200 = vmatmul.f32.gmra.mxu0 %v8501_v3  ;;  %v1227_v26 = vmul.f32 %v8501_v3, %v8501_v3 }
 0x2bd   : > { %1281 = vmatmul.f32.gmra.mxu1 %v1227_v26 }
 0x2c2   : > { %v8506_v6 = vpop.f32.mrf.mxu3 }
 0x2c3   : > { %1203 = vmatmul.f32.gmra.mxu0 %v8506_v6  ;;  %v1228_v52 = vmul.f32 %v8506_v6, %v8506_v6 }
 0x2c5   : > { %1284 = vmatmul.f32.gmra.mxu1 %v1228_v52 }
 0x2ca   : > { %v8511_v36 = vpop.f32.mrf.mxu3 }
 0x2cb   : > { %1206 = vmatmul.f32.gmra.mxu0 %v8511_v36  ;;  %v1229_v15 = vmul.f32 %v8511_v36, %v8511_v36 }
 0x2cd   : > { %1287 = vmatmul.f32.gmra.mxu1 %v1229_v15 }
 0x2d2   : > { %v8516_v39 = vpop.f32.mrf.mxu3 }
 0x2d3   : > { %1209 = vmatmul.f32.gmra.mxu0 %v8516_v39  ;;  %v1230_v23 = vmul.f32 %v8516_v39, %v8516_v39 }
 0x2d5   : > { %1290 = vmatmul.f32.gmra.mxu1 %v1230_v23 }
 0x2da   : > { %v8521_v49 = vpop.f32.mrf.mxu3 }
 0x2db   : > { %1212 = vmatmul.f32.gmra.mxu0 %v8521_v49  ;;  %v1231_v57 = vmul.f32 %v8521_v49, %v8521_v49 }
 0x2dd   : > { %1293 = vmatmul.f32.gmra.mxu1 %v1231_v57 }
 0x2e0   : > { %v1168_v46 = vpop.f32.mrf.mxu0 }
 0x2e1   : > { %v1297_v5 = vmul.f32 %v1168_v46, %v1168_v46  ;;  %v1505_v42 = vsub.f32 %v8446_v13, %v1168_v46 }
 0x2e2   : > { %v1249_v40 = vpop.f32.mrf.mxu1 }
 0x2e3   : > { %v1313_v45 = vsub.f32 %v1249_v40, %v1297_v5 }
 0x2e5   : > { %v1329_v60 = vadd.f32 1e-05, %v1313_v45 }
 0x2e7   : > { %7020 = vrsqrt.f32 %v1329_v60  ;;  %vm1351_vm1 = vweird.f32 %v1329_v60 }
 0x2e8   : > { %v1171_v19 = vpop.f32.mrf.mxu0 }
 0x2e9   : > { %v1298_v24 = vmul.f32 %v1171_v19, %v1171_v19  ;;  %v1506_v15 = vsub.f32 %v8451_v0, %v1171_v19 }
 0x2ea   : > { %v1252_v10 = vpop.f32.mrf.mxu1 }
 0x2eb   : > { %v1314_v16 = vsub.f32 %v1252_v10, %v1298_v24 }
 0x2ed   : > { %v7021_v47 = vpop.eup %7020  ;;  %v1330_v33 = vadd.f32 1e-05, %v1314_v16 }
 0x2ee   : > { %v1346_v8 = vmul.f32 %v7021_v47, %v1329_v60  ;;  %vm1352_vm0 = vweird.f32 %v7021_v47 }
 0x2ef   : > { %7022 = vrsqrt.f32 %v1330_v33  ;;  %vm1353_vm2 = vmor %vm1351_vm1, %vm1352_vm0  ;;  %vm1361_vm4 = vweird.f32 %v1330_v33 }
 0x2f0   : > { %v1347_v35 = vmul.f32 %v7021_v47, %v1346_v8  ;;  %v8526_v54 = vpop.f32.mrf.mxu0 }
 0x2f1   : > { %v1299_v48 = vmul.f32 %v8526_v54, %v8526_v54 }
 0x2f2   : > { %v1348_v1 = vmul.f32 0.5, %v1347_v35  ;;  %v1255_v27 = vpop.f32.mrf.mxu1 }
 0x2f3   : > { %v1315_v17 = vsub.f32 %v1255_v27, %v1299_v48  ;;  %v1507_v27 = vsub.f32 %v8456_v4, %v8526_v54 }
 0x2f4   : > { %v1349_v22 = vsub.f32 1.5, %v1348_v1 }
 0x2f5   : > { %v7023_v62 = vpop.eup %7022  ;;  %v1331_v31 = vadd.f32 1e-05, %v1315_v17 }
 0x2f6   : > { %v1350_v63 = vmul.f32 %v7021_v47, %v1349_v22  ;;  %v1356_v9 = vmul.f32 %v7023_v62, %v1330_v33  ;;  %vm1362_vm3 = vweird.f32 %v7023_v62  ;;  %v7485_v33 = vld [vmem:[%s7703_s9 + $0x8] sm:$0xff] }
 0x2f7   : > { %7024 = vrsqrt.f32 %v1331_v31  ;;  %vm1363_vm5 = vmor %vm1361_vm4, %vm1362_vm3  ;;  %vm1371_vm7 = vweird.f32 %v1331_v31 }
 0x2f8   : > { %v1354_v59 = vsel %vm1353_vm2, %v7021_v47, %v1350_v63  ;;  %v1357_v7 = vmul.f32 %v7023_v62, %v1356_v9  ;;  %v8535_v32 = vpop.f32.mrf.mxu0 }
 0x2f9   : > { %v1522_v41 = vmul.f32 %v8533_v20, %v1354_v59  ;;  %v1300_v29 = vmul.f32 %v8535_v32, %v8535_v32 }
 0x2fa   : > { %v1358_v25 = vmul.f32 0.5, %v1357_v7  ;;  %v1258_v53 = vpop.f32.mrf.mxu1 }
 0x2fb   : > { %v1316_v12 = vsub.f32 %v1258_v53, %v1300_v29  ;;  %v1538_v38 = vmul.f32 %v1522_v41, %v1505_v42  ;;  %v7486_v53 = vld [vmem:[%s7703_s9 + $0x10] sm:$0xff] }
 0x2fc   : > { %v1359_v51 = vsub.f32 1.5, %v1358_v25 }
 0x2fd   : > { %v7025_v50 = vpop.eup %7024  ;;  %v1332_v21 = vadd.f32 1e-05, %v1316_v12  ;;  %v1555_v13 = vadd.f32 %v8544_v43, %v1538_v38 }
 0x2fe   : > { %v1360_v30 = vmul.f32 %v7023_v62, %v1359_v51  ;;  %v1366_v18 = vmul.f32 %v7025_v50, %v1331_v31  ;;  %vm1372_vm6 = vweird.f32 %v7025_v50  ;;  %v6819_v31 = vld [vmem:[%s12391_s2 + $0x178] sm:$0xff] }
 0x2ff   : > { %7026 = vrsqrt.f32 %v1332_v21  ;;  %v8548_v44 = vadd.f32 %v7484_v61, %v1555_v13  ;;  %vm1373_vm8 = vmor %vm1371_vm7, %vm1372_vm6  ;;  %1894 = vmatpush.msrb.mxu2 %v6819_v31  ;;  %vm1381_vm10 = vweird.f32 %v1332_v21  ;;  %v1508_v13 = vsub.f32 %v8461_v56, %v8535_v32  ;;  %v6818_v61 = vld [vmem:[%s12391_s2 + $0x170] sm:$0xff] }
 0x300   : > { %v1364_v58 = vsel %vm1363_vm5, %v7023_v62, %v1360_v30  ;;  %v1367_v26 = vmul.f32 %v7025_v50, %v1366_v18  ;;  %v8550_v52 = vpop.f32.mrf.mxu0 }
 0x301   : > { %v1523_v23 = vmul.f32 %v8533_v20, %v1364_v58  ;;  %v1301_v57 = vmul.f32 %v8550_v52, %v8550_v52  ;;  %v8558_v46 = vmul.f32 %v8548_v44, %v8548_v44  ;;  %1895 = vmatpush.msrb.mxu2 %v6818_v61 }
 0x302   : > { %v1368_v5 = vmul.f32 0.5, %v1367_v26  ;;  %v1261_v40 = vpop.f32.mrf.mxu1 }
 0x303   : > { %v1317_v45 = vsub.f32 %v1261_v40, %v1301_v57  ;;  %1604 = vrot.lane.b32.xlu1 %v8558_v46, %s7608_s30  ;;  %v1539_v60 = vmul.f32 %v1523_v23, %v1506_v15 }
 0x304   : > { %v1369_v24 = vsub.f32 1.5, %v1368_v5 }
 0x305   : > { %v7027_v0 = vpop.eup %7026  ;;  %v1333_v19 = vadd.f32 1e-05, %v1317_v45  ;;  %v1556_v10 = vadd.f32 %v8544_v43, %v1539_v60  ;;  %v7487_v60 = vld [vmem:[%s7703_s9 + $0x18] sm:$0xff] }
 0x306   : > { %v1370_v16 = vmul.f32 %v7025_v50, %v1369_v24  ;;  %v1376_v47 = vmul.f32 %v7027_v0, %v1332_v21  ;;  %vm1382_vm9 = vweird.f32 %v7027_v0 }
 0x307   : > { %7028 = vrsqrt.f32 %v1333_v19  ;;  %v8564_v8 = vadd.f32 %v7485_v33, %v1556_v10  ;;  %vm1383_vm11 = vmor %vm1381_vm10, %vm1382_vm9  ;;  %vm1391_vm13 = vweird.f32 %v1333_v19 }
 0x308   : > { %v1374_v35 = vsel %vm1373_vm8, %v7025_v50, %v1370_v16  ;;  %v1377_v48 = vmul.f32 %v7027_v0, %v1376_v47  ;;  %v8566_v1 = vpop.f32.mrf.mxu0  ;;  %v1509_v47 = vsub.f32 %v8466_v11, %v8550_v52 }
 0x309   : > { %v1524_v17 = vmul.f32 %v8533_v20, %v1374_v35  ;;  %v1302_v22 = vmul.f32 %v8566_v1, %v8566_v1  ;;  %v8575_v62 = vmul.f32 %v8564_v8, %v8564_v8 }
 0x30a   : > { %v1378_v63 = vmul.f32 0.5, %v1377_v48  ;;  %v1264_v9 = vpop.f32.mrf.mxu1  ;;  %v6817_v48 = vld [vmem:[%s12391_s2 + $0x168] sm:$0xff] }
 0x30b   : > { %v1318_v59 = vsub.f32 %v1264_v9, %v1302_v22  ;;  %1606 = vrot.lane.b32.xlu2 %v8575_v62, %s7608_s30  ;;  %v1540_v4 = vmul.f32 %v1524_v17, %v1507_v27  ;;  %1896 = vmatpush.msrb.mxu2 %v6817_v48 }
 0x30c   : > { %v1379_v54 = vsub.f32 1.5, %v1378_v63 }
 0x30d   : > { %v7029_v7 = vpop.eup %7028  ;;  %v1334_v42 = vadd.f32 1e-05, %v1318_v59  ;;  %v1557_v41 = vadd.f32 %v8544_v43, %v1540_v4 }
 0x30e   : > { %v1380_v29 = vmul.f32 %v7027_v0, %v1379_v54  ;;  %v1386_v25 = vmul.f32 %v7029_v7, %v1333_v19  ;;  %vm1392_vm12 = vweird.f32 %v7029_v7  ;;  %v7488_v54 = vld [vmem:[%s7703_s9 + $0x20] sm:$0xff] }
 0x30f   : > { %7030 = vrsqrt.f32 %v1334_v42  ;;  %v8584_v12 = vadd.f32 %v7486_v53, %v1557_v41  ;;  %vm1393_vm14 = vmor %vm1391_vm13, %vm1392_vm12  ;;  %vm1401_vm0 = vweird.f32 %v1334_v42  ;;  %v1510_v53 = vsub.f32 %v8471_v37, %v8566_v1 }
 0x310   : > { %v1384_v38 = vsel %vm1383_vm11, %v7027_v0, %v1380_v29  ;;  %v1387_v51 = vmul.f32 %v7029_v7, %v1386_v25  ;;  %v8586_v50 = vpop.f32.mrf.mxu0 }
 0x311   : > { %v1525_v30 = vmul.f32 %v8533_v20, %v1384_v38  ;;  %v1303_v18 = vmul.f32 %v8586_v50, %v8586_v50  ;;  %v8595_v21 = vmul.f32 %v8584_v12, %v8584_v12 }
 0x312   : > { %v1388_v58 = vmul.f32 0.5, %v1387_v51  ;;  %v1267_v26 = vpop.f32.mrf.mxu1 }
 0x313   : > { %v1319_v15 = vsub.f32 %v1267_v26, %v1303_v18  ;;  %1608 = vrot.lane.b32.xlu0 %v8595_v21, %s7608_s30  ;;  %v1541_v56 = vmul.f32 %v1525_v30, %v1508_v13  ;;  %v6816_v13 = vld [vmem:[%s12391_s2 + $0x160] sm:$0xff] }
 0x314   : > { %v1389_v32 = vsub.f32 1.5, %v1388_v58  ;;  %1897 = vmatpush.msrb.mxu2 %v6816_v13 }
 0x315   : > { %v7031_v23 = vpop.eup %7030  ;;  %v1335_v57 = vadd.f32 1e-05, %v1319_v15  ;;  %v1558_v5 = vadd.f32 %v8544_v43, %v1541_v56 }
 0x316   : > { %v1390_v40 = vmul.f32 %v7029_v7, %v1389_v32  ;;  %v1396_v45 = vmul.f32 %v7031_v23, %v1334_v42  ;;  %vm1402_vm15 = vweird.f32 %v7031_v23 }
 0x317   : > { %7032 = vrsqrt.f32 %v1335_v57  ;;  %v8604_v24 = vadd.f32 %v7487_v60, %v1558_v5  ;;  %vm1403_vm1 = vmor %vm1401_vm0, %vm1402_vm15  ;;  %vm1411_vm3 = vweird.f32 %v1335_v57 }
 0x318   : > { %v1394_v0 = vsel %vm1393_vm14, %v7029_v7, %v1390_v40  ;;  %v1397_v10 = vmul.f32 %v7031_v23, %v1396_v45  ;;  %v8606_v16 = vpop.f32.mrf.mxu0 }
 0x319   : > { %v1526_v33 = vmul.f32 %v8533_v20, %v1394_v0  ;;  %v1304_v35 = vmul.f32 %v8606_v16, %v8606_v16  ;;  %v8615_v19 = vmul.f32 %v8604_v24, %v8604_v24  ;;  %v1511_v0 = vsub.f32 %v8476_v34, %v8586_v50 }
 0x31a   : > { %v1398_v27 = vmul.f32 0.5, %v1397_v10  ;;  %v1270_v17 = vpop.f32.mrf.mxu1 }
 0x31b   : > { %v1320_v22 = vsub.f32 %v1270_v17, %v1304_v35  ;;  %1610 = vrot.lane.b32.xlu1 %v8615_v19, %s7608_s30  ;;  %v1542_v11 = vmul.f32 %v1526_v33, %v1509_v47  ;;  %v6815_v33 = vld [vmem:[%s12391_s2 + $0x158] sm:$0xff] }
 0x31c   : > { %v1399_v52 = vsub.f32 1.5, %v1398_v27  ;;  %1898 = vmatpush.msrb.mxu2 %v6815_v33  ;;  %v6813_v33 = vld [vmem:[%s12391_s2 + $0x148] sm:$0xff] }
 0x31d   : > { %v7033_v31 = vpop.eup %7032  ;;  %v1336_v63 = vadd.f32 1e-05, %v1320_v22  ;;  %v1559_v9 = vadd.f32 %v8544_v43, %v1542_v11 }
 0x31e   : > { %v1400_v59 = vmul.f32 %v7031_v23, %v1399_v52  ;;  %v1406_v4 = vmul.f32 %v7033_v31, %v1335_v57  ;;  %vm1412_vm2 = vweird.f32 %v7033_v31 }
 0x31f   : > { %7034 = vrsqrt.f32 %v1336_v63  ;;  %v8624_v7 = vadd.f32 %v7488_v54, %v1559_v9  ;;  %vm1413_vm4 = vmor %vm1411_vm3, %vm1412_vm2  ;;  %vm1421_vm6 = vweird.f32 %v1336_v63  ;;  %v7490_v9 = vld [vmem:[%s7703_s9 + $0x30] sm:$0xff] }
 0x320   : > { %v1404_v41 = vsel %vm1403_vm1, %v7031_v23, %v1400_v59  ;;  %v1407_v29 = vmul.f32 %v7033_v31, %v1406_v4  ;;  %v8626_v25 = vpop.f32.mrf.mxu0  ;;  %v7489_v23 = vld [vmem:[%s7703_s9 + $0x28] sm:$0xff] }
 0x321   : > { %v1527_v38 = vmul.f32 %v8533_v20, %v1404_v41  ;;  %v1305_v51 = vmul.f32 %v8626_v25, %v8626_v25  ;;  %v8635_v42 = vmul.f32 %v8624_v7, %v8624_v7 }
 0x322   : > { %v1408_v30 = vmul.f32 0.5, %v1407_v29  ;;  %v1273_v18 = vpop.f32.mrf.mxu1  ;;  %v1512_v29 = vsub.f32 %v8481_v55, %v8606_v16 }
 0x323   : > { %v1321_v61 = vsub.f32 %v1273_v18, %v1305_v51  ;;  %1612 = vrot.lane.b32.xlu2 %v8635_v42, %s7608_s30  ;;  %v1543_v37 = vmul.f32 %v1527_v38, %v1510_v53  ;;  %v6814_v51 = vld [vmem:[%s12391_s2 + $0x150] sm:$0xff] }
 0x324   : > { %v1409_v1 = vsub.f32 1.5, %v1408_v30  ;;  %1899 = vmatpush.msrb.mxu2 %v6814_v51 }
 0x325   : > { %v7035_v58 = vpop.eup %7034  ;;  %v1337_v26 = vadd.f32 1e-05, %v1321_v61  ;;  %v1560_v15 = vadd.f32 %v8544_v43, %v1543_v37 }
 0x326   : > { %v1410_v56 = vmul.f32 %v7033_v31, %v1409_v1  ;;  %v1416_v32 = vmul.f32 %v7035_v58, %v1336_v63  ;;  %vm1422_vm5 = vweird.f32 %v7035_v58  ;;  %1900 = vmatpush.msrb.mxu2 %v6813_v33 }
 0x327   : > { %7036 = vrsqrt.f32 %v1337_v26  ;;  %v8644_v5 = vadd.f32 %v7489_v23, %v1560_v15  ;;  %vm1423_vm7 = vmor %vm1421_vm6, %vm1422_vm5  ;;  %vm1431_vm9 = vweird.f32 %v1337_v26 }
 0x328   : > { %v1414_v40 = vsel %vm1413_vm4, %v7033_v31, %v1410_v56  ;;  %v1417_v45 = vmul.f32 %v7035_v58, %v1416_v32  ;;  %v8646_v60 = vpop.f32.mrf.mxu0  ;;  %v7491_v56 = vld [vmem:[%s7703_s9 + $0x38] sm:$0xff] }
 0x329   : > { %v1528_v10 = vmul.f32 %v8533_v20, %v1414_v40  ;;  %v1306_v47 = vmul.f32 %v8646_v60, %v8646_v60  ;;  %v8655_v57 = vmul.f32 %v8644_v5, %v8644_v5 }
 0x32a   : > { %v1418_v35 = vmul.f32 0.5, %v1417_v45  ;;  %v1276_v48 = vpop.f32.mrf.mxu1 }
 0x32b   : > { %v1322_v27 = vsub.f32 %v1276_v48, %v1306_v47  ;;  %1614 = vrot.lane.b32.xlu0 %v8655_v57, %s7608_s30  ;;  %v1544_v34 = vmul.f32 %v1528_v10, %v1511_v0  ;;  %v1513_v0 = vsub.f32 %v8486_v28, %v8626_v25 }
 0x32c   : > { %v1419_v50 = vsub.f32 1.5, %v1418_v35 }
 0x32d   : > { %v7037_v17 = vpop.eup %7036  ;;  %v1338_v22 = vadd.f32 1e-05, %v1322_v27  ;;  %v1561_v11 = vadd.f32 %v8544_v43, %v1544_v34 }
 0x32e   : > { %v1420_v52 = vmul.f32 %v7035_v58, %v1419_v50  ;;  %v1426_v31 = vmul.f32 %v7037_v17, %v1337_v26  ;;  %vm1432_vm8 = vweird.f32 %v7037_v17 }
 0x32f   : > { %7038 = vrsqrt.f32 %v1338_v22  ;;  %v8664_v59 = vadd.f32 %v7490_v9, %v1561_v11  ;;  %vm1433_vm10 = vmor %vm1431_vm9, %vm1432_vm8  ;;  %vm1441_vm12 = vweird.f32 %v1338_v22 }
 0x330   : > { %v1424_v4 = vsel %vm1423_vm7, %v7035_v58, %v1420_v52  ;;  %v1427_v54 = vmul.f32 %v7037_v17, %v1426_v31  ;;  %v8666_v41 = vpop.f32.mrf.mxu0  ;;  %v7492_v31 = vld [vmem:[%s7703_s9 + $0x40] sm:$0xff] }
 0x331   : > { %v1529_v53 = vmul.f32 %v8533_v20, %v1424_v4  ;;  %v1307_v38 = vmul.f32 %v8666_v41, %v8666_v41  ;;  %v8675_v63 = vmul.f32 %v8664_v59, %v8664_v59 }
 0x332   : > { %v1428_v13 = vmul.f32 0.5, %v1427_v54  ;;  %v1279_v30 = vpop.f32.mrf.mxu1 }
 0x333   : > { %v1323_v18 = vsub.f32 %v1279_v30, %v1307_v38  ;;  %1616 = vrot.lane.b32.xlu1 %v8675_v63, %s7608_s30  ;;  %v1545_v55 = vmul.f32 %v1529_v53, %v1512_v29  ;;  %v1514_v53 = vsub.f32 %v8491_v2, %v8646_v60 }
 0x334   : > { %v1429_v16 = vsub.f32 1.5, %v1428_v13  ;;  %v6812_v13 = vld [vmem:[%s12391_s2 + $0x140] sm:$0xff] }
 0x335   : > { %v7039_v61 = vpop.eup %7038  ;;  %v1339_v37 = vadd.f32 1e-05, %v1323_v18  ;;  %v1562_v1 = vadd.f32 %v8544_v43, %v1545_v55  ;;  %1901 = vmatpush.msrb.mxu2 %v6812_v13 }
 0x336   : > { %v1430_v58 = vmul.f32 %v7037_v17, %v1429_v16  ;;  %v1436_v15 = vmul.f32 %v7039_v61, %v1338_v22  ;;  %vm1442_vm11 = vweird.f32 %v7039_v61 }
 0x337   : > { %7040 = vrsqrt.f32 %v1339_v37  ;;  %v8684_v32 = vadd.f32 %v7491_v56, %v1562_v1  ;;  %vm1443_vm13 = vmor %vm1441_vm12, %vm1442_vm11  ;;  %vm1451_vm15 = vweird.f32 %v1339_v37  ;;  %v7493_v56 = vld [vmem:[%s7703_s9 + $0x48] sm:$0xff] }
 0x338   : > { %v1434_v23 = vsel %vm1433_vm10, %v7037_v17, %v1430_v58  ;;  %v1437_v40 = vmul.f32 %v7039_v61, %v1436_v15  ;;  %v8686_v45 = vpop.f32.mrf.mxu0 }
 0x339   : > { %v1530_v10 = vmul.f32 %v8533_v20, %v1434_v23  ;;  %v1308_v47 = vmul.f32 %v8686_v45, %v8686_v45  ;;  %v8695_v26 = vmul.f32 %v8684_v32, %v8684_v32  ;;  %v1516_v13 = vsub.f32 %v8501_v3, %v8686_v45 }
 0x33a   : > { %v1438_v35 = vmul.f32 0.5, %v1437_v40  ;;  %v1282_v48 = vpop.f32.mrf.mxu1 }
 0x33b   : > { %v1324_v27 = vsub.f32 %v1282_v48, %v1308_v47  ;;  %1618 = vrot.lane.b32.xlu2 %v8695_v26, %s7608_s30  ;;  %v1546_v28 = vmul.f32 %v1530_v10, %v1513_v0  ;;  %v1515_v47 = vsub.f32 %v8496_v14, %v8666_v41  ;;  %v6811_v48 = vld [vmem:[%s12391_s2 + $0x138] sm:$0xff] }
 0x33c   : > { %v1439_v25 = vsub.f32 1.5, %v1438_v35  ;;  %1902 = vmatpush.msrb.mxu2 %v6811_v48 }
 0x33d   : > { %v7041_v34 = vpop.eup %7040  ;;  %v1340_v50 = vadd.f32 1e-05, %v1324_v27  ;;  %v1563_v17 = vadd.f32 %v8544_v43, %v1546_v28 }
 0x33e   : > { %v1440_v11 = vmul.f32 %v7039_v61, %v1439_v25  ;;  %v1446_v52 = vmul.f32 %v7041_v34, %v1339_v37  ;;  %vm1452_vm14 = vweird.f32 %v7041_v34 }
 0x33f   : > { %7042 = vrsqrt.f32 %v1340_v50  ;;  %v8704_v9 = vadd.f32 %v7492_v31, %v1563_v17  ;;  %vm1453_vm0 = vmor %vm1451_vm15, %vm1452_vm14  ;;  %vm1461_vm2 = vweird.f32 %v1340_v50 }
 0x340   : > { %v1444_v4 = vsel %vm1443_vm13, %v7039_v61, %v1440_v11  ;;  %v1447_v54 = vmul.f32 %v7041_v34, %v1446_v52  ;;  %v8706_v29 = vpop.f32.mrf.mxu0 }
 0x341   : > { %v1531_v38 = vmul.f32 %v8533_v20, %v1444_v4  ;;  %v1309_v51 = vmul.f32 %v8706_v29, %v8706_v29  ;;  %v8715_v22 = vmul.f32 %v8704_v9, %v8704_v9  ;;  %v7494_v4 = vld [vmem:[%s7703_s9 + $0x50] sm:$0xff] }
 0x342   : > { %v1448_v30 = vmul.f32 0.5, %v1447_v54  ;;  %v1285_v18 = vpop.f32.mrf.mxu1 }
 0x343   : > { %v1325_v55 = vsub.f32 %v1285_v18, %v1309_v51  ;;  %1620 = vrot.lane.b32.xlu0 %v8715_v22, %s7608_s30  ;;  %v1547_v2 = vmul.f32 %v1531_v38, %v1514_v53 }
 0x344   : > { %v1449_v60 = vsub.f32 1.5, %v1448_v30 }
 0x345   : > { %v7043_v16 = vpop.eup %7042  ;;  %v1341_v61 = vadd.f32 1e-05, %v1325_v55  ;;  %v1564_v1 = vadd.f32 %v8544_v43, %v1547_v2  ;;  %v6810_v55 = vld [vmem:[%s12391_s2 + $0x130] sm:$0xff]  ;;  %v6809_v2 = vld [vmem:[%s12391_s2 + $0x128] sm:$0xff] }
 0x346   : > { %v1450_v58 = vmul.f32 %v7041_v34, %v1449_v60  ;;  %v1456_v15 = vmul.f32 %v7043_v16, %v1340_v50  ;;  %vm1462_vm1 = vweird.f32 %v7043_v16  ;;  %1903 = vmatpush.msrb.mxu2 %v6810_v55 }
 0x347   : > { %7044 = vrsqrt.f32 %v1341_v61  ;;  %v8724_v23 = vadd.f32 %v7493_v56, %v1564_v1  ;;  %vm1463_vm3 = vmor %vm1461_vm2, %vm1462_vm1  ;;  %vm1471_vm5 = vweird.f32 %v1341_v61 }
 0x348   : > { %v1454_v40 = vsel %vm1453_vm0, %v7041_v34, %v1450_v58  ;;  %v1457_v0 = vmul.f32 %v7043_v16, %v1456_v15  ;;  %v8726_v10 = vpop.f32.mrf.mxu0  ;;  %1904 = vmatpush.msrb.mxu2 %v6809_v2 }
 0x349   : > { %v1532_v33 = vmul.f32 %v8533_v20, %v1454_v40  ;;  %v1310_v35 = vmul.f32 %v8726_v10, %v8726_v10  ;;  %v8735_v37 = vmul.f32 %v8724_v23, %v8724_v23  ;;  %v6808_v40 = vld [vmem:[%s12391_s2 + $0x120] sm:$0xff] }
 0x34a   : > { %v1458_v27 = vmul.f32 0.5, %v1457_v0  ;;  %v1288_v28 = vpop.f32.mrf.mxu1  ;;  %v6807_v0 = vld [vmem:[%s12391_s2 + $0x118] sm:$0xff]  ;;  %1905 = vmatpush.msrb.mxu2 %v6808_v40 }
 0x34b   : > { %v1326_v25 = vsub.f32 %v1288_v28, %v1310_v35  ;;  %1622 = vrot.lane.b32.xlu1 %v8735_v37, %s7608_s30  ;;  %v1548_v14 = vmul.f32 %v1532_v33, %v1515_v47  ;;  %v7495_v35 = vld [vmem:[%s7703_s9 + $0x58] sm:$0xff] }
 0x34c   : > { %v1459_v41 = vsub.f32 1.5, %v1458_v27  ;;  %1906 = vmatpush.msrb.mxu2 %v6807_v0 }
 0x34d   : > { %v7045_v34 = vpop.eup %7044  ;;  %v1342_v17 = vadd.f32 1e-05, %v1326_v25  ;;  %v1565_v11 = vadd.f32 %v8544_v43, %v1548_v14  ;;  %v1517_v14 = vsub.f32 %v8506_v6, %v8706_v29 }
 0x34e   : > { %v1460_v52 = vmul.f32 %v7043_v16, %v1459_v41  ;;  %v1466_v31 = vmul.f32 %v7045_v34, %v1341_v61  ;;  %vm1472_vm4 = vweird.f32 %v7045_v34 }
 0x34f   : > { %7046 = vrsqrt.f32 %v1342_v17  ;;  %v8744_v54 = vadd.f32 %v7494_v4, %v1565_v11  ;;  %vm1473_vm6 = vmor %vm1471_vm5, %vm1472_vm4  ;;  %vm1481_vm8 = vweird.f32 %v1342_v17 }
 0x350   : > { %v1464_v53 = vsel %vm1463_vm3, %v7043_v16, %v1460_v52  ;;  %v1467_v38 = vmul.f32 %v7045_v34, %v1466_v31  ;;  %v8746_v51 = vpop.f32.mrf.mxu0 }
 0x351   : > { %v1533_v30 = vmul.f32 %v8533_v20, %v1464_v53  ;;  %v1311_v18 = vmul.f32 %v8746_v51, %v8746_v51  ;;  %v8755_v50 = vmul.f32 %v8744_v54, %v8744_v54 }
 0x352   : > { %v1468_v60 = vmul.f32 0.5, %v1467_v38  ;;  %v1291_v16 = vpop.f32.mrf.mxu1 }
 0x353   : > { %v1327_v3 = vsub.f32 %v1291_v16, %v1311_v18  ;;  %1624 = vrot.lane.b32.xlu2 %v8755_v50, %s7608_s30  ;;  %v1549_v45 = vmul.f32 %v1533_v30, %v1516_v13  ;;  %v7496_v18 = vld [vmem:[%s7703_s9 + $0x60] sm:$0xff]  ;;  %v1518_v16 = vsub.f32 %v8511_v36, %v8726_v10  ;;  %v7497_v10 = vld [vmem:[%s7703_s9 + $0x68] sm:$0xff] }
 0x354   : > { %v1469_v1 = vsub.f32 1.5, %v1468_v60 }
 0x355   : > { %v7047_v58 = vpop.eup %7046  ;;  %v1343_v15 = vadd.f32 1e-05, %v1327_v3  ;;  %v1566_v56 = vadd.f32 %v8544_v43, %v1549_v45 }
 0x356   : > { %v1470_v47 = vmul.f32 %v7045_v34, %v1469_v1  ;;  %v1476_v33 = vmul.f32 %v7047_v58, %v1342_v17  ;;  %vm1482_vm7 = vweird.f32 %v7047_v58 }
 0x357   : > { %7048 = vrsqrt.f32 %v1343_v15  ;;  %v8773_v48 = vadd.f32 %v7495_v35, %v1566_v56  ;;  %vm1483_vm9 = vmor %vm1481_vm8, %vm1482_vm7  ;;  %vm1491_vm11 = vweird.f32 %v1343_v15  ;;  %v6806_v35 = vld [vmem:[%s12391_s2 + $0x110] sm:$0xff] }
 0x358   : > { %v1474_v27 = vsel %vm1473_vm6, %v7045_v34, %v1470_v47  ;;  %v1477_v28 = vmul.f32 %v7047_v58, %v1476_v33  ;;  %v8775_v25 = vpop.f32.mrf.mxu0  ;;  %1907 = vmatpush.msrb.mxu2 %v6806_v35 }
 0x359   : > { %v1534_v41 = vmul.f32 %v8533_v20, %v1474_v27  ;;  %v1312_v61 = vmul.f32 %v8775_v25, %v8775_v25  ;;  %v8784_v11 = vmul.f32 %v8773_v48, %v8773_v48 }
 0x35a   : > { %v1478_v52 = vmul.f32 0.5, %v1477_v28  ;;  %v1294_v31 = vpop.f32.mrf.mxu1 }
 0x35b   : > { %v1328_v34 = vsub.f32 %v1294_v31, %v1312_v61  ;;  %1626 = vrot.lane.b32.xlu0 %v8784_v11, %s7608_s30  ;;  %v1550_v4 = vmul.f32 %v1534_v41, %v1517_v14  ;;  %v1519_v41 = vsub.f32 %v8516_v39, %v8746_v51  ;;  %v6805_v39 = vld [vmem:[%s12391_s2 + $0x108] sm:$0xff] }
 0x35c   : > { %v1479_v53 = vsub.f32 1.5, %v1478_v52  ;;  %1908 = vmatpush.msrb.mxu2 %v6805_v39 }
 0x35d   : > { %v7049_v6 = vpop.eup %7048  ;;  %v1344_v29 = vadd.f32 1e-05, %v1328_v34  ;;  %v1567_v38 = vadd.f32 %v8544_v43, %v1550_v4  ;;  %v7498_v4 = vld [vmem:[%s7703_s9 + $0x70] sm:$0xff] }
 0x35e   : > { %v1480_v13 = vmul.f32 %v7047_v58, %v1479_v53  ;;  %v1486_v30 = vmul.f32 %v7049_v6, %v1343_v15  ;;  %vm1492_vm10 = vweird.f32 %v7049_v6 }
 0x35f   : > { %7050 = vrsqrt.f32 %v1344_v29  ;;  %v8790_v55 = vadd.f32 %v7496_v18, %v1567_v38  ;;  %vm1493_vm12 = vmor %vm1491_vm11, %vm1492_vm10  ;;  %vm1501_vm14 = vweird.f32 %v1344_v29  ;;  %v1520_v38 = vsub.f32 %v8521_v49, %v8775_v25  ;;  %v8845_v49 = vld [vmem:[%s12393_s4 + $0x78] sm:$0xff] }
 0x360   : > { %v1484_v2 = vsel %vm1483_vm9, %v7047_v58, %v1480_v13  ;;  %v1487_v60 = vmul.f32 %v7049_v6, %v1486_v30 }
 0x361   : > { %v1535_v3 = vmul.f32 %v8533_v20, %v1484_v2  ;;  %v8797_v45 = vmul.f32 %v8790_v55, %v8790_v55 }
 0x362   : > { %v1488_v1 = vmul.f32 0.5, %v1487_v60 }
 0x363   : > { %1628 = vrot.lane.b32.xlu1 %v8797_v45, %s7608_s30  ;;  %v1551_v17 = vmul.f32 %v1535_v3, %v1518_v16  ;;  %v8854_v16 = vld [vmem:[%s12393_s4 + $0x70] sm:$0xff] }
 0x364   : > { %v1489_v56 = vsub.f32 1.5, %v1488_v1  ;;  %v7501_v1 = vld [vmem:[%s7703_s9 + $0x78] sm:$0xff] }
 0x365   : > { %v7051_v40 = vpop.eup %7050  ;;  %v1607_v58 = vpop.permute.xlu2 %1606  ;;  %v1568_v0 = vadd.f32 %v8544_v43, %v1551_v17 }
 0x366   : > { %v1490_v47 = vmul.f32 %v7049_v6, %v1489_v56  ;;  %v1496_v36 = vmul.f32 %v7051_v40, %v1344_v29  ;;  %v8809_v14 = vadd.f32 %v1607_v58, %v8575_v62  ;;  %vm1502_vm13 = vweird.f32 %v7051_v40  ;;  %v6804_v29 = vld [vmem:[%s12391_s2 + $0x100] sm:$0xff]  ;;  %v8864_v56 = vld [vmem:[%s12393_s4 + $0x68] sm:$0xff]  ;;  %v8883_v58 = vld [vmem:[%s12393_s4 + $0x58] sm:$0xff] }
 0x367   : > { %v8803_v33 = vadd.f32 %v7497_v10, %v1568_v0  ;;  %vm1503_vm15 = vmor %vm1501_vm14, %vm1502_vm13  ;;  %1909 = vmatpush.msrb.mxu2 %v6804_v29 }
 0x368   : > { %v1494_v27 = vsel %vm1493_vm12, %v7049_v6, %v1490_v47  ;;  %v1497_v28 = vmul.f32 %v7051_v40, %v1496_v36  ;;  %7052 = vrsqrt.f32 %v8809_v14  ;;  %v8889_v36 = vld [vmem:[%s12393_s4 + $0x50] sm:$0xff]  ;;  %vm1668_vm2 = vweird.f32 %v8809_v14 }
 0x369   : > { %v1536_v15 = vmul.f32 %v8533_v20, %v1494_v27  ;;  %v8816_v61 = vmul.f32 %v8803_v33, %v8803_v33  ;;  %2756 = vmatpush.msra.mxu2 %v8845_v49  ;;  %v8895_v27 = vld [vmem:[%s12393_s4 + $0x48] sm:$0xff] }
 0x36a   : > { %v1498_v52 = vmul.f32 0.5, %v1497_v28 }
 0x36b   : > { %1630 = vrot.lane.b32.xlu2 %v8816_v61, %s7608_s30  ;;  %v1552_v31 = vmul.f32 %v1536_v15, %v1519_v41  ;;  %2757 = vmatpush.msra.mxu2 %v8854_v16 }
 0x36c   : > { %v1499_v34 = vsub.f32 1.5, %v1498_v52  ;;  %v8904_v52 = vld [vmem:[%s12393_s4 + $0x40] sm:$0xff] }
 0x36d   : > { %v1569_v62 = vadd.f32 %v8544_v43, %v1552_v31  ;;  %2758 = vmatpush.msra.mxu2 %v8864_v56 }
 0x36e   : > { %v1500_v51 = vmul.f32 %v7051_v40, %v1499_v34  ;;  %v8838_v18 = vpop.eup %7052  ;;  %v8910_v34 = vld [vmem:[%s12393_s4 + $0x38] sm:$0xff] }
 0x36f   : > { %v8826_v53 = vadd.f32 %v7498_v4, %v1569_v62  ;;  %vm1669_vm0 = vweird.f32 %v8838_v18 }
 0x370   : > { %v1504_v6 = vsel %vm1503_vm15, %v7051_v40, %v1500_v51  ;;  %v8919_v51 = vld [vmem:[%s12393_s4 + $0x30] sm:$0xff]  ;;  %vm8924_vm3 = vmor %vm1668_vm2, %vm1669_vm0 }
 0x371   : > { %v1537_v13 = vmul.f32 %v8533_v20, %v1504_v6  ;;  %v8833_v30 = vmul.f32 %v8826_v53, %v8826_v53  ;;  %v1663_v20 = vmul.f32 %v8838_v18, %v8809_v14  ;;  %v8942_v14 = vld [vmem:[%s12393_s4 + $0x20] sm:$0xff] }
 0x373   : > { %1632 = vrot.lane.b32.xlu0 %v8833_v30, %s7608_s30  ;;  %v1553_v2 = vmul.f32 %v1537_v13, %v1520_v38  ;;  %v8931_v13 = vld [vmem:[%s12393_s4 + $0x28] sm:$0xff] }
 0x375   : > { %v1605_v25 = vpop.permute.xlu1 %1604  ;;  %v1570_v60 = vadd.f32 %v8544_v43, %v1553_v2  ;;  %v1664_v43 = vmul.f32 %v8838_v18, %v1663_v20  ;;  %v8934_v2 = vstv %s6803_s19  ;;  %s6917_s19 = sld [smem:[#allocation2 + $0x7]] }
 0x376   : > { %v1636_v3 = vadd.f32 %v1605_v25, %v8558_v46  ;;  %v8875_v46 = vld [vmem:[%s12393_s4 + $0x60] sm:$0xff] }
 0x377   : > { %v8859_v17 = vadd.f32 %v7501_v1, %v1570_v60  ;;  %2759 = vmatpush.msra.mxu2 %v8875_v46  ;;  %v1665_v0 = vmul.f32 0.5, %v1664_v43  ;;  %v8951_v60 = vld [vmem:[%s12393_s4 + $0x18] sm:$0xff] }
 0x378   : > { %7054 = vrsqrt.f32 %v1636_v3  ;;  %vm1658_vm4 = vweird.f32 %v1636_v3 }
 0x379   : > { %v8870_v40 = vmul.f32 %v8859_v17, %v8859_v17  ;;  %2760 = vmatpush.msra.mxu2 %v8883_v58  ;;  %v1666_v41 = vsub.f32 1.5, %v1665_v0  ;;  %v8960_v0 = vld [vmem:[%s12393_s4 + $0x10] sm:$0xff] }
 0x37b   : > { %1634 = vrot.lane.b32.xlu1 %v8870_v40, %s7608_s30  ;;  %2761 = vmatpush.msra.mxu2 %v8889_v36  ;;  %v1667_v39 = vmul.f32 %v8838_v18, %v1666_v41 }
 0x37d   : > { %v1613_v47 = vpop.permute.xlu2 %1612  ;;  %2762 = vmatpush.msra.mxu2 %v8895_v27 }
 0x37e   : > { %v7055_v10 = vpop.eup %7054  ;;  %v8899_v28 = vadd.f32 %v1613_v47, %v8635_v42 }
 0x37f   : > { %v1653_v35 = vmul.f32 %v7055_v10, %v1636_v3  ;;  %2763 = vmatpush.msra.mxu2 %v8904_v52  ;;  %vm1659_vm1 = vweird.f32 %v7055_v10 }
 0x380   : > { %7056 = vrsqrt.f32 %v8899_v28  ;;  %vm1660_vm5 = vmor %vm1658_vm4, %vm1659_vm1  ;;  %vm1698_vm11 = vweird.f32 %v8899_v28 }
 0x381   : > { %v1654_v15 = vmul.f32 %v7055_v10, %v1653_v35  ;;  %2764 = vmatpush.msra.mxu2 %v8910_v34 }
 0x383   : > { %v1655_v31 = vmul.f32 0.5, %v1654_v15  ;;  %2765 = vmatpush.msra.mxu2 %v8919_v51  ;;  %v8967_v15 = vld [vmem:[%s12393_s4 + $0x8] sm:$0xff] }
 0x385   : > { %v1656_v42 = vsub.f32 1.5, %v1655_v31  ;;  %v1609_v62 = vpop.permute.xlu0 %1608  ;;  %2766 = vmatpush.msra.mxu2 %v8931_v13 }
 0x386   : > { %v1638_v4 = vadd.f32 %v1609_v62, %v8595_v21  ;;  %v1671_v21 = vsel %vm8924_vm3, %v8838_v18, %v1667_v39  ;;  %v8945_v20 = vpop.eup %7056 }
 0x387   : > { %v1657_v38 = vmul.f32 %v7055_v10, %v1656_v42  ;;  %2767 = vmatpush.msra.mxu2 %v8942_v14  ;;  %v1814_v18 = vmul.f32 %v8934_v2, %v1671_v21  ;;  %v1693_v1 = vmul.f32 %v8945_v20, %v8899_v28  ;;  %vm1699_vm9 = vweird.f32 %v8945_v20 }
 0x388   : > { %7058 = vrsqrt.f32 %v1638_v4  ;;  %vm1678_vm7 = vweird.f32 %v1638_v4  ;;  %vm1700_vm12 = vmor %vm1698_vm11, %vm1699_vm9 }
 0x389   : > { %v1661_v29 = vsel %vm1660_vm5, %v7055_v10, %v1657_v38  ;;  %2768 = vmatpush.msra.mxu2 %v8951_v60  ;;  %v1830_v42 = vsub.f32 1.0, %v1814_v18  ;;  %v1694_v62 = vmul.f32 %v8945_v20, %v1693_v1 }
 0x38a   : > { %v1813_v25 = vmul.f32 %v8934_v2, %v1661_v29 }
 0x38b   : > { %2769 = vmatpush.msra.mxu2 %v8960_v0  ;;  %v1846_v38 = vmax.f32 %v1830_v42, 0.0  ;;  %v1695_v29 = vmul.f32 0.5, %v1694_v62 }
 0x38c   : > { %v1829_v3 = vsub.f32 1.0, %v1813_v25 }
 0x38d   : > { %v1611_v43 = vpop.permute.xlu1 %1610  ;;  %2770 = vmatpush.msra.mxu2 %v8967_v15 }
 0x38e   : > { %v7059_v47 = vpop.eup %7058  ;;  %v1639_v10 = vadd.f32 %v1611_v43, %v8615_v19  ;;  %v1845_v35 = vmax.f32 %v1829_v3, 0.0  ;;  %v8977_v19 = vld [vmem:[%s12393_s4] sm:$0xff]  ;;  %v8988_v43 = vmul.f32 %v1846_v38, %v8564_v8 }
 0x38f   : > { %v1673_v41 = vmul.f32 %v7059_v47, %v1638_v4  ;;  %2771 = vmatpush.msra.mxu2 %v8977_v19  ;;  %vm1679_vm6 = vweird.f32 %v7059_v47 }
 0x390   : > { %7060 = vrsqrt.f32 %v1639_v10  ;;  %v8971_v31 = vmul.f32 %v1845_v35, %v8548_v44  ;;  %vm1680_vm8 = vmor %vm1678_vm7, %vm1679_vm6  ;;  %vm1688_vm13 = vweird.f32 %v1639_v10 }
 0x391   : > { %v1674_v39 = vmul.f32 %v7059_v47, %v1673_v41 }
 0x392   : > { %1910 = vmatmul.f32.vlgmr.msrb.gmra.mxu2 %v8971_v31 }
 0x393   : > { %v1675_v6 = vmul.f32 0.5, %v1674_v39  ;;  %3648 = vmatpush.msrb.mxu2 %v8845_v49  ;;  %v1696_v49 = vsub.f32 1.5, %v1695_v29 }
 0x395   : > { %v1676_v44 = vsub.f32 1.5, %v1675_v6  ;;  %v1619_v21 = vpop.permute.xlu2 %1618  ;;  %3649 = vmatpush.msrb.mxu2 %v8854_v16  ;;  %v1697_v42 = vmul.f32 %v8945_v20, %v1696_v49 }
 0x396   : > { %v7061_v25 = vpop.eup %7060  ;;  %v8985_v1 = vadd.f32 %v1619_v21, %v8695_v26 }
 0x397   : > { %v1683_v3 = vmul.f32 %v7061_v25, %v1639_v10  ;;  %v1677_v18 = vmul.f32 %v7059_v47, %v1676_v44  ;;  %3650 = vmatpush.msrb.mxu2 %v8864_v56  ;;  %vm1689_vm10 = vweird.f32 %v7061_v25  ;;  %v1701_v6 = vsel %vm1700_vm12, %v8945_v20, %v1697_v42 }
 0x398   : > { %7062 = vrsqrt.f32 %v8985_v1  ;;  %vm1690_vm14 = vmor %vm1688_vm13, %vm1689_vm10  ;;  %vm1728_vm4 = vweird.f32 %v8985_v1 }
 0x399   : > { %v1684_v35 = vmul.f32 %v7061_v25, %v1683_v3  ;;  %v1681_v41 = vsel %vm1680_vm8, %v7059_v47, %v1677_v18  ;;  %3651 = vmatpush.msrb.mxu2 %v8875_v46 }
 0x39a   : > { %1913 = vmatmul.f32.gmra.mxu2 %v8988_v43  ;;  %v1815_v16 = vmul.f32 %v8934_v2, %v1681_v41 }
 0x39b   : > { %v1685_v4 = vmul.f32 0.5, %v1684_v35  ;;  %3652 = vmatpush.msrb.mxu2 %v8883_v58 }
 0x39c   : > { %v1831_v26 = vsub.f32 1.0, %v1815_v16 }
 0x39d   : > { %v1686_v56 = vsub.f32 1.5, %v1685_v4  ;;  %v1615_v8 = vpop.permute.xlu0 %1614  ;;  %3653 = vmatpush.msrb.mxu2 %v8889_v36 }
 0x39e   : > { %v1641_v46 = vadd.f32 %v1615_v8, %v8655_v57  ;;  %v1847_v47 = vmax.f32 %v1831_v26, 0.0  ;;  %v9006_v36 = vpop.eup %7062 }
 0x39f   : > { %v1687_v58 = vmul.f32 %v7061_v25, %v1686_v56  ;;  %3654 = vmatpush.msrb.mxu2 %v8895_v27  ;;  %v1817_v27 = vmul.f32 %v8934_v2, %v1701_v6  ;;  %vm1729_vm2 = vweird.f32 %v9006_v36 }
 0x3a0   : > { %7064 = vrsqrt.f32 %v1641_v46  ;;  %v9002_v62 = vmul.f32 %v1847_v47, %v8584_v12  ;;  %v1723_v12 = vmul.f32 %v9006_v36, %v8985_v1  ;;  %vm1708_vm0 = vweird.f32 %v1641_v46  ;;  %vm1730_vm5 = vmor %vm1728_vm4, %vm1729_vm2 }
 0x3a1   : > { %v1691_v39 = vsel %vm1690_vm14, %v7061_v25, %v1687_v58  ;;  %3655 = vmatpush.msrb.mxu2 %v8904_v52 }
 0x3a2   : > { %1916 = vmatmul.f32.gmra.mxu2 %v9002_v62  ;;  %v1816_v57 = vmul.f32 %v8934_v2, %v1691_v39  ;;  %v1724_v21 = vmul.f32 %v9006_v36, %v1723_v12 }
 0x3a3   : > { %3656 = vmatpush.msrb.mxu2 %v8910_v34  ;;  %v1833_v34 = vsub.f32 1.0, %v1817_v27 }
 0x3a4   : > { %v1832_v28 = vsub.f32 1.0, %v1816_v57  ;;  %v1725_v3 = vmul.f32 0.5, %v1724_v21 }
 0x3a5   : > { %v1617_v10 = vpop.permute.xlu1 %1616  ;;  %3657 = vmatpush.msrb.mxu2 %v8919_v51 }
 0x3a6   : > { %v7065_v20 = vpop.eup %7064  ;;  %v1642_v52 = vadd.f32 %v1617_v10, %v8675_v63  ;;  %v1848_v38 = vmax.f32 %v1832_v28, 0.0  ;;  %v1849_v63 = vmax.f32 %v1833_v34, 0.0 }
 0x3a7   : > { %v1703_v29 = vmul.f32 %v7065_v20, %v1641_v46  ;;  %3658 = vmatpush.msrb.mxu2 %v8931_v13  ;;  %vm1709_vm15 = vweird.f32 %v7065_v20 }
 0x3a8   : > { %7066 = vrsqrt.f32 %v1642_v52  ;;  %v9018_v44 = vmul.f32 %v1848_v38, %v8604_v24  ;;  %vm1710_vm1 = vmor %vm1708_vm0, %vm1709_vm15  ;;  %v9030_v41 = vmul.f32 %v1849_v63, %v8624_v7  ;;  %vm1718_vm6 = vweird.f32 %v1642_v52 }
 0x3a9   : > { %v1704_v25 = vmul.f32 %v7065_v20, %v1703_v29  ;;  %3659 = vmatpush.msrb.mxu2 %v8942_v14 }
 0x3aa   : > { %1919 = vmatmul.f32.gmra.mxu2 %v9018_v44 }
 0x3ab   : > { %v1705_v51 = vmul.f32 0.5, %v1704_v25  ;;  %3660 = vmatpush.msrb.mxu2 %v8951_v60  ;;  %v1726_v60 = vsub.f32 1.5, %v1725_v3 }
 0x3ad   : > { %v1706_v18 = vsub.f32 1.5, %v1705_v51  ;;  %v1625_v13 = vpop.permute.xlu2 %1624  ;;  %3661 = vmatpush.msrb.mxu2 %v8960_v0  ;;  %v1727_v7 = vmul.f32 %v9006_v36, %v1726_v60 }
 0x3ae   : > { %v7067_v24 = vpop.eup %7066  ;;  %v9027_v14 = vadd.f32 %v1625_v13, %v8755_v50 }
 0x3af   : > { %v1713_v49 = vmul.f32 %v7067_v24, %v1642_v52  ;;  %v1707_v35 = vmul.f32 %v7065_v20, %v1706_v18  ;;  %3662 = vmatpush.msrb.mxu2 %v8967_v15  ;;  %vm1719_vm3 = vweird.f32 %v7067_v24  ;;  %v1731_v58 = vsel %vm1730_vm5, %v9006_v36, %v1727_v7 }
 0x3b0   : > { %7068 = vrsqrt.f32 %v9027_v14  ;;  %vm1720_vm7 = vmor %vm1718_vm6, %vm1719_vm3  ;;  %vm1758_vm13 = vweird.f32 %v9027_v14 }
 0x3b1   : > { %v1714_v16 = vmul.f32 %v7067_v24, %v1713_v49  ;;  %v1711_v4 = vsel %vm1710_vm1, %v7065_v20, %v1707_v35  ;;  %3663 = vmatpush.msrb.mxu2 %v8977_v19 }
 0x3b2   : > { %1922 = vmatmul.f32.gmra.mxu2 %v9030_v41  ;;  %v1818_v0 = vmul.f32 %v8934_v2, %v1711_v4 }
 0x3b3   : > { %v1715_v26 = vmul.f32 0.5, %v1714_v16 }
 0x3b4   : > { %v1834_v15 = vsub.f32 1.0, %v1818_v0 }
 0x3b5   : > { %v1716_v50 = vsub.f32 1.5, %v1715_v26  ;;  %v1621_v56 = vpop.permute.xlu0 %1620 }
 0x3b6   : > { %v1644_v8 = vadd.f32 %v1621_v56, %v8715_v22  ;;  %v1850_v19 = vmax.f32 %v1834_v15, 0.0  ;;  %v7069_v39 = vpop.eup %7068  ;;  %v1820_v22 = vmul.f32 %v8934_v2, %v1731_v58 }
 0x3b7   : > { %v1717_v42 = vmul.f32 %v7067_v24, %v1716_v50  ;;  %v1753_v57 = vmul.f32 %v7069_v39, %v9027_v14  ;;  %vm1759_vm11 = vweird.f32 %v7069_v39 }
 0x3b8   : > { %7070 = vrsqrt.f32 %v1644_v8  ;;  %v9041_v46 = vmul.f32 %v1850_v19, %v8644_v5  ;;  %v1836_v36 = vsub.f32 1.0, %v1820_v22  ;;  %vm1738_vm9 = vweird.f32 %v1644_v8  ;;  %vm1760_vm14 = vmor %vm1758_vm13, %vm1759_vm11 }
 0x3b9   : > { %v1721_v47 = vsel %vm1720_vm7, %v7067_v24, %v1717_v42  ;;  %v1754_v52 = vmul.f32 %v7069_v39, %v1753_v57 }
 0x3ba   : > { %1925 = vmatmul.f32.gmra.mxu2 %v9041_v46  ;;  %v1819_v6 = vmul.f32 %v8934_v2, %v1721_v47  ;;  %v1852_v34 = vmax.f32 %v1836_v36, 0.0 }
 0x3bb   : > { %v1755_v21 = vmul.f32 0.5, %v1754_v52 }
 0x3bc   : > { %v1835_v1 = vsub.f32 1.0, %v1819_v6 }
 0x3bd   : > { %v1623_v28 = vpop.permute.xlu1 %1622  ;;  %v1756_v13 = vsub.f32 1.5, %v1755_v21 }
 0x3be   : > { %v7071_v27 = vpop.eup %7070  ;;  %v1645_v12 = vadd.f32 %v1623_v28, %v8735_v37  ;;  %v1851_v10 = vmax.f32 %v1835_v1, 0.0 }
 0x3bf   : > { %v1733_v5 = vmul.f32 %v7071_v27, %v1644_v8  ;;  %vm1739_vm8 = vweird.f32 %v7071_v27  ;;  %v1757_v4 = vmul.f32 %v7069_v39, %v1756_v13 }
 0x3c0   : > { %7072 = vrsqrt.f32 %v1645_v12  ;;  %v9050_v20 = vmul.f32 %v1851_v10, %v8664_v59  ;;  %vm1740_vm10 = vmor %vm1738_vm9, %vm1739_vm8  ;;  %v9057_v59 = vmul.f32 %v1852_v34, %v8684_v32  ;;  %vm1748_vm15 = vweird.f32 %v1645_v12 }
 0x3c1   : > { %v1734_v38 = vmul.f32 %v7071_v27, %v1733_v5  ;;  %v1761_v7 = vsel %vm1760_vm14, %v7069_v39, %v1757_v4 }
 0x3c2   : > { %1928 = vmatmul.f32.gmra.mxu2 %v9050_v20  ;;  %12422 = vst [vmem:[#allocation5_spill] sm:$0xff] %v9057_v59  ;;  %v1823_v14 = vmul.f32 %v8934_v2, %v1761_v7 }
 0x3c3   : > { %v1735_v29 = vmul.f32 0.5, %v1734_v38 }
 0x3c4   : > { %v1839_v39 = vsub.f32 1.0, %v1823_v14 }
 0x3c5   : > { %v1736_v25 = vsub.f32 1.5, %v1735_v29  ;;  %v1631_v51 = vpop.permute.xlu2 %1630 }
 0x3c6   : > { %v7073_v63 = vpop.eup %7072  ;;  %v9054_v18 = vadd.f32 %v1631_v51, %v8816_v61 }
 0x3c7   : > { %v1737_v3 = vmul.f32 %v7071_v27, %v1736_v25  ;;  %v1743_v37 = vmul.f32 %v7073_v63, %v1645_v12  ;;  %vm1749_vm12 = vweird.f32 %v7073_v63  ;;  %v1855_v12 = vmax.f32 %v1839_v39, 0.0 }
 0x3c8   : > { %7074 = vrsqrt.f32 %v9054_v18  ;;  %vm1750_vm0 = vmor %vm1748_vm15, %vm1749_vm12  ;;  %vm1788_vm6 = vweird.f32 %v9054_v18 }
 0x3c9   : > { %v1744_v24 = vmul.f32 %v7073_v63, %v1743_v37  ;;  %v1741_v49 = vsel %vm1740_vm10, %v7071_v27, %v1737_v3  ;;  %v9077_v38 = vmul.f32 %v1855_v12, %v8744_v54 }
 0x3ca   : > { %1931 = vmatmul.f32.gmra.mxu2 %v9057_v59  ;;  %v1821_v35 = vmul.f32 %v8934_v2, %v1741_v49 }
 0x3cb   : > { %v1745_v60 = vmul.f32 0.5, %v1744_v24  ;;  %12425 = vst [vmem:[#allocation8_spill] sm:$0xff] %v9077_v38 }
 0x3cc   : > { %v1837_v16 = vsub.f32 1.0, %v1821_v35 }
 0x3cd   : > { %v1746_v0 = vsub.f32 1.5, %v1745_v60  ;;  %v1627_v61 = vpop.permute.xlu0 %1626 }
 0x3ce   : > { %v1647_v32 = vadd.f32 %v1627_v61, %v8784_v11  ;;  %v1853_v26 = vmax.f32 %v1837_v16, 0.0  ;;  %v7075_v8 = vpop.eup %7074 }
 0x3cf   : > { %v1747_v15 = vmul.f32 %v7073_v63, %v1746_v0  ;;  %v1783_v11 = vmul.f32 %v7075_v8, %v9054_v18  ;;  %vm1789_vm4 = vweird.f32 %v7075_v8 }
 0x3d0   : > { %7076 = vrsqrt.f32 %v1647_v32  ;;  %v9065_v50 = vmul.f32 %v1853_v26, %v8704_v9  ;;  %vm1768_vm2 = vweird.f32 %v1647_v32  ;;  %vm1790_vm7 = vmor %vm1788_vm6, %vm1789_vm4 }
 0x3d1   : > { %v1751_v56 = vsel %vm1750_vm0, %v7073_v63, %v1747_v15  ;;  %v1784_v57 = vmul.f32 %v7075_v8, %v1783_v11 }
 0x3d2   : > { %12423 = vst [vmem:[#allocation6_spill] sm:$0xff] %v9065_v50  ;;  %1934 = vmatmul.f32.gmra.mxu2 %v9065_v50  ;;  %v1822_v19 = vmul.f32 %v8934_v2, %v1751_v56 }
 0x3d3   : > { %v1785_v10 = vmul.f32 0.5, %v1784_v57 }
 0x3d4   : > { %v1838_v42 = vsub.f32 1.0, %v1822_v19 }
 0x3d5   : > { %v1629_v47 = vpop.permute.xlu1 %1628 }
 0x3d6   : > { %v7077_v58 = vpop.eup %7076  ;;  %v1648_v6 = vadd.f32 %v1629_v47, %v8797_v45  ;;  %v1854_v1 = vmax.f32 %v1838_v42, 0.0 }
 0x3d7   : > { %v1763_v22 = vmul.f32 %v7077_v58, %v1647_v32  ;;  %vm1769_vm1 = vweird.f32 %v7077_v58 }
 0x3d8   : > { %7078 = vrsqrt.f32 %v1648_v6  ;;  %v9073_v9 = vmul.f32 %v1854_v1, %v8724_v23  ;;  %vm1770_vm3 = vmor %vm1768_vm2, %vm1769_vm1  ;;  %v1786_v23 = vsub.f32 1.5, %v1785_v10  ;;  %vm1778_vm8 = vweird.f32 %v1648_v6 }
 0x3d9   : > { %v1764_v28 = vmul.f32 %v7077_v58, %v1763_v22 }
 0x3da   : > { %12424 = vst [vmem:[#allocation7_spill] sm:$0xff] %v9073_v9  ;;  %1937 = vmatmul.f32.gmra.mxu2 %v9073_v9  ;;  %v1787_v63 = vmul.f32 %v7075_v8, %v1786_v23 }
 0x3db   : > { %v1765_v27 = vmul.f32 0.5, %v1764_v28 }
 0x3dc   : > { %v1791_v60 = vsel %vm1790_vm7, %v7075_v8, %v1787_v63 }
 0x3dd   : > { %v1766_v5 = vsub.f32 1.5, %v1765_v27  ;;  %v1826_v18 = vmul.f32 %v8934_v2, %v1791_v60 }
 0x3de   : > { %v7079_v36 = vpop.eup %7078 }
 0x3df   : > { %v1767_v52 = vmul.f32 %v7077_v58, %v1766_v5  ;;  %v1773_v45 = vmul.f32 %v7079_v36, %v1648_v6  ;;  %vm1779_vm5 = vweird.f32 %v7079_v36 }
 0x3e0   : > { %vm1780_vm9 = vmor %vm1778_vm8, %vm1779_vm5 }
 0x3e1   : > { %v1774_v29 = vmul.f32 %v7079_v36, %v1773_v45  ;;  %v1771_v34 = vsel %vm1770_vm3, %v7077_v58, %v1767_v52 }
 0x3e2   : > { %1940 = vmatmul.f32.gmra.mxu2 %v9077_v38  ;;  %v1824_v21 = vmul.f32 %v8934_v2, %v1771_v34 }
 0x3e3   : > { %v1775_v25 = vmul.f32 0.5, %v1774_v29 }
 0x3e4   : > { %v1840_v51 = vsub.f32 1.0, %v1824_v21 }
 0x3e5   : > { %v1776_v3 = vsub.f32 1.5, %v1775_v25  ;;  %v1633_v37 = vpop.permute.xlu0 %1632 }
 0x3e6   : > { %v1650_v13 = vadd.f32 %v1633_v37, %v8833_v30  ;;  %v1856_v54 = vmax.f32 %v1840_v51, 0.0 }
 0x3e7   : > { %v1777_v24 = vmul.f32 %v7079_v36, %v1776_v3 }
 0x3e8   : > { %7080 = vrsqrt.f32 %v1650_v13  ;;  %v9084_v49 = vmul.f32 %v1856_v54, %v8773_v48  ;;  %v1842_v48 = vsub.f32 1.0, %v1826_v18  ;;  %vm1798_vm11 = vweird.f32 %v1650_v13 }
 0x3e9   : > { %v1781_v35 = vsel %vm1780_vm9, %v7079_v36, %v1777_v24 }
 0x3ea   : > { %12426 = vst [vmem:[#allocation9_spill] sm:$0xff] %v9084_v49  ;;  %1943 = vmatmul.f32.gmra.mxu2 %v9084_v49  ;;  %v1825_v16 = vmul.f32 %v8934_v2, %v1781_v35  ;;  %v1858_v8 = vmax.f32 %v1842_v48, 0.0 }
 0x3ec   : > { %v1841_v4 = vsub.f32 1.0, %v1825_v16 }
 0x3ed   : > { %v1635_v0 = vpop.permute.xlu1 %1634 }
 0x3ee   : > { %v7081_v30 = vpop.eup %7080  ;;  %v1651_v61 = vadd.f32 %v1635_v0, %v8870_v40  ;;  %v1857_v32 = vmax.f32 %v1841_v4, 0.0  ;;  %v9095_v40 = vmul.f32 %v1858_v8, %v8803_v33 }
 0x3ef   : > { %v1793_v26 = vmul.f32 %v7081_v30, %v1650_v13  ;;  %vm1799_vm10 = vweird.f32 %v7081_v30 }
 0x3f0   : > { %7082 = vrsqrt.f32 %v1651_v61  ;;  %v9091_v15 = vmul.f32 %v1857_v32, %v8790_v55  ;;  %vm1800_vm12 = vmor %vm1798_vm11, %vm1799_vm10  ;;  %12428 = vst [vmem:[#allocation11_spill] sm:$0xff] %v9095_v40  ;;  %vm1808_vm14 = vweird.f32 %v1651_v61 }
 0x3f1   : > { %v1794_v56 = vmul.f32 %v7081_v30, %v1793_v26 }
 0x3f2   : > { %12427 = vst [vmem:[#allocation10_spill] sm:$0xff] %v9091_v15  ;;  %1946 = vmatmul.f32.gmra.mxu2 %v9091_v15 }
 0x3f3   : > { %v1795_v7 = vmul.f32 0.5, %v1794_v56 }
 0x3f5   : > { %v1796_v19 = vsub.f32 1.5, %v1795_v7 }
 0x3f6   : > { %v7083_v42 = vpop.eup %7082 }
 0x3f7   : > { %v1797_v14 = vmul.f32 %v7081_v30, %v1796_v19  ;;  %v1803_v11 = vmul.f32 %v7083_v42, %v1651_v61  ;;  %vm1809_vm13 = vweird.f32 %v7083_v42 }
 0x3f8   : > { %vm1810_vm15 = vmor %vm1808_vm14, %vm1809_vm13 }
 0x3f9   : > { %v1804_v47 = vmul.f32 %v7083_v42, %v1803_v11  ;;  %v1801_v58 = vsel %vm1800_vm12, %v7081_v30, %v1797_v14 }
 0x3fa   : > { %1949 = vmatmul.f32.gmra.mxu2 %v9095_v40  ;;  %v1827_v55 = vmul.f32 %v8934_v2, %v1801_v58 }
 0x3fb   : > { %v1805_v6 = vmul.f32 0.5, %v1804_v47 }
 0x3fc   : > { %v1843_v1 = vsub.f32 1.0, %v1827_v55 }
 0x3fd   : > { %v1806_v22 = vsub.f32 1.5, %v1805_v6 }
 0x3fe   : > { %v1859_v39 = vmax.f32 %v1843_v1, 0.0 }
 0x3ff   : > { %v1807_v57 = vmul.f32 %v7083_v42, %v1806_v22 }
 0x400   : > { %v9100_v28 = vmul.f32 %v1859_v39, %v8826_v53 }
 0x401   : > { %v1811_v27 = vsel %vm1810_vm15, %v7083_v42, %v1807_v57 }
 0x402   : > { %12429 = vst [vmem:[#allocation12_spill] sm:$0xff] %v9100_v28  ;;  %1952 = vmatmul.f32.gmra.mxu2 %v9100_v28  ;;  %v1828_v33 = vmul.f32 %v8934_v2, %v1811_v27 }
 0x404   : > { %v1844_v12 = vsub.f32 1.0, %v1828_v33 }
 0x406   : > { %v1860_v10 = vmax.f32 %v1844_v12, 0.0 }
 0x408   : > { %v9105_v5 = vmul.f32 %v1860_v10, %v8859_v17 }
 0x40a   : > { %12430 = vst [vmem:[#allocation13_spill] sm:$0xff] %v9105_v5  ;;  %1955 = vmatmul.f32.gmra.mxu2 %v9105_v5 }
 0x415   : > { %v9108_v36 = vpop.f32.mrf.mxu2 }
 0x416   : > { %v2027_v52 = vmul.f32 %v9108_v36, %v9108_v36  ;;  %1978 = vmatmul.f32.vlgmr.msrb.gmra.mxu3 %v9108_v36 }
 0x418   : > { %2059 = vmatmul.f32.vlgmr.msra.gmra.mxu0 %v2027_v52 }
 0x41d   : > { %v9113_v53 = vpop.f32.mrf.mxu2 }
 0x41e   : > { %1981 = vmatmul.f32.gmra.mxu3 %v9113_v53  ;;  %v2028_v2 = vmul.f32 %v9113_v53, %v9113_v53 }
 0x420   : > { %2062 = vmatmul.f32.gmra.mxu0 %v2028_v2 }
 0x425   : > { %v9118_v17 = vpop.f32.mrf.mxu2 }
 0x426   : > { %1984 = vmatmul.f32.gmra.mxu3 %v9118_v17  ;;  %v2029_v45 = vmul.f32 %v9118_v17, %v9118_v17 }
 0x428   : > { %2065 = vmatmul.f32.gmra.mxu0 %v2029_v45 }
 0x42d   : > { %v9123_v23 = vpop.f32.mrf.mxu2 }
 0x42e   : > { %1987 = vmatmul.f32.gmra.mxu3 %v9123_v23  ;;  %v2030_v29 = vmul.f32 %v9123_v23, %v9123_v23 }
 0x430   : > { %2068 = vmatmul.f32.gmra.mxu0 %v2030_v29 }
 0x435   : > { %v9128_v34 = vpop.f32.mrf.mxu2 }
 0x436   : > { %1990 = vmatmul.f32.gmra.mxu3 %v9128_v34  ;;  %v2031_v21 = vmul.f32 %v9128_v34, %v9128_v34 }
 0x438   : > { %2071 = vmatmul.f32.gmra.mxu0 %v2031_v21 }
 0x43d   : > { %v9133_v25 = vpop.f32.mrf.mxu2 }
 0x43e   : > { %1993 = vmatmul.f32.gmra.mxu3 %v9133_v25  ;;  %v2032_v51 = vmul.f32 %v9133_v25, %v9133_v25 }
 0x440   : > { %2074 = vmatmul.f32.gmra.mxu0 %v2032_v51  ;;  %v9195_v51 = vld [vmem:[%s12392_s3 + $0x4] ss:$0 sm:$0xff] }
 0x445   : > { %v9138_v63 = vpop.f32.mrf.mxu2 }
 0x446   : > { %1996 = vmatmul.f32.gmra.mxu3 %v9138_v63  ;;  %v2033_v3 = vmul.f32 %v9138_v63, %v9138_v63 }
 0x448   : > { %2077 = vmatmul.f32.gmra.mxu0 %v2033_v3 }
 0x44d   : > { %v9143_v37 = vpop.f32.mrf.mxu2 }
 0x44e   : > { %1999 = vmatmul.f32.gmra.mxu3 %v9143_v37  ;;  %v2034_v13 = vmul.f32 %v9143_v37, %v9143_v37 }
 0x450   : > { %2080 = vmatmul.f32.gmra.mxu0 %v2034_v13 }
 0x455   : > { %v9148_v54 = vpop.f32.mrf.mxu2 }
 0x456   : > { %2002 = vmatmul.f32.gmra.mxu3 %v9148_v54  ;;  %v2035_v24 = vmul.f32 %v9148_v54, %v9148_v54 }
 0x458   : > { %2083 = vmatmul.f32.gmra.mxu0 %v2035_v24 }
 0x45d   : > { %v9153_v35 = vpop.f32.mrf.mxu2 }
 0x45e   : > { %2005 = vmatmul.f32.gmra.mxu3 %v9153_v35  ;;  %v2036_v60 = vmul.f32 %v9153_v35, %v9153_v35 }
 0x460   : > { %2086 = vmatmul.f32.gmra.mxu0 %v2036_v60 }
 0x465   : > { %v9158_v16 = vpop.f32.mrf.mxu2 }
 0x466   : > { %2008 = vmatmul.f32.gmra.mxu3 %v9158_v16  ;;  %v2037_v4 = vmul.f32 %v9158_v16, %v9158_v16 }
 0x468   : > { %2089 = vmatmul.f32.gmra.mxu0 %v2037_v4 }
 0x46d   : > { %v9163_v18 = vpop.f32.mrf.mxu2 }
 0x46e   : > { %2011 = vmatmul.f32.gmra.mxu3 %v9163_v18  ;;  %v2038_v0 = vmul.f32 %v9163_v18, %v9163_v18 }
 0x470   : > { %2092 = vmatmul.f32.gmra.mxu0 %v2038_v0 }
 0x475   : > { %v9168_v30 = vpop.f32.mrf.mxu2 }
 0x476   : > { %2014 = vmatmul.f32.gmra.mxu3 %v9168_v30  ;;  %v2039_v61 = vmul.f32 %v9168_v30, %v9168_v30 }
 0x478   : > { %2095 = vmatmul.f32.gmra.mxu0 %v2039_v61 }
 0x47d   : > { %v9173_v32 = vpop.f32.mrf.mxu2 }
 0x47e   : > { %2017 = vmatmul.f32.gmra.mxu3 %v9173_v32  ;;  %v2040_v26 = vmul.f32 %v9173_v32, %v9173_v32 }
 0x480   : > { %2098 = vmatmul.f32.gmra.mxu0 %v2040_v26 }
 0x485   : > { %v9178_v48 = vpop.f32.mrf.mxu2 }
 0x486   : > { %2020 = vmatmul.f32.gmra.mxu3 %v9178_v48  ;;  %v2041_v56 = vmul.f32 %v9178_v48, %v9178_v48 }
 0x488   : > { %2101 = vmatmul.f32.gmra.mxu0 %v2041_v56 }
 0x48d   : > { %v9183_v7 = vpop.f32.mrf.mxu2 }
 0x48e   : > { %2023 = vmatmul.f32.gmra.mxu3 %v9183_v7  ;;  %v2042_v8 = vmul.f32 %v9183_v7, %v9183_v7 }
 0x490   : > { %2104 = vmatmul.f32.gmra.mxu0 %v2042_v8  ;;  %v9206_v8 = vld [vmem:[%s12392_s3 + $0x5] ss:$0 sm:$0xff] }
 0x495   : > { %v2060_v19 = vpop.f32.mrf.mxu0 }
 0x499   : > { %v1979_v42 = vpop.f32.mrf.mxu3 }
 0x49a   : > { %v2108_v14 = vmul.f32 %v1979_v42, %v1979_v42  ;;  %v2316_v61 = vsub.f32 %v9108_v36, %v1979_v42 }
 0x49c   : > { %v2124_v11 = vsub.f32 %v2060_v19, %v2108_v14 }
 0x49d   : > { %v2063_v47 = vpop.f32.mrf.mxu0 }
 0x49e   : > { %v2140_v58 = vadd.f32 1e-05, %v2124_v11 }
 0x4a0   : > { %7084 = vrsqrt.f32 %v2140_v58  ;;  %vm2162_vm1 = vweird.f32 %v2140_v58 }
 0x4a1   : > { %v1982_v55 = vpop.f32.mrf.mxu3 }
 0x4a2   : > { %v2109_v6 = vmul.f32 %v1982_v55, %v1982_v55 }
 0x4a4   : > { %v2125_v1 = vsub.f32 %v2063_v47, %v2109_v6 }
 0x4a5   : > { %v2066_v22 = vpop.f32.mrf.mxu0 }
 0x4a6   : > { %v7085_v39 = vpop.eup %7084  ;;  %v2141_v57 = vadd.f32 1e-05, %v2125_v1 }
 0x4a7   : > { %v2157_v27 = vmul.f32 %v7085_v39, %v2140_v58  ;;  %vm2163_vm0 = vweird.f32 %v7085_v39 }
 0x4a8   : > { %7086 = vrsqrt.f32 %v2141_v57  ;;  %vm2164_vm2 = vmor %vm2162_vm1, %vm2163_vm0  ;;  %vm2172_vm4 = vweird.f32 %v2141_v57 }
 0x4a9   : > { %v2158_v33 = vmul.f32 %v7085_v39, %v2157_v27  ;;  %v9188_v12 = vpop.f32.mrf.mxu3 }
 0x4aa   : > { %v2110_v10 = vmul.f32 %v9188_v12, %v9188_v12 }
 0x4ab   : > { %v2159_v52 = vmul.f32 0.5, %v2158_v33 }
 0x4ac   : > { %v2126_v2 = vsub.f32 %v2066_v22, %v2110_v10 }
 0x4ad   : > { %v2160_v45 = vsub.f32 1.5, %v2159_v52  ;;  %v2069_v29 = vpop.f32.mrf.mxu0  ;;  %v2317_v52 = vsub.f32 %v9113_v53, %v1982_v55 }
 0x4ae   : > { %v7087_v21 = vpop.eup %7086  ;;  %v2142_v3 = vadd.f32 1e-05, %v2126_v2 }
 0x4af   : > { %v2161_v13 = vmul.f32 %v7085_v39, %v2160_v45  ;;  %v2167_v24 = vmul.f32 %v7087_v21, %v2141_v57  ;;  %vm2173_vm3 = vweird.f32 %v7087_v21 }
 0x4b0   : > { %7088 = vrsqrt.f32 %v2142_v3  ;;  %vm2174_vm5 = vmor %vm2172_vm4, %vm2173_vm3  ;;  %vm2182_vm7 = vweird.f32 %v2142_v3 }
 0x4b1   : > { %v2165_v60 = vsel %vm2164_vm2, %v7085_v39, %v2161_v13  ;;  %v2168_v4 = vmul.f32 %v7087_v21, %v2167_v24  ;;  %v9197_v0 = vpop.f32.mrf.mxu3 }
 0x4b2   : > { %v2333_v26 = vmul.f32 %v9195_v51, %v2165_v60  ;;  %v2111_v56 = vmul.f32 %v9197_v0, %v9197_v0 }
 0x4b3   : > { %v2169_v19 = vmul.f32 0.5, %v2168_v4 }
 0x4b4   : > { %v2349_v14 = vmul.f32 %v2333_v26, %v2316_v61  ;;  %v2127_v11 = vsub.f32 %v2069_v29, %v2111_v56 }
 0x4b5   : > { %v2170_v47 = vsub.f32 1.5, %v2169_v19  ;;  %v2072_v58 = vpop.f32.mrf.mxu0 }
 0x4b6   : > { %v7089_v6 = vpop.eup %7088  ;;  %v2143_v1 = vadd.f32 1e-05, %v2127_v11  ;;  %v9209_v36 = vadd.f32 %v9206_v8, %v2349_v14  ;;  %v2318_v11 = vsub.f32 %v9118_v17, %v9188_v12 }
 0x4b7   : > { %v2171_v42 = vmul.f32 %v7087_v21, %v2170_v47  ;;  %v2177_v22 = vmul.f32 %v7089_v6, %v2142_v3  ;;  %vm2183_vm6 = vweird.f32 %v7089_v6 }
 0x4b8   : > { %7090 = vrsqrt.f32 %v2143_v1  ;;  %v9213_v39 = vmul.f32 %v9209_v36, %v9209_v36  ;;  %vm2184_vm8 = vmor %vm2182_vm7, %vm2183_vm6  ;;  %vm2192_vm10 = vweird.f32 %v2143_v1 }
 0x4b9   : > { %v2175_v27 = vsel %vm2174_vm5, %v7087_v21, %v2171_v42  ;;  %v2178_v33 = vmul.f32 %v7089_v6, %v2177_v22  ;;  %v9215_v10 = vpop.f32.mrf.mxu3 }
 0x4ba   : > { %v2334_v2 = vmul.f32 %v9195_v51, %v2175_v27  ;;  %v2112_v45 = vmul.f32 %v9215_v10, %v9215_v10  ;;  %2399 = vrot.lane.b32.xlu2 %v9213_v39, %s7608_s30 }
 0x4bb   : > { %v2179_v57 = vmul.f32 0.5, %v2178_v33 }
 0x4bc   : > { %v2350_v29 = vmul.f32 %v2334_v2, %v2317_v52  ;;  %v2128_v13 = vsub.f32 %v2072_v58, %v2112_v45 }
 0x4bd   : > { %v2180_v24 = vsub.f32 1.5, %v2179_v57  ;;  %v2075_v60 = vpop.f32.mrf.mxu0 }
 0x4be   : > { %v7091_v21 = vpop.eup %7090  ;;  %v2144_v4 = vadd.f32 1e-05, %v2128_v13  ;;  %v9224_v61 = vadd.f32 %v9206_v8, %v2350_v29 }
 0x4bf   : > { %v2181_v53 = vmul.f32 %v7089_v6, %v2180_v24  ;;  %v2187_v55 = vmul.f32 %v7091_v21, %v2143_v1  ;;  %vm2193_vm9 = vweird.f32 %v7091_v21 }
 0x4c0   : > { %7092 = vrsqrt.f32 %v2144_v4  ;;  %v9228_v26 = vmul.f32 %v9224_v61, %v9224_v61  ;;  %vm2194_vm11 = vmor %vm2192_vm10, %vm2193_vm9  ;;  %vm2202_vm13 = vweird.f32 %v2144_v4 }
 0x4c1   : > { %v2185_v56 = vsel %vm2184_vm8, %v7089_v6, %v2181_v53  ;;  %v2188_v19 = vmul.f32 %v7091_v21, %v2187_v55  ;;  %v9230_v14 = vpop.f32.mrf.mxu3  ;;  %v6838_v6 = vld [vmem:[%s12391_s2 + $0x1f8] sm:$0xff] }
 0x4c2   : > { %v2335_v47 = vmul.f32 %v9195_v51, %v2185_v56  ;;  %v2113_v58 = vmul.f32 %v9230_v14, %v9230_v14  ;;  %2401 = vrot.lane.b32.xlu0 %v9228_v26, %s7608_s30  ;;  %2689 = vmatpush.msra.mxu1 %v6838_v6 }
 0x4c3   : > { %v2189_v3 = vmul.f32 0.5, %v2188_v19 }
 0x4c4   : > { %v2351_v42 = vmul.f32 %v2335_v47, %v2318_v11  ;;  %v2129_v22 = vsub.f32 %v2075_v60, %v2113_v58  ;;  %v2319_v60 = vsub.f32 %v9123_v23, %v9197_v0 }
 0x4c5   : > { %v2190_v27 = vsub.f32 1.5, %v2189_v3  ;;  %v2078_v33 = vpop.f32.mrf.mxu0 }
 0x4c6   : > { %v7093_v17 = vpop.eup %7092  ;;  %v2145_v12 = vadd.f32 1e-05, %v2129_v22  ;;  %v9243_v52 = vadd.f32 %v9206_v8, %v2351_v42 }
 0x4c7   : > { %v2191_v2 = vmul.f32 %v7091_v21, %v2190_v27  ;;  %v2197_v45 = vmul.f32 %v7093_v17, %v2144_v4  ;;  %vm2203_vm12 = vweird.f32 %v7093_v17 }
 0x4c8   : > { %7094 = vrsqrt.f32 %v2145_v12  ;;  %v9247_v57 = vmul.f32 %v9243_v52, %v9243_v52  ;;  %vm2204_vm14 = vmor %vm2202_vm13, %vm2203_vm12  ;;  %vm2212_vm0 = vweird.f32 %v2145_v12 }
 0x4c9   : > { %v2195_v29 = vsel %vm2194_vm11, %v7091_v21, %v2191_v2  ;;  %v2198_v13 = vmul.f32 %v7093_v17, %v2197_v45  ;;  %v9249_v24 = vpop.f32.mrf.mxu3  ;;  %v6837_v21 = vld [vmem:[%s12391_s2 + $0x1f0] sm:$0xff]  ;;  %v2320_v2 = vsub.f32 %v9128_v34, %v9215_v10 }
 0x4ca   : > { %v2336_v53 = vmul.f32 %v9195_v51, %v2195_v29  ;;  %v2114_v55 = vmul.f32 %v9249_v24, %v9249_v24  ;;  %2403 = vrot.lane.b32.xlu1 %v9247_v57, %s7608_s30  ;;  %2690 = vmatpush.msra.mxu1 %v6837_v21 }
 0x4cb   : > { %v2199_v1 = vmul.f32 0.5, %v2198_v13 }
 0x4cc   : > { %v2352_v56 = vmul.f32 %v2336_v53, %v2319_v60  ;;  %v2130_v19 = vsub.f32 %v2078_v33, %v2114_v55 }
 0x4cd   : > { %v2200_v11 = vsub.f32 1.5, %v2199_v1  ;;  %v2081_v47 = vpop.f32.mrf.mxu0 }
 0x4ce   : > { %v7095_v23 = vpop.eup %7094  ;;  %v2146_v0 = vadd.f32 1e-05, %v2130_v19  ;;  %v9262_v58 = vadd.f32 %v9206_v8, %v2352_v56 }
 0x4cf   : > { %v2201_v3 = vmul.f32 %v7093_v17, %v2200_v11  ;;  %v2207_v42 = vmul.f32 %v7095_v23, %v2145_v12  ;;  %vm2213_vm15 = vweird.f32 %v7095_v23 }
 0x4d0   : > { %7096 = vrsqrt.f32 %v2146_v0  ;;  %v9266_v22 = vmul.f32 %v9262_v58, %v9262_v58  ;;  %vm2214_vm1 = vmor %vm2212_vm0, %vm2213_vm15  ;;  %vm2222_vm3 = vweird.f32 %v2146_v0 }
 0x4d1   : > { %v2205_v6 = vsel %vm2204_vm14, %v7093_v17, %v2201_v3  ;;  %v2208_v27 = vmul.f32 %v7095_v23, %v2207_v42  ;;  %v9268_v33 = vpop.f32.mrf.mxu3  ;;  %v6836_v17 = vld [vmem:[%s12391_s2 + $0x1e8] sm:$0xff]  ;;  %v2321_v42 = vsub.f32 %v9133_v25, %v9230_v14 }
 0x4d2   : > { %v2337_v45 = vmul.f32 %v9195_v51, %v2205_v6  ;;  %v2115_v29 = vmul.f32 %v9268_v33, %v9268_v33  ;;  %2405 = vrot.lane.b32.xlu2 %v9266_v22, %s7608_s30  ;;  %2691 = vmatpush.msra.mxu1 %v6836_v17 }
 0x4d3   : > { %v2209_v4 = vmul.f32 0.5, %v2208_v27 }
 0x4d4   : > { %v2353_v13 = vmul.f32 %v2337_v45, %v2320_v2  ;;  %v2131_v60 = vsub.f32 %v2081_v47, %v2115_v29 }
 0x4d5   : > { %v2210_v53 = vsub.f32 1.5, %v2209_v4  ;;  %v2084_v55 = vpop.f32.mrf.mxu0 }
 0x4d6   : > { %v7097_v34 = vpop.eup %7096  ;;  %v2147_v10 = vadd.f32 1e-05, %v2131_v60  ;;  %v9281_v1 = vadd.f32 %v9206_v8, %v2353_v13 }
 0x4d7   : > { %v2211_v56 = vmul.f32 %v7095_v23, %v2210_v53  ;;  %v2217_v19 = vmul.f32 %v7097_v34, %v2146_v0  ;;  %vm2223_vm2 = vweird.f32 %v7097_v34 }
 0x4d8   : > { %7098 = vrsqrt.f32 %v2147_v10  ;;  %v9285_v21 = vmul.f32 %v9281_v1, %v9281_v1  ;;  %vm2224_vm4 = vmor %vm2222_vm3, %vm2223_vm2  ;;  %vm2232_vm6 = vweird.f32 %v2147_v10 }
 0x4d9   : > { %v2215_v11 = vsel %vm2214_vm1, %v7095_v23, %v2211_v56  ;;  %v2218_v47 = vmul.f32 %v7097_v34, %v2217_v19  ;;  %v9287_v3 = vpop.f32.mrf.mxu3  ;;  %v6835_v23 = vld [vmem:[%s12391_s2 + $0x1e0] sm:$0xff] }
 0x4da   : > { %v2338_v6 = vmul.f32 %v9195_v51, %v2215_v11  ;;  %v2116_v27 = vmul.f32 %v9287_v3, %v9287_v3  ;;  %2407 = vrot.lane.b32.xlu0 %v9285_v21, %s7608_s30  ;;  %2692 = vmatpush.msra.mxu1 %v6835_v23  ;;  %v2322_v11 = vsub.f32 %v9138_v63, %v9249_v24 }
 0x4db   : > { %v2219_v12 = vmul.f32 0.5, %v2218_v47 }
 0x4dc   : > { %v2354_v2 = vmul.f32 %v2338_v6, %v2321_v42  ;;  %v2132_v45 = vsub.f32 %v2084_v55, %v2116_v27 }
 0x4dd   : > { %v2220_v29 = vsub.f32 1.5, %v2219_v12  ;;  %v2087_v4 = vpop.f32.mrf.mxu0 }
 0x4de   : > { %v7099_v25 = vpop.eup %7098  ;;  %v2148_v14 = vadd.f32 1e-05, %v2132_v45  ;;  %v9300_v13 = vadd.f32 %v9206_v8, %v2354_v2 }
 0x4df   : > { %v2221_v60 = vmul.f32 %v7097_v34, %v2220_v29  ;;  %v2227_v17 = vmul.f32 %v7099_v25, %v2147_v10  ;;  %vm2233_vm5 = vweird.f32 %v7099_v25 }
 0x4e0   : > { %7100 = vrsqrt.f32 %v2148_v14  ;;  %v9304_v53 = vmul.f32 %v9300_v13, %v9300_v13  ;;  %vm2234_vm7 = vmor %vm2232_vm6, %vm2233_vm5  ;;  %vm2242_vm9 = vweird.f32 %v2148_v14 }
 0x4e1   : > { %v2225_v55 = vsel %vm2224_vm4, %v7097_v34, %v2221_v60  ;;  %v2228_v56 = vmul.f32 %v7099_v25, %v2227_v17  ;;  %v9306_v19 = vpop.f32.mrf.mxu3  ;;  %v6834_v34 = vld [vmem:[%s12391_s2 + $0x1d8] sm:$0xff] }
 0x4e2   : > { %v2339_v47 = vmul.f32 %v9195_v51, %v2225_v55  ;;  %v2117_v42 = vmul.f32 %v9306_v19, %v9306_v19  ;;  %2409 = vrot.lane.b32.xlu1 %v9304_v53, %s7608_s30  ;;  %2693 = vmatpush.msra.mxu1 %v6834_v34 }
 0x4e3   : > { %v2229_v0 = vmul.f32 0.5, %v2228_v56  ;;  %v2323_v56 = vsub.f32 %v9143_v37, %v9268_v33 }
 0x4e4   : > { %v2355_v6 = vmul.f32 %v2339_v47, %v2322_v11  ;;  %v2133_v27 = vsub.f32 %v2087_v4, %v2117_v42 }
 0x4e5   : > { %v2230_v12 = vsub.f32 1.5, %v2229_v0  ;;  %v2090_v2 = vpop.f32.mrf.mxu0 }
 0x4e6   : > { %v7101_v63 = vpop.eup %7100  ;;  %v2149_v24 = vadd.f32 1e-05, %v2133_v27  ;;  %v9319_v45 = vadd.f32 %v9206_v8, %v2355_v6 }
 0x4e7   : > { %v2231_v23 = vmul.f32 %v7099_v25, %v2230_v12  ;;  %v2237_v29 = vmul.f32 %v7101_v63, %v2148_v14  ;;  %vm2243_vm8 = vweird.f32 %v7101_v63 }
 0x4e8   : > { %7102 = vrsqrt.f32 %v2149_v24  ;;  %v9323_v4 = vmul.f32 %v9319_v45, %v9319_v45  ;;  %vm2244_vm10 = vmor %vm2242_vm9, %vm2243_vm8  ;;  %vm2252_vm12 = vweird.f32 %v2149_v24 }
 0x4e9   : > { %v2235_v60 = vsel %vm2234_vm7, %v7099_v25, %v2231_v23  ;;  %v2238_v17 = vmul.f32 %v7101_v63, %v2237_v29  ;;  %v9325_v55 = vpop.f32.mrf.mxu3  ;;  %v6833_v25 = vld [vmem:[%s12391_s2 + $0x1d0] sm:$0xff] }
 0x4ea   : > { %v2340_v11 = vmul.f32 %v9195_v51, %v2235_v60  ;;  %v2118_v47 = vmul.f32 %v9325_v55, %v9325_v55  ;;  %2411 = vrot.lane.b32.xlu2 %v9323_v4, %s7608_s30  ;;  %2694 = vmatpush.msra.mxu1 %v6833_v25 }
 0x4eb   : > { %v2239_v10 = vmul.f32 0.5, %v2238_v17 }
 0x4ec   : > { %v2356_v42 = vmul.f32 %v2340_v11, %v2323_v56  ;;  %v2134_v0 = vsub.f32 %v2090_v2, %v2118_v47  ;;  %v2324_v56 = vsub.f32 %v9148_v54, %v9287_v3 }
 0x4ed   : > { %v2240_v6 = vsub.f32 1.5, %v2239_v10  ;;  %v2093_v27 = vpop.f32.mrf.mxu0 }
 0x4ee   : > { %v7103_v37 = vpop.eup %7102  ;;  %v2150_v33 = vadd.f32 1e-05, %v2134_v0  ;;  %v9338_v34 = vadd.f32 %v9206_v8, %v2356_v42 }
 0x4ef   : > { %v2241_v12 = vmul.f32 %v7101_v63, %v2240_v6  ;;  %v2247_v23 = vmul.f32 %v7103_v37, %v2149_v24  ;;  %vm2253_vm11 = vweird.f32 %v7103_v37 }
 0x4f0   : > { %7104 = vrsqrt.f32 %v2150_v33  ;;  %v9342_v2 = vmul.f32 %v9338_v34, %v9338_v34  ;;  %vm2254_vm13 = vmor %vm2252_vm12, %vm2253_vm11  ;;  %vm2262_vm15 = vweird.f32 %v2150_v33 }
 0x4f1   : > { %v2245_v29 = vsel %vm2244_vm10, %v7101_v63, %v2241_v12  ;;  %v2248_v60 = vmul.f32 %v7103_v37, %v2247_v23  ;;  %v9344_v17 = vpop.f32.mrf.mxu3  ;;  %v6832_v63 = vld [vmem:[%s12391_s2 + $0x1c8] sm:$0xff] }
 0x4f2   : > { %v2341_v11 = vmul.f32 %v9195_v51, %v2245_v29  ;;  %v2119_v47 = vmul.f32 %v9344_v17, %v9344_v17  ;;  %2413 = vrot.lane.b32.xlu0 %v9342_v2, %s7608_s30  ;;  %2695 = vmatpush.msra.mxu1 %v6832_v63 }
 0x4f3   : > { %v2249_v14 = vmul.f32 0.5, %v2248_v60 }
 0x4f4   : > { %v2357_v10 = vmul.f32 %v2341_v11, %v2324_v56  ;;  %v2135_v42 = vsub.f32 %v2093_v27, %v2119_v47  ;;  %v2325_v11 = vsub.f32 %v9153_v35, %v9306_v19 }
 0x4f5   : > { %v2250_v0 = vsub.f32 1.5, %v2249_v14  ;;  %v2096_v25 = vpop.f32.mrf.mxu0 }
 0x4f6   : > { %v7105_v54 = vpop.eup %7104  ;;  %v2151_v3 = vadd.f32 1e-05, %v2135_v42  ;;  %v9357_v6 = vadd.f32 %v9206_v8, %v2357_v10 }
 0x4f7   : > { %v2251_v12 = vmul.f32 %v7103_v37, %v2250_v0  ;;  %v2257_v23 = vmul.f32 %v7105_v54, %v2150_v33  ;;  %vm2263_vm14 = vweird.f32 %v7105_v54 }
 0x4f8   : > { %7106 = vrsqrt.f32 %v2151_v3  ;;  %v9361_v27 = vmul.f32 %v9357_v6, %v9357_v6  ;;  %vm2264_vm0 = vmor %vm2262_vm15, %vm2263_vm14  ;;  %vm2272_vm2 = vweird.f32 %v2151_v3 }
 0x4f9   : > { %v2255_v29 = vsel %vm2254_vm13, %v7103_v37, %v2251_v12  ;;  %v2258_v60 = vmul.f32 %v7105_v54, %v2257_v23  ;;  %v9363_v56 = vpop.f32.mrf.mxu3  ;;  %v6831_v37 = vld [vmem:[%s12391_s2 + $0x1c0] sm:$0xff] }
 0x4fa   : > { %v2342_v47 = vmul.f32 %v9195_v51, %v2255_v29  ;;  %v2120_v14 = vmul.f32 %v9363_v56, %v9363_v56  ;;  %2415 = vrot.lane.b32.xlu1 %v9361_v27, %s7608_s30  ;;  %2696 = vmatpush.msra.mxu1 %v6831_v37 }
 0x4fb   : > { %v2259_v24 = vmul.f32 0.5, %v2258_v60 }
 0x4fc   : > { %v2358_v10 = vmul.f32 %v2342_v47, %v2325_v11  ;;  %v2136_v42 = vsub.f32 %v2096_v25, %v2120_v14  ;;  %v2326_v14 = vsub.f32 %v9158_v16, %v9325_v55  ;;  %v6829_v16 = vld [vmem:[%s12391_s2 + $0x1b0] sm:$0xff] }
 0x4fd   : > { %v2260_v63 = vsub.f32 1.5, %v2259_v24  ;;  %v2099_v29 = vpop.f32.mrf.mxu0 }
 0x4fe   : > { %v7107_v0 = vpop.eup %7106  ;;  %v9375_v35 = vadd.f32 1e-05, %v2136_v42  ;;  %v9378_v19 = vadd.f32 %v9206_v8, %v2358_v10  ;;  %v6830_v10 = vld [vmem:[%s12391_s2 + $0x1b8] sm:$0xff] }
 0x4ff   : > { %v2261_v12 = vmul.f32 %v7105_v54, %v2260_v63  ;;  %v2267_v23 = vmul.f32 %v7107_v0, %v2151_v3  ;;  %2697 = vmatpush.msra.mxu1 %v6830_v10  ;;  %vm2273_vm1 = vweird.f32 %v7107_v0  ;;  %v2327_v3 = vsub.f32 %v9163_v18, %v9344_v17  ;;  %v6825_v18 = vld [vmem:[%s12391_s2 + $0x190] sm:$0xff] }
 0x500   : > { %7108 = vrsqrt.f32 %v9375_v35  ;;  %v9383_v25 = vmul.f32 %v9378_v19, %v9378_v19  ;;  %vm2274_vm3 = vmor %vm2272_vm2, %vm2273_vm1  ;;  %vm2282_vm5 = vweird.f32 %v9375_v35 }
 0x501   : > { %v2265_v60 = vsel %vm2264_vm0, %v7105_v54, %v2261_v12  ;;  %v2268_v11 = vmul.f32 %v7107_v0, %v2267_v23  ;;  %v9385_v47 = vpop.f32.mrf.mxu3  ;;  %2698 = vmatpush.msra.mxu1 %v6829_v16 }
 0x502   : > { %v2343_v24 = vmul.f32 %v9195_v51, %v2265_v60  ;;  %v2121_v33 = vmul.f32 %v9385_v47, %v9385_v47  ;;  %2417 = vrot.lane.b32.xlu2 %v9383_v25, %s7608_s30  ;;  %v6828_v60 = vld [vmem:[%s12391_s2 + $0x1a8] sm:$0xff] }
 0x503   : > { %v2269_v42 = vmul.f32 0.5, %v2268_v11  ;;  %2699 = vmatpush.msra.mxu1 %v6828_v60 }
 0x504   : > { %v2359_v54 = vmul.f32 %v2343_v24, %v2326_v14  ;;  %v2137_v37 = vsub.f32 %v2099_v29, %v2121_v33  ;;  %v6827_v24 = vld [vmem:[%s12391_s2 + $0x1a0] sm:$0xff] }
 0x505   : > { %v2270_v55 = vsub.f32 1.5, %v2269_v42  ;;  %v2102_v42 = vpop.f32.mrf.mxu0  ;;  %2700 = vmatpush.msra.mxu1 %v6827_v24 }
 0x506   : > { %v7109_v63 = vpop.eup %7108  ;;  %v9400_v12 = vadd.f32 1e-05, %v2137_v37  ;;  %v9403_v23 = vadd.f32 %v9206_v8, %v2359_v54 }
 0x507   : > { %v2271_v11 = vmul.f32 %v7107_v0, %v2270_v55  ;;  %v2277_v29 = vmul.f32 %v7109_v63, %v9375_v35  ;;  %vm2283_vm4 = vweird.f32 %v7109_v63  ;;  %v2328_v35 = vsub.f32 %v9168_v30, %v9363_v56  ;;  %v9468_v56 = vld [vmem:[%s12393_s4 + $0x70] sm:$0xff] }
 0x508   : > { %7110 = vrsqrt.f32 %v9400_v12  ;;  %v9412_v14 = vmul.f32 %v9403_v23, %v9403_v23  ;;  %vm2284_vm6 = vmor %vm2282_vm5, %vm2283_vm4  ;;  %vm2292_vm8 = vweird.f32 %v9400_v12 }
 0x509   : > { %v2275_v33 = vsel %vm2274_vm3, %v7107_v0, %v2271_v11  ;;  %v2278_v10 = vmul.f32 %v7109_v63, %v2277_v29  ;;  %v9417_v54 = vpop.f32.mrf.mxu3  ;;  %v6826_v0 = vld [vmem:[%s12391_s2 + $0x198] sm:$0xff] }
 0x50a   : > { %v2344_v37 = vmul.f32 %v9195_v51, %v2275_v33  ;;  %v2122_v16 = vmul.f32 %v9417_v54, %v9417_v54  ;;  %2419 = vrot.lane.b32.xlu0 %v9412_v14, %s7608_s30  ;;  %2701 = vmatpush.msra.mxu1 %v6826_v0 }
 0x50b   : > { %v2279_v55 = vmul.f32 0.5, %v2278_v10  ;;  %v6824_v10 = vld [vmem:[%s12391_s2 + $0x188] sm:$0xff] }
 0x50c   : > { %v2360_v60 = vmul.f32 %v2344_v37, %v2327_v3  ;;  %v2138_v11 = vsub.f32 %v2102_v42, %v2122_v16  ;;  %2702 = vmatpush.msra.mxu1 %v6825_v18  ;;  %v6823_v37 = vld [vmem:[%s12391_s2 + $0x180] sm:$0xff] }
 0x50d   : > { %v2280_v17 = vsub.f32 1.5, %v2279_v55 }
 0x50e   : > { %v7111_v29 = vpop.eup %7110  ;;  %v9432_v24 = vadd.f32 1e-05, %v2138_v11  ;;  %v9435_v33 = vadd.f32 %v9206_v8, %v2360_v60  ;;  %2703 = vmatpush.msra.mxu1 %v6824_v10  ;;  %v2105_v10 = vpop.f32.mrf.mxu0 }
 0x50f   : > { %v2281_v0 = vmul.f32 %v7109_v63, %v2280_v17  ;;  %v2287_v42 = vmul.f32 %v7111_v29, %v9400_v12  ;;  %v9462_v17 = vld [vmem:[%s12393_s4 + $0x78] sm:$0xff]  ;;  %vm2293_vm7 = vweird.f32 %v7111_v29 }
 0x510   : > { %7112 = vrsqrt.f32 %v9432_v24  ;;  %v9445_v3 = vmul.f32 %v9435_v33, %v9435_v33  ;;  %2704 = vmatpush.msra.mxu1 %v6823_v37  ;;  %vm2294_vm9 = vmor %vm2292_vm8, %vm2293_vm7  ;;  %vm2302_vm11 = vweird.f32 %v9432_v24 }
 0x511   : > { %v2285_v16 = vsel %vm2284_vm6, %v7109_v63, %v2281_v0  ;;  %v2288_v55 = vmul.f32 %v7111_v29, %v2287_v42  ;;  %v9450_v60 = vpop.f32.mrf.mxu3 }
 0x512   : > { %v2345_v11 = vmul.f32 %v9195_v51, %v2285_v16  ;;  %v2123_v18 = vmul.f32 %v9450_v60, %v9450_v60  ;;  %2421 = vrot.lane.b32.xlu1 %v9445_v3, %s7608_s30  ;;  %3567 = vmatpush.msrb.mxu1 %v9462_v17 }
 0x513   : > { %v2289_v63 = vmul.f32 0.5, %v2288_v55 }
 0x514   : > { %v2361_v0 = vmul.f32 %v2345_v11, %v2328_v35  ;;  %v2139_v42 = vsub.f32 %v2105_v10, %v2123_v18  ;;  %v2400_v30 = vpop.permute.xlu2 %2399  ;;  %3568 = vmatpush.msrb.mxu1 %v9468_v56  ;;  %v9482_v35 = vld [vmem:[%s12393_s4 + $0x68] sm:$0xff] }
 0x515   : > { %v2290_v37 = vsub.f32 1.5, %v2289_v63  ;;  %v9472_v16 = vadd.f32 %v2400_v30, %v9213_v39  ;;  %v9496_v63 = vld [vmem:[%s12393_s4 + $0x60] sm:$0xff]  ;;  %v9507_v30 = vld [vmem:[%s12393_s4 + $0x58] sm:$0xff] }
 0x516   : > { %v7113_v5 = vpop.eup %7112  ;;  %v9474_v28 = vadd.f32 1e-05, %v2139_v42  ;;  %v9477_v55 = vadd.f32 %v9206_v8, %v2361_v0  ;;  %3569 = vmatpush.msrb.mxu1 %v9482_v35  ;;  %v2329_v0 = vsub.f32 %v9173_v32, %v9385_v47 }
 0x517   : > { %v2291_v11 = vmul.f32 %v7111_v29, %v2290_v37  ;;  %v2297_v18 = vmul.f32 %v7113_v5, %v9432_v24  ;;  %7114 = vrsqrt.f32 %v9472_v16  ;;  %vm2303_vm10 = vweird.f32 %v7113_v5 }
 0x518   : > { %7116 = vrsqrt.f32 %v9474_v28  ;;  %v9491_v39 = vmul.f32 %v9477_v55, %v9477_v55  ;;  %3570 = vmatpush.msrb.mxu1 %v9496_v63  ;;  %vm2304_vm12 = vmor %vm2302_vm11, %vm2303_vm10  ;;  %v2330_v24 = vsub.f32 %v9178_v48, %v9417_v54  ;;  %v9552_v48 = vld [vmem:[%s12393_s4 + $0x30] sm:$0xff]  ;;  %v9555_v54 = vstv %s6822_s28 }
 0x519   : > { %v2295_v10 = vsel %vm2294_vm9, %v7111_v29, %v2291_v11  ;;  %v2298_v12 = vmul.f32 %v7113_v5, %v2297_v18  ;;  %v9513_v29 = vld [vmem:[%s12393_s4 + $0x50] sm:$0xff]  ;;  %vm2453_vm15 = vweird.f32 %v9472_v16  ;;  %vm2312_vm0 = vweird.f32 %v9474_v28 }
 0x51a   : > { %v2346_v42 = vmul.f32 %v9195_v51, %v2295_v10  ;;  %2423 = vrot.lane.b32.xlu2 %v9491_v39, %s7608_s30  ;;  %3571 = vmatpush.msrb.mxu1 %v9507_v30 }
 0x51b   : > { %v2299_v37 = vmul.f32 0.5, %v2298_v12  ;;  %v9523_v12 = vld [vmem:[%s12393_s4 + $0x48] sm:$0xff] }
 0x51c   : > { %v2362_v40 = vmul.f32 %v2346_v42, %v2329_v0  ;;  %3572 = vmatpush.msrb.mxu1 %v9513_v29 }
 0x51d   : > { %v7115_v32 = vpop.eup %7114  ;;  %v2300_v47 = vsub.f32 1.5, %v2299_v37 }
 0x51e   : > { %v7117_v11 = vpop.eup %7116  ;;  %v2448_v18 = vmul.f32 %v7115_v32, %v9472_v16  ;;  %v9518_v10 = vadd.f32 %v9206_v8, %v2362_v40  ;;  %3573 = vmatpush.msrb.mxu1 %v9523_v12  ;;  %v9535_v40 = vld [vmem:[%s12393_s4 + $0x40] sm:$0xff]  ;;  %vm2454_vm13 = vweird.f32 %v7115_v32 }
 0x51f   : > { %v2301_v0 = vmul.f32 %v7113_v5, %v2300_v47  ;;  %v2307_v42 = vmul.f32 %v7117_v11, %v9474_v28  ;;  %vm2313_vm14 = vweird.f32 %v7117_v11  ;;  %vm2455_vm1 = vmor %vm2453_vm15, %vm2454_vm13  ;;  %v2331_v28 = vsub.f32 %v9183_v7, %v9450_v60 }
 0x520   : > { %v2449_v37 = vmul.f32 %v7115_v32, %v2448_v18  ;;  %v9530_v15 = vmul.f32 %v9518_v10, %v9518_v10  ;;  %3574 = vmatpush.msrb.mxu1 %v9535_v40  ;;  %v9546_v18 = vld [vmem:[%s12393_s4 + $0x38] sm:$0xff]  ;;  %vm2314_vm2 = vmor %vm2312_vm0, %vm2313_vm14 }
 0x521   : > { %v2305_v49 = vsel %vm2304_vm12, %v7113_v5, %v2301_v0  ;;  %v2308_v38 = vmul.f32 %v7117_v11, %v2307_v42 }
 0x522   : > { %v2347_v47 = vmul.f32 %v9195_v51, %v2305_v49  ;;  %v2450_v9 = vmul.f32 0.5, %v2449_v37  ;;  %2425 = vrot.lane.b32.xlu0 %v9530_v15, %s7608_s30  ;;  %3575 = vmatpush.msrb.mxu1 %v9546_v18 }
 0x523   : > { %v2309_v50 = vmul.f32 0.5, %v2308_v38 }
 0x524   : > { %v2363_v59 = vmul.f32 %v2347_v47, %v2330_v24  ;;  %v2451_v5 = vsub.f32 1.5, %v2450_v9  ;;  %3576 = vmatpush.msrb.mxu1 %v9552_v48  ;;  %v9564_v9 = vld [vmem:[%s12393_s4 + $0x28] sm:$0xff] }
 0x525   : > { %v2310_v49 = vsub.f32 1.5, %v2309_v50 }
 0x526   : > { %v2452_v0 = vmul.f32 %v7115_v32, %v2451_v5  ;;  %v9559_v42 = vadd.f32 %v9206_v8, %v2363_v59  ;;  %3577 = vmatpush.msrb.mxu1 %v9564_v9  ;;  %v9575_v59 = vld [vmem:[%s12393_s4 + $0x20] sm:$0xff] }
 0x527   : > { %v2311_v38 = vmul.f32 %v7117_v11, %v2310_v49 }
 0x528   : > { %v2456_v50 = vsel %vm2455_vm1, %v7115_v32, %v2452_v0  ;;  %v9570_v37 = vmul.f32 %v9559_v42, %v9559_v42  ;;  %3578 = vmatpush.msrb.mxu1 %v9575_v59  ;;  %v7528_v32 = vld [vmem:[%s12393_s4 + $0x18] sm:$0xff] }
 0x529   : > { %v2315_v16 = vsel %vm2314_vm2, %v7117_v11, %v2311_v38  ;;  %v2608_v24 = vmul.f32 %v9555_v54, %v2456_v50  ;;  %v7529_v11 = vld [vmem:[%s12393_s4 + $0x10] sm:$0xff] }
 0x52a   : > { %v2348_v47 = vmul.f32 %v9195_v51, %v2315_v16  ;;  %2427 = vrot.lane.b32.xlu1 %v9570_v37, %s7608_s30  ;;  %3579 = vmatpush.msrb.mxu1 %v7528_v32  ;;  %v9596_v51 = vld [vmem:[%s12393_s4 + $0x8] sm:$0xff] }
 0x52b   : > { %v2624_v5 = vsub.f32 1.0, %v2608_v24 }
 0x52c   : > { %v2364_v49 = vmul.f32 %v2348_v47, %v2331_v28  ;;  %v2406_v0 = vpop.permute.xlu2 %2405  ;;  %3580 = vmatpush.msrb.mxu1 %v7529_v11 }
 0x52d   : > { %v2640_v38 = vmax.f32 %v2624_v5, 0.0  ;;  %v2434_v60 = vadd.f32 %v2406_v0, %v9266_v22 }
 0x52e   : > { %v9591_v7 = vadd.f32 %v9206_v8, %v2364_v49  ;;  %3581 = vmatpush.msrb.mxu1 %v9596_v51  ;;  %v9608_v8 = vld [vmem:[%s12393_s4] sm:$0xff] }
 0x52f   : > { %v2656_v50 = vmul.f32 %v2640_v38, %v9209_v36  ;;  %7118 = vrsqrt.f32 %v2434_v60  ;;  %vm2483_vm8 = vweird.f32 %v2434_v60 }
 0x530   : > { %v9603_v16 = vmul.f32 %v9591_v7, %v9591_v7  ;;  %3582 = vmatpush.msrb.mxu1 %v9608_v8 }
 0x531   : > { %2705 = vmatmul.f32.vlgmr.msra.gmra.mxu1 %v2656_v50 }
 0x532   : > { %2429 = vrot.lane.b32.xlu2 %v9603_v16, %s7608_s30  ;;  %4442 = vmatpush.msra.mxu1 %v9462_v17 }
 0x534   : > { %v2402_v22 = vpop.permute.xlu0 %2401  ;;  %4443 = vmatpush.msra.mxu1 %v9468_v56 }
 0x535   : > { %v2432_v36 = vadd.f32 %v2402_v22, %v9228_v26  ;;  %v7119_v24 = vpop.eup %7118 }
 0x536   : > { %4444 = vmatpush.msra.mxu1 %v9482_v35  ;;  %v2478_v28 = vmul.f32 %v7119_v24, %v2434_v60  ;;  %vm2484_vm6 = vweird.f32 %v7119_v24 }
 0x537   : > { %7120 = vrsqrt.f32 %v2432_v36  ;;  %vm2463_vm4 = vweird.f32 %v2432_v36  ;;  %vm2485_vm9 = vmor %vm2483_vm8, %vm2484_vm6 }
 0x538   : > { %4445 = vmatpush.msra.mxu1 %v9496_v63  ;;  %v2479_v26 = vmul.f32 %v7119_v24, %v2478_v28 }
 0x53a   : > { %4446 = vmatpush.msra.mxu1 %v9507_v30  ;;  %v2480_v63 = vmul.f32 0.5, %v2479_v26 }
 0x53c   : > { %v2404_v47 = vpop.permute.xlu1 %2403  ;;  %4447 = vmatpush.msra.mxu1 %v9513_v29 }
 0x53d   : > { %v7121_v5 = vpop.eup %7120  ;;  %v2433_v17 = vadd.f32 %v2404_v47, %v9247_v57 }
 0x53e   : > { %v2458_v49 = vmul.f32 %v7121_v5, %v2432_v36  ;;  %4448 = vmatpush.msra.mxu1 %v9523_v12  ;;  %vm2464_vm3 = vweird.f32 %v7121_v5 }
 0x53f   : > { %7122 = vrsqrt.f32 %v2433_v17  ;;  %vm2465_vm5 = vmor %vm2463_vm4, %vm2464_vm3  ;;  %vm2473_vm10 = vweird.f32 %v2433_v17 }
 0x540   : > { %v2459_v56 = vmul.f32 %v7121_v5, %v2458_v49  ;;  %4449 = vmatpush.msra.mxu1 %v9535_v40  ;;  %v2481_v40 = vsub.f32 1.5, %v2480_v63 }
 0x542   : > { %v2460_v35 = vmul.f32 0.5, %v2459_v56  ;;  %4450 = vmatpush.msra.mxu1 %v9546_v18  ;;  %v2482_v36 = vmul.f32 %v7119_v24, %v2481_v40 }
 0x544   : > { %v2461_v30 = vsub.f32 1.5, %v2460_v35  ;;  %v2412_v0 = vpop.permute.xlu2 %2411  ;;  %4451 = vmatpush.msra.mxu1 %v9552_v48  ;;  %v2486_v26 = vsel %vm2485_vm9, %v7119_v24, %v2482_v36 }
 0x545   : > { %v7123_v29 = vpop.eup %7122  ;;  %v9627_v12 = vadd.f32 %v2412_v0, %v9323_v4 }
 0x546   : > { %v2462_v38 = vmul.f32 %v7121_v5, %v2461_v30  ;;  %v2468_v57 = vmul.f32 %v7123_v29, %v2433_v17  ;;  %4452 = vmatpush.msra.mxu1 %v9564_v9  ;;  %vm2474_vm7 = vweird.f32 %v7123_v29 }
 0x547   : > { %7124 = vrsqrt.f32 %v9627_v12  ;;  %vm2475_vm11 = vmor %vm2473_vm10, %vm2474_vm7  ;;  %vm2513_vm1 = vweird.f32 %v9627_v12 }
 0x548   : > { %v2469_v50 = vmul.f32 %v7123_v29, %v2468_v57  ;;  %v2466_v22 = vsel %vm2465_vm5, %v7121_v5, %v2462_v38  ;;  %4453 = vmatpush.msra.mxu1 %v9575_v59 }
 0x549   : > { %v2609_v18 = vmul.f32 %v9555_v54, %v2466_v22 }
 0x54a   : > { %v2470_v28 = vmul.f32 0.5, %v2469_v50  ;;  %4454 = vmatpush.msra.mxu1 %v7528_v32 }
 0x54b   : > { %v2625_v48 = vsub.f32 1.0, %v2609_v18 }
 0x54c   : > { %v2471_v47 = vsub.f32 1.5, %v2470_v28  ;;  %v2408_v9 = vpop.permute.xlu0 %2407  ;;  %4455 = vmatpush.msra.mxu1 %v7529_v11 }
 0x54d   : > { %v2435_v4 = vadd.f32 %v2408_v9, %v9285_v21  ;;  %v2641_v49 = vmax.f32 %v2625_v48, 0.0  ;;  %v7125_v56 = vpop.eup %7124  ;;  %v2611_v21 = vmul.f32 %v9555_v54, %v2486_v26 }
 0x54e   : > { %v2472_v5 = vmul.f32 %v7123_v29, %v2471_v47  ;;  %4456 = vmatpush.msra.mxu1 %v9596_v51  ;;  %v2508_v35 = vmul.f32 %v7125_v56, %v9627_v12  ;;  %vm2514_vm15 = vweird.f32 %v7125_v56 }
 0x54f   : > { %7126 = vrsqrt.f32 %v2435_v4  ;;  %v2657_v59 = vmul.f32 %v2641_v49, %v9224_v61  ;;  %v2627_v24 = vsub.f32 1.0, %v2611_v21  ;;  %vm2493_vm13 = vweird.f32 %v2435_v4  ;;  %vm2515_vm2 = vmor %vm2513_vm1, %vm2514_vm15 }
 0x550   : > { %v2476_v32 = vsel %vm2475_vm11, %v7123_v29, %v2472_v5  ;;  %4457 = vmatpush.msra.mxu1 %v9608_v8  ;;  %v2509_v8 = vmul.f32 %v7125_v56, %v2508_v35 }
 0x551   : > { %2708 = vmatmul.f32.gmra.mxu1 %v2657_v59  ;;  %v2610_v11 = vmul.f32 %v9555_v54, %v2476_v32  ;;  %v2643_v57 = vmax.f32 %v2627_v24, 0.0 }
 0x552   : > { %v2510_v40 = vmul.f32 0.5, %v2509_v8 }
 0x553   : > { %v2626_v60 = vsub.f32 1.0, %v2610_v11 }
 0x554   : > { %v2410_v17 = vpop.permute.xlu1 %2409  ;;  %v2511_v36 = vsub.f32 1.5, %v2510_v40 }
 0x555   : > { %v7127_v63 = vpop.eup %7126  ;;  %v2436_v51 = vadd.f32 %v2410_v17, %v9304_v53  ;;  %v2642_v30 = vmax.f32 %v2626_v60, 0.0 }
 0x556   : > { %v2488_v0 = vmul.f32 %v7127_v63, %v2435_v4  ;;  %vm2494_vm12 = vweird.f32 %v7127_v63  ;;  %v2512_v32 = vmul.f32 %v7125_v56, %v2511_v36 }
 0x557   : > { %7128 = vrsqrt.f32 %v2436_v51  ;;  %v2658_v61 = vmul.f32 %v2642_v30, %v9243_v52  ;;  %vm2495_vm14 = vmor %vm2493_vm13, %vm2494_vm12  ;;  %v2659_v52 = vmul.f32 %v2643_v57, %v9262_v58  ;;  %vm2503_vm3 = vweird.f32 %v2436_v51 }
 0x558   : > { %v2489_v29 = vmul.f32 %v7127_v63, %v2488_v0  ;;  %v2516_v35 = vsel %vm2515_vm2, %v7125_v56, %v2512_v32 }
 0x559   : > { %2711 = vmatmul.f32.gmra.mxu1 %v2658_v61  ;;  %v2614_v0 = vmul.f32 %v9555_v54, %v2516_v35 }
 0x55a   : > { %v2490_v38 = vmul.f32 0.5, %v2489_v29 }
 0x55b   : > { %v2630_v29 = vsub.f32 1.0, %v2614_v0 }
 0x55c   : > { %v2491_v50 = vsub.f32 1.5, %v2490_v38  ;;  %v2418_v22 = vpop.permute.xlu2 %2417 }
 0x55d   : > { %v7129_v18 = vpop.eup %7128  ;;  %v9642_v53 = vadd.f32 %v2418_v22, %v9383_v25  ;;  %v2646_v40 = vmax.f32 %v2630_v29, 0.0 }
 0x55e   : > { %v2492_v28 = vmul.f32 %v7127_v63, %v2491_v50  ;;  %v2498_v48 = vmul.f32 %v7129_v18, %v2436_v51  ;;  %vm2504_vm0 = vweird.f32 %v7129_v18 }
 0x55f   : > { %7130 = vrsqrt.f32 %v9642_v53  ;;  %vm2505_vm4 = vmor %vm2503_vm3, %vm2504_vm0  ;;  %vm2543_vm10 = vweird.f32 %v9642_v53 }
 0x560   : > { %v2499_v47 = vmul.f32 %v7129_v18, %v2498_v48  ;;  %v2496_v9 = vsel %vm2495_vm14, %v7127_v63, %v2492_v28 }
 0x561   : > { %2714 = vmatmul.f32.gmra.mxu1 %v2659_v52  ;;  %v2612_v49 = vmul.f32 %v9555_v54, %v2496_v9 }
 0x562   : > { %v2500_v5 = vmul.f32 0.5, %v2499_v47 }
 0x563   : > { %v2628_v59 = vsub.f32 1.0, %v2612_v49 }
 0x564   : > { %v2501_v4 = vsub.f32 1.5, %v2500_v5  ;;  %v2414_v26 = vpop.permute.xlu0 %2413 }
 0x565   : > { %v2438_v25 = vadd.f32 %v2414_v26, %v9342_v2  ;;  %v2644_v58 = vmax.f32 %v2628_v59, 0.0  ;;  %v7131_v17 = vpop.eup %7130 }
 0x566   : > { %v2502_v11 = vmul.f32 %v7129_v18, %v2501_v4  ;;  %v2538_v12 = vmul.f32 %v7131_v17, %v9642_v53  ;;  %vm2544_vm8 = vweird.f32 %v7131_v17 }
 0x567   : > { %7132 = vrsqrt.f32 %v2438_v25  ;;  %v2660_v60 = vmul.f32 %v2644_v58, %v9281_v1  ;;  %vm2523_vm6 = vweird.f32 %v2438_v25  ;;  %vm2545_vm11 = vmor %vm2543_vm10, %vm2544_vm8 }
 0x568   : > { %v2506_v21 = vsel %vm2505_vm4, %v7129_v18, %v2502_v11  ;;  %v2539_v56 = vmul.f32 %v7131_v17, %v2538_v12 }
 0x569   : > { %2717 = vmatmul.f32.gmra.mxu1 %v2660_v60  ;;  %v2613_v63 = vmul.f32 %v9555_v54, %v2506_v21 }
 0x56a   : > { %v2540_v50 = vmul.f32 0.5, %v2539_v56 }
 0x56b   : > { %v2629_v30 = vsub.f32 1.0, %v2613_v63 }
 0x56c   : > { %v2416_v2 = vpop.permute.xlu1 %2415  ;;  %v2541_v36 = vsub.f32 1.5, %v2540_v50 }
 0x56d   : > { %v7133_v61 = vpop.eup %7132  ;;  %v2439_v24 = vadd.f32 %v2416_v2, %v9361_v27  ;;  %v2645_v51 = vmax.f32 %v2629_v30, 0.0 }
 0x56e   : > { %v2518_v8 = vmul.f32 %v7133_v61, %v2438_v25  ;;  %vm2524_vm5 = vweird.f32 %v7133_v61  ;;  %v2542_v32 = vmul.f32 %v7131_v17, %v2541_v36 }
 0x56f   : > { %7134 = vrsqrt.f32 %v2439_v24  ;;  %v2661_v1 = vmul.f32 %v2645_v51, %v9300_v13  ;;  %vm2525_vm7 = vmor %vm2523_vm6, %vm2524_vm5  ;;  %v2662_v13 = vmul.f32 %v2646_v40, %v9319_v45  ;;  %vm2533_vm12 = vweird.f32 %v2439_v24 }
 0x570   : > { %v2519_v38 = vmul.f32 %v7133_v61, %v2518_v8  ;;  %v2546_v60 = vsel %vm2545_vm11, %v7131_v17, %v2542_v32 }
 0x571   : > { %2720 = vmatmul.f32.gmra.mxu1 %v2661_v1  ;;  %v2617_v30 = vmul.f32 %v9555_v54, %v2546_v60 }
 0x572   : > { %v2520_v57 = vmul.f32 0.5, %v2519_v38 }
 0x574   : > { %v2521_v22 = vsub.f32 1.5, %v2520_v57  ;;  %v2424_v18 = vpop.permute.xlu2 %2423 }
 0x575   : > { %v7135_v28 = vpop.eup %7134  ;;  %v9656_v27 = vadd.f32 %v2424_v18, %v9491_v39 }
 0x576   : > { %v2522_v48 = vmul.f32 %v7133_v61, %v2521_v22  ;;  %v2528_v52 = vmul.f32 %v7135_v28, %v2439_v24  ;;  %vm2534_vm9 = vweird.f32 %v7135_v28  ;;  %v2633_v24 = vsub.f32 1.0, %v2617_v30 }
 0x577   : > { %7136 = vrsqrt.f32 %v9656_v27  ;;  %vm2535_vm13 = vmor %vm2533_vm12, %vm2534_vm9  ;;  %vm2573_vm3 = vweird.f32 %v9656_v27 }
 0x578   : > { %v2529_v47 = vmul.f32 %v7135_v28, %v2528_v52  ;;  %v2526_v9 = vsel %vm2525_vm7, %v7133_v61, %v2522_v48  ;;  %v2649_v1 = vmax.f32 %v2633_v24, 0.0 }
 0x579   : > { %2723 = vmatmul.f32.gmra.mxu1 %v2662_v13  ;;  %v2615_v49 = vmul.f32 %v9555_v54, %v2526_v9 }
 0x57a   : > { %v2530_v5 = vmul.f32 0.5, %v2529_v47 }
 0x57b   : > { %v2631_v59 = vsub.f32 1.0, %v2615_v49 }
 0x57c   : > { %v2531_v4 = vsub.f32 1.5, %v2530_v5  ;;  %v2420_v26 = vpop.permute.xlu0 %2419 }
 0x57d   : > { %v2441_v39 = vadd.f32 %v2420_v26, %v9412_v14  ;;  %v2647_v45 = vmax.f32 %v2631_v59, 0.0  ;;  %v7137_v21 = vpop.eup %7136 }
 0x57e   : > { %v2532_v25 = vmul.f32 %v7135_v28, %v2531_v4  ;;  %v2568_v53 = vmul.f32 %v7137_v21, %v9656_v27  ;;  %vm2574_vm1 = vweird.f32 %v7137_v21 }
 0x57f   : > { %7138 = vrsqrt.f32 %v2441_v39  ;;  %v2663_v58 = vmul.f32 %v2647_v45, %v9338_v34  ;;  %vm2553_vm15 = vweird.f32 %v2441_v39  ;;  %vm2575_vm4 = vmor %vm2573_vm3, %vm2574_vm1 }
 0x580   : > { %v2536_v11 = vsel %vm2535_vm13, %v7135_v28, %v2532_v25  ;;  %v2569_v17 = vmul.f32 %v7137_v21, %v2568_v53 }
 0x581   : > { %2726 = vmatmul.f32.gmra.mxu1 %v2663_v58  ;;  %v2616_v35 = vmul.f32 %v9555_v54, %v2536_v11 }
 0x582   : > { %v2570_v29 = vmul.f32 0.5, %v2569_v17 }
 0x583   : > { %v2632_v63 = vsub.f32 1.0, %v2616_v35 }
 0x584   : > { %v2422_v14 = vpop.permute.xlu1 %2421  ;;  %v2571_v22 = vsub.f32 1.5, %v2570_v29 }
 0x585   : > { %v7139_v0 = vpop.eup %7138  ;;  %v2442_v12 = vadd.f32 %v2422_v14, %v9445_v3  ;;  %v2648_v2 = vmax.f32 %v2632_v63, 0.0 }
 0x586   : > { %v2548_v61 = vmul.f32 %v7139_v0, %v2441_v39  ;;  %vm2554_vm14 = vweird.f32 %v7139_v0  ;;  %v2572_v36 = vmul.f32 %v7137_v21, %v2571_v22 }
 0x587   : > { %7140 = vrsqrt.f32 %v2442_v12  ;;  %v2664_v34 = vmul.f32 %v2648_v2, %v9357_v6  ;;  %vm2555_vm0 = vmor %vm2553_vm15, %vm2554_vm14  ;;  %v2665_v6 = vmul.f32 %v2649_v1, %v9378_v19  ;;  %vm2563_vm5 = vweird.f32 %v2442_v12 }
 0x588   : > { %v2549_v51 = vmul.f32 %v7139_v0, %v2548_v61  ;;  %v2576_v32 = vsel %vm2575_vm4, %v7137_v21, %v2572_v36 }
 0x589   : > { %2729 = vmatmul.f32.gmra.mxu1 %v2664_v34  ;;  %v2620_v45 = vmul.f32 %v9555_v54, %v2576_v32 }
 0x58a   : > { %v2550_v8 = vmul.f32 0.5, %v2549_v51 }
 0x58b   : > { %v2636_v35 = vsub.f32 1.0, %v2620_v45 }
 0x58c   : > { %v2551_v56 = vsub.f32 1.5, %v2550_v8  ;;  %v2430_v38 = vpop.permute.xlu2 %2429 }
 0x58d   : > { %v7141_v57 = vpop.eup %7140  ;;  %v9670_v3 = vadd.f32 %v2430_v38, %v9603_v16  ;;  %v2652_v53 = vmax.f32 %v2636_v35, 0.0 }
 0x58e   : > { %v2552_v40 = vmul.f32 %v7139_v0, %v2551_v56  ;;  %v2558_v50 = vmul.f32 %v7141_v57, %v2442_v12  ;;  %vm2564_vm2 = vweird.f32 %v7141_v57 }
 0x58f   : > { %7142 = vrsqrt.f32 %v9670_v3  ;;  %vm2565_vm6 = vmor %vm2563_vm5, %vm2564_vm2  ;;  %vm2603_vm12 = vweird.f32 %v9670_v3 }
 0x590   : > { %v2559_v18 = vmul.f32 %v7141_v57, %v2558_v50  ;;  %v2556_v28 = vsel %vm2555_vm0, %v7139_v0, %v2552_v40 }
 0x591   : > { %2732 = vmatmul.f32.gmra.mxu1 %v2665_v6  ;;  %v2618_v48 = vmul.f32 %v9555_v54, %v2556_v28 }
 0x592   : > { %v2560_v52 = vmul.f32 0.5, %v2559_v18 }
 0x593   : > { %v2634_v13 = vsub.f32 1.0, %v2618_v48 }
 0x594   : > { %v2561_v47 = vsub.f32 1.5, %v2560_v52  ;;  %v2426_v9 = vpop.permute.xlu0 %2425 }
 0x595   : > { %v2444_v16 = vadd.f32 %v2426_v9, %v9530_v15  ;;  %v2650_v19 = vmax.f32 %v2634_v13, 0.0  ;;  %v7143_v4 = vpop.eup %7142 }
 0x596   : > { %v2562_v49 = vmul.f32 %v7141_v57, %v2561_v47  ;;  %v2598_v27 = vmul.f32 %v7143_v4, %v9670_v3  ;;  %vm2604_vm10 = vweird.f32 %v7143_v4 }
 0x597   : > { %7144 = vrsqrt.f32 %v2444_v16  ;;  %v2666_v5 = vmul.f32 %v2650_v19, %v9403_v23  ;;  %vm2583_vm8 = vweird.f32 %v2444_v16  ;;  %vm2605_vm13 = vmor %vm2603_vm12, %vm2604_vm10 }
 0x598   : > { %v2566_v59 = vsel %vm2565_vm6, %v7141_v57, %v2562_v49  ;;  %v2599_v21 = vmul.f32 %v7143_v4, %v2598_v27 }
 0x599   : > { %2735 = vmatmul.f32.gmra.mxu1 %v2666_v5  ;;  %v2619_v26 = vmul.f32 %v9555_v54, %v2566_v59 }
 0x59a   : > { %v2600_v14 = vmul.f32 0.5, %v2599_v21 }
 0x59b   : > { %v2635_v39 = vsub.f32 1.0, %v2619_v26 }
 0x59c   : > { %v2428_v15 = vpop.permute.xlu1 %2427  ;;  %v2601_v34 = vsub.f32 1.5, %v2600_v14 }
 0x59d   : > { %v7145_v25 = vpop.eup %7144  ;;  %v2445_v58 = vadd.f32 %v2428_v15, %v9570_v37  ;;  %v2651_v11 = vmax.f32 %v2635_v39, 0.0  ;;  %v2668_v37 = vmul.f32 %v2652_v53, %v9477_v55 }
 0x59e   : > { %v2578_v60 = vmul.f32 %v7145_v25, %v2444_v16  ;;  %vm2584_vm7 = vweird.f32 %v7145_v25  ;;  %v2602_v1 = vmul.f32 %v7143_v4, %v2601_v34 }
 0x59f   : > { %7146 = vrsqrt.f32 %v2445_v58  ;;  %v2667_v23 = vmul.f32 %v2651_v11, %v9435_v33  ;;  %vm2585_vm9 = vmor %vm2583_vm8, %vm2584_vm7  ;;  %vm2593_vm14 = vweird.f32 %v2445_v58 }
 0x5a0   : > { %v2579_v63 = vmul.f32 %v7145_v25, %v2578_v60  ;;  %v2606_v6 = vsel %vm2605_vm13, %v7143_v4, %v2602_v1  ;;  %v9774_v1 = vld [vmem:[%s12392_s3 + $0x6] ss:$0 sm:$0xff] }
 0x5a1   : > { %2738 = vmatmul.f32.gmra.mxu1 %v2667_v23  ;;  %v2623_v18 = vmul.f32 %v9555_v54, %v2606_v6 }
 0x5a2   : > { %v2580_v30 = vmul.f32 0.5, %v2579_v63 }
 0x5a3   : > { %v2639_v52 = vsub.f32 1.0, %v2623_v18 }
 0x5a4   : > { %v2581_v0 = vsub.f32 1.5, %v2580_v30 }
 0x5a5   : > { %v7147_v12 = vpop.eup %7146  ;;  %v2655_v13 = vmax.f32 %v2639_v52, 0.0 }
 0x5a6   : > { %v2582_v2 = vmul.f32 %v7145_v25, %v2581_v0  ;;  %v2588_v61 = vmul.f32 %v7147_v12, %v2445_v58  ;;  %vm2594_vm11 = vweird.f32 %v7147_v12 }
 0x5a7   : > { %vm2595_vm15 = vmor %vm2593_vm14, %vm2594_vm11  ;;  %v2671_v36 = vmul.f32 %v2655_v13, %v9591_v7 }
 0x5a8   : > { %v2589_v24 = vmul.f32 %v7147_v12, %v2588_v61  ;;  %v2586_v17 = vsel %vm2585_vm9, %v7145_v25, %v2582_v2 }
 0x5a9   : > { %2741 = vmatmul.f32.gmra.mxu1 %v2668_v37  ;;  %v2621_v33 = vmul.f32 %v9555_v54, %v2586_v17 }
 0x5aa   : > { %v2590_v51 = vmul.f32 0.5, %v2589_v24 }
 0x5ab   : > { %v2637_v8 = vsub.f32 1.0, %v2621_v33 }
 0x5ac   : > { %v2591_v29 = vsub.f32 1.5, %v2590_v51 }
 0x5ad   : > { %v2653_v56 = vmax.f32 %v2637_v8, 0.0 }
 0x5ae   : > { %v2592_v38 = vmul.f32 %v7147_v12, %v2591_v29  ;;  %v9686_v57 = vpop.f32.mrf.mxu1 }
 0x5af   : > { %v2821_v55 = vmul.f32 %v9686_v57, %v9686_v57  ;;  %2772 = vmatmul.f32.vlgmr.msra.gmra.mxu2 %v9686_v57  ;;  %v2669_v40 = vmul.f32 %v2653_v56, %v9518_v10 }
 0x5b0   : > { %v2596_v50 = vsel %vm2595_vm15, %v7147_v12, %v2592_v38 }
 0x5b1   : > { %2744 = vmatmul.f32.gmra.mxu1 %v2669_v40  ;;  %2853 = vmatmul.f32.vlgmr.msra.gmra.mxu3 %v2821_v55  ;;  %v2622_v3 = vmul.f32 %v9555_v54, %v2596_v50  ;;  %v9781_v40 = vld [vmem:[%s12392_s3 + $0x7] ss:$0 sm:$0xff] }
 0x5b3   : > { %v2638_v22 = vsub.f32 1.0, %v2622_v3 }
 0x5b5   : > { %v2654_v28 = vmax.f32 %v2638_v22, 0.0 }
 0x5b7   : > { %v2670_v48 = vmul.f32 %v2654_v28, %v9559_v42 }
 0x5b9   : > { %2747 = vmatmul.f32.gmra.mxu1 %v2670_v48 }
 0x5c1   : > { %2750 = vmatmul.f32.gmra.mxu1 %v2671_v36 }
 0x5ce   : > { %v9696_v47 = vpop.f32.mrf.mxu1 }
 0x5cf   : > { %2775 = vmatmul.f32.gmra.mxu2 %v9696_v47  ;;  %v2822_v10 = vmul.f32 %v9696_v47, %v9696_v47 }
 0x5d1   : > { %2856 = vmatmul.f32.gmra.mxu3 %v2822_v10 }
 0x5d6   : > { %v9701_v9 = vpop.f32.mrf.mxu1 }
 0x5d7   : > { %2778 = vmatmul.f32.gmra.mxu2 %v9701_v9  ;;  %v2823_v54 = vmul.f32 %v9701_v9, %v9701_v9 }
 0x5d9   : > { %2859 = vmatmul.f32.gmra.mxu3 %v2823_v54 }
 0x5de   : > { %v9706_v42 = vpop.f32.mrf.mxu1 }
 0x5df   : > { %2781 = vmatmul.f32.gmra.mxu2 %v9706_v42  ;;  %v2824_v7 = vmul.f32 %v9706_v42, %v9706_v42 }
 0x5e1   : > { %2862 = vmatmul.f32.gmra.mxu3 %v2824_v7 }
 0x5e6   : > { %v9711_v16 = vpop.f32.mrf.mxu1 }
 0x5e7   : > { %2784 = vmatmul.f32.gmra.mxu2 %v9711_v16  ;;  %v2825_v19 = vmul.f32 %v9711_v16, %v9711_v16 }
 0x5e9   : > { %2865 = vmatmul.f32.gmra.mxu3 %v2825_v19 }
 0x5ee   : > { %v9716_v49 = vpop.f32.mrf.mxu1 }
 0x5ef   : > { %2787 = vmatmul.f32.gmra.mxu2 %v9716_v49  ;;  %v2826_v5 = vmul.f32 %v9716_v49, %v9716_v49 }
 0x5f1   : > { %2868 = vmatmul.f32.gmra.mxu3 %v2826_v5 }
 0x5f6   : > { %v9721_v59 = vpop.f32.mrf.mxu1 }
 0x5f7   : > { %2790 = vmatmul.f32.gmra.mxu2 %v9721_v59  ;;  %v2827_v32 = vmul.f32 %v9721_v59, %v9721_v59 }
 0x5f9   : > { %2871 = vmatmul.f32.gmra.mxu3 %v2827_v32 }
 0x5fe   : > { %v9726_v4 = vpop.f32.mrf.mxu1 }
 0x5ff   : > { %2793 = vmatmul.f32.gmra.mxu2 %v9726_v4  ;;  %v2828_v26 = vmul.f32 %v9726_v4, %v9726_v4 }
 0x601   : > { %2874 = vmatmul.f32.gmra.mxu3 %v2828_v26 }
 0x606   : > { %v9731_v39 = vpop.f32.mrf.mxu1 }
 0x607   : > { %2796 = vmatmul.f32.gmra.mxu2 %v9731_v39  ;;  %v2829_v45 = vmul.f32 %v9731_v39, %v9731_v39 }
 0x609   : > { %2877 = vmatmul.f32.gmra.mxu3 %v2829_v45 }
 0x60e   : > { %v9736_v27 = vpop.f32.mrf.mxu1 }
 0x60f   : > { %2799 = vmatmul.f32.gmra.mxu2 %v9736_v27  ;;  %v2830_v15 = vmul.f32 %v9736_v27, %v9736_v27 }
 0x611   : > { %2880 = vmatmul.f32.gmra.mxu3 %v2830_v15 }
 0x616   : > { %v9741_v25 = vpop.f32.mrf.mxu1 }
 0x617   : > { %2802 = vmatmul.f32.gmra.mxu2 %v9741_v25  ;;  %v2831_v58 = vmul.f32 %v9741_v25, %v9741_v25 }
 0x619   : > { %2883 = vmatmul.f32.gmra.mxu3 %v2831_v58 }
 0x61e   : > { %v9746_v11 = vpop.f32.mrf.mxu1 }
 0x61f   : > { %2805 = vmatmul.f32.gmra.mxu2 %v9746_v11  ;;  %v2832_v60 = vmul.f32 %v9746_v11, %v9746_v11 }
 0x621   : > { %2886 = vmatmul.f32.gmra.mxu3 %v2832_v60 }
 0x626   : > { %v9751_v23 = vpop.f32.mrf.mxu1 }
 0x627   : > { %2808 = vmatmul.f32.gmra.mxu2 %v9751_v23  ;;  %v2833_v35 = vmul.f32 %v9751_v23, %v9751_v23 }
 0x629   : > { %2889 = vmatmul.f32.gmra.mxu3 %v2833_v35 }
 0x62e   : > { %v9756_v21 = vpop.f32.mrf.mxu1 }
 0x62f   : > { %2811 = vmatmul.f32.gmra.mxu2 %v9756_v21  ;;  %v2834_v63 = vmul.f32 %v9756_v21, %v9756_v21 }
 0x631   : > { %2892 = vmatmul.f32.gmra.mxu3 %v2834_v63 }
 0x632   : > { %v2773_v30 = vpop.f32.mrf.mxu2 }
 0x633   : > { %v2902_v53 = vmul.f32 %v2773_v30, %v2773_v30  ;;  %v3110_v38 = vsub.f32 %v9686_v57, %v2773_v30 }
 0x634   : > { %v2854_v14 = vpop.f32.mrf.mxu3 }
 0x635   : > { %v2918_v0 = vsub.f32 %v2854_v14, %v2902_v53 }
 0x636   : > { %v9761_v12 = vpop.f32.mrf.mxu1 }
 0x637   : > { %v2934_v2 = vadd.f32 1e-05, %v2918_v0  ;;  %2814 = vmatmul.f32.gmra.mxu2 %v9761_v12  ;;  %v2835_v61 = vmul.f32 %v9761_v12, %v9761_v12 }
 0x639   : > { %7148 = vrsqrt.f32 %v2934_v2  ;;  %2895 = vmatmul.f32.gmra.mxu3 %v2835_v61  ;;  %vm2956_vm1 = vweird.f32 %v2934_v2 }
 0x63e   : > { %v9766_v37 = vpop.f32.mrf.mxu1 }
 0x63f   : > { %v7149_v34 = vpop.eup %7148  ;;  %2817 = vmatmul.f32.gmra.mxu2 %v9766_v37  ;;  %v2836_v24 = vmul.f32 %v9766_v37, %v9766_v37 }
 0x640   : > { %v2951_v17 = vmul.f32 %v7149_v34, %v2934_v2  ;;  %vm2957_vm0 = vweird.f32 %v7149_v34 }
 0x641   : > { %2898 = vmatmul.f32.gmra.mxu3 %v2836_v24  ;;  %vm2958_vm2 = vmor %vm2956_vm1, %vm2957_vm0 }
 0x642   : > { %v2952_v33 = vmul.f32 %v7149_v34, %v2951_v17 }
 0x644   : > { %v2953_v51 = vmul.f32 0.5, %v2952_v33 }
 0x646   : > { %v2954_v8 = vsub.f32 1.5, %v2953_v51 }
 0x648   : > { %v2955_v29 = vmul.f32 %v7149_v34, %v2954_v8 }
 0x64a   : > { %v2959_v56 = vsel %vm2958_vm2, %v7149_v34, %v2955_v29 }
 0x64b   : > { %v3127_v55 = vmul.f32 %v9774_v1, %v2959_v56 }
 0x64d   : > { %v3143_v50 = vmul.f32 %v3127_v55, %v3110_v38 }
 0x64f   : > { %v3160_v6 = vadd.f32 %v9781_v40, %v3143_v50 }
 0x651   : > { %v9785_v3 = vadd.f32 %v3160_v6, %v8971_v31 }
 0x652   : > { %v2776_v22 = vpop.f32.mrf.mxu2 }
 0x653   : > { %v2903_v18 = vmul.f32 %v2776_v22, %v2776_v22  ;;  %v9789_v28 = vmul.f32 %v9785_v3, %v9785_v3  ;;  %v3111_v61 = vsub.f32 %v9696_v47, %v2776_v22 }
 0x654   : > { %v2857_v57 = vpop.f32.mrf.mxu3 }
 0x655   : > { %v2919_v48 = vsub.f32 %v2857_v57, %v2903_v18  ;;  %3209 = vrot.lane.b32.xlu0 %v9789_v28, %s7608_s30 }
 0x657   : > { %v2935_v52 = vadd.f32 1e-05, %v2919_v48 }
 0x659   : > { %7150 = vrsqrt.f32 %v2935_v52  ;;  %vm2966_vm4 = vweird.f32 %v2935_v52 }
 0x65a   : > { %v2779_v13 = vpop.f32.mrf.mxu2 }
 0x65b   : > { %v2904_v36 = vmul.f32 %v2779_v13, %v2779_v13  ;;  %v3112_v48 = vsub.f32 %v9701_v9, %v2779_v13 }
 0x65c   : > { %v2860_v10 = vpop.f32.mrf.mxu3 }
 0x65d   : > { %v2920_v54 = vsub.f32 %v2860_v10, %v2904_v36 }
 0x65f   : > { %v7151_v7 = vpop.eup %7150  ;;  %v2936_v31 = vadd.f32 1e-05, %v2920_v54 }
 0x660   : > { %v2961_v19 = vmul.f32 %v7151_v7, %v2935_v52  ;;  %vm2967_vm3 = vweird.f32 %v7151_v7 }
 0x661   : > { %7152 = vrsqrt.f32 %v2936_v31  ;;  %vm2968_vm5 = vmor %vm2966_vm4, %vm2967_vm3  ;;  %vm2976_vm7 = vweird.f32 %v2936_v31 }
 0x662   : > { %v2962_v5 = vmul.f32 %v7151_v7, %v2961_v19  ;;  %v9793_v32 = vpop.f32.mrf.mxu2 }
 0x663   : > { %v2905_v26 = vmul.f32 %v9793_v32, %v9793_v32 }
 0x664   : > { %v2963_v45 = vmul.f32 0.5, %v2962_v5  ;;  %v2863_v15 = vpop.f32.mrf.mxu3 }
 0x665   : > { %v2921_v58 = vsub.f32 %v2863_v15, %v2905_v26 }
 0x666   : > { %v2964_v60 = vsub.f32 1.5, %v2963_v45 }
 0x667   : > { %v7153_v35 = vpop.eup %7152  ;;  %v2937_v63 = vadd.f32 1e-05, %v2921_v58 }
 0x668   : > { %v2965_v30 = vmul.f32 %v7151_v7, %v2964_v60  ;;  %v2971_v53 = vmul.f32 %v7153_v35, %v2936_v31  ;;  %vm2977_vm6 = vweird.f32 %v7153_v35 }
 0x669   : > { %7154 = vrsqrt.f32 %v2937_v63  ;;  %vm2978_vm8 = vmor %vm2976_vm7, %vm2977_vm6  ;;  %vm2986_vm10 = vweird.f32 %v2937_v63 }
 0x66a   : > { %v2969_v14 = vsel %vm2968_vm5, %v7151_v7, %v2965_v30  ;;  %v2972_v0 = vmul.f32 %v7153_v35, %v2971_v53  ;;  %v9797_v2 = vpop.f32.mrf.mxu2  ;;  %v3113_v53 = vsub.f32 %v9706_v42, %v9793_v32 }
 0x66b   : > { %v3128_v34 = vmul.f32 %v9774_v1, %v2969_v14  ;;  %v2906_v24 = vmul.f32 %v9797_v2, %v9797_v2 }
 0x66c   : > { %v2973_v17 = vmul.f32 0.5, %v2972_v0  ;;  %v2866_v33 = vpop.f32.mrf.mxu3 }
 0x66d   : > { %v2922_v51 = vsub.f32 %v2866_v33, %v2906_v24  ;;  %v3144_v8 = vmul.f32 %v3128_v34, %v3111_v61 }
 0x66e   : > { %v2974_v29 = vsub.f32 1.5, %v2973_v17 }
 0x66f   : > { %v7155_v56 = vpop.eup %7154  ;;  %v2938_v38 = vadd.f32 1e-05, %v2922_v51  ;;  %v3161_v55 = vadd.f32 %v9781_v40, %v3144_v8 }
 0x670   : > { %v2975_v50 = vmul.f32 %v7153_v35, %v2974_v29  ;;  %v2981_v6 = vmul.f32 %v7155_v56, %v2937_v63  ;;  %vm2987_vm9 = vweird.f32 %v7155_v56 }
 0x671   : > { %7156 = vrsqrt.f32 %v2938_v38  ;;  %v9805_v47 = vadd.f32 %v3161_v55, %v8988_v43  ;;  %v6857_v43 = vld [vmem:[%s12391_s2 + $0x278] sm:$0xff]  ;;  %vm2988_vm11 = vmor %vm2986_vm10, %vm2987_vm9  ;;  %vm2996_vm13 = vweird.f32 %v2938_v38 }
 0x672   : > { %v2979_v22 = vsel %vm2978_vm8, %v7153_v35, %v2975_v50  ;;  %v2982_v18 = vmul.f32 %v7155_v56, %v2981_v6  ;;  %v9807_v57 = vpop.f32.mrf.mxu2  ;;  %3499 = vmatpush.msrb.mxu0 %v6857_v43 }
 0x673   : > { %v3129_v52 = vmul.f32 %v9774_v1, %v2979_v22  ;;  %v2907_v36 = vmul.f32 %v9807_v57, %v9807_v57  ;;  %v9815_v10 = vmul.f32 %v9805_v47, %v9805_v47  ;;  %v3114_v22 = vsub.f32 %v9711_v16, %v9797_v2 }
 0x674   : > { %v2983_v54 = vmul.f32 0.5, %v2982_v18  ;;  %v2869_v7 = vpop.f32.mrf.mxu3 }
 0x675   : > { %v2923_v31 = vsub.f32 %v2869_v7, %v2907_v36  ;;  %3211 = vrot.lane.b32.xlu1 %v9815_v10, %s7608_s30  ;;  %v3145_v9 = vmul.f32 %v3129_v52, %v3112_v48 }
 0x676   : > { %v2984_v13 = vsub.f32 1.5, %v2983_v54 }
 0x677   : > { %v7157_v19 = vpop.eup %7156  ;;  %v2939_v5 = vadd.f32 1e-05, %v2923_v31  ;;  %v3162_v26 = vadd.f32 %v9781_v40, %v3145_v9 }
 0x678   : > { %v2985_v45 = vmul.f32 %v7155_v56, %v2984_v13  ;;  %v2991_v15 = vmul.f32 %v7157_v19, %v2938_v38  ;;  %vm2997_vm12 = vweird.f32 %v7157_v19 }
 0x679   : > { %7158 = vrsqrt.f32 %v2939_v5  ;;  %v9824_v58 = vadd.f32 %v3162_v26, %v9002_v62  ;;  %v6856_v62 = vld [vmem:[%s12391_s2 + $0x270] sm:$0xff]  ;;  %vm2998_vm14 = vmor %vm2996_vm13, %vm2997_vm12  ;;  %vm3006_vm0 = vweird.f32 %v2939_v5 }
 0x67a   : > { %v2989_v60 = vsel %vm2988_vm11, %v7155_v56, %v2985_v45  ;;  %v2992_v35 = vmul.f32 %v7157_v19, %v2991_v15  ;;  %v9826_v30 = vpop.f32.mrf.mxu2  ;;  %3500 = vmatpush.msrb.mxu0 %v6856_v62 }
 0x67b   : > { %v3130_v14 = vmul.f32 %v9774_v1, %v2989_v60  ;;  %v2908_v0 = vmul.f32 %v9826_v30, %v9826_v30  ;;  %v9835_v63 = vmul.f32 %v9824_v58, %v9824_v58  ;;  %v3115_v60 = vsub.f32 %v9716_v49, %v9807_v57 }
 0x67c   : > { %v2993_v61 = vmul.f32 0.5, %v2992_v35  ;;  %v2872_v34 = vpop.f32.mrf.mxu3 }
 0x67d   : > { %v2924_v24 = vsub.f32 %v2872_v34, %v2908_v0  ;;  %3213 = vrot.lane.b32.xlu2 %v9835_v63, %s7608_s30  ;;  %v3146_v42 = vmul.f32 %v3130_v14, %v3113_v53 }
 0x67e   : > { %v2994_v32 = vsub.f32 1.5, %v2993_v61 }
 0x67f   : > { %v7159_v17 = vpop.eup %7158  ;;  %v2940_v33 = vadd.f32 1e-05, %v2924_v24  ;;  %v3163_v51 = vadd.f32 %v9781_v40, %v3146_v42 }
 0x680   : > { %v2995_v8 = vmul.f32 %v7157_v19, %v2994_v32  ;;  %v3001_v29 = vmul.f32 %v7159_v17, %v2939_v5  ;;  %vm3007_vm15 = vweird.f32 %v7159_v17 }
 0x681   : > { %7160 = vrsqrt.f32 %v2940_v33  ;;  %v9844_v56 = vadd.f32 %v3163_v51, %v9018_v44  ;;  %v6855_v44 = vld [vmem:[%s12391_s2 + $0x268] sm:$0xff]  ;;  %vm3008_vm1 = vmor %vm3006_vm0, %vm3007_vm15  ;;  %vm3016_vm3 = vweird.f32 %v2940_v33 }
 0x682   : > { %v2999_v55 = vsel %vm2998_vm14, %v7157_v19, %v2995_v8  ;;  %v3002_v50 = vmul.f32 %v7159_v17, %v3001_v29  ;;  %v9846_v6 = vpop.f32.mrf.mxu2  ;;  %3501 = vmatpush.msrb.mxu0 %v6855_v44 }
 0x683   : > { %v3131_v18 = vmul.f32 %v9774_v1, %v2999_v55  ;;  %v2909_v48 = vmul.f32 %v9846_v6, %v9846_v6  ;;  %v9855_v38 = vmul.f32 %v9844_v56, %v9844_v56  ;;  %v3116_v55 = vsub.f32 %v9721_v59, %v9826_v30 }
 0x684   : > { %v3003_v52 = vmul.f32 0.5, %v3002_v50  ;;  %v2875_v36 = vpop.f32.mrf.mxu3 }
 0x685   : > { %v2925_v43 = vsub.f32 %v2875_v36, %v2909_v48  ;;  %3215 = vrot.lane.b32.xlu0 %v9855_v38, %s7608_s30  ;;  %v3147_v16 = vmul.f32 %v3131_v18, %v3114_v22 }
 0x686   : > { %v3004_v2 = vsub.f32 1.5, %v3003_v52 }
 0x687   : > { %v7161_v54 = vpop.eup %7160  ;;  %v2941_v7 = vadd.f32 1e-05, %v2925_v43  ;;  %v3164_v31 = vadd.f32 %v9781_v40, %v3147_v16 }
 0x688   : > { %v3005_v9 = vmul.f32 %v7159_v17, %v3004_v2  ;;  %v3011_v13 = vmul.f32 %v7161_v54, %v2940_v33  ;;  %vm3017_vm2 = vweird.f32 %v7161_v54 }
 0x689   : > { %7162 = vrsqrt.f32 %v2941_v7  ;;  %v9864_v19 = vadd.f32 %v3164_v31, %v9030_v41  ;;  %v6854_v41 = vld [vmem:[%s12391_s2 + $0x260] sm:$0xff]  ;;  %vm3018_vm4 = vmor %vm3016_vm3, %vm3017_vm2  ;;  %vm3026_vm6 = vweird.f32 %v2941_v7 }
 0x68a   : > { %v3009_v26 = vsel %vm3008_vm1, %v7159_v17, %v3005_v9  ;;  %v3012_v45 = vmul.f32 %v7161_v54, %v3011_v13  ;;  %v9866_v15 = vpop.f32.mrf.mxu2  ;;  %3502 = vmatpush.msrb.mxu0 %v6854_v41 }
 0x68b   : > { %v3132_v35 = vmul.f32 %v9774_v1, %v3009_v26  ;;  %v2910_v53 = vmul.f32 %v9866_v15, %v9866_v15  ;;  %v9875_v5 = vmul.f32 %v9864_v19, %v9864_v19  ;;  %v3117_v26 = vsub.f32 %v9726_v4, %v9846_v6 }
 0x68c   : > { %v3013_v14 = vmul.f32 0.5, %v3012_v45  ;;  %v2878_v0 = vpop.f32.mrf.mxu3 }
 0x68d   : > { %v2926_v62 = vsub.f32 %v2878_v0, %v2910_v53  ;;  %3217 = vrot.lane.b32.xlu1 %v9875_v5, %s7608_s30  ;;  %v3148_v49 = vmul.f32 %v3132_v35, %v3115_v60 }
 0x68e   : > { %v3014_v57 = vsub.f32 1.5, %v3013_v14 }
 0x68f   : > { %v7163_v61 = vpop.eup %7162  ;;  %v2942_v34 = vadd.f32 1e-05, %v2926_v62  ;;  %v3165_v24 = vadd.f32 %v9781_v40, %v3148_v49 }
 0x690   : > { %v3015_v42 = vmul.f32 %v7161_v54, %v3014_v57  ;;  %v3021_v32 = vmul.f32 %v7163_v61, %v2941_v7  ;;  %vm3027_vm5 = vweird.f32 %v7163_v61 }
 0x691   : > { %7164 = vrsqrt.f32 %v2942_v34  ;;  %v9884_v17 = vadd.f32 %v3165_v24, %v9041_v46  ;;  %v6853_v46 = vld [vmem:[%s12391_s2 + $0x258] sm:$0xff]  ;;  %vm3028_vm7 = vmor %vm3026_vm6, %vm3027_vm5  ;;  %vm3036_vm9 = vweird.f32 %v2942_v34 }
 0x692   : > { %v3019_v51 = vsel %vm3018_vm4, %v7161_v54, %v3015_v42  ;;  %v3022_v8 = vmul.f32 %v7163_v61, %v3021_v32  ;;  %v9886_v29 = vpop.f32.mrf.mxu2  ;;  %3503 = vmatpush.msrb.mxu0 %v6853_v46 }
 0x693   : > { %v3133_v50 = vmul.f32 %v9774_v1, %v3019_v51  ;;  %v2911_v22 = vmul.f32 %v9886_v29, %v9886_v29  ;;  %v9895_v33 = vmul.f32 %v9884_v17, %v9884_v17 }
 0x694   : > { %v3023_v18 = vmul.f32 0.5, %v3022_v8  ;;  %v2881_v48 = vpop.f32.mrf.mxu3  ;;  %v3118_v8 = vsub.f32 %v9731_v39, %v9866_v15 }
 0x695   : > { %v2927_v44 = vsub.f32 %v2881_v48, %v2911_v22  ;;  %3219 = vrot.lane.b32.xlu2 %v9895_v33, %s7608_s30  ;;  %v3149_v59 = vmul.f32 %v3133_v50, %v3116_v55  ;;  %v6851_v22 = vld [vmem:[%s12391_s2 + $0x248] sm:$0xff] }
 0x696   : > { %v3024_v30 = vsub.f32 1.5, %v3023_v18 }
 0x697   : > { %v7165_v52 = vpop.eup %7164  ;;  %v2943_v36 = vadd.f32 1e-05, %v2927_v44  ;;  %v3166_v43 = vadd.f32 %v9781_v40, %v3149_v59 }
 0x698   : > { %v3025_v16 = vmul.f32 %v7163_v61, %v3024_v30  ;;  %v3031_v2 = vmul.f32 %v7165_v52, %v2942_v34  ;;  %vm3037_vm8 = vweird.f32 %v7165_v52 }
 0x699   : > { %7166 = vrsqrt.f32 %v2943_v36  ;;  %v9904_v54 = vadd.f32 %v3166_v43, %v9050_v20  ;;  %v6852_v20 = vld [vmem:[%s12391_s2 + $0x250] sm:$0xff]  ;;  %vm3038_vm10 = vmor %vm3036_vm9, %vm3037_vm8  ;;  %vm3046_vm12 = vweird.f32 %v2943_v36 }
 0x69a   : > { %v3029_v31 = vsel %vm3028_vm7, %v7163_v61, %v3025_v16  ;;  %v3032_v9 = vmul.f32 %v7165_v52, %v3031_v2  ;;  %v9906_v13 = vpop.f32.mrf.mxu2  ;;  %3504 = vmatpush.msrb.mxu0 %v6852_v20  ;;  %v12431_v61 = vld [vmem:[#allocation5_spill] sm:$0xff]  ;;  %v12432_v16 = vld [vmem:[#allocation6_spill] sm:$0xff] }
 0x69b   : > { %v3134_v45 = vmul.f32 %v9774_v1, %v3029_v31  ;;  %v2912_v60 = vmul.f32 %v9906_v13, %v9906_v13  ;;  %v9915_v7 = vmul.f32 %v9904_v54, %v9904_v54 }
 0x69c   : > { %v3033_v35 = vmul.f32 0.5, %v3032_v9  ;;  %v2884_v53 = vpop.f32.mrf.mxu3  ;;  %3505 = vmatpush.msrb.mxu0 %v6851_v22 }
 0x69d   : > { %v2928_v41 = vsub.f32 %v2884_v53, %v2912_v60  ;;  %3221 = vrot.lane.b32.xlu0 %v9915_v7, %s7608_s30  ;;  %v3150_v4 = vmul.f32 %v3134_v45, %v3117_v26  ;;  %v3119_v45 = vsub.f32 %v9736_v27, %v9886_v29 }
 0x69e   : > { %v3034_v6 = vsub.f32 1.5, %v3033_v35  ;;  %v6850_v35 = vld [vmem:[%s12391_s2 + $0x240] sm:$0xff] }
 0x69f   : > { %v7167_v14 = vpop.eup %7166  ;;  %v2944_v0 = vadd.f32 1e-05, %v2928_v41  ;;  %v3167_v62 = vadd.f32 %v9781_v40, %v3150_v4  ;;  %3506 = vmatpush.msrb.mxu0 %v6850_v35 }
 0x6a0   : > { %v3035_v49 = vmul.f32 %v7165_v52, %v3034_v6  ;;  %v3041_v57 = vmul.f32 %v7167_v14, %v2943_v36  ;;  %vm3047_vm11 = vweird.f32 %v7167_v14 }
 0x6a1   : > { %7168 = vrsqrt.f32 %v2944_v0  ;;  %v9924_v24 = vadd.f32 %v3167_v62, %v12431_v61  ;;  %vm3048_vm13 = vmor %vm3046_vm12, %vm3047_vm11  ;;  %vm3056_vm15 = vweird.f32 %v2944_v0  ;;  %v12433_v61 = vld [vmem:[#allocation7_spill] sm:$0xff] }
 0x6a2   : > { %v3039_v42 = vsel %vm3038_vm10, %v7165_v52, %v3035_v49  ;;  %v3042_v32 = vmul.f32 %v7167_v14, %v3041_v57  ;;  %v9926_v51 = vpop.f32.mrf.mxu2 }
 0x6a3   : > { %v3135_v55 = vmul.f32 %v9774_v1, %v3039_v42  ;;  %v2913_v50 = vmul.f32 %v9926_v51, %v9926_v51  ;;  %v9935_v34 = vmul.f32 %v9924_v24, %v9924_v24 }
 0x6a4   : > { %v3043_v46 = vmul.f32 0.5, %v3042_v32  ;;  %v2887_v18 = vpop.f32.mrf.mxu3 }
 0x6a5   : > { %v2929_v48 = vsub.f32 %v2887_v18, %v2913_v50  ;;  %3223 = vrot.lane.b32.xlu1 %v9935_v34, %s7608_s30  ;;  %v3151_v39 = vmul.f32 %v3135_v55, %v3118_v8  ;;  %v3120_v50 = vsub.f32 %v9741_v25, %v9906_v13  ;;  %v6849_v18 = vld [vmem:[%s12391_s2 + $0x238] sm:$0xff] }
 0x6a6   : > { %v3044_v15 = vsub.f32 1.5, %v3043_v46  ;;  %3507 = vmatpush.msrb.mxu0 %v6849_v18  ;;  %v12435_v18 = vld [vmem:[#allocation9_spill] sm:$0xff] }
 0x6a7   : > { %v7169_v44 = vpop.eup %7168  ;;  %v2945_v59 = vadd.f32 1e-05, %v2929_v48  ;;  %v3168_v30 = vadd.f32 %v9781_v40, %v3151_v39 }
 0x6a8   : > { %v3045_v52 = vmul.f32 %v7167_v14, %v3044_v15  ;;  %v3051_v43 = vmul.f32 %v7169_v44, %v2944_v0  ;;  %vm3057_vm14 = vweird.f32 %v7169_v44 }
 0x6a9   : > { %7170 = vrsqrt.f32 %v2945_v59  ;;  %v9944_v2 = vadd.f32 %v3168_v30, %v12432_v16  ;;  %vm3058_vm0 = vmor %vm3056_vm15, %vm3057_vm14  ;;  %vm3066_vm2 = vweird.f32 %v2945_v59 }
 0x6aa   : > { %v3049_v31 = vsel %vm3048_vm13, %v7167_v14, %v3045_v52  ;;  %v3052_v9 = vmul.f32 %v7169_v44, %v3051_v43  ;;  %v9946_v26 = vpop.f32.mrf.mxu2  ;;  %v6848_v43 = vld [vmem:[%s12391_s2 + $0x230] sm:$0xff] }
 0x6ab   : > { %v3136_v60 = vmul.f32 %v9774_v1, %v3049_v31  ;;  %v2914_v20 = vmul.f32 %v9946_v26, %v9946_v26  ;;  %v9955_v36 = vmul.f32 %v9944_v2, %v9944_v2  ;;  %3508 = vmatpush.msrb.mxu0 %v6848_v43 }
 0x6ac   : > { %v3053_v53 = vmul.f32 0.5, %v3052_v9  ;;  %v2890_v41 = vpop.f32.mrf.mxu3  ;;  %v12434_v9 = vld [vmem:[#allocation8_spill] sm:$0xff] }
 0x6ad   : > { %v2930_v4 = vsub.f32 %v2890_v41, %v2914_v20  ;;  %3225 = vrot.lane.b32.xlu2 %v9955_v36, %s7608_s30  ;;  %v3152_v27 = vmul.f32 %v3136_v60, %v3119_v45  ;;  %v6847_v60 = vld [vmem:[%s12391_s2 + $0x228] sm:$0xff] }
 0x6ae   : > { %v3054_v29 = vsub.f32 1.5, %v3053_v53  ;;  %3509 = vmatpush.msrb.mxu0 %v6847_v60 }
 0x6af   : > { %v7171_v6 = vpop.eup %7170  ;;  %v9962_v14 = vadd.f32 1e-05, %v2930_v4  ;;  %v3169_v62 = vadd.f32 %v9781_v40, %v3152_v27 }
 0x6b0   : > { %v3055_v49 = vmul.f32 %v7169_v44, %v3054_v29  ;;  %v3061_v57 = vmul.f32 %v7171_v6, %v2945_v59  ;;  %vm3067_vm1 = vweird.f32 %v7171_v6  ;;  %v3121_v59 = vsub.f32 %v9746_v11, %v9926_v51  ;;  %v6846_v29 = vld [vmem:[%s12391_s2 + $0x220] sm:$0xff]  ;;  %v6845_v51 = vld [vmem:[%s12391_s2 + $0x218] sm:$0xff] }
 0x6b1   : > { %7172 = vrsqrt.f32 %v9962_v14  ;;  %v9967_v42 = vadd.f32 %v3169_v62, %v12433_v61  ;;  %vm3068_vm3 = vmor %vm3066_vm2, %vm3067_vm1  ;;  %3510 = vmatpush.msrb.mxu0 %v6846_v29  ;;  %vm3076_vm5 = vweird.f32 %v9962_v14  ;;  %v10061_v29 = vld [vmem:[%s12393_s4 + $0x70] sm:$0xff] }
 0x6b2   : > { %v3059_v32 = vsel %vm3058_vm0, %v7169_v44, %v3055_v49  ;;  %v3062_v8 = vmul.f32 %v7171_v6, %v3061_v57  ;;  %v9969_v55 = vpop.f32.mrf.mxu2 }
 0x6b3   : > { %v3137_v22 = vmul.f32 %v9774_v1, %v3059_v32  ;;  %v2915_v46 = vmul.f32 %v9969_v55, %v9969_v55  ;;  %v9978_v0 = vmul.f32 %v9967_v42, %v9967_v42  ;;  %3511 = vmatpush.msrb.mxu0 %v6845_v51 }
 0x6b4   : > { %v3063_v48 = vmul.f32 0.5, %v3062_v8  ;;  %v2893_v39 = vpop.f32.mrf.mxu3 }
 0x6b5   : > { %v2931_v15 = vsub.f32 %v2893_v39, %v2915_v46  ;;  %3227 = vrot.lane.b32.xlu0 %v9978_v0, %s7608_s30  ;;  %v3153_v25 = vmul.f32 %v3137_v22, %v3120_v50  ;;  %v6844_v50 = vld [vmem:[%s12391_s2 + $0x210] sm:$0xff]  ;;  %v6843_v39 = vld [vmem:[%s12391_s2 + $0x208] sm:$0xff] }
 0x6b6   : > { %v3064_v13 = vsub.f32 1.5, %v3063_v48  ;;  %3512 = vmatpush.msrb.mxu0 %v6844_v50 }
 0x6b7   : > { %v7173_v44 = vpop.eup %7172  ;;  %v9985_v30 = vadd.f32 1e-05, %v2931_v15  ;;  %v3170_v52 = vadd.f32 %v9781_v40, %v3153_v25 }
 0x6b8   : > { %v3065_v16 = vmul.f32 %v7171_v6, %v3064_v13  ;;  %v3071_v31 = vmul.f32 %v7173_v44, %v9962_v14  ;;  %vm3077_vm4 = vweird.f32 %v7173_v44  ;;  %3513 = vmatpush.msrb.mxu0 %v6843_v39  ;;  %v3122_v14 = vsub.f32 %v9751_v23, %v9946_v26  ;;  %v10052_v26 = vld [vmem:[%s12393_s4 + $0x78] sm:$0xff] }
 0x6b9   : > { %7174 = vrsqrt.f32 %v9985_v30  ;;  %v9994_v45 = vadd.f32 %v3170_v52, %v12434_v9  ;;  %vm3078_vm6 = vmor %vm3076_vm5, %vm3077_vm4  ;;  %vm3086_vm8 = vweird.f32 %v9985_v30 }
 0x6ba   : > { %v3069_v20 = vsel %vm3068_vm3, %v7171_v6, %v3065_v16  ;;  %v3072_v35 = vmul.f32 %v7173_v44, %v3071_v31  ;;  %v9999_v53 = vpop.f32.mrf.mxu2 }
 0x6bb   : > { %v3138_v41 = vmul.f32 %v9774_v1, %v3069_v20  ;;  %v2916_v4 = vmul.f32 %v9999_v53, %v9999_v53  ;;  %v10008_v27 = vmul.f32 %v9994_v45, %v9994_v45 }
 0x6bc   : > { %v3073_v6 = vmul.f32 0.5, %v3072_v35  ;;  %v2896_v62 = vpop.f32.mrf.mxu3 }
 0x6bd   : > { %v2932_v49 = vsub.f32 %v2896_v62, %v2916_v4  ;;  %3229 = vrot.lane.b32.xlu1 %v10008_v27, %s7608_s30  ;;  %v3154_v11 = vmul.f32 %v3138_v41, %v3121_v59 }
 0x6be   : > { %v3074_v57 = vsub.f32 1.5, %v3073_v6 }
 0x6bf   : > { %v7175_v61 = vpop.eup %7174  ;;  %v10018_v32 = vadd.f32 1e-05, %v2932_v49  ;;  %v3171_v8 = vadd.f32 %v9781_v40, %v3154_v11  ;;  %v12436_v11 = vld [vmem:[#allocation10_spill] sm:$0xff] }
 0x6c0   : > { %v3075_v22 = vmul.f32 %v7173_v44, %v3074_v57  ;;  %v3081_v46 = vmul.f32 %v7175_v61, %v9985_v30  ;;  %vm3087_vm7 = vweird.f32 %v7175_v61  ;;  %v10076_v57 = vld [vmem:[%s12393_s4 + $0x68] sm:$0xff] }
 0x6c1   : > { %7176 = vrsqrt.f32 %v10018_v32  ;;  %v10028_v48 = vadd.f32 %v3171_v8, %v12435_v18  ;;  %vm3088_vm9 = vmor %vm3086_vm8, %vm3087_vm7  ;;  %vm3096_vm11 = vweird.f32 %v10018_v32 }
 0x6c2   : > { %v3079_v15 = vsel %vm3078_vm6, %v7173_v44, %v3075_v22  ;;  %v3082_v25 = vmul.f32 %v7175_v61, %v3081_v46  ;;  %v10033_v13 = vpop.f32.mrf.mxu2  ;;  %v6842_v44 = vld [vmem:[%s12391_s2 + $0x200] sm:$0xff] }
 0x6c3   : > { %v3139_v52 = vmul.f32 %v9774_v1, %v3079_v15  ;;  %v2917_v43 = vmul.f32 %v10033_v13, %v10033_v13  ;;  %v10042_v16 = vmul.f32 %v10028_v48, %v10028_v48  ;;  %3514 = vmatpush.msrb.mxu0 %v6842_v44  ;;  %v10090_v46 = vld [vmem:[%s12393_s4 + $0x60] sm:$0xff] }
 0x6c4   : > { %v3083_v31 = vmul.f32 0.5, %v3082_v25  ;;  %v2899_v9 = vpop.f32.mrf.mxu3  ;;  %v10105_v25 = vld [vmem:[%s12393_s4 + $0x50] sm:$0xff] }
 0x6c5   : > { %v2933_v60 = vsub.f32 %v2899_v9, %v2917_v43  ;;  %3231 = vrot.lane.b32.xlu2 %v10042_v16, %s7608_s30  ;;  %v3155_v23 = vmul.f32 %v3139_v52, %v3122_v14  ;;  %4361 = vmatpush.msra.mxu0 %v10052_v26 }
 0x6c6   : > { %v3084_v20 = vsub.f32 1.5, %v3083_v31  ;;  %v12437_v31 = vld [vmem:[#allocation11_spill] sm:$0xff] }
 0x6c7   : > { %v7177_v35 = vpop.eup %7176  ;;  %v10055_v59 = vadd.f32 1e-05, %v2933_v60  ;;  %v3210_v41 = vpop.permute.xlu0 %3209  ;;  %v3172_v4 = vadd.f32 %v9781_v40, %v3155_v23  ;;  %4362 = vmatpush.msra.mxu0 %v10061_v29  ;;  %v10117_v60 = vld [vmem:[%s12393_s4 + $0x48] sm:$0xff] }
 0x6c8   : > { %v3085_v6 = vmul.f32 %v7175_v61, %v3084_v20  ;;  %v3091_v62 = vmul.f32 %v7177_v35, %v10018_v32  ;;  %v10067_v49 = vadd.f32 %v3210_v41, %v9789_v28  ;;  %v3123_v28 = vsub.f32 %v9756_v21, %v9969_v55  ;;  %v10098_v21 = vld [vmem:[%s12393_s4 + $0x58] sm:$0xff] }
 0x6c9   : > { %7178 = vrsqrt.f32 %v10055_v59  ;;  %v10071_v51 = vadd.f32 %v3172_v4, %v12436_v11  ;;  %4363 = vmatpush.msra.mxu0 %v10076_v57  ;;  %vm3097_vm10 = vweird.f32 %v7177_v35  ;;  %v3124_v32 = vsub.f32 %v9761_v12, %v9999_v53  ;;  %v10138_v53 = vld [vmem:[%s12393_s4 + $0x38] sm:$0xff] }
 0x6ca   : > { %v3089_v8 = vsel %vm3088_vm9, %v7175_v61, %v3085_v6  ;;  %v3092_v30 = vmul.f32 %v7177_v35, %v3091_v62  ;;  %7180 = vrsqrt.f32 %v10067_v49  ;;  %vm3098_vm12 = vmor %vm3096_vm11, %vm3097_vm10  ;;  %v10130_v62 = vld [vmem:[%s12393_s4 + $0x40] sm:$0xff]  ;;  %vm3106_vm15 = vweird.f32 %v10055_v59 }
 0x6cb   : > { %v3140_v50 = vmul.f32 %v9774_v1, %v3089_v8  ;;  %v10085_v22 = vmul.f32 %v10071_v51, %v10071_v51  ;;  %4364 = vmatpush.msra.mxu0 %v10090_v46  ;;  %vm3263_vm1 = vweird.f32 %v10067_v49 }
 0x6cc   : > { %v3093_v61 = vmul.f32 0.5, %v3092_v30 }
 0x6cd   : > { %3233 = vrot.lane.b32.xlu0 %v10085_v22, %s7608_s30  ;;  %v3156_v18 = vmul.f32 %v3140_v50, %v3123_v28  ;;  %4365 = vmatpush.msra.mxu0 %v10098_v21 }
 0x6ce   : > { %v3094_v55 = vsub.f32 1.5, %v3093_v61  ;;  %v10145_v61 = vld [vmem:[%s12393_s4 + $0x30] sm:$0xff] }
 0x6cf   : > { %v7179_v39 = vpop.eup %7178  ;;  %v3173_v15 = vadd.f32 %v9781_v40, %v3156_v18  ;;  %4366 = vmatpush.msra.mxu0 %v10105_v25 }
 0x6d0   : > { %v7181_v14 = vpop.eup %7180  ;;  %v3095_v52 = vmul.f32 %v7177_v35, %v3094_v55  ;;  %v3101_v43 = vmul.f32 %v7179_v39, %v10055_v59  ;;  %vm3107_vm13 = vweird.f32 %v7179_v39  ;;  %v10149_v55 = vstv %s6841_s11 }
 0x6d1   : > { %v3258_v44 = vmul.f32 %v7181_v14, %v10067_v49  ;;  %v10112_v9 = vadd.f32 %v3173_v15, %v12437_v31  ;;  %4367 = vmatpush.msra.mxu0 %v10117_v60  ;;  %vm3264_vm14 = vweird.f32 %v7181_v14  ;;  %vm3108_vm0 = vmor %vm3106_vm15, %vm3107_vm13 }
 0x6d2   : > { %v3099_v23 = vsel %vm3098_vm12, %v7177_v35, %v3095_v52  ;;  %v3102_v20 = vmul.f32 %v7179_v39, %v3101_v43  ;;  %v12438_v52 = vld [vmem:[#allocation12_spill] sm:$0xff]  ;;  %vm3265_vm2 = vmor %vm3263_vm1, %vm3264_vm14 }
 0x6d3   : > { %v3141_v41 = vmul.f32 %v9774_v1, %v3099_v23  ;;  %v3259_v4 = vmul.f32 %v7181_v14, %v3258_v44  ;;  %v10125_v6 = vmul.f32 %v10112_v9, %v10112_v9  ;;  %4368 = vmatpush.msra.mxu0 %v10130_v62  ;;  %v10158_v44 = vld [vmem:[%s12393_s4 + $0x28] sm:$0xff]  ;;  %v3125_v23 = vsub.f32 %v9766_v37, %v10033_v13 }
 0x6d4   : > { %v3103_v11 = vmul.f32 0.5, %v3102_v20 }
 0x6d5   : > { %v3260_v35 = vmul.f32 0.5, %v3259_v4  ;;  %3235 = vrot.lane.b32.xlu1 %v10125_v6, %s7608_s30  ;;  %v3157_v12 = vmul.f32 %v3141_v41, %v3124_v32  ;;  %4369 = vmatpush.msra.mxu0 %v10138_v53  ;;  %v10173_v41 = vld [vmem:[%s12393_s4 + $0x20] sm:$0xff] }
 0x6d6   : > { %v3104_v8 = vsub.f32 1.5, %v3103_v11  ;;  %v12439_v11 = vld [vmem:[#allocation13_spill] sm:$0xff] }
 0x6d7   : > { %v3261_v30 = vsub.f32 1.5, %v3260_v35  ;;  %v3214_v28 = vpop.permute.xlu2 %3213  ;;  %v3174_v50 = vadd.f32 %v9781_v40, %v3157_v12  ;;  %4370 = vmatpush.msra.mxu0 %v10145_v61  ;;  %v7546_v12 = vld [vmem:[%s12393_s4 + $0x8] sm:$0xff] }
 0x6d8   : > { %v3105_v18 = vmul.f32 %v7179_v39, %v3104_v8  ;;  %v3243_v59 = vadd.f32 %v3214_v28, %v9835_v63 }
 0x6d9   : > { %v3262_v15 = vmul.f32 %v7181_v14, %v3261_v30  ;;  %v10153_v43 = vadd.f32 %v3174_v50, %v12438_v52  ;;  %4371 = vmatpush.msra.mxu0 %v10158_v44  ;;  %v10202_v30 = vld [vmem:[%s12393_s4] sm:$0xff] }
 0x6da   : > { %v3109_v31 = vsel %vm3108_vm0, %v7179_v39, %v3105_v18  ;;  %7182 = vrsqrt.f32 %v3243_v59  ;;  %vm3283_vm5 = vweird.f32 %v3243_v59 }
 0x6db   : > { %v3142_v49 = vmul.f32 %v9774_v1, %v3109_v31  ;;  %v3266_v20 = vsel %vm3265_vm2, %v7181_v14, %v3262_v15  ;;  %v10168_v32 = vmul.f32 %v10153_v43, %v10153_v43  ;;  %4372 = vmatpush.msra.mxu0 %v10173_v41  ;;  %v7544_v1 = vld [vmem:[%s12393_s4 + $0x18] sm:$0xff]  ;;  %v7545_v14 = vld [vmem:[%s12393_s4 + $0x10] sm:$0xff] }
 0x6dc   : > { %v3418_v39 = vmul.f32 %v10149_v55, %v3266_v20 }
 0x6dd   : > { %3237 = vrot.lane.b32.xlu2 %v10168_v32, %s7608_s30  ;;  %v3158_v37 = vmul.f32 %v3142_v49, %v3125_v23  ;;  %4373 = vmatpush.msra.mxu0 %v7544_v1 }
 0x6de   : > { %v3434_v63 = vsub.f32 1.0, %v3418_v39 }
 0x6df   : > { %v3175_v13 = vadd.f32 %v9781_v40, %v3158_v37  ;;  %4374 = vmatpush.msra.mxu0 %v7545_v14 }
 0x6e0   : > { %v3450_v4 = vmax.f32 %v3434_v63, 0.0  ;;  %v7183_v28 = vpop.eup %7182 }
 0x6e1   : > { %v10187_v35 = vadd.f32 %v3175_v13, %v12439_v11  ;;  %4375 = vmatpush.msra.mxu0 %v7546_v12  ;;  %vm3284_vm3 = vweird.f32 %v7183_v28 }
 0x6e2   : > { %v10193_v8 = vmul.f32 %v3450_v4, %v9785_v3  ;;  %v3278_v3 = vmul.f32 %v7183_v28, %v3243_v59  ;;  %vm3285_vm6 = vmor %vm3283_vm5, %vm3284_vm3 }
 0x6e3   : > { %v10197_v40 = vmul.f32 %v10187_v35, %v10187_v35  ;;  %4376 = vmatpush.msra.mxu0 %v10202_v30 }
 0x6e4   : > { %3515 = vmatmul.f32.vlgmr.msrb.gmra.mxu0 %v10193_v8  ;;  %v3279_v15 = vmul.f32 %v7183_v28, %v3278_v3 }
 0x6e5   : > { %3239 = vrot.lane.b32.xlu0 %v10197_v40, %s7608_s30  ;;  %5253 = vmatpush.msrb.mxu0 %v10052_v26 }
 0x6e6   : > { %v3280_v52 = vmul.f32 0.5, %v3279_v15 }
 0x6e7   : > { %v3212_v50 = vpop.permute.xlu1 %3211  ;;  %5254 = vmatpush.msrb.mxu0 %v10061_v29 }
 0x6e8   : > { %v3242_v18 = vadd.f32 %v3212_v50, %v9815_v10  ;;  %v3281_v10 = vsub.f32 1.5, %v3280_v52 }
 0x6e9   : > { %5255 = vmatpush.msrb.mxu0 %v10076_v57 }
 0x6ea   : > { %7184 = vrsqrt.f32 %v3242_v18  ;;  %vm3273_vm7 = vweird.f32 %v3242_v18 }
 0x6eb   : > { %5256 = vmatpush.msrb.mxu0 %v10090_v46  ;;  %v3282_v46 = vmul.f32 %v7183_v28, %v3281_v10 }
 0x6ed   : > { %5257 = vmatpush.msrb.mxu0 %v10098_v21 }
 0x6ef   : > { %v3220_v31 = vpop.permute.xlu2 %3219  ;;  %5258 = vmatpush.msrb.mxu0 %v10105_v25 }
 0x6f0   : > { %v7185_v23 = vpop.eup %7184  ;;  %v10217_v29 = vadd.f32 %v3220_v31, %v9895_v33 }
 0x6f1   : > { %v3268_v26 = vmul.f32 %v7185_v23, %v3242_v18  ;;  %5259 = vmatpush.msrb.mxu0 %v10117_v60  ;;  %vm3274_vm4 = vweird.f32 %v7185_v23 }
 0x6f2   : > { %7186 = vrsqrt.f32 %v10217_v29  ;;  %vm3275_vm8 = vmor %vm3273_vm7, %vm3274_vm4  ;;  %vm3313_vm14 = vweird.f32 %v10217_v29 }
 0x6f3   : > { %v3269_v49 = vmul.f32 %v7185_v23, %v3268_v26  ;;  %5260 = vmatpush.msrb.mxu0 %v10130_v62 }
 0x6f5   : > { %v3270_v57 = vmul.f32 0.5, %v3269_v49  ;;  %5261 = vmatpush.msrb.mxu0 %v10138_v53  ;;  %v3286_v53 = vsel %vm3285_vm6, %v7183_v28, %v3282_v46 }
 0x6f7   : > { %v3271_v21 = vsub.f32 1.5, %v3270_v57  ;;  %v3216_v25 = vpop.permute.xlu0 %3215  ;;  %5262 = vmatpush.msrb.mxu0 %v10145_v61  ;;  %v3420_v61 = vmul.f32 %v10149_v55, %v3286_v53 }
 0x6f8   : > { %v3244_v33 = vadd.f32 %v3216_v25, %v9855_v38  ;;  %v7187_v20 = vpop.eup %7186 }
 0x6f9   : > { %v3272_v60 = vmul.f32 %v7185_v23, %v3271_v21  ;;  %5263 = vmatpush.msrb.mxu0 %v10158_v44  ;;  %v3308_v38 = vmul.f32 %v7187_v20, %v10217_v29  ;;  %v3436_v11 = vsub.f32 1.0, %v3420_v61  ;;  %vm3314_vm12 = vweird.f32 %v7187_v20 }
 0x6fa   : > { %7188 = vrsqrt.f32 %v3244_v33  ;;  %vm3293_vm10 = vweird.f32 %v3244_v33  ;;  %vm3315_vm15 = vmor %vm3313_vm14, %vm3314_vm12 }
 0x6fb   : > { %v3276_v62 = vsel %vm3275_vm8, %v7185_v23, %v3272_v60  ;;  %5264 = vmatpush.msrb.mxu0 %v10173_v41  ;;  %v3309_v28 = vmul.f32 %v7187_v20, %v3308_v38  ;;  %v3452_v50 = vmax.f32 %v3436_v11, 0.0 }
 0x6fc   : > { %v3419_v39 = vmul.f32 %v10149_v55, %v3276_v62 }
 0x6fd   : > { %5265 = vmatpush.msrb.mxu0 %v7544_v1  ;;  %v10239_v31 = vmul.f32 %v3452_v50, %v9824_v58 }
 0x6fe   : > { %v3435_v37 = vsub.f32 1.0, %v3419_v39 }
 0x6ff   : > { %v3218_v59 = vpop.permute.xlu1 %3217  ;;  %5266 = vmatpush.msrb.mxu0 %v7545_v14  ;;  %v3310_v14 = vmul.f32 0.5, %v3309_v28 }
 0x700   : > { %v7189_v63 = vpop.eup %7188  ;;  %v3245_v44 = vadd.f32 %v3218_v59, %v9875_v5  ;;  %v3451_v13 = vmax.f32 %v3435_v37, 0.0 }
 0x701   : > { %v3288_v4 = vmul.f32 %v7189_v63, %v3244_v33  ;;  %5267 = vmatpush.msrb.mxu0 %v7546_v12  ;;  %vm3294_vm9 = vweird.f32 %v7189_v63 }
 0x702   : > { %7190 = vrsqrt.f32 %v3245_v44  ;;  %v10231_v41 = vmul.f32 %v3451_v13, %v9805_v47  ;;  %vm3295_vm11 = vmor %vm3293_vm10, %vm3294_vm9  ;;  %vm3303_vm0 = vweird.f32 %v3245_v44 }
 0x703   : > { %v3289_v1 = vmul.f32 %v7189_v63, %v3288_v4  ;;  %5268 = vmatpush.msrb.mxu0 %v10202_v30  ;;  %v3311_v30 = vsub.f32 1.5, %v3310_v14 }
 0x704   : > { %3518 = vmatmul.f32.gmra.mxu0 %v10231_v41 }
 0x705   : > { %v3290_v3 = vmul.f32 0.5, %v3289_v1  ;;  %v3312_v46 = vmul.f32 %v7187_v20, %v3311_v30 }
 0x707   : > { %v3291_v18 = vsub.f32 1.5, %v3290_v3  ;;  %v3226_v5 = vpop.permute.xlu2 %3225  ;;  %v3316_v53 = vsel %vm3315_vm15, %v7187_v20, %v3312_v46 }
 0x708   : > { %v7191_v15 = vpop.eup %7190  ;;  %v10236_v47 = vadd.f32 %v3226_v5, %v9955_v36  ;;  %v3423_v29 = vmul.f32 %v10149_v55, %v3316_v53 }
 0x709   : > { %v3292_v52 = vmul.f32 %v7189_v63, %v3291_v18  ;;  %v3298_v12 = vmul.f32 %v7191_v15, %v3245_v44  ;;  %vm3304_vm13 = vweird.f32 %v7191_v15 }
 0x70a   : > { %7192 = vrsqrt.f32 %v10236_v47  ;;  %vm3305_vm1 = vmor %vm3303_vm0, %vm3304_vm13  ;;  %v3439_v20 = vsub.f32 1.0, %v3423_v29  ;;  %vm3343_vm7 = vweird.f32 %v10236_v47 }
 0x70b   : > { %v3299_v23 = vmul.f32 %v7191_v15, %v3298_v12  ;;  %v3296_v26 = vsel %vm3295_vm11, %v7189_v63, %v3292_v52 }
 0x70c   : > { %3521 = vmatmul.f32.gmra.mxu0 %v10239_v31  ;;  %v3421_v10 = vmul.f32 %v10149_v55, %v3296_v26  ;;  %v3455_v1 = vmax.f32 %v3439_v20, 0.0 }
 0x70d   : > { %v3300_v49 = vmul.f32 0.5, %v3299_v23 }
 0x70e   : > { %v3437_v57 = vsub.f32 1.0, %v3421_v10 }
 0x70f   : > { %v3301_v21 = vsub.f32 1.5, %v3300_v49  ;;  %v3222_v36 = vpop.permute.xlu0 %3221 }
 0x710   : > { %v3247_v58 = vadd.f32 %v3222_v36, %v9915_v7  ;;  %v3453_v25 = vmax.f32 %v3437_v57, 0.0  ;;  %v7193_v39 = vpop.eup %7192 }
 0x711   : > { %v3302_v33 = vmul.f32 %v7191_v15, %v3301_v21  ;;  %v3338_v7 = vmul.f32 %v7193_v39, %v10236_v47  ;;  %vm3344_vm5 = vweird.f32 %v7193_v39 }
 0x712   : > { %7194 = vrsqrt.f32 %v3247_v58  ;;  %v10247_v60 = vmul.f32 %v3453_v25, %v9844_v56  ;;  %vm3323_vm3 = vweird.f32 %v3247_v58  ;;  %vm3345_vm8 = vmor %vm3343_vm7, %vm3344_vm5 }
 0x713   : > { %v3306_v62 = vsel %vm3305_vm1, %v7191_v15, %v3302_v33  ;;  %v3339_v4 = vmul.f32 %v7193_v39, %v3338_v7 }
 0x714   : > { %3524 = vmatmul.f32.gmra.mxu0 %v10247_v60  ;;  %v3422_v37 = vmul.f32 %v10149_v55, %v3306_v62 }
 0x715   : > { %v3340_v3 = vmul.f32 0.5, %v3339_v4 }
 0x716   : > { %v3438_v61 = vsub.f32 1.0, %v3422_v37 }
 0x717   : > { %v3224_v38 = vpop.permute.xlu1 %3223  ;;  %v3341_v52 = vsub.f32 1.5, %v3340_v3 }
 0x718   : > { %v7195_v59 = vpop.eup %7194  ;;  %v3248_v63 = vadd.f32 %v3224_v38, %v9935_v34  ;;  %v3454_v44 = vmax.f32 %v3438_v61, 0.0 }
 0x719   : > { %v3318_v13 = vmul.f32 %v7195_v59, %v3247_v58  ;;  %vm3324_vm2 = vweird.f32 %v7195_v59  ;;  %v3342_v49 = vmul.f32 %v7193_v39, %v3341_v52 }
 0x71a   : > { %7196 = vrsqrt.f32 %v3248_v63  ;;  %v10255_v56 = vmul.f32 %v3454_v44, %v9864_v19  ;;  %vm3325_vm4 = vmor %vm3323_vm3, %vm3324_vm2  ;;  %v10262_v19 = vmul.f32 %v3455_v1, %v9884_v17  ;;  %vm3333_vm9 = vweird.f32 %v3248_v63 }
 0x71b   : > { %v3319_v11 = vmul.f32 %v7195_v59, %v3318_v13  ;;  %v3346_v25 = vsel %vm3345_vm8, %v7193_v39, %v3342_v49 }
 0x71c   : > { %3527 = vmatmul.f32.gmra.mxu0 %v10255_v56  ;;  %12440 = vst [vmem:[#allocation5_spill] sm:$0xff] %v10262_v19  ;;  %v3426_v47 = vmul.f32 %v10149_v55, %v3346_v25 }
 0x71d   : > { %v3320_v28 = vmul.f32 0.5, %v3319_v11 }
 0x71e   : > { %v3442_v39 = vsub.f32 1.0, %v3426_v47 }
 0x71f   : > { %v3321_v50 = vsub.f32 1.5, %v3320_v28  ;;  %v3232_v14 = vpop.permute.xlu2 %3231 }
 0x720   : > { %v7197_v18 = vpop.eup %7196  ;;  %v10259_v15 = vadd.f32 %v3232_v14, %v10042_v16  ;;  %v3458_v13 = vmax.f32 %v3442_v39, 0.0 }
 0x721   : > { %v3322_v5 = vmul.f32 %v7195_v59, %v3321_v50  ;;  %v3328_v34 = vmul.f32 %v7197_v18, %v3248_v63  ;;  %vm3334_vm6 = vweird.f32 %v7197_v18 }
 0x722   : > { %7198 = vrsqrt.f32 %v10259_v15  ;;  %vm3335_vm10 = vmor %vm3333_vm9, %vm3334_vm6  ;;  %vm3373_vm0 = vweird.f32 %v10259_v15 }
 0x723   : > { %v3329_v12 = vmul.f32 %v7197_v18, %v3328_v34  ;;  %v3326_v30 = vsel %vm3325_vm4, %v7195_v59, %v3322_v5 }
 0x724   : > { %3530 = vmatmul.f32.gmra.mxu0 %v10262_v19  ;;  %v3424_v23 = vmul.f32 %v10149_v55, %v3326_v30 }
 0x725   : > { %v3330_v26 = vmul.f32 0.5, %v3329_v12 }
 0x726   : > { %v3440_v10 = vsub.f32 1.0, %v3424_v23 }
 0x727   : > { %v3331_v57 = vsub.f32 1.5, %v3330_v26  ;;  %v3228_v16 = vpop.permute.xlu0 %3227 }
 0x728   : > { %v3250_v17 = vadd.f32 %v3228_v16, %v9978_v0  ;;  %v3456_v46 = vmax.f32 %v3440_v10, 0.0  ;;  %v7199_v33 = vpop.eup %7198 }
 0x729   : > { %v3332_v21 = vmul.f32 %v7197_v18, %v3331_v57  ;;  %v3368_v0 = vmul.f32 %v7199_v33, %v10259_v15  ;;  %vm3374_vm14 = vweird.f32 %v7199_v33 }
 0x72a   : > { %7200 = vrsqrt.f32 %v3250_v17  ;;  %v10270_v36 = vmul.f32 %v3456_v46, %v9904_v54  ;;  %vm3353_vm12 = vweird.f32 %v3250_v17  ;;  %vm3375_vm1 = vmor %vm3373_vm0, %vm3374_vm14 }
 0x72b   : > { %v3336_v58 = vsel %vm3335_vm10, %v7197_v18, %v3332_v21  ;;  %v3369_v59 = vmul.f32 %v7199_v33, %v3368_v0 }
 0x72c   : > { %12441 = vst [vmem:[#allocation6_spill] sm:$0xff] %v10270_v36  ;;  %3533 = vmatmul.f32.gmra.mxu0 %v10270_v36  ;;  %v3425_v62 = vmul.f32 %v10149_v55, %v3336_v58 }
 0x72d   : > { %v3370_v20 = vmul.f32 0.5, %v3369_v59 }
 0x72e   : > { %v3441_v53 = vsub.f32 1.0, %v3425_v62 }
 0x72f   : > { %v3230_v37 = vpop.permute.xlu1 %3229  ;;  %v3371_v50 = vsub.f32 1.5, %v3370_v20 }
 0x730   : > { %v7201_v61 = vpop.eup %7200  ;;  %v3251_v29 = vadd.f32 %v3230_v37, %v10008_v27  ;;  %v3457_v7 = vmax.f32 %v3441_v53, 0.0 }
 0x731   : > { %v3348_v38 = vmul.f32 %v7201_v61, %v3250_v17  ;;  %vm3354_vm11 = vweird.f32 %v7201_v61  ;;  %v3372_v12 = vmul.f32 %v7199_v33, %v3371_v50 }
 0x732   : > { %7202 = vrsqrt.f32 %v3251_v29  ;;  %v10278_v54 = vmul.f32 %v3457_v7, %v9924_v24  ;;  %vm3355_vm13 = vmor %vm3353_vm12, %vm3354_vm11  ;;  %v10285_v24 = vmul.f32 %v3458_v13, %v9944_v2  ;;  %vm3363_vm2 = vweird.f32 %v3251_v29 }
 0x733   : > { %v3349_v63 = vmul.f32 %v7201_v61, %v3348_v38  ;;  %v3376_v57 = vsel %vm3375_vm1, %v7199_v33, %v3372_v12 }
 0x734   : > { %12442 = vst [vmem:[#allocation7_spill] sm:$0xff] %v10278_v54  ;;  %3536 = vmatmul.f32.gmra.mxu0 %v10278_v54  ;;  %v3429_v15 = vmul.f32 %v10149_v55, %v3376_v57 }
 0x735   : > { %v3350_v44 = vmul.f32 0.5, %v3349_v63  ;;  %12443 = vst [vmem:[#allocation8_spill] sm:$0xff] %v10285_v24 }
 0x736   : > { %v3445_v33 = vsub.f32 1.0, %v3429_v15 }
 0x737   : > { %v3351_v4 = vsub.f32 1.5, %v3350_v44  ;;  %v3238_v11 = vpop.permute.xlu2 %3237 }
 0x738   : > { %v7203_v28 = vpop.eup %7202  ;;  %v10282_v3 = vadd.f32 %v3238_v11, %v10168_v32 }
 0x739   : > { %v3352_v1 = vmul.f32 %v7201_v61, %v3351_v4  ;;  %v3358_v27 = vmul.f32 %v7203_v28, %v3251_v29  ;;  %vm3364_vm15 = vweird.f32 %v7203_v28 }
 0x73a   : > { %7204 = vrsqrt.f32 %v10282_v3  ;;  %vm3365_vm3 = vmor %vm3363_vm2, %vm3364_vm15  ;;  %vm3403_vm9 = vweird.f32 %v10282_v3 }
 0x73b   : > { %v3359_v14 = vmul.f32 %v7203_v28, %v3358_v27  ;;  %v3356_v18 = vsel %vm3355_vm13, %v7201_v61, %v3352_v1  ;;  %v3461_v61 = vmax.f32 %v3445_v33, 0.0 }
 0x73c   : > { %3539 = vmatmul.f32.gmra.mxu0 %v10285_v24  ;;  %v3427_v5 = vmul.f32 %v10149_v55, %v3356_v18 }
 0x73d   : > { %v3360_v34 = vmul.f32 0.5, %v3359_v14  ;;  %v10305_v59 = vmul.f32 %v3461_v61, %v10028_v48 }
 0x73e   : > { %v3443_v52 = vsub.f32 1.0, %v3427_v5 }
 0x73f   : > { %v3361_v30 = vsub.f32 1.5, %v3360_v34  ;;  %v3234_v32 = vpop.permute.xlu0 %3233  ;;  %12446 = vst [vmem:[#allocation11_spill] sm:$0xff] %v10305_v59 }
 0x740   : > { %v3253_v2 = vadd.f32 %v3234_v32, %v10085_v22  ;;  %v3459_v23 = vmax.f32 %v3443_v52, 0.0  ;;  %v7205_v16 = vpop.eup %7204 }
 0x741   : > { %v3362_v26 = vmul.f32 %v7203_v28, %v3361_v30  ;;  %v3398_v22 = vmul.f32 %v7205_v16, %v10282_v3  ;;  %vm3404_vm7 = vweird.f32 %v7205_v16 }
 0x742   : > { %7206 = vrsqrt.f32 %v3253_v2  ;;  %v10293_v10 = vmul.f32 %v3459_v23, %v9967_v42  ;;  %vm3383_vm5 = vweird.f32 %v3253_v2  ;;  %vm3405_vm10 = vmor %vm3403_vm9, %vm3404_vm7 }
 0x743   : > { %v3366_v49 = vsel %vm3365_vm3, %v7203_v28, %v3362_v26  ;;  %v3399_v47 = vmul.f32 %v7205_v16, %v3398_v22 }
 0x744   : > { %12444 = vst [vmem:[#allocation9_spill] sm:$0xff] %v10293_v10  ;;  %3542 = vmatmul.f32.gmra.mxu0 %v10293_v10  ;;  %v3428_v17 = vmul.f32 %v10149_v55, %v3366_v49  ;;  %v10769_v10 = vld [vmem:[%s12393_s4 + $0x38] sm:$0xff] }
 0x745   : > { %v3400_v29 = vmul.f32 0.5, %v3399_v47 }
 0x746   : > { %v3444_v46 = vsub.f32 1.0, %v3428_v17 }
 0x747   : > { %v3236_v21 = vpop.permute.xlu1 %3235 }
 0x748   : > { %v7207_v58 = vpop.eup %7206  ;;  %v3254_v25 = vadd.f32 %v3236_v21, %v10125_v6  ;;  %v3460_v62 = vmax.f32 %v3444_v46, 0.0 }
 0x749   : > { %v3378_v53 = vmul.f32 %v7207_v58, %v3253_v2  ;;  %vm3384_vm4 = vweird.f32 %v7207_v58 }
 0x74a   : > { %7208 = vrsqrt.f32 %v3254_v25  ;;  %v10301_v42 = vmul.f32 %v3460_v62, %v9994_v45  ;;  %vm3385_vm6 = vmor %vm3383_vm5, %vm3384_vm4  ;;  %v3401_v45 = vsub.f32 1.5, %v3400_v29  ;;  %vm3393_vm11 = vweird.f32 %v3254_v25 }
 0x74b   : > { %v3379_v0 = vmul.f32 %v7207_v58, %v3378_v53 }
 0x74c   : > { %12445 = vst [vmem:[#allocation10_spill] sm:$0xff] %v10301_v42  ;;  %3545 = vmatmul.f32.gmra.mxu0 %v10301_v42  ;;  %v3402_v11 = vmul.f32 %v7205_v16, %v3401_v45 }
 0x74d   : > { %v3380_v37 = vmul.f32 0.5, %v3379_v0 }
 0x74e   : > { %v3406_v5 = vsel %vm3405_vm10, %v7205_v16, %v3402_v11 }
 0x74f   : > { %v3381_v7 = vsub.f32 1.5, %v3380_v37  ;;  %v3432_v3 = vmul.f32 %v10149_v55, %v3406_v5 }
 0x750   : > { %v7209_v38 = vpop.eup %7208 }
 0x751   : > { %v3382_v39 = vmul.f32 %v7207_v58, %v3381_v7  ;;  %v3388_v6 = vmul.f32 %v7209_v38, %v3254_v25  ;;  %vm3394_vm8 = vweird.f32 %v7209_v38  ;;  %v3448_v23 = vsub.f32 1.0, %v3432_v3 }
 0x752   : > { %vm3395_vm12 = vmor %vm3393_vm11, %vm3394_vm8 }
 0x753   : > { %v3389_v63 = vmul.f32 %v7209_v38, %v3388_v6  ;;  %v3386_v44 = vsel %vm3385_vm6, %v7207_v58, %v3382_v39  ;;  %v3464_v57 = vmax.f32 %v3448_v23, 0.0 }
 0x754   : > { %3548 = vmatmul.f32.gmra.mxu0 %v10305_v59  ;;  %v3430_v13 = vmul.f32 %v10149_v55, %v3386_v44 }
 0x755   : > { %v3390_v20 = vmul.f32 0.5, %v3389_v63  ;;  %v10327_v46 = vmul.f32 %v3464_v57, %v10153_v43  ;;  %v10413_v57 = vld [vmem:[%s12392_s3 + $0x8] ss:$0 sm:$0xff] }
 0x756   : > { %v3446_v4 = vsub.f32 1.0, %v3430_v13 }
 0x757   : > { %v3391_v28 = vsub.f32 1.5, %v3390_v20  ;;  %v3240_v1 = vpop.permute.xlu0 %3239  ;;  %12449 = vst [vmem:[#allocation14_spill] sm:$0xff] %v10327_v46 }
 0x758   : > { %v3256_v27 = vadd.f32 %v3240_v1, %v10197_v40  ;;  %v3462_v48 = vmax.f32 %v3446_v4, 0.0 }
 0x759   : > { %v3392_v50 = vmul.f32 %v7209_v38, %v3391_v28 }
 0x75a   : > { %7210 = vrsqrt.f32 %v3256_v27  ;;  %v10312_v14 = vmul.f32 %v3462_v48, %v10071_v51  ;;  %vm3413_vm14 = vweird.f32 %v3256_v27 }
 0x75b   : > { %v3396_v18 = vsel %vm3395_vm12, %v7209_v38, %v3392_v50 }
 0x75c   : > { %12447 = vst [vmem:[#allocation12_spill] sm:$0xff] %v10312_v14  ;;  %3551 = vmatmul.f32.gmra.mxu0 %v10312_v14  ;;  %v3431_v34 = vmul.f32 %v10149_v55, %v3396_v18 }
 0x75e   : > { %v3447_v52 = vsub.f32 1.0, %v3431_v34 }
 0x760   : > { %v7211_v12 = vpop.eup %7210  ;;  %v3463_v40 = vmax.f32 %v3447_v52, 0.0 }
 0x761   : > { %v3408_v30 = vmul.f32 %v7211_v12, %v3256_v27  ;;  %v10317_v32 = vpop.f32.mrf.mxu0  ;;  %vm3414_vm13 = vweird.f32 %v7211_v12 }
 0x762   : > { %v3632_v2 = vmul.f32 %v10317_v32, %v10317_v32  ;;  %3583 = vmatmul.f32.vlgmr.msrb.gmra.mxu1 %v10317_v32  ;;  %v10323_v51 = vmul.f32 %v3463_v40, %v10112_v9  ;;  %vm3415_vm15 = vmor %vm3413_vm14, %vm3414_vm13 }
 0x763   : > { %v3409_v26 = vmul.f32 %v7211_v12, %v3408_v30 }
 0x764   : > { %12448 = vst [vmem:[#allocation13_spill] sm:$0xff] %v10323_v51  ;;  %3554 = vmatmul.f32.gmra.mxu0 %v10323_v51  ;;  %3664 = vmatmul.f32.vlgmr.msrb.gmra.mxu2 %v3632_v2 }
 0x765   : > { %v3410_v49 = vmul.f32 0.5, %v3409_v26 }
 0x767   : > { %v3411_v16 = vsub.f32 1.5, %v3410_v49 }
 0x769   : > { %v3412_v17 = vmul.f32 %v7211_v12, %v3411_v16 }
 0x76b   : > { %v3416_v15 = vsel %vm3415_vm15, %v7211_v12, %v3412_v17 }
 0x76c   : > { %3557 = vmatmul.f32.gmra.mxu0 %v10327_v46  ;;  %v3433_v9 = vmul.f32 %v10149_v55, %v3416_v15 }
 0x76e   : > { %v3449_v22 = vsub.f32 1.0, %v3433_v9 }
 0x770   : > { %v3465_v21 = vmax.f32 %v3449_v22, 0.0  ;;  %v10420_v22 = vld [vmem:[%s12392_s3 + $0x9] ss:$0 sm:$0xff] }
 0x772   : > { %v10332_v58 = vmul.f32 %v3465_v21, %v10187_v35 }
 0x774   : > { %12450 = vst [vmem:[#allocation15_spill] sm:$0xff] %v10332_v58  ;;  %3560 = vmatmul.f32.gmra.mxu0 %v10332_v58 }
 0x781   : > { %v10335_v25 = vpop.f32.mrf.mxu0 }
 0x782   : > { %3586 = vmatmul.f32.gmra.mxu1 %v10335_v25  ;;  %v3633_v43 = vmul.f32 %v10335_v25, %v10335_v25 }
 0x784   : > { %3667 = vmatmul.f32.gmra.mxu2 %v3633_v43 }
 0x789   : > { %v10340_v62 = vpop.f32.mrf.mxu0 }
 0x78a   : > { %3589 = vmatmul.f32.gmra.mxu1 %v10340_v62  ;;  %v3634_v55 = vmul.f32 %v10340_v62, %v10340_v62 }
 0x78c   : > { %3670 = vmatmul.f32.gmra.mxu2 %v3634_v55 }
 0x791   : > { %v10345_v35 = vpop.f32.mrf.mxu0 }
 0x792   : > { %3592 = vmatmul.f32.gmra.mxu1 %v10345_v35  ;;  %v3635_v53 = vmul.f32 %v10345_v35, %v10345_v35 }
 0x794   : > { %3673 = vmatmul.f32.gmra.mxu2 %v3635_v53 }
 0x799   : > { %v10350_v33 = vpop.f32.mrf.mxu0 }
 0x79a   : > { %3595 = vmatmul.f32.gmra.mxu1 %v10350_v33  ;;  %v3636_v47 = vmul.f32 %v10350_v33, %v10350_v33 }
 0x79c   : > { %3676 = vmatmul.f32.gmra.mxu2 %v3636_v47 }
 0x7a1   : > { %v10355_v0 = vpop.f32.mrf.mxu0 }
 0x7a2   : > { %3598 = vmatmul.f32.gmra.mxu1 %v10355_v0  ;;  %v3637_v37 = vmul.f32 %v10355_v0, %v10355_v0 }
 0x7a4   : > { %3679 = vmatmul.f32.gmra.mxu2 %v3637_v37 }
 0x7a9   : > { %v10360_v61 = vpop.f32.mrf.mxu0 }
 0x7aa   : > { %3601 = vmatmul.f32.gmra.mxu1 %v10360_v61  ;;  %v3638_v29 = vmul.f32 %v10360_v61, %v10360_v61 }
 0x7ac   : > { %3682 = vmatmul.f32.gmra.mxu2 %v3638_v29 }
 0x7b1   : > { %v10365_v7 = vpop.f32.mrf.mxu0 }
 0x7b2   : > { %3604 = vmatmul.f32.gmra.mxu1 %v10365_v7  ;;  %v3639_v38 = vmul.f32 %v10365_v7, %v10365_v7 }
 0x7b4   : > { %3685 = vmatmul.f32.gmra.mxu2 %v3639_v38 }
 0x7b9   : > { %v10370_v39 = vpop.f32.mrf.mxu0 }
 0x7ba   : > { %3607 = vmatmul.f32.gmra.mxu1 %v10370_v39  ;;  %v3640_v6 = vmul.f32 %v10370_v39, %v10370_v39 }
 0x7bc   : > { %3688 = vmatmul.f32.gmra.mxu2 %v3640_v6 }
 0x7c1   : > { %v10375_v45 = vpop.f32.mrf.mxu0 }
 0x7c2   : > { %3610 = vmatmul.f32.gmra.mxu1 %v10375_v45  ;;  %v3641_v63 = vmul.f32 %v10375_v45, %v10375_v45 }
 0x7c4   : > { %3691 = vmatmul.f32.gmra.mxu2 %v3641_v63 }
 0x7c9   : > { %v10380_v44 = vpop.f32.mrf.mxu0 }
 0x7ca   : > { %3613 = vmatmul.f32.gmra.mxu1 %v10380_v44  ;;  %v3642_v13 = vmul.f32 %v10380_v44, %v10380_v44 }
 0x7cc   : > { %3694 = vmatmul.f32.gmra.mxu2 %v3642_v13 }
 0x7d1   : > { %v10385_v20 = vpop.f32.mrf.mxu0 }
 0x7d2   : > { %3616 = vmatmul.f32.gmra.mxu1 %v10385_v20  ;;  %v3643_v4 = vmul.f32 %v10385_v20, %v10385_v20 }
 0x7d4   : > { %3697 = vmatmul.f32.gmra.mxu2 %v3643_v4 }
 0x7d9   : > { %v10390_v11 = vpop.f32.mrf.mxu0 }
 0x7da   : > { %3619 = vmatmul.f32.gmra.mxu1 %v10390_v11  ;;  %v3644_v28 = vmul.f32 %v10390_v11, %v10390_v11 }
 0x7dc   : > { %3700 = vmatmul.f32.gmra.mxu2 %v3644_v28 }
 0x7df   : > { %v3584_v48 = vpop.f32.mrf.mxu1 }
 0x7e0   : > { %v3713_v50 = vmul.f32 %v3584_v48, %v3584_v48  ;;  %v3921_v15 = vsub.f32 %v10317_v32, %v3584_v48 }
 0x7e1   : > { %v10395_v1 = vpop.f32.mrf.mxu0 }
 0x7e2   : > { %3622 = vmatmul.f32.gmra.mxu1 %v10395_v1  ;;  %v3645_v27 = vmul.f32 %v10395_v1, %v10395_v1 }
 0x7e4   : > { %3703 = vmatmul.f32.gmra.mxu2 %v3645_v27 }
 0x7e7   : > { %v3665_v18 = vpop.f32.mrf.mxu2 }
 0x7e8   : > { %v3729_v5 = vsub.f32 %v3665_v18, %v3713_v50 }
 0x7e9   : > { %v10400_v34 = vpop.f32.mrf.mxu0 }
 0x7ea   : > { %v3745_v52 = vadd.f32 1e-05, %v3729_v5  ;;  %3625 = vmatmul.f32.gmra.mxu1 %v10400_v34  ;;  %v3646_v3 = vmul.f32 %v10400_v34, %v10400_v34 }
 0x7ec   : > { %7212 = vrsqrt.f32 %v3745_v52  ;;  %3706 = vmatmul.f32.gmra.mxu2 %v3646_v3  ;;  %vm3767_vm1 = vweird.f32 %v3745_v52 }
 0x7f1   : > { %v10405_v12 = vpop.f32.mrf.mxu0 }
 0x7f2   : > { %v7213_v40 = vpop.eup %7212  ;;  %3628 = vmatmul.f32.gmra.mxu1 %v10405_v12  ;;  %v3647_v30 = vmul.f32 %v10405_v12, %v10405_v12 }
 0x7f3   : > { %v3762_v2 = vmul.f32 %v7213_v40, %v3745_v52  ;;  %vm3768_vm0 = vweird.f32 %v7213_v40 }
 0x7f4   : > { %3709 = vmatmul.f32.gmra.mxu2 %v3647_v30  ;;  %vm3769_vm2 = vmor %vm3767_vm1, %vm3768_vm0 }
 0x7f5   : > { %v3763_v23 = vmul.f32 %v7213_v40, %v3762_v2 }
 0x7f7   : > { %v3764_v26 = vmul.f32 0.5, %v3763_v23 }
 0x7f9   : > { %v3765_v49 = vsub.f32 1.5, %v3764_v26 }
 0x7fb   : > { %v3766_v16 = vmul.f32 %v7213_v40, %v3765_v49 }
 0x7fd   : > { %v3770_v17 = vsel %vm3769_vm2, %v7213_v40, %v3766_v16 }
 0x7fe   : > { %v3938_v9 = vmul.f32 %v10413_v57, %v3770_v17 }
 0x7ff   : > { %v3587_v21 = vpop.f32.mrf.mxu1 }
 0x800   : > { %v3954_v43 = vmul.f32 %v3938_v9, %v3921_v15  ;;  %v3714_v47 = vmul.f32 %v3587_v21, %v3587_v21  ;;  %v6876_v15 = vld [vmem:[%s12391_s2 + $0x2f8] sm:$0xff]  ;;  %v3922_v9 = vsub.f32 %v10335_v25, %v3587_v21 }
 0x801   : > { %4294 = vmatpush.msrb.mxu3 %v6876_v15 }
 0x802   : > { %v10423_v55 = vadd.f32 %v10420_v22, %v3954_v43 }
 0x804   : > { %v10427_v53 = vmul.f32 %v10423_v55, %v10423_v55 }
 0x806   : > { %4004 = vrot.lane.b32.xlu1 %v10427_v53, %s7608_s30 }
 0x807   : > { %v10431_v32 = vpop.f32.mrf.mxu1  ;;  %v3668_v37 = vpop.f32.mrf.mxu2 }
 0x808   : > { %v3730_v29 = vsub.f32 %v3668_v37, %v3714_v47  ;;  %v3715_v6 = vmul.f32 %v10431_v32, %v10431_v32 }
 0x80a   : > { %v3746_v38 = vadd.f32 1e-05, %v3730_v29 }
 0x80c   : > { %7214 = vrsqrt.f32 %v3746_v38  ;;  %vm3777_vm4 = vweird.f32 %v3746_v38 }
 0x80f   : > { %v10435_v63 = vpop.f32.mrf.mxu1  ;;  %v3671_v13 = vpop.f32.mrf.mxu2 }
 0x810   : > { %v3731_v4 = vsub.f32 %v3671_v13, %v3715_v6  ;;  %v3716_v18 = vmul.f32 %v10435_v63, %v10435_v63 }
 0x812   : > { %v7215_v28 = vpop.eup %7214  ;;  %v3747_v27 = vadd.f32 1e-05, %v3731_v4 }
 0x813   : > { %v3772_v48 = vmul.f32 %v7215_v28, %v3746_v38  ;;  %vm3778_vm3 = vweird.f32 %v7215_v28 }
 0x814   : > { %7216 = vrsqrt.f32 %v3747_v27  ;;  %vm3779_vm5 = vmor %vm3777_vm4, %vm3778_vm3  ;;  %vm3787_vm7 = vweird.f32 %v3747_v27 }
 0x815   : > { %v3773_v50 = vmul.f32 %v7215_v28, %v3772_v48 }
 0x817   : > { %v3774_v5 = vmul.f32 0.5, %v3773_v50  ;;  %v10439_v52 = vpop.f32.mrf.mxu1  ;;  %v3674_v3 = vpop.f32.mrf.mxu2 }
 0x818   : > { %v3732_v40 = vsub.f32 %v3674_v3, %v3716_v18  ;;  %v3717_v43 = vmul.f32 %v10439_v52, %v10439_v52 }
 0x819   : > { %v3775_v30 = vsub.f32 1.5, %v3774_v5 }
 0x81a   : > { %v7217_v2 = vpop.eup %7216  ;;  %v3748_v23 = vadd.f32 1e-05, %v3732_v40  ;;  %v6875_v40 = vld [vmem:[%s12391_s2 + $0x2f0] sm:$0xff] }
 0x81b   : > { %v3776_v26 = vmul.f32 %v7215_v28, %v3775_v30  ;;  %v3782_v49 = vmul.f32 %v7217_v2, %v3747_v27  ;;  %vm3788_vm6 = vweird.f32 %v7217_v2  ;;  %v3923_v30 = vsub.f32 %v10340_v62, %v10431_v32  ;;  %4295 = vmatpush.msrb.mxu3 %v6875_v40 }
 0x81c   : > { %7218 = vrsqrt.f32 %v3748_v23  ;;  %vm3789_vm8 = vmor %vm3787_vm7, %vm3788_vm6  ;;  %vm3797_vm10 = vweird.f32 %v3748_v23 }
 0x81d   : > { %v3780_v16 = vsel %vm3779_vm5, %v7215_v28, %v3776_v26  ;;  %v3783_v17 = vmul.f32 %v7217_v2, %v3782_v49 }
 0x81e   : > { %v3939_v47 = vmul.f32 %v10413_v57, %v3780_v16 }
 0x81f   : > { %v3784_v37 = vmul.f32 0.5, %v3783_v17  ;;  %v10448_v29 = vpop.f32.mrf.mxu1  ;;  %v3677_v38 = vpop.f32.mrf.mxu2 }
 0x820   : > { %v3733_v6 = vsub.f32 %v3677_v38, %v3717_v43  ;;  %v3955_v13 = vmul.f32 %v3939_v47, %v3922_v9  ;;  %v3718_v26 = vmul.f32 %v10448_v29, %v10448_v29 }
 0x821   : > { %v3785_v4 = vsub.f32 1.5, %v3784_v37 }
 0x822   : > { %v7219_v28 = vpop.eup %7218  ;;  %v3749_v48 = vadd.f32 1e-05, %v3733_v6  ;;  %v10451_v50 = vadd.f32 %v10420_v22, %v3955_v13 }
 0x823   : > { %v3786_v25 = vmul.f32 %v7217_v2, %v3785_v4  ;;  %v3792_v21 = vmul.f32 %v7219_v28, %v3748_v23  ;;  %vm3798_vm9 = vweird.f32 %v7219_v28  ;;  %v6874_v4 = vld [vmem:[%s12391_s2 + $0x2e8] sm:$0xff] }
 0x824   : > { %7220 = vrsqrt.f32 %v3749_v48  ;;  %v10455_v18 = vmul.f32 %v10451_v50, %v10451_v50  ;;  %vm3799_vm11 = vmor %vm3797_vm10, %vm3798_vm9  ;;  %4296 = vmatpush.msrb.mxu3 %v6874_v4  ;;  %vm3807_vm13 = vweird.f32 %v3749_v48 }
 0x825   : > { %v3790_v5 = vsel %vm3789_vm8, %v7217_v2, %v3786_v25  ;;  %v3793_v3 = vmul.f32 %v7219_v28, %v3792_v21  ;;  %v3924_v25 = vsub.f32 %v10345_v35, %v10435_v63 }
 0x826   : > { %4006 = vrot.lane.b32.xlu2 %v10455_v18, %s7608_s30  ;;  %v3940_v27 = vmul.f32 %v10413_v57, %v3790_v5 }
 0x827   : > { %v3794_v49 = vmul.f32 0.5, %v3793_v3  ;;  %v10467_v16 = vpop.f32.mrf.mxu1  ;;  %v3680_v2 = vpop.f32.mrf.mxu2 }
 0x828   : > { %v3734_v17 = vsub.f32 %v3680_v2, %v3718_v26  ;;  %v3956_v15 = vmul.f32 %v3940_v27, %v3923_v30  ;;  %v3719_v21 = vmul.f32 %v10467_v16, %v10467_v16 }
 0x829   : > { %v3795_v9 = vsub.f32 1.5, %v3794_v49 }
 0x82a   : > { %v7221_v43 = vpop.eup %7220  ;;  %v3750_v47 = vadd.f32 1e-05, %v3734_v17  ;;  %v10470_v62 = vadd.f32 %v10420_v22, %v3956_v15 }
 0x82b   : > { %v3796_v32 = vmul.f32 %v7219_v28, %v3795_v9  ;;  %v3802_v37 = vmul.f32 %v7221_v43, %v3749_v48  ;;  %vm3808_vm12 = vweird.f32 %v7221_v43 }
 0x82c   : > { %7222 = vrsqrt.f32 %v3750_v47  ;;  %v10474_v38 = vmul.f32 %v10470_v62, %v10470_v62  ;;  %vm3809_vm14 = vmor %vm3807_vm13, %vm3808_vm12  ;;  %vm3817_vm0 = vweird.f32 %v3750_v47 }
 0x82d   : > { %v3800_v6 = vsel %vm3799_vm11, %v7219_v28, %v3796_v32  ;;  %v3803_v13 = vmul.f32 %v7221_v43, %v3802_v37  ;;  %v6873_v32 = vld [vmem:[%s12391_s2 + $0x2e0] sm:$0xff]  ;;  %v3925_v37 = vsub.f32 %v10350_v33, %v10439_v52 }
 0x82e   : > { %4008 = vrot.lane.b32.xlu0 %v10474_v38, %s7608_s30  ;;  %v3941_v23 = vmul.f32 %v10413_v57, %v3800_v6  ;;  %4297 = vmatpush.msrb.mxu3 %v6873_v32 }
 0x82f   : > { %v3804_v5 = vmul.f32 0.5, %v3803_v13  ;;  %v10486_v3 = vpop.f32.mrf.mxu1  ;;  %v3683_v28 = vpop.f32.mrf.mxu2 }
 0x830   : > { %v3735_v40 = vsub.f32 %v3683_v28, %v3719_v21  ;;  %v3957_v30 = vmul.f32 %v3941_v23, %v3924_v25  ;;  %v3720_v6 = vmul.f32 %v10486_v3, %v10486_v3 }
 0x831   : > { %v3805_v26 = vsub.f32 1.5, %v3804_v5 }
 0x832   : > { %v7223_v27 = vpop.eup %7222  ;;  %v3751_v49 = vadd.f32 1e-05, %v3735_v40  ;;  %v10489_v35 = vadd.f32 %v10420_v22, %v3957_v30 }
 0x833   : > { %v3806_v63 = vmul.f32 %v7221_v43, %v3805_v26  ;;  %v3812_v2 = vmul.f32 %v7223_v27, %v3750_v47  ;;  %vm3818_vm15 = vweird.f32 %v7223_v27 }
 0x834   : > { %7224 = vrsqrt.f32 %v3751_v49  ;;  %v10493_v17 = vmul.f32 %v10489_v35, %v10489_v35  ;;  %vm3819_vm1 = vmor %vm3817_vm0, %vm3818_vm15  ;;  %vm3827_vm3 = vweird.f32 %v3751_v49 }
 0x835   : > { %v3810_v15 = vsel %vm3809_vm14, %v7221_v43, %v3806_v63  ;;  %v3813_v9 = vmul.f32 %v7223_v27, %v3812_v2  ;;  %v6872_v2 = vld [vmem:[%s12391_s2 + $0x2d8] sm:$0xff] }
 0x836   : > { %4010 = vrot.lane.b32.xlu1 %v10493_v17, %s7608_s30  ;;  %v3942_v48 = vmul.f32 %v10413_v57, %v3810_v15  ;;  %v3926_v15 = vsub.f32 %v10355_v0, %v10448_v29  ;;  %4298 = vmatpush.msrb.mxu3 %v6872_v2 }
 0x837   : > { %v3814_v13 = vmul.f32 0.5, %v3813_v9  ;;  %v10505_v4 = vpop.f32.mrf.mxu1  ;;  %v3686_v43 = vpop.f32.mrf.mxu2 }
 0x838   : > { %v3736_v25 = vsub.f32 %v3686_v43, %v3720_v6  ;;  %v3958_v21 = vmul.f32 %v3942_v48, %v3925_v37  ;;  %v3721_v9 = vmul.f32 %v10505_v4, %v10505_v4 }
 0x839   : > { %v3815_v23 = vsub.f32 1.5, %v3814_v13 }
 0x83a   : > { %v7225_v5 = vpop.eup %7224  ;;  %v3752_v28 = vadd.f32 1e-05, %v3736_v25  ;;  %v10508_v33 = vadd.f32 %v10420_v22, %v3958_v21 }
 0x83b   : > { %v3816_v52 = vmul.f32 %v7223_v27, %v3815_v23  ;;  %v3822_v40 = vmul.f32 %v7225_v5, %v3751_v49  ;;  %vm3828_vm2 = vweird.f32 %v7225_v5 }
 0x83c   : > { %7226 = vrsqrt.f32 %v3752_v28  ;;  %v10512_v30 = vmul.f32 %v10508_v33, %v10508_v33  ;;  %vm3829_vm4 = vmor %vm3827_vm3, %vm3828_vm2  ;;  %vm3837_vm6 = vweird.f32 %v3752_v28 }
 0x83d   : > { %v3820_v26 = vsel %vm3819_vm1, %v7223_v27, %v3816_v52  ;;  %v3823_v63 = vmul.f32 %v7225_v5, %v3822_v40 }
 0x83e   : > { %4012 = vrot.lane.b32.xlu2 %v10512_v30, %s7608_s30  ;;  %v3943_v47 = vmul.f32 %v10413_v57, %v3820_v26  ;;  %v6871_v26 = vld [vmem:[%s12391_s2 + $0x2d0] sm:$0xff] }
 0x83f   : > { %v3824_v32 = vmul.f32 0.5, %v3823_v63  ;;  %v10524_v37 = vpop.f32.mrf.mxu1  ;;  %v3689_v27 = vpop.f32.mrf.mxu2  ;;  %v3927_v63 = vsub.f32 %v10360_v61, %v10467_v16  ;;  %4299 = vmatpush.msrb.mxu3 %v6871_v26  ;;  %v3928_v26 = vsub.f32 %v10365_v7, %v10486_v3 }
 0x840   : > { %v3737_v6 = vsub.f32 %v3689_v27, %v3721_v9  ;;  %v3959_v48 = vmul.f32 %v3943_v47, %v3926_v15  ;;  %v3722_v2 = vmul.f32 %v10524_v37, %v10524_v37 }
 0x841   : > { %v3825_v13 = vsub.f32 1.5, %v3824_v32 }
 0x842   : > { %v7227_v43 = vpop.eup %7226  ;;  %v3753_v25 = vadd.f32 1e-05, %v3737_v6  ;;  %v10527_v0 = vadd.f32 %v10420_v22, %v3959_v48 }
 0x843   : > { %v3826_v29 = vmul.f32 %v7225_v5, %v3825_v13  ;;  %v3832_v21 = vmul.f32 %v7227_v43, %v3752_v28  ;;  %vm3838_vm5 = vweird.f32 %v7227_v43 }
 0x844   : > { %7228 = vrsqrt.f32 %v3753_v25  ;;  %v10531_v23 = vmul.f32 %v10527_v0, %v10527_v0  ;;  %vm3839_vm7 = vmor %vm3837_vm6, %vm3838_vm5  ;;  %vm3847_vm9 = vweird.f32 %v3753_v25 }
 0x845   : > { %v3830_v52 = vsel %vm3829_vm4, %v7225_v5, %v3826_v29  ;;  %v3833_v40 = vmul.f32 %v7227_v43, %v3832_v21 }
 0x846   : > { %4014 = vrot.lane.b32.xlu0 %v10531_v23, %s7608_s30  ;;  %v3944_v49 = vmul.f32 %v10413_v57, %v3830_v52 }
 0x847   : > { %v3834_v15 = vmul.f32 0.5, %v3833_v40  ;;  %v10543_v9 = vpop.f32.mrf.mxu1  ;;  %v3692_v5 = vpop.f32.mrf.mxu2  ;;  %v6870_v40 = vld [vmem:[%s12391_s2 + $0x2c8] sm:$0xff] }
 0x848   : > { %v3738_v47 = vsub.f32 %v3692_v5, %v3722_v2  ;;  %v3960_v32 = vmul.f32 %v3944_v49, %v3927_v63  ;;  %v3723_v63 = vmul.f32 %v10543_v9, %v10543_v9  ;;  %4300 = vmatpush.msrb.mxu3 %v6870_v40  ;;  %v6869_v40 = vld [vmem:[%s12391_s2 + $0x2c0] sm:$0xff] }
 0x849   : > { %v3835_v27 = vsub.f32 1.5, %v3834_v15 }
 0x84a   : > { %v7229_v6 = vpop.eup %7228  ;;  %v3754_v48 = vadd.f32 1e-05, %v3738_v47  ;;  %v10546_v61 = vadd.f32 %v10420_v22, %v3960_v32  ;;  %4301 = vmatpush.msrb.mxu3 %v6869_v40 }
 0x84b   : > { %v3836_v16 = vmul.f32 %v7227_v43, %v3835_v27  ;;  %v3842_v13 = vmul.f32 %v7229_v6, %v3753_v25  ;;  %vm3848_vm8 = vweird.f32 %v7229_v6 }
 0x84c   : > { %7230 = vrsqrt.f32 %v3754_v48  ;;  %v10550_v29 = vmul.f32 %v10546_v61, %v10546_v61  ;;  %vm3849_vm10 = vmor %vm3847_vm9, %vm3848_vm8  ;;  %vm3857_vm12 = vweird.f32 %v3754_v48 }
 0x84d   : > { %v3840_v21 = vsel %vm3839_vm7, %v7227_v43, %v3836_v16  ;;  %v3843_v52 = vmul.f32 %v7229_v6, %v3842_v13 }
 0x84e   : > { %4016 = vrot.lane.b32.xlu1 %v10550_v29, %s7608_s30  ;;  %v3945_v28 = vmul.f32 %v10413_v57, %v3840_v21 }
 0x84f   : > { %v3844_v2 = vmul.f32 0.5, %v3843_v52  ;;  %v10562_v49 = vpop.f32.mrf.mxu1  ;;  %v3695_v43 = vpop.f32.mrf.mxu2 }
 0x850   : > { %v3739_v15 = vsub.f32 %v3695_v43, %v3723_v63  ;;  %v3961_v5 = vmul.f32 %v3945_v28, %v3928_v26  ;;  %v3929_v26 = vsub.f32 %v10370_v39, %v10505_v4  ;;  %v3724_v63 = vmul.f32 %v10562_v49, %v10562_v49 }
 0x851   : > { %v3845_v47 = vsub.f32 1.5, %v3844_v2 }
 0x852   : > { %v7231_v32 = vpop.eup %7230  ;;  %v3755_v27 = vadd.f32 1e-05, %v3739_v15  ;;  %v10565_v7 = vadd.f32 %v10420_v22, %v3961_v5 }
 0x853   : > { %v3846_v3 = vmul.f32 %v7229_v6, %v3845_v47  ;;  %v3852_v16 = vmul.f32 %v7231_v32, %v3754_v48  ;;  %vm3858_vm11 = vweird.f32 %v7231_v32 }
 0x854   : > { %7232 = vrsqrt.f32 %v3755_v27  ;;  %v10569_v13 = vmul.f32 %v10565_v7, %v10565_v7  ;;  %vm3859_vm13 = vmor %vm3857_vm12, %vm3858_vm11  ;;  %vm3867_vm15 = vweird.f32 %v3755_v27 }
 0x855   : > { %v3850_v21 = vsel %vm3849_vm10, %v7229_v6, %v3846_v3  ;;  %v3853_v52 = vmul.f32 %v7231_v32, %v3852_v16 }
 0x856   : > { %4018 = vrot.lane.b32.xlu2 %v10569_v13, %s7608_s30  ;;  %v3946_v25 = vmul.f32 %v10413_v57, %v3850_v21 }
 0x857   : > { %v3854_v28 = vmul.f32 0.5, %v3853_v52  ;;  %v10581_v2 = vpop.f32.mrf.mxu1  ;;  %v3698_v6 = vpop.f32.mrf.mxu2 }
 0x858   : > { %v3740_v43 = vsub.f32 %v3698_v6, %v3724_v63  ;;  %v3962_v15 = vmul.f32 %v3946_v25, %v3929_v26  ;;  %v6868_v26 = vld [vmem:[%s12391_s2 + $0x2b8] sm:$0xff]  ;;  %v3930_v63 = vsub.f32 %v10375_v45, %v10524_v37  ;;  %v3725_v25 = vmul.f32 %v10581_v2, %v10581_v2 }
 0x859   : > { %v3855_v5 = vsub.f32 1.5, %v3854_v28  ;;  %4302 = vmatpush.msrb.mxu3 %v6868_v26 }
 0x85a   : > { %v7233_v47 = vpop.eup %7232  ;;  %v3756_v3 = vadd.f32 1e-05, %v3740_v43  ;;  %v10584_v39 = vadd.f32 %v10420_v22, %v3962_v15 }
 0x85b   : > { %v3856_v4 = vmul.f32 %v7231_v32, %v3855_v5  ;;  %v3862_v16 = vmul.f32 %v7233_v47, %v3755_v27  ;;  %vm3868_vm14 = vweird.f32 %v7233_v47 }
 0x85c   : > { %7234 = vrsqrt.f32 %v3756_v3  ;;  %v10588_v21 = vmul.f32 %v10584_v39, %v10584_v39  ;;  %vm3869_vm0 = vmor %vm3867_vm15, %vm3868_vm14  ;;  %vm3877_vm2 = vweird.f32 %v3756_v3 }
 0x85d   : > { %v3860_v52 = vsel %vm3859_vm13, %v7231_v32, %v3856_v4  ;;  %v3863_v40 = vmul.f32 %v7233_v47, %v3862_v16 }
 0x85e   : > { %4020 = vrot.lane.b32.xlu0 %v10588_v21, %s7608_s30  ;;  %v3947_v48 = vmul.f32 %v10413_v57, %v3860_v52 }
 0x85f   : > { %v3864_v28 = vmul.f32 0.5, %v3863_v40  ;;  %v10600_v6 = vpop.f32.mrf.mxu1  ;;  %v3701_v32 = vpop.f32.mrf.mxu2 }
 0x860   : > { %v3741_v43 = vsub.f32 %v3701_v32, %v3725_v25  ;;  %v3963_v15 = vmul.f32 %v3947_v48, %v3930_v63  ;;  %v6867_v63 = vld [vmem:[%s12391_s2 + $0x2b0] sm:$0xff]  ;;  %v3931_v25 = vsub.f32 %v10380_v44, %v10543_v9  ;;  %v3726_v48 = vmul.f32 %v10600_v6, %v10600_v6  ;;  %v6866_v9 = vld [vmem:[%s12391_s2 + $0x2a8] sm:$0xff] }
 0x861   : > { %v3865_v5 = vsub.f32 1.5, %v3864_v28  ;;  %4303 = vmatpush.msrb.mxu3 %v6867_v63 }
 0x862   : > { %v7235_v4 = vpop.eup %7234  ;;  %v3757_v16 = vadd.f32 1e-05, %v3741_v43  ;;  %v10603_v45 = vadd.f32 %v10420_v22, %v3963_v15 }
 0x863   : > { %v3866_v37 = vmul.f32 %v7233_v47, %v3865_v5  ;;  %v3872_v58 = vmul.f32 %v7235_v4, %v3756_v3  ;;  %vm3878_vm1 = vweird.f32 %v7235_v4  ;;  %4304 = vmatpush.msrb.mxu3 %v6866_v9 }
 0x864   : > { %7236 = vrsqrt.f32 %v3757_v16  ;;  %v10607_v52 = vmul.f32 %v10603_v45, %v10603_v45  ;;  %vm3879_vm3 = vmor %vm3877_vm2, %vm3878_vm1  ;;  %vm3887_vm5 = vweird.f32 %v3757_v16 }
 0x865   : > { %v3870_v40 = vsel %vm3869_vm0, %v7233_v47, %v3866_v37  ;;  %v3873_v26 = vmul.f32 %v7235_v4, %v3872_v58 }
 0x866   : > { %4022 = vrot.lane.b32.xlu1 %v10607_v52, %s7608_s30  ;;  %v3948_v27 = vmul.f32 %v10413_v57, %v3870_v40 }
 0x867   : > { %v3874_v28 = vmul.f32 0.5, %v3873_v26  ;;  %v3704_v32 = vpop.f32.mrf.mxu2  ;;  %v10619_v15 = vpop.f32.mrf.mxu1 }
 0x868   : > { %v3742_v47 = vsub.f32 %v3704_v32, %v3726_v48  ;;  %v3964_v58 = vmul.f32 %v3948_v27, %v3931_v25  ;;  %v6865_v25 = vld [vmem:[%s12391_s2 + $0x2a0] sm:$0xff]  ;;  %v3727_v3 = vmul.f32 %v10619_v15, %v10619_v15 }
 0x869   : > { %v3875_v43 = vsub.f32 1.5, %v3874_v28  ;;  %4305 = vmatpush.msrb.mxu3 %v6865_v25  ;;  %v3932_v28 = vsub.f32 %v10385_v20, %v10562_v49  ;;  %v6863_v20 = vld [vmem:[%s12391_s2 + $0x290] sm:$0xff] }
 0x86a   : > { %v7237_v5 = vpop.eup %7236  ;;  %v10621_v37 = vadd.f32 1e-05, %v3742_v47  ;;  %v10624_v44 = vadd.f32 %v10420_v22, %v3964_v58  ;;  %v6864_v47 = vld [vmem:[%s12391_s2 + $0x298] sm:$0xff] }
 0x86b   : > { %v3876_v40 = vmul.f32 %v7235_v4, %v3875_v43  ;;  %v3882_v26 = vmul.f32 %v7237_v5, %v3757_v16  ;;  %4306 = vmatpush.msrb.mxu3 %v6864_v47  ;;  %vm3888_vm4 = vweird.f32 %v7237_v5 }
 0x86c   : > { %7238 = vrsqrt.f32 %v10621_v37  ;;  %v10632_v63 = vmul.f32 %v10624_v44, %v10624_v44  ;;  %vm3889_vm6 = vmor %vm3887_vm5, %vm3888_vm4  ;;  %vm3897_vm8 = vweird.f32 %v10621_v37 }
 0x86d   : > { %v3880_v48 = vsel %vm3879_vm3, %v7235_v4, %v3876_v40  ;;  %v3883_v27 = vmul.f32 %v7237_v5, %v3882_v26  ;;  %4307 = vmatpush.msrb.mxu3 %v6863_v20  ;;  %v10679_v20 = vld [vmem:[%s12393_s4 + $0x78] sm:$0xff] }
 0x86e   : > { %4024 = vrot.lane.b32.xlu2 %v10632_v63, %s7608_s30  ;;  %v3949_v32 = vmul.f32 %v10413_v57, %v3880_v48  ;;  %v6862_v48 = vld [vmem:[%s12391_s2 + $0x288] sm:$0xff] }
 0x86f   : > { %v3884_v58 = vmul.f32 0.5, %v3883_v27  ;;  %v3707_v43 = vpop.f32.mrf.mxu2  ;;  %v6861_v27 = vld [vmem:[%s12391_s2 + $0x280] sm:$0xff]  ;;  %4308 = vmatpush.msrb.mxu3 %v6862_v48 }
 0x870   : > { %v3743_v4 = vsub.f32 %v3707_v43, %v3727_v3  ;;  %v3965_v9 = vmul.f32 %v3949_v32, %v3932_v28  ;;  %v10662_v32 = vpop.f32.mrf.mxu1 }
 0x871   : > { %v3885_v49 = vsub.f32 1.5, %v3884_v58  ;;  %4309 = vmatpush.msrb.mxu3 %v6861_v27  ;;  %v3728_v16 = vmul.f32 %v10662_v32, %v10662_v32 }
 0x872   : > { %v7239_v40 = vpop.eup %7238  ;;  %v10650_v26 = vadd.f32 1e-05, %v3743_v4  ;;  %v10653_v25 = vadd.f32 %v10420_v22, %v3965_v9  ;;  %v3933_v4 = vsub.f32 %v10390_v11, %v10581_v2  ;;  %v10685_v2 = vld [vmem:[%s12393_s4 + $0x70] sm:$0xff] }
 0x873   : > { %v3886_v28 = vmul.f32 %v7237_v5, %v3885_v49  ;;  %v3892_v3 = vmul.f32 %v7239_v40, %v10621_v37  ;;  %5172 = vmatpush.msra.mxu3 %v10679_v20  ;;  %vm3898_vm7 = vweird.f32 %v7239_v40 }
 0x874   : > { %7240 = vrsqrt.f32 %v10650_v26  ;;  %v10667_v47 = vmul.f32 %v10653_v25, %v10653_v25  ;;  %vm3899_vm9 = vmor %vm3897_vm8, %vm3898_vm7  ;;  %vm3907_vm11 = vweird.f32 %v10650_v26 }
 0x875   : > { %v3890_v58 = vsel %vm3889_vm6, %v7237_v5, %v3886_v28  ;;  %v3893_v43 = vmul.f32 %v7239_v40, %v3892_v3  ;;  %5173 = vmatpush.msra.mxu3 %v10685_v2 }
 0x876   : > { %4026 = vrot.lane.b32.xlu0 %v10667_v47, %s7608_s30  ;;  %v3950_v9 = vmul.f32 %v10413_v57, %v3890_v58 }
 0x877   : > { %v3894_v5 = vmul.f32 0.5, %v3893_v43  ;;  %v3710_v49 = vpop.f32.mrf.mxu2 }
 0x878   : > { %v3744_v48 = vsub.f32 %v3710_v49, %v3728_v16  ;;  %v4005_v27 = vpop.permute.xlu1 %4004  ;;  %v3966_v11 = vmul.f32 %v3950_v9, %v3933_v4  ;;  %v10699_v4 = vld [vmem:[%s12393_s4 + $0x68] sm:$0xff] }
 0x879   : > { %v3895_v28 = vsub.f32 1.5, %v3894_v5  ;;  %v10689_v3 = vadd.f32 %v4005_v27, %v10427_v53  ;;  %5174 = vmatpush.msra.mxu3 %v10699_v4  ;;  %v10713_v5 = vld [vmem:[%s12393_s4 + $0x60] sm:$0xff] }
 0x87a   : > { %v7241_v58 = vpop.eup %7240  ;;  %v10691_v46 = vadd.f32 1e-05, %v3744_v48  ;;  %v10694_v43 = vadd.f32 %v10420_v22, %v3966_v11  ;;  %v3934_v48 = vsub.f32 %v10395_v1, %v10600_v6  ;;  %v10724_v11 = vld [vmem:[%s12393_s4 + $0x58] sm:$0xff] }
 0x87b   : > { %v3896_v16 = vmul.f32 %v7239_v40, %v3895_v28  ;;  %v3902_v9 = vmul.f32 %v7241_v58, %v10650_v26  ;;  %7242 = vrsqrt.f32 %v10689_v3  ;;  %5175 = vmatpush.msra.mxu3 %v10713_v5  ;;  %vm3908_vm10 = vweird.f32 %v7241_v58 }
 0x87c   : > { %7244 = vrsqrt.f32 %v10691_v46  ;;  %v10708_v53 = vmul.f32 %v10694_v43, %v10694_v43  ;;  %vm3909_vm12 = vmor %vm3907_vm11, %vm3908_vm10  ;;  %v3935_v26 = vsub.f32 %v10400_v34, %v10619_v15  ;;  %v10775_v34 = vld [vmem:[%s12393_s4 + $0x30] sm:$0xff]  ;;  %vm4058_vm15 = vweird.f32 %v10689_v3 }
 0x87d   : > { %v3900_v49 = vsel %vm3899_vm9, %v7239_v40, %v3896_v16  ;;  %v3903_v37 = vmul.f32 %v7241_v58, %v3902_v9  ;;  %5176 = vmatpush.msra.mxu3 %v10724_v11  ;;  %v10730_v40 = vld [vmem:[%s12393_s4 + $0x50] sm:$0xff]  ;;  %vm3917_vm0 = vweird.f32 %v10691_v46 }
 0x87e   : > { %4028 = vrot.lane.b32.xlu1 %v10708_v53, %s7608_s30  ;;  %v3951_v27 = vmul.f32 %v10413_v57, %v3900_v49 }
 0x87f   : > { %v3904_v28 = vmul.f32 0.5, %v3903_v37  ;;  %5177 = vmatpush.msra.mxu3 %v10730_v40 }
 0x880   : > { %v4007_v51 = vpop.permute.xlu2 %4006  ;;  %v3967_v14 = vmul.f32 %v3951_v27, %v3934_v48  ;;  %v10745_v48 = vld [vmem:[%s12393_s4 + $0x48] sm:$0xff] }
 0x881   : > { %v7243_v1 = vpop.eup %7242  ;;  %v3905_v6 = vsub.f32 1.5, %v3904_v28  ;;  %v10736_v16 = vadd.f32 %v4007_v51, %v10455_v18  ;;  %5178 = vmatpush.msra.mxu3 %v10745_v48  ;;  %v10758_v18 = vld [vmem:[%s12393_s4 + $0x40] sm:$0xff] }
 0x882   : > { %v7245_v9 = vpop.eup %7244  ;;  %v4053_v49 = vmul.f32 %v7243_v1, %v10689_v3  ;;  %v10740_v37 = vadd.f32 %v10420_v22, %v3967_v14  ;;  %vm4059_vm13 = vweird.f32 %v7243_v1 }
 0x883   : > { %v3906_v27 = vmul.f32 %v7241_v58, %v3905_v6  ;;  %v3912_v28 = vmul.f32 %v7245_v9, %v10691_v46  ;;  %7246 = vrsqrt.f32 %v10736_v16  ;;  %5179 = vmatpush.msra.mxu3 %v10758_v18  ;;  %vm3918_vm14 = vweird.f32 %v7245_v9  ;;  %vm4060_vm1 = vmor %vm4058_vm15, %vm4059_vm13 }
 0x884   : > { %v4054_v51 = vmul.f32 %v7243_v1, %v4053_v49  ;;  %v10753_v14 = vmul.f32 %v10740_v37, %v10740_v37  ;;  %vm3919_vm2 = vmor %vm3917_vm0, %vm3918_vm14  ;;  %v3936_v46 = vsub.f32 %v10405_v12, %v10662_v32  ;;  %vm4068_vm4 = vweird.f32 %v10736_v16 }
 0x885   : > { %v3910_v6 = vsel %vm3909_vm12, %v7241_v58, %v3906_v27  ;;  %v3913_v59 = vmul.f32 %v7245_v9, %v3912_v28  ;;  %5180 = vmatpush.msra.mxu3 %v10769_v10 }
 0x886   : > { %v4055_v42 = vmul.f32 0.5, %v4054_v51  ;;  %4030 = vrot.lane.b32.xlu2 %v10753_v14, %s7608_s30  ;;  %v3952_v49 = vmul.f32 %v10413_v57, %v3910_v6  ;;  %v10779_v51 = vstv %s10733_s17  ;;  %s6898_s17 = sld [smem:[#allocation2 + $0x6]] }
 0x887   : > { %v3914_v24 = vmul.f32 0.5, %v3913_v59  ;;  %5181 = vmatpush.msra.mxu3 %v10775_v34 }
 0x888   : > { %v4056_v58 = vsub.f32 1.5, %v4055_v42  ;;  %v3968_v27 = vmul.f32 %v3952_v49, %v3935_v26  ;;  %v10789_v26 = vld [vmem:[%s12393_s4 + $0x28] sm:$0xff] }
 0x889   : > { %v7247_v15 = vpop.eup %7246  ;;  %v3915_v28 = vsub.f32 1.5, %v3914_v24  ;;  %5182 = vmatpush.msra.mxu3 %v10789_v26 }
 0x88a   : > { %v4057_v6 = vmul.f32 %v7243_v1, %v4056_v58  ;;  %v4063_v59 = vmul.f32 %v7247_v15, %v10736_v16  ;;  %v10784_v42 = vadd.f32 %v10420_v22, %v3968_v27  ;;  %v7559_v27 = vld [vmem:[%s12393_s4 + $0x20] sm:$0xff]  ;;  %vm4069_vm3 = vweird.f32 %v7247_v15 }
 0x88b   : > { %v3916_v49 = vmul.f32 %v7245_v9, %v3915_v28  ;;  %5183 = vmatpush.msra.mxu3 %v7559_v27  ;;  %vm4070_vm5 = vmor %vm4068_vm4, %vm4069_vm3 }
 0x88c   : > { %v4061_v24 = vsel %vm4060_vm1, %v7243_v1, %v4057_v6  ;;  %v4064_v3 = vmul.f32 %v7247_v15, %v4063_v59  ;;  %v10796_v58 = vmul.f32 %v10784_v42, %v10784_v42  ;;  %v7560_v6 = vld [vmem:[%s12393_s4 + $0x18] sm:$0xff] }
 0x88d   : > { %v3920_v54 = vsel %vm3919_vm2, %v7245_v9, %v3916_v49  ;;  %v4213_v36 = vmul.f32 %v10779_v51, %v4061_v24  ;;  %5184 = vmatpush.msra.mxu3 %v7560_v6  ;;  %v7561_v49 = vld [vmem:[%s12393_s4 + $0x10] sm:$0xff] }
 0x88e   : > { %v4065_v28 = vmul.f32 0.5, %v4064_v3  ;;  %4032 = vrot.lane.b32.xlu0 %v10796_v58, %s7608_s30  ;;  %v3953_v1 = vmul.f32 %v10413_v57, %v3920_v54  ;;  %v7562_v57 = vld [vmem:[%s12393_s4 + $0x8] sm:$0xff] }
 0x88f   : > { %v4229_v59 = vsub.f32 1.0, %v4213_v36  ;;  %5185 = vmatpush.msra.mxu3 %v7561_v49 }
 0x890   : > { %v4066_v19 = vsub.f32 1.5, %v4065_v28  ;;  %v3969_v9 = vmul.f32 %v3953_v1, %v3936_v46 }
 0x891   : > { %v4245_v12 = vmax.f32 %v4229_v59, 0.0  ;;  %5186 = vmatpush.msra.mxu3 %v7562_v57 }
 0x892   : > { %v4067_v32 = vmul.f32 %v7247_v15, %v4066_v19  ;;  %v10815_v54 = vadd.f32 %v10420_v22, %v3969_v9  ;;  %v7563_v19 = vld [vmem:[%s12393_s4] sm:$0xff] }
 0x893   : > { %v4261_v36 = vmul.f32 %v4245_v12, %v10423_v55  ;;  %5187 = vmatpush.msra.mxu3 %v7563_v19 }
 0x894   : > { %v10823_v24 = vmul.f32 %v10815_v54, %v10815_v54  ;;  %v4071_v3 = vsel %vm4070_vm5, %v7247_v15, %v4067_v32 }
 0x895   : > { %4310 = vmatmul.f32.vlgmr.msrb.gmra.mxu3 %v4261_v36  ;;  %v4214_v22 = vmul.f32 %v10779_v51, %v4071_v3 }
 0x896   : > { %4034 = vrot.lane.b32.xlu1 %v10823_v24, %s7608_s30  ;;  %6047 = vmatpush.msrb.mxu3 %v10679_v20 }
 0x897   : > { %v4230_v16 = vsub.f32 1.0, %v4214_v22 }
 0x898   : > { %v4013_v55 = vpop.permute.xlu2 %4012  ;;  %6048 = vmatpush.msrb.mxu3 %v10685_v2 }
 0x899   : > { %v4246_v46 = vmax.f32 %v4230_v16, 0.0  ;;  %v4040_v15 = vadd.f32 %v4013_v55, %v10512_v30 }
 0x89a   : > { %6049 = vmatpush.msrb.mxu3 %v10699_v4 }
 0x89b   : > { %v4262_v28 = vmul.f32 %v4246_v46, %v10451_v50  ;;  %7248 = vrsqrt.f32 %v4040_v15  ;;  %vm4098_vm11 = vweird.f32 %v4040_v15 }
 0x89c   : > { %6050 = vmatpush.msrb.mxu3 %v10713_v5 }
 0x89d   : > { %4313 = vmatmul.f32.gmra.mxu3 %v4262_v28 }
 0x89e   : > { %6051 = vmatpush.msrb.mxu3 %v10724_v11 }
 0x8a0   : > { %v4009_v1 = vpop.permute.xlu0 %4008  ;;  %6052 = vmatpush.msrb.mxu3 %v10730_v40 }
 0x8a1   : > { %v4038_v20 = vadd.f32 %v4009_v1, %v10474_v38  ;;  %v7249_v2 = vpop.eup %7248 }
 0x8a2   : > { %6053 = vmatpush.msrb.mxu3 %v10745_v48  ;;  %v4093_v50 = vmul.f32 %v7249_v2, %v4040_v15  ;;  %vm4099_vm9 = vweird.f32 %v7249_v2 }
 0x8a3   : > { %7250 = vrsqrt.f32 %v4038_v20  ;;  %vm4078_vm7 = vweird.f32 %v4038_v20  ;;  %vm4100_vm12 = vmor %vm4098_vm11, %vm4099_vm9 }
 0x8a4   : > { %6054 = vmatpush.msrb.mxu3 %v10758_v18  ;;  %v4094_v38 = vmul.f32 %v7249_v2, %v4093_v50 }
 0x8a6   : > { %6055 = vmatpush.msrb.mxu3 %v10769_v10  ;;  %v4095_v18 = vmul.f32 0.5, %v4094_v38 }
 0x8a8   : > { %v4011_v30 = vpop.permute.xlu1 %4010  ;;  %6056 = vmatpush.msrb.mxu3 %v10775_v34 }
 0x8a9   : > { %v7251_v4 = vpop.eup %7250  ;;  %v4039_v5 = vadd.f32 %v4011_v30, %v10493_v17 }
 0x8aa   : > { %v4073_v11 = vmul.f32 %v7251_v4, %v4038_v20  ;;  %6057 = vmatpush.msrb.mxu3 %v10789_v26  ;;  %vm4079_vm6 = vweird.f32 %v7251_v4  ;;  %v4096_v26 = vsub.f32 1.5, %v4095_v18 }
 0x8ab   : > { %7252 = vrsqrt.f32 %v4039_v5  ;;  %vm4080_vm8 = vmor %vm4078_vm7, %vm4079_vm6  ;;  %vm4088_vm13 = vweird.f32 %v4039_v5 }
 0x8ac   : > { %v4074_v40 = vmul.f32 %v7251_v4, %v4073_v11  ;;  %6058 = vmatpush.msrb.mxu3 %v7559_v27  ;;  %v4097_v3 = vmul.f32 %v7249_v2, %v4096_v26 }
 0x8ae   : > { %v4075_v48 = vmul.f32 0.5, %v4074_v40  ;;  %6059 = vmatpush.msrb.mxu3 %v7560_v6  ;;  %v4101_v28 = vsel %vm4100_vm12, %v7249_v2, %v4097_v3 }
 0x8af   : > { %v4217_v30 = vmul.f32 %v10779_v51, %v4101_v28 }
 0x8b0   : > { %v4076_v59 = vsub.f32 1.5, %v4075_v48  ;;  %v4019_v10 = vpop.permute.xlu2 %4018  ;;  %6060 = vmatpush.msrb.mxu3 %v7561_v49 }
 0x8b1   : > { %v7253_v9 = vpop.eup %7252  ;;  %v10847_v17 = vadd.f32 %v4019_v10, %v10569_v13  ;;  %v4233_v40 = vsub.f32 1.0, %v4217_v30 }
 0x8b2   : > { %v4077_v12 = vmul.f32 %v7251_v4, %v4076_v59  ;;  %v4083_v34 = vmul.f32 %v7253_v9, %v4039_v5  ;;  %6061 = vmatpush.msrb.mxu3 %v7562_v57  ;;  %vm4089_vm10 = vweird.f32 %v7253_v9 }
 0x8b3   : > { %7254 = vrsqrt.f32 %v10847_v17  ;;  %vm4090_vm14 = vmor %vm4088_vm13, %vm4089_vm10  ;;  %v4249_v59 = vmax.f32 %v4233_v40, 0.0  ;;  %vm4128_vm4 = vweird.f32 %v10847_v17 }
 0x8b4   : > { %v4084_v32 = vmul.f32 %v7253_v9, %v4083_v34  ;;  %v4081_v36 = vsel %vm4080_vm8, %v7251_v4, %v4077_v12  ;;  %6062 = vmatpush.msrb.mxu3 %v7563_v19 }
 0x8b5   : > { %v4215_v27 = vmul.f32 %v10779_v51, %v4081_v36 }
 0x8b6   : > { %v4085_v6 = vmul.f32 0.5, %v4084_v32 }
 0x8b7   : > { %v4231_v49 = vsub.f32 1.0, %v4215_v27 }
 0x8b8   : > { %v4086_v22 = vsub.f32 1.5, %v4085_v6  ;;  %v4015_v16 = vpop.permute.xlu0 %4014 }
 0x8b9   : > { %v4041_v57 = vadd.f32 %v4015_v16, %v10531_v23  ;;  %v4247_v13 = vmax.f32 %v4231_v49, 0.0  ;;  %v7255_v1 = vpop.eup %7254 }
 0x8ba   : > { %v4087_v55 = vmul.f32 %v7253_v9, %v4086_v22  ;;  %v4123_v15 = vmul.f32 %v7255_v1, %v10847_v17  ;;  %vm4129_vm2 = vweird.f32 %v7255_v1 }
 0x8bb   : > { %7256 = vrsqrt.f32 %v4041_v57  ;;  %v4263_v19 = vmul.f32 %v4247_v13, %v10470_v62  ;;  %vm4108_vm0 = vweird.f32 %v4041_v57  ;;  %vm4130_vm5 = vmor %vm4128_vm4, %vm4129_vm2 }
 0x8bc   : > { %v4091_v46 = vsel %vm4090_vm14, %v7253_v9, %v4087_v55  ;;  %v4124_v2 = vmul.f32 %v7255_v1, %v4123_v15 }
 0x8bd   : > { %4316 = vmatmul.f32.gmra.mxu3 %v4263_v19  ;;  %v4216_v20 = vmul.f32 %v10779_v51, %v4091_v46 }
 0x8be   : > { %v4125_v10 = vmul.f32 0.5, %v4124_v2 }
 0x8bf   : > { %v4232_v50 = vsub.f32 1.0, %v4216_v20 }
 0x8c0   : > { %v4017_v23 = vpop.permute.xlu1 %4016  ;;  %v4126_v36 = vsub.f32 1.5, %v4125_v10 }
 0x8c1   : > { %v7257_v4 = vpop.eup %7256  ;;  %v4042_v11 = vadd.f32 %v4017_v23, %v10550_v29  ;;  %v4248_v5 = vmax.f32 %v4232_v50, 0.0 }
 0x8c2   : > { %v4103_v38 = vmul.f32 %v7257_v4, %v4041_v57  ;;  %vm4109_vm15 = vweird.f32 %v7257_v4  ;;  %v4127_v16 = vmul.f32 %v7255_v1, %v4126_v36 }
 0x8c3   : > { %7258 = vrsqrt.f32 %v4042_v11  ;;  %v4264_v62 = vmul.f32 %v4248_v5, %v10489_v35  ;;  %vm4110_vm1 = vmor %vm4108_vm0, %vm4109_vm15  ;;  %v4265_v35 = vmul.f32 %v4249_v59, %v10508_v33  ;;  %vm4118_vm6 = vweird.f32 %v4042_v11 }
 0x8c4   : > { %v4104_v48 = vmul.f32 %v7257_v4, %v4103_v38  ;;  %v4131_v28 = vsel %vm4130_vm5, %v7255_v1, %v4127_v16 }
 0x8c5   : > { %4319 = vmatmul.f32.gmra.mxu3 %v4264_v62  ;;  %v4220_v15 = vmul.f32 %v10779_v51, %v4131_v28 }
 0x8c6   : > { %v4105_v18 = vmul.f32 0.5, %v4104_v48 }
 0x8c7   : > { %v4236_v38 = vsub.f32 1.0, %v4220_v15 }
 0x8c8   : > { %v4106_v9 = vsub.f32 1.5, %v4105_v18  ;;  %v4025_v12 = vpop.permute.xlu2 %4024 }
 0x8c9   : > { %v7259_v34 = vpop.eup %7258  ;;  %v10859_v29 = vadd.f32 %v4025_v12, %v10632_v63  ;;  %v4252_v2 = vmax.f32 %v4236_v38, 0.0 }
 0x8ca   : > { %v4107_v26 = vmul.f32 %v7257_v4, %v4106_v9  ;;  %v4113_v32 = vmul.f32 %v7259_v34, %v4042_v11  ;;  %vm4119_vm3 = vweird.f32 %v7259_v34 }
 0x8cb   : > { %7260 = vrsqrt.f32 %v10859_v29  ;;  %vm4120_vm7 = vmor %vm4118_vm6, %vm4119_vm3  ;;  %vm4158_vm13 = vweird.f32 %v10859_v29 }
 0x8cc   : > { %v4114_v27 = vmul.f32 %v7259_v34, %v4113_v32  ;;  %v4111_v6 = vsel %vm4110_vm1, %v7257_v4, %v4107_v26 }
 0x8cd   : > { %4322 = vmatmul.f32.gmra.mxu3 %v4265_v35  ;;  %v4218_v49 = vmul.f32 %v10779_v51, %v4111_v6 }
 0x8ce   : > { %v4115_v3 = vmul.f32 0.5, %v4114_v27 }
 0x8cf   : > { %v4234_v22 = vsub.f32 1.0, %v4218_v49 }
 0x8d0   : > { %v4116_v57 = vsub.f32 1.5, %v4115_v3  ;;  %v4021_v13 = vpop.permute.xlu0 %4020 }
 0x8d1   : > { %v4044_v63 = vadd.f32 %v4021_v13, %v10588_v21  ;;  %v4250_v33 = vmax.f32 %v4234_v22, 0.0  ;;  %v7261_v20 = vpop.eup %7260 }
 0x8d2   : > { %v4117_v55 = vmul.f32 %v7259_v34, %v4116_v57  ;;  %v4153_v17 = vmul.f32 %v7261_v20, %v10859_v29  ;;  %vm4159_vm11 = vweird.f32 %v7261_v20 }
 0x8d3   : > { %7262 = vrsqrt.f32 %v4044_v63  ;;  %v4266_v19 = vmul.f32 %v4250_v33, %v10527_v0  ;;  %vm4138_vm9 = vweird.f32 %v4044_v63  ;;  %vm4160_vm14 = vmor %vm4158_vm13, %vm4159_vm11 }
 0x8d4   : > { %v4121_v46 = vsel %vm4120_vm7, %v7259_v34, %v4117_v55  ;;  %v4154_v1 = vmul.f32 %v7261_v20, %v4153_v17 }
 0x8d5   : > { %4325 = vmatmul.f32.gmra.mxu3 %v4266_v19  ;;  %v4219_v50 = vmul.f32 %v10779_v51, %v4121_v46 }
 0x8d6   : > { %v4155_v48 = vmul.f32 0.5, %v4154_v1 }
 0x8d7   : > { %v4235_v30 = vsub.f32 1.0, %v4219_v50 }
 0x8d8   : > { %v4023_v21 = vpop.permute.xlu1 %4022  ;;  %v4156_v34 = vsub.f32 1.5, %v4155_v48 }
 0x8d9   : > { %v7263_v23 = vpop.eup %7262  ;;  %v4045_v4 = vadd.f32 %v4023_v21, %v10607_v52  ;;  %v4251_v11 = vmax.f32 %v4235_v30, 0.0 }
 0x8da   : > { %v4133_v5 = vmul.f32 %v7263_v23, %v4044_v63  ;;  %vm4139_vm8 = vweird.f32 %v7263_v23  ;;  %v4157_v6 = vmul.f32 %v7261_v20, %v4156_v34 }
 0x8db   : > { %7264 = vrsqrt.f32 %v4045_v4  ;;  %v4267_v0 = vmul.f32 %v4251_v11, %v10546_v61  ;;  %vm4140_vm10 = vmor %vm4138_vm9, %vm4139_vm8  ;;  %v4268_v61 = vmul.f32 %v4252_v2, %v10565_v7  ;;  %vm4148_vm15 = vweird.f32 %v4045_v4 }
 0x8dc   : > { %v4134_v62 = vmul.f32 %v7263_v23, %v4133_v5  ;;  %v4161_v13 = vsel %vm4160_vm14, %v7261_v20, %v4157_v6 }
 0x8dd   : > { %4328 = vmatmul.f32.gmra.mxu3 %v4267_v0  ;;  %v4223_v19 = vmul.f32 %v10779_v51, %v4161_v13 }
 0x8de   : > { %v4135_v40 = vmul.f32 0.5, %v4134_v62 }
 0x8df   : > { %v4239_v15 = vsub.f32 1.0, %v4223_v19 }
 0x8e0   : > { %v4136_v18 = vsub.f32 1.5, %v4135_v40  ;;  %v4031_v59 = vpop.permute.xlu2 %4030 }
 0x8e1   : > { %v7265_v10 = vpop.eup %7264  ;;  %v10873_v52 = vadd.f32 %v4031_v59, %v10753_v14 }
 0x8e2   : > { %v4137_v9 = vmul.f32 %v7263_v23, %v4136_v18  ;;  %v4143_v12 = vmul.f32 %v7265_v10, %v4045_v4  ;;  %vm4149_vm12 = vweird.f32 %v7265_v10 }
 0x8e3   : > { %7266 = vrsqrt.f32 %v10873_v52  ;;  %vm4150_vm0 = vmor %vm4148_vm15, %vm4149_vm12  ;;  %vm4188_vm6 = vweird.f32 %v10873_v52 }
 0x8e4   : > { %v4144_v26 = vmul.f32 %v7265_v10, %v4143_v12  ;;  %v4141_v32 = vsel %vm4140_vm10, %v7263_v23, %v4137_v9  ;;  %v4255_v23 = vmax.f32 %v4239_v15, 0.0 }
 0x8e5   : > { %4331 = vmatmul.f32.gmra.mxu3 %v4268_v61  ;;  %v4221_v35 = vmul.f32 %v10779_v51, %v4141_v32 }
 0x8e6   : > { %v4145_v36 = vmul.f32 0.5, %v4144_v26 }
 0x8e7   : > { %v4237_v27 = vsub.f32 1.0, %v4221_v35 }
 0x8e8   : > { %v4146_v49 = vsub.f32 1.5, %v4145_v36  ;;  %v4027_v3 = vpop.permute.xlu0 %4026 }
 0x8e9   : > { %v4047_v14 = vadd.f32 %v4027_v3, %v10667_v47  ;;  %v4253_v7 = vmax.f32 %v4237_v27, 0.0  ;;  %v7267_v63 = vpop.eup %7266 }
 0x8ea   : > { %v4147_v22 = vmul.f32 %v7265_v10, %v4146_v49  ;;  %v4183_v29 = vmul.f32 %v7267_v63, %v10873_v52  ;;  %vm4189_vm4 = vweird.f32 %v7267_v63 }
 0x8eb   : > { %7268 = vrsqrt.f32 %v4047_v14  ;;  %v4269_v16 = vmul.f32 %v4253_v7, %v10584_v39  ;;  %vm4168_vm2 = vweird.f32 %v4047_v14  ;;  %vm4190_vm7 = vmor %vm4188_vm6, %vm4189_vm4 }
 0x8ec   : > { %v4151_v57 = vsel %vm4150_vm0, %v7265_v10, %v4147_v22  ;;  %v4184_v20 = vmul.f32 %v7267_v63, %v4183_v29 }
 0x8ed   : > { %4334 = vmatmul.f32.gmra.mxu3 %v4269_v16  ;;  %v4222_v33 = vmul.f32 %v10779_v51, %v4151_v57 }
 0x8ee   : > { %v4185_v4 = vmul.f32 0.5, %v4184_v20 }
 0x8ef   : > { %v4238_v55 = vsub.f32 1.0, %v4222_v33 }
 0x8f0   : > { %v4029_v47 = vpop.permute.xlu1 %4028  ;;  %v4186_v1 = vsub.f32 1.5, %v4185_v4 }
 0x8f1   : > { %v7269_v46 = vpop.eup %7268  ;;  %v4048_v28 = vadd.f32 %v4029_v47, %v10708_v53  ;;  %v4254_v50 = vmax.f32 %v4238_v55, 0.0  ;;  %v4271_v53 = vmul.f32 %v4255_v23, %v10624_v44 }
 0x8f2   : > { %v4163_v30 = vmul.f32 %v7269_v46, %v4047_v14  ;;  %vm4169_vm1 = vweird.f32 %v7269_v46  ;;  %v4187_v18 = vmul.f32 %v7267_v63, %v4186_v1 }
 0x8f3   : > { %7270 = vrsqrt.f32 %v4048_v28  ;;  %v4270_v39 = vmul.f32 %v4254_v50, %v10603_v45  ;;  %vm4170_vm3 = vmor %vm4168_vm2, %vm4169_vm1  ;;  %vm4178_vm8 = vweird.f32 %v4048_v28 }
 0x8f4   : > { %v4164_v17 = vmul.f32 %v7269_v46, %v4163_v30  ;;  %v4191_v26 = vsel %vm4190_vm7, %v7267_v63, %v4187_v18 }
 0x8f5   : > { %4337 = vmatmul.f32.gmra.mxu3 %v4270_v39  ;;  %v4226_v36 = vmul.f32 %v10779_v51, %v4191_v26 }
 0x8f6   : > { %v4165_v21 = vmul.f32 0.5, %v4164_v17 }
 0x8f7   : > { %v4242_v14 = vsub.f32 1.0, %v4226_v36 }
 0x8f8   : > { %v4166_v11 = vsub.f32 1.5, %v4165_v21 }
 0x8f9   : > { %v7271_v5 = vpop.eup %7270  ;;  %v4258_v22 = vmax.f32 %v4242_v14, 0.0 }
 0x8fa   : > { %v4167_v0 = vmul.f32 %v7269_v46, %v4166_v11  ;;  %v4173_v38 = vmul.f32 %v7271_v5, %v4048_v28  ;;  %vm4179_vm5 = vweird.f32 %v7271_v5 }
 0x8fb   : > { %vm4180_vm9 = vmor %vm4178_vm8, %vm4179_vm5  ;;  %v4274_v33 = vmul.f32 %v4258_v22, %v10740_v37 }
 0x8fc   : > { %v4174_v62 = vmul.f32 %v7271_v5, %v4173_v38  ;;  %v4171_v40 = vsel %vm4170_vm3, %v7269_v46, %v4167_v0 }
 0x8fd   : > { %4340 = vmatmul.f32.gmra.mxu3 %v4271_v53  ;;  %v4224_v45 = vmul.f32 %v10779_v51, %v4171_v40 }
 0x8fe   : > { %v4175_v2 = vmul.f32 0.5, %v4174_v62 }
 0x8ff   : > { %v4240_v48 = vsub.f32 1.0, %v4224_v45 }
 0x900   : > { %v4176_v59 = vsub.f32 1.5, %v4175_v2  ;;  %v4033_v10 = vpop.permute.xlu0 %4032 }
 0x901   : > { %v4050_v9 = vadd.f32 %v4033_v10, %v10796_v58  ;;  %v4256_v12 = vmax.f32 %v4240_v48, 0.0 }
 0x902   : > { %v4177_v44 = vmul.f32 %v7271_v5, %v4176_v59 }
 0x903   : > { %7272 = vrsqrt.f32 %v4050_v9  ;;  %v4272_v61 = vmul.f32 %v4256_v12, %v10653_v25  ;;  %vm4198_vm11 = vweird.f32 %v4050_v9 }
 0x904   : > { %v4181_v34 = vsel %vm4180_vm9, %v7271_v5, %v4177_v44 }
 0x905   : > { %4343 = vmatmul.f32.gmra.mxu3 %v4272_v61  ;;  %v4225_v32 = vmul.f32 %v10779_v51, %v4181_v34 }
 0x907   : > { %v4241_v35 = vsub.f32 1.0, %v4225_v32 }
 0x908   : > { %v4035_v27 = vpop.permute.xlu1 %4034 }
 0x909   : > { %v7273_v52 = vpop.eup %7272  ;;  %v4051_v58 = vadd.f32 %v4035_v27, %v10823_v24  ;;  %v4257_v6 = vmax.f32 %v4241_v35, 0.0 }
 0x90a   : > { %v4193_v49 = vmul.f32 %v7273_v52, %v4050_v9  ;;  %vm4199_vm10 = vweird.f32 %v7273_v52 }
 0x90b   : > { %7274 = vrsqrt.f32 %v4051_v58  ;;  %v4273_v3 = vmul.f32 %v4257_v6, %v10694_v43  ;;  %vm4200_vm12 = vmor %vm4198_vm11, %vm4199_vm10  ;;  %vm4208_vm14 = vweird.f32 %v4051_v58 }
 0x90c   : > { %v4194_v7 = vmul.f32 %v7273_v52, %v4193_v49 }
 0x90d   : > { %4346 = vmatmul.f32.gmra.mxu3 %v4273_v3 }
 0x90e   : > { %v4195_v25 = vmul.f32 0.5, %v4194_v7 }
 0x910   : > { %v4196_v16 = vsub.f32 1.5, %v4195_v25 }
 0x911   : > { %v7275_v57 = vpop.eup %7274 }
 0x912   : > { %v4197_v13 = vmul.f32 %v7273_v52, %v4196_v16  ;;  %v4203_v63 = vmul.f32 %v7275_v57, %v4051_v58  ;;  %vm4209_vm13 = vweird.f32 %v7275_v57 }
 0x913   : > { %vm4210_vm15 = vmor %vm4208_vm14, %vm4209_vm13 }
 0x914   : > { %v4204_v24 = vmul.f32 %v7275_v57, %v4203_v63  ;;  %v4201_v55 = vsel %vm4200_vm12, %v7273_v52, %v4197_v13 }
 0x915   : > { %4349 = vmatmul.f32.gmra.mxu3 %v4274_v33  ;;  %v4227_v19 = vmul.f32 %v10779_v51, %v4201_v55 }
 0x916   : > { %v4205_v43 = vmul.f32 0.5, %v4204_v24 }
 0x917   : > { %v4243_v29 = vsub.f32 1.0, %v4227_v19 }
 0x918   : > { %v4206_v47 = vsub.f32 1.5, %v4205_v43  ;;  %v10897_v46 = vpop.f32.mrf.mxu3  ;;  %v10983_v43 = vld [vmem:[%s12392_s3 + $0xa] ss:$0 sm:$0xff] }
 0x919   : > { %v4426_v28 = vmul.f32 %v10897_v46, %v10897_v46  ;;  %4377 = vmatmul.f32.vlgmr.msra.gmra.mxu0 %v10897_v46  ;;  %v4259_v50 = vmax.f32 %v4243_v29, 0.0 }
 0x91a   : > { %v4207_v30 = vmul.f32 %v7275_v57, %v4206_v47 }
 0x91b   : > { %4458 = vmatmul.f32.vlgmr.msra.gmra.mxu1 %v4426_v28  ;;  %v4275_v37 = vmul.f32 %v4259_v50, %v10784_v42 }
 0x91c   : > { %v4211_v39 = vsel %vm4210_vm15, %v7275_v57, %v4207_v30 }
 0x91d   : > { %4352 = vmatmul.f32.gmra.mxu3 %v4275_v37  ;;  %v4228_v15 = vmul.f32 %v10779_v51, %v4211_v39  ;;  %v10990_v39 = vld [vmem:[%s12392_s3 + $0xb] ss:$0 sm:$0xff] }
 0x91f   : > { %v4244_v20 = vsub.f32 1.0, %v4228_v15 }
 0x920   : > { %v10904_v17 = vpop.f32.mrf.mxu3 }
 0x921   : > { %4380 = vmatmul.f32.gmra.mxu0 %v10904_v17  ;;  %v4427_v21 = vmul.f32 %v10904_v17, %v10904_v17  ;;  %v4260_v23 = vmax.f32 %v4244_v20, 0.0 }
 0x923   : > { %4461 = vmatmul.f32.gmra.mxu1 %v4427_v21  ;;  %v4276_v4 = vmul.f32 %v4260_v23, %v10815_v54 }
 0x925   : > { %4355 = vmatmul.f32.gmra.mxu3 %v4276_v4 }
 0x940   : > { %v10910_v11 = vpop.f32.mrf.mxu3 }
 0x941   : > { %4383 = vmatmul.f32.gmra.mxu0 %v10910_v11  ;;  %v4428_v51 = vmul.f32 %v10910_v11, %v10910_v11 }
 0x943   : > { %4464 = vmatmul.f32.gmra.mxu1 %v4428_v51 }
 0x948   : > { %v10915_v42 = vpop.f32.mrf.mxu3 }
 0x949   : > { %4386 = vmatmul.f32.gmra.mxu0 %v10915_v42  ;;  %v4429_v5 = vmul.f32 %v10915_v42, %v10915_v42 }
 0x94b   : > { %4467 = vmatmul.f32.gmra.mxu1 %v4429_v5 }
 0x950   : > { %v10920_v0 = vpop.f32.mrf.mxu3 }
 0x951   : > { %4389 = vmatmul.f32.gmra.mxu0 %v10920_v0  ;;  %v4430_v54 = vmul.f32 %v10920_v0, %v10920_v0 }
 0x953   : > { %4470 = vmatmul.f32.gmra.mxu1 %v4430_v54 }
 0x958   : > { %v10925_v38 = vpop.f32.mrf.mxu3 }
 0x959   : > { %4392 = vmatmul.f32.gmra.mxu0 %v10925_v38  ;;  %v4431_v53 = vmul.f32 %v10925_v38, %v10925_v38 }
 0x95b   : > { %4473 = vmatmul.f32.gmra.mxu1 %v4431_v53 }
 0x960   : > { %v10930_v1 = vpop.f32.mrf.mxu3 }
 0x961   : > { %4395 = vmatmul.f32.gmra.mxu0 %v10930_v1  ;;  %v4432_v62 = vmul.f32 %v10930_v1, %v10930_v1 }
 0x963   : > { %4476 = vmatmul.f32.gmra.mxu1 %v4432_v62 }
 0x968   : > { %v10935_v40 = vpop.f32.mrf.mxu3 }
 0x969   : > { %4398 = vmatmul.f32.gmra.mxu0 %v10935_v40  ;;  %v4433_v45 = vmul.f32 %v10935_v40, %v10935_v40 }
 0x96b   : > { %4479 = vmatmul.f32.gmra.mxu1 %v4433_v45 }
 0x970   : > { %v10940_v2 = vpop.f32.mrf.mxu3 }
 0x971   : > { %4401 = vmatmul.f32.gmra.mxu0 %v10940_v2  ;;  %v4434_v48 = vmul.f32 %v10940_v2, %v10940_v2 }
 0x973   : > { %4482 = vmatmul.f32.gmra.mxu1 %v4434_v48 }
 0x978   : > { %v10945_v18 = vpop.f32.mrf.mxu3 }
 0x979   : > { %4404 = vmatmul.f32.gmra.mxu0 %v10945_v18  ;;  %v4435_v59 = vmul.f32 %v10945_v18, %v10945_v18 }
 0x97b   : > { %4485 = vmatmul.f32.gmra.mxu1 %v4435_v59 }
 0x980   : > { %v10950_v10 = vpop.f32.mrf.mxu3 }
 0x981   : > { %4407 = vmatmul.f32.gmra.mxu0 %v10950_v10  ;;  %v4436_v9 = vmul.f32 %v10950_v10, %v10950_v10 }
 0x983   : > { %4488 = vmatmul.f32.gmra.mxu1 %v4436_v9 }
 0x988   : > { %v10955_v12 = vpop.f32.mrf.mxu3 }
 0x989   : > { %4410 = vmatmul.f32.gmra.mxu0 %v10955_v12  ;;  %v4437_v44 = vmul.f32 %v10955_v12, %v10955_v12 }
 0x98b   : > { %4491 = vmatmul.f32.gmra.mxu1 %v4437_v44 }
 0x990   : > { %v10960_v61 = vpop.f32.mrf.mxu3 }
 0x991   : > { %4413 = vmatmul.f32.gmra.mxu0 %v10960_v61  ;;  %v4438_v34 = vmul.f32 %v10960_v61, %v10960_v61 }
 0x993   : > { %4494 = vmatmul.f32.gmra.mxu1 %v4438_v34 }
 0x996   : > { %v4378_v26 = vpop.f32.mrf.mxu0 }
 0x997   : > { %v4507_v32 = vmul.f32 %v4378_v26, %v4378_v26  ;;  %v4715_v30 = vsub.f32 %v10897_v46, %v4378_v26 }
 0x998   : > { %v10965_v35 = vpop.f32.mrf.mxu3  ;;  %v4459_v36 = vpop.f32.mrf.mxu1 }
 0x999   : > { %v4523_v27 = vsub.f32 %v4459_v36, %v4507_v32  ;;  %4416 = vmatmul.f32.gmra.mxu0 %v10965_v35  ;;  %v4439_v52 = vmul.f32 %v10965_v35, %v10965_v35 }
 0x99b   : > { %v4539_v58 = vadd.f32 1e-05, %v4523_v27  ;;  %4497 = vmatmul.f32.gmra.mxu1 %v4439_v52 }
 0x99d   : > { %7276 = vrsqrt.f32 %v4539_v58  ;;  %vm4561_vm1 = vweird.f32 %v4539_v58 }
 0x99e   : > { %v4381_v6 = vpop.f32.mrf.mxu0 }
 0x99f   : > { %v4508_v49 = vmul.f32 %v4381_v6, %v4381_v6  ;;  %v4716_v5 = vsub.f32 %v10904_v17, %v4381_v6 }
 0x9a0   : > { %v10970_v3 = vpop.f32.mrf.mxu3  ;;  %v4462_v14 = vpop.f32.mrf.mxu1 }
 0x9a1   : > { %v4524_v7 = vsub.f32 %v4462_v14, %v4508_v49  ;;  %4419 = vmatmul.f32.gmra.mxu0 %v10970_v3  ;;  %v4440_v25 = vmul.f32 %v10970_v3, %v10970_v3 }
 0x9a3   : > { %v7277_v22 = vpop.eup %7276  ;;  %v4540_v16 = vadd.f32 1e-05, %v4524_v7  ;;  %4500 = vmatmul.f32.gmra.mxu1 %v4440_v25 }
 0x9a4   : > { %v4556_v57 = vmul.f32 %v7277_v22, %v4539_v58  ;;  %vm4562_vm0 = vweird.f32 %v7277_v22 }
 0x9a5   : > { %7278 = vrsqrt.f32 %v4540_v16  ;;  %vm4563_vm2 = vmor %vm4561_vm1, %vm4562_vm0  ;;  %vm4571_vm4 = vweird.f32 %v4540_v16 }
 0x9a6   : > { %v4557_v13 = vmul.f32 %v7277_v22, %v4556_v57 }
 0x9a8   : > { %v4558_v63 = vmul.f32 0.5, %v4557_v13  ;;  %v10975_v33 = vpop.f32.mrf.mxu3 }
 0x9a9   : > { %4422 = vmatmul.f32.gmra.mxu0 %v10975_v33  ;;  %v4441_v24 = vmul.f32 %v10975_v33, %v10975_v33 }
 0x9aa   : > { %v4559_v55 = vsub.f32 1.5, %v4558_v63 }
 0x9ab   : > { %v7279_v19 = vpop.eup %7278  ;;  %4503 = vmatmul.f32.gmra.mxu1 %v4441_v24 }
 0x9ac   : > { %v4560_v29 = vmul.f32 %v7277_v22, %v4559_v55  ;;  %v4566_v47 = vmul.f32 %v7279_v19, %v4540_v16  ;;  %vm4572_vm3 = vweird.f32 %v7279_v19 }
 0x9ad   : > { %vm4573_vm5 = vmor %vm4571_vm4, %vm4572_vm3 }
 0x9ae   : > { %v4564_v28 = vsel %vm4563_vm2, %v7277_v22, %v4560_v29  ;;  %v4567_v50 = vmul.f32 %v7279_v19, %v4566_v47 }
 0x9af   : > { %v4732_v37 = vmul.f32 %v10983_v43, %v4564_v28 }
 0x9b0   : > { %v4568_v15 = vmul.f32 0.5, %v4567_v50 }
 0x9b1   : > { %v4748_v20 = vmul.f32 %v4732_v37, %v4715_v30  ;;  %v6895_v30 = vld [vmem:[%s12391_s2 + $0x378] sm:$0xff] }
 0x9b2   : > { %v4569_v21 = vsub.f32 1.5, %v4568_v15  ;;  %5104 = vmatpush.msra.mxu2 %v6895_v30 }
 0x9b3   : > { %v4765_v23 = vadd.f32 %v10990_v39, %v4748_v20 }
 0x9b4   : > { %v4570_v4 = vmul.f32 %v7279_v19, %v4569_v21 }
 0x9b5   : > { %v10994_v51 = vadd.f32 %v4765_v23, %v10193_v8 }
 0x9b6   : > { %v4574_v46 = vsel %vm4573_vm5, %v7279_v19, %v4570_v4 }
 0x9b7   : > { %v4733_v54 = vmul.f32 %v10983_v43, %v4574_v46  ;;  %v11000_v53 = vmul.f32 %v10994_v51, %v10994_v51 }
 0x9b9   : > { %4814 = vrot.lane.b32.xlu2 %v11000_v53, %s7608_s30  ;;  %v4749_v62 = vmul.f32 %v4733_v54, %v4716_v5 }
 0x9bb   : > { %v4766_v45 = vadd.f32 %v10990_v39, %v4749_v62 }
 0x9bd   : > { %v11006_v48 = vadd.f32 %v4766_v45, %v10231_v41 }
 0x9be   : > { %v4384_v8 = vpop.f32.mrf.mxu0 }
 0x9bf   : > { %v4509_v59 = vmul.f32 %v4384_v8, %v4384_v8  ;;  %v11010_v17 = vmul.f32 %v11006_v48, %v11006_v48  ;;  %v4717_v47 = vsub.f32 %v10910_v11, %v4384_v8 }
 0x9c0   : > { %v4465_v9 = vpop.f32.mrf.mxu1 }
 0x9c1   : > { %v4525_v44 = vsub.f32 %v4465_v9, %v4509_v59  ;;  %4816 = vrot.lane.b32.xlu0 %v11010_v17, %s7608_s30 }
 0x9c3   : > { %v4541_v34 = vadd.f32 1e-05, %v4525_v44 }
 0x9c5   : > { %7280 = vrsqrt.f32 %v4541_v34  ;;  %vm4581_vm7 = vweird.f32 %v4541_v34 }
 0x9c6   : > { %v4387_v26 = vpop.f32.mrf.mxu0 }
 0x9c7   : > { %v4510_v32 = vmul.f32 %v4387_v26, %v4387_v26  ;;  %v4718_v9 = vsub.f32 %v10915_v42, %v4387_v26 }
 0x9c8   : > { %v4468_v36 = vpop.f32.mrf.mxu1 }
 0x9c9   : > { %v4526_v27 = vsub.f32 %v4468_v36, %v4510_v32 }
 0x9cb   : > { %v7281_v52 = vpop.eup %7280  ;;  %v4542_v41 = vadd.f32 1e-05, %v4526_v27 }
 0x9cc   : > { %v4576_v58 = vmul.f32 %v7281_v52, %v4541_v34  ;;  %vm4582_vm6 = vweird.f32 %v7281_v52 }
 0x9cd   : > { %7282 = vrsqrt.f32 %v4542_v41  ;;  %vm4583_vm8 = vmor %vm4581_vm7, %vm4582_vm6  ;;  %vm4591_vm10 = vweird.f32 %v4542_v41 }
 0x9ce   : > { %v4577_v6 = vmul.f32 %v7281_v52, %v4576_v58  ;;  %v11014_v49 = vpop.f32.mrf.mxu0 }
 0x9cf   : > { %v4511_v14 = vmul.f32 %v11014_v49, %v11014_v49 }
 0x9d0   : > { %v4578_v7 = vmul.f32 0.5, %v4577_v6  ;;  %v4471_v25 = vpop.f32.mrf.mxu1 }
 0x9d1   : > { %v4527_v22 = vsub.f32 %v4471_v25, %v4511_v14 }
 0x9d2   : > { %v4579_v16 = vsub.f32 1.5, %v4578_v7 }
 0x9d3   : > { %v7283_v57 = vpop.eup %7282  ;;  %v4543_v13 = vadd.f32 1e-05, %v4527_v22 }
 0x9d4   : > { %v4580_v63 = vmul.f32 %v7281_v52, %v4579_v16  ;;  %v4586_v24 = vmul.f32 %v7283_v57, %v4542_v41  ;;  %vm4592_vm9 = vweird.f32 %v7283_v57 }
 0x9d5   : > { %7284 = vrsqrt.f32 %v4543_v13  ;;  %vm4593_vm11 = vmor %vm4591_vm10, %vm4592_vm9  ;;  %vm4601_vm13 = vweird.f32 %v4543_v13 }
 0x9d6   : > { %v4584_v55 = vsel %vm4583_vm8, %v7281_v52, %v4580_v63  ;;  %v4587_v19 = vmul.f32 %v7283_v57, %v4586_v24  ;;  %v11018_v29 = vpop.f32.mrf.mxu0  ;;  %v4719_v63 = vsub.f32 %v10920_v0, %v11014_v49 }
 0x9d7   : > { %v4734_v28 = vmul.f32 %v10983_v43, %v4584_v55  ;;  %v4512_v50 = vmul.f32 %v11018_v29, %v11018_v29 }
 0x9d8   : > { %v4588_v37 = vmul.f32 0.5, %v4587_v19  ;;  %v4474_v15 = vpop.f32.mrf.mxu1 }
 0x9d9   : > { %v4528_v20 = vsub.f32 %v4474_v15, %v4512_v50  ;;  %v4750_v21 = vmul.f32 %v4734_v28, %v4717_v47 }
 0x9da   : > { %v4589_v23 = vsub.f32 1.5, %v4588_v37 }
 0x9db   : > { %v7285_v4 = vpop.eup %7284  ;;  %v4544_v46 = vadd.f32 1e-05, %v4528_v20  ;;  %v4767_v11 = vadd.f32 %v10990_v39, %v4750_v21 }
 0x9dc   : > { %v4590_v5 = vmul.f32 %v7283_v57, %v4589_v23  ;;  %v4596_v54 = vmul.f32 %v7285_v4, %v4543_v13  ;;  %vm4602_vm12 = vweird.f32 %v7285_v4 }
 0x9dd   : > { %7286 = vrsqrt.f32 %v4544_v46  ;;  %v11029_v62 = vadd.f32 %v4767_v11, %v10239_v31  ;;  %v6894_v31 = vld [vmem:[%s12391_s2 + $0x370] sm:$0xff]  ;;  %vm4603_vm14 = vmor %vm4601_vm13, %vm4602_vm12  ;;  %vm4611_vm0 = vweird.f32 %v4544_v46 }
 0x9de   : > { %v4594_v45 = vsel %vm4593_vm11, %v7283_v57, %v4590_v5  ;;  %v4597_v8 = vmul.f32 %v7285_v4, %v4596_v54  ;;  %v11031_v59 = vpop.f32.mrf.mxu0  ;;  %5105 = vmatpush.msra.mxu2 %v6894_v31  ;;  %v4720_v5 = vsub.f32 %v10925_v38, %v11018_v29 }
 0x9df   : > { %v4735_v44 = vmul.f32 %v10983_v43, %v4594_v45  ;;  %v4513_v34 = vmul.f32 %v11031_v59, %v11031_v59  ;;  %v11039_v32 = vmul.f32 %v11029_v62, %v11029_v62 }
 0x9e0   : > { %v4598_v36 = vmul.f32 0.5, %v4597_v8  ;;  %v4477_v27 = vpop.f32.mrf.mxu1 }
 0x9e1   : > { %v4529_v52 = vsub.f32 %v4477_v27, %v4513_v34  ;;  %4818 = vrot.lane.b32.xlu1 %v11039_v32, %s7608_s30  ;;  %v4751_v42 = vmul.f32 %v4735_v44, %v4718_v9 }
 0x9e2   : > { %v4599_v26 = vsub.f32 1.5, %v4598_v36 }
 0x9e3   : > { %v7287_v41 = vpop.eup %7286  ;;  %v4545_v58 = vadd.f32 1e-05, %v4529_v52  ;;  %v4768_v6 = vadd.f32 %v10990_v39, %v4751_v42  ;;  %v12451_v42 = vld [vmem:[#allocation5_spill] sm:$0xff] }
 0x9e4   : > { %v4600_v14 = vmul.f32 %v7285_v4, %v4599_v26  ;;  %v4606_v7 = vmul.f32 %v7287_v41, %v4544_v46  ;;  %vm4612_vm15 = vweird.f32 %v7287_v41 }
 0x9e5   : > { %7288 = vrsqrt.f32 %v4545_v58  ;;  %v11048_v25 = vadd.f32 %v4768_v6, %v10247_v60  ;;  %v6893_v60 = vld [vmem:[%s12391_s2 + $0x368] sm:$0xff]  ;;  %vm4613_vm1 = vmor %vm4611_vm0, %vm4612_vm15  ;;  %vm4621_vm3 = vweird.f32 %v4545_v58 }
 0x9e6   : > { %v4604_v22 = vsel %vm4603_vm14, %v7285_v4, %v4600_v14  ;;  %v4607_v16 = vmul.f32 %v7287_v41, %v4606_v7  ;;  %v11050_v57 = vpop.f32.mrf.mxu0  ;;  %5106 = vmatpush.msra.mxu2 %v6893_v60  ;;  %v4721_v7 = vsub.f32 %v10930_v1, %v11031_v59 }
 0x9e7   : > { %v4736_v24 = vmul.f32 %v10983_v43, %v4604_v22  ;;  %v4514_v55 = vmul.f32 %v11050_v57, %v11050_v57  ;;  %v11059_v13 = vmul.f32 %v11048_v25, %v11048_v25 }
 0x9e8   : > { %v4608_v19 = vmul.f32 0.5, %v4607_v16  ;;  %v4480_v47 = vpop.f32.mrf.mxu1 }
 0x9e9   : > { %v4530_v28 = vsub.f32 %v4480_v47, %v4514_v55  ;;  %4820 = vrot.lane.b32.xlu2 %v11059_v13, %s7608_s30  ;;  %v4752_v0 = vmul.f32 %v4736_v24, %v4719_v63  ;;  %v6891_v63 = vld [vmem:[%s12391_s2 + $0x358] sm:$0xff] }
 0x9ea   : > { %v4609_v49 = vsub.f32 1.5, %v4608_v19 }
 0x9eb   : > { %v7289_v50 = vpop.eup %7288  ;;  %v4546_v30 = vadd.f32 1e-05, %v4530_v28  ;;  %v4769_v37 = vadd.f32 %v10990_v39, %v4752_v0  ;;  %v6890_v0 = vld [vmem:[%s12391_s2 + $0x350] sm:$0xff] }
 0x9ec   : > { %v4610_v15 = vmul.f32 %v7287_v41, %v4609_v49  ;;  %v4616_v20 = vmul.f32 %v7289_v50, %v4545_v58  ;;  %vm4622_vm2 = vweird.f32 %v7289_v50 }
 0x9ed   : > { %7290 = vrsqrt.f32 %v4546_v30  ;;  %v11068_v21 = vadd.f32 %v4769_v37, %v10255_v56  ;;  %v6892_v56 = vld [vmem:[%s12391_s2 + $0x360] sm:$0xff]  ;;  %vm4623_vm4 = vmor %vm4621_vm3, %vm4622_vm2  ;;  %vm4631_vm6 = vweird.f32 %v4546_v30  ;;  %v12452_v37 = vld [vmem:[#allocation6_spill] sm:$0xff] }
 0x9ee   : > { %v4614_v23 = vsel %vm4613_vm1, %v7287_v41, %v4610_v15  ;;  %v4617_v4 = vmul.f32 %v7289_v50, %v4616_v20  ;;  %v11070_v11 = vpop.f32.mrf.mxu0  ;;  %5107 = vmatpush.msra.mxu2 %v6892_v56  ;;  %v6889_v20 = vld [vmem:[%s12391_s2 + $0x348] sm:$0xff] }
 0x9ef   : > { %v4737_v54 = vmul.f32 %v10983_v43, %v4614_v23  ;;  %v4515_v45 = vmul.f32 %v11070_v11, %v11070_v11  ;;  %v11079_v46 = vmul.f32 %v11068_v21, %v11068_v21 }
 0x9f0   : > { %v4618_v8 = vmul.f32 0.5, %v4617_v4  ;;  %v4483_v9 = vpop.f32.mrf.mxu1  ;;  %5108 = vmatpush.msra.mxu2 %v6891_v63 }
 0x9f1   : > { %v4531_v44 = vsub.f32 %v4483_v9, %v4515_v45  ;;  %4822 = vrot.lane.b32.xlu0 %v11079_v46, %s7608_s30  ;;  %v4753_v38 = vmul.f32 %v4737_v54, %v4720_v5 }
 0x9f2   : > { %v4619_v29 = vsub.f32 1.5, %v4618_v8  ;;  %5109 = vmatpush.msra.mxu2 %v6890_v0  ;;  %v6888_v8 = vld [vmem:[%s12391_s2 + $0x340] sm:$0xff] }
 0x9f3   : > { %v7291_v34 = vpop.eup %7290  ;;  %v11086_v31 = vadd.f32 1e-05, %v4531_v44  ;;  %v4770_v36 = vadd.f32 %v10990_v39, %v4753_v38 }
 0x9f4   : > { %v4620_v27 = vmul.f32 %v7289_v50, %v4619_v29  ;;  %v4626_v52 = vmul.f32 %v7291_v34, %v4546_v30  ;;  %vm4632_vm5 = vweird.f32 %v7291_v34  ;;  %5110 = vmatpush.msra.mxu2 %v6889_v20  ;;  %v4722_v30 = vsub.f32 %v10935_v40, %v11050_v57  ;;  %v6887_v57 = vld [vmem:[%s12391_s2 + $0x338] sm:$0xff] }
 0x9f5   : > { %7292 = vrsqrt.f32 %v11086_v31  ;;  %v11091_v26 = vadd.f32 %v4770_v36, %v12451_v42  ;;  %vm4633_vm7 = vmor %vm4631_vm6, %vm4632_vm5  ;;  %vm4641_vm9 = vweird.f32 %v11086_v31 }
 0x9f6   : > { %v4624_v41 = vsel %vm4623_vm4, %v7289_v50, %v4620_v27  ;;  %v4627_v6 = vmul.f32 %v7291_v34, %v4626_v52  ;;  %v11093_v14 = vpop.f32.mrf.mxu0  ;;  %5111 = vmatpush.msra.mxu2 %v6888_v8  ;;  %v6886_v52 = vld [vmem:[%s12391_s2 + $0x330] sm:$0xff]  ;;  %v6881_v8 = vld [vmem:[%s12391_s2 + $0x308] sm:$0xff] }
 0x9f7   : > { %v4738_v22 = vmul.f32 %v10983_v43, %v4624_v41  ;;  %v4516_v16 = vmul.f32 %v11093_v14, %v11093_v14  ;;  %v11102_v58 = vmul.f32 %v11091_v26, %v11091_v26 }
 0x9f8   : > { %v4628_v24 = vmul.f32 0.5, %v4627_v6  ;;  %v4486_v55 = vpop.f32.mrf.mxu1  ;;  %5112 = vmatpush.msra.mxu2 %v6887_v57  ;;  %v12453_v6 = vld [vmem:[#allocation7_spill] sm:$0xff] }
 0x9f9   : > { %v4532_v60 = vsub.f32 %v4486_v55, %v4516_v16  ;;  %4824 = vrot.lane.b32.xlu1 %v11102_v58, %s7608_s30  ;;  %v4754_v1 = vmul.f32 %v4738_v22, %v4721_v7  ;;  %v6885_v22 = vld [vmem:[%s12391_s2 + $0x328] sm:$0xff] }
 0x9fa   : > { %v4629_v59 = vsub.f32 1.5, %v4628_v24  ;;  %5113 = vmatpush.msra.mxu2 %v6886_v52 }
 0x9fb   : > { %v7293_v19 = vpop.eup %7292  ;;  %v11109_v47 = vadd.f32 1e-05, %v4532_v60  ;;  %v4771_v28 = vadd.f32 %v10990_v39, %v4754_v1 }
 0x9fc   : > { %v4630_v49 = vmul.f32 %v7291_v34, %v4629_v59  ;;  %v4636_v50 = vmul.f32 %v7293_v19, %v11086_v31  ;;  %vm4642_vm8 = vweird.f32 %v7293_v19  ;;  %5114 = vmatpush.msra.mxu2 %v6885_v22  ;;  %v4723_v31 = vsub.f32 %v10940_v2, %v11070_v11  ;;  %v6884_v59 = vld [vmem:[%s12391_s2 + $0x320] sm:$0xff]  ;;  %v6883_v11 = vld [vmem:[%s12391_s2 + $0x318] sm:$0xff] }
 0x9fd   : > { %7294 = vrsqrt.f32 %v11109_v47  ;;  %v11118_v15 = vadd.f32 %v4771_v28, %v12452_v37  ;;  %vm4643_vm10 = vmor %vm4641_vm9, %vm4642_vm8  ;;  %vm4651_vm12 = vweird.f32 %v11109_v47 }
 0x9fe   : > { %v4634_v23 = vsel %vm4633_vm7, %v7291_v34, %v4630_v49  ;;  %v4637_v4 = vmul.f32 %v7293_v19, %v4636_v50  ;;  %v11123_v5 = vpop.f32.mrf.mxu0  ;;  %5115 = vmatpush.msra.mxu2 %v6884_v59 }
 0x9ff   : > { %v4739_v54 = vmul.f32 %v10983_v43, %v4634_v23  ;;  %v4517_v45 = vmul.f32 %v11123_v5, %v11123_v5  ;;  %v11132_v56 = vmul.f32 %v11118_v15, %v11118_v15  ;;  %v6882_v23 = vld [vmem:[%s12391_s2 + $0x310] sm:$0xff] }
 0xa00   : > { %v4638_v9 = vmul.f32 0.5, %v4637_v4  ;;  %v4489_v44 = vpop.f32.mrf.mxu1  ;;  %5116 = vmatpush.msra.mxu2 %v6883_v11 }
 0xa01   : > { %v4533_v38 = vsub.f32 %v4489_v44, %v4517_v45  ;;  %4826 = vrot.lane.b32.xlu2 %v11132_v56, %s7608_s30  ;;  %v4755_v40 = vmul.f32 %v4739_v54, %v4722_v30  ;;  %v12454_v54 = vld [vmem:[#allocation8_spill] sm:$0xff] }
 0xa02   : > { %v4639_v29 = vsub.f32 1.5, %v4638_v9  ;;  %5117 = vmatpush.msra.mxu2 %v6882_v23 }
 0xa03   : > { %v7295_v34 = vpop.eup %7294  ;;  %v11142_v36 = vadd.f32 1e-05, %v4533_v38  ;;  %v4772_v27 = vadd.f32 %v10990_v39, %v4755_v40 }
 0xa04   : > { %v4640_v42 = vmul.f32 %v7293_v19, %v4639_v29  ;;  %v4646_v41 = vmul.f32 %v7295_v34, %v11109_v47  ;;  %vm4652_vm11 = vweird.f32 %v7295_v34  ;;  %5118 = vmatpush.msra.mxu2 %v6881_v8  ;;  %v4724_v47 = vsub.f32 %v10945_v18, %v11093_v14  ;;  %v7564_v14 = vld [vmem:[%s12393_s4 + $0x78] sm:$0xff] }
 0xa05   : > { %7296 = vrsqrt.f32 %v11142_v36  ;;  %v11152_v7 = vadd.f32 %v4772_v27, %v12453_v6  ;;  %vm4653_vm13 = vmor %vm4651_vm12, %vm4652_vm11  ;;  %vm4661_vm15 = vweird.f32 %v11142_v36 }
 0xa06   : > { %v4644_v16 = vsel %vm4643_vm10, %v7293_v19, %v4640_v42  ;;  %v4647_v63 = vmul.f32 %v7295_v34, %v4646_v41  ;;  %v11157_v24 = vpop.f32.mrf.mxu0 }
 0xa07   : > { %v4740_v55 = vmul.f32 %v10983_v43, %v4644_v16  ;;  %v4518_v60 = vmul.f32 %v11157_v24, %v11157_v24  ;;  %v11166_v1 = vmul.f32 %v11152_v7, %v11152_v7 }
 0xa08   : > { %v4648_v19 = vmul.f32 0.5, %v4647_v63  ;;  %v4492_v28 = vpop.f32.mrf.mxu1 }
 0xa09   : > { %v4534_v0 = vsub.f32 %v4492_v28, %v4518_v60  ;;  %4828 = vrot.lane.b32.xlu0 %v11166_v1, %s7608_s30  ;;  %v4756_v2 = vmul.f32 %v4740_v55, %v4723_v31  ;;  %v7565_v31 = vld [vmem:[%s12393_s4 + $0x70] sm:$0xff] }
 0xa0a   : > { %v4649_v49 = vsub.f32 1.5, %v4648_v19  ;;  %v12455_v19 = vld [vmem:[#allocation9_spill] sm:$0xff] }
 0xa0b   : > { %v7297_v50 = vpop.eup %7296  ;;  %v11176_v37 = vadd.f32 1e-05, %v4534_v0  ;;  %v4773_v20 = vadd.f32 %v10990_v39, %v4756_v2  ;;  %v7566_v0 = vld [vmem:[%s12393_s4 + $0x68] sm:$0xff] }
 0xa0c   : > { %v4650_v4 = vmul.f32 %v7295_v34, %v4649_v49  ;;  %v4656_v30 = vmul.f32 %v7297_v50, %v11142_v36  ;;  %vm4662_vm14 = vweird.f32 %v7297_v50 }
 0xa0d   : > { %7298 = vrsqrt.f32 %v11176_v37  ;;  %v11186_v45 = vadd.f32 %v4773_v20, %v12454_v54  ;;  %vm4663_vm0 = vmor %vm4661_vm15, %vm4662_vm14  ;;  %vm4671_vm2 = vweird.f32 %v11176_v37 }
 0xa0e   : > { %v4654_v9 = vsel %vm4653_vm13, %v7295_v34, %v4650_v4  ;;  %v4657_v44 = vmul.f32 %v7297_v50, %v4656_v30  ;;  %v11191_v38 = vpop.f32.mrf.mxu0  ;;  %v6880_v34 = vld [vmem:[%s12391_s2 + $0x300] sm:$0xff] }
 0xa0f   : > { %v4741_v40 = vmul.f32 %v10983_v43, %v4654_v9  ;;  %v4519_v57 = vmul.f32 %v11191_v38, %v11191_v38  ;;  %v11200_v29 = vmul.f32 %v11186_v45, %v11186_v45  ;;  %5119 = vmatpush.msra.mxu2 %v6880_v34 }
 0xa10   : > { %v4658_v27 = vmul.f32 0.5, %v4657_v44  ;;  %v4495_v52 = vpop.f32.mrf.mxu1 }
 0xa11   : > { %v4535_v42 = vsub.f32 %v4495_v52, %v4519_v57  ;;  %4830 = vrot.lane.b32.xlu1 %v11200_v29, %s7608_s30  ;;  %v4757_v18 = vmul.f32 %v4741_v40, %v4724_v47  ;;  %5966 = vmatpush.msrb.mxu2 %v7564_v14  ;;  %v7569_v40 = vld [vmem:[%s12393_s4 + $0x50] sm:$0xff] }
 0xa12   : > { %v4659_v41 = vsub.f32 1.5, %v4658_v27 }
 0xa13   : > { %v7299_v6 = vpop.eup %7298  ;;  %v11210_v22 = vadd.f32 1e-05, %v4535_v42  ;;  %v4815_v16 = vpop.permute.xlu2 %4814  ;;  %v4774_v63 = vadd.f32 %v10990_v39, %v4757_v18  ;;  %5967 = vmatpush.msrb.mxu2 %v7565_v31  ;;  %v7570_v42 = vld [vmem:[%s12393_s4 + $0x48] sm:$0xff] }
 0xa14   : > { %v4660_v55 = vmul.f32 %v7297_v50, %v4659_v41  ;;  %v4666_v60 = vmul.f32 %v7299_v6, %v11176_v37  ;;  %v11219_v59 = vadd.f32 %v4815_v16, %v11000_v53  ;;  %v4725_v53 = vsub.f32 %v10950_v10, %v11123_v5  ;;  %v7568_v5 = vld [vmem:[%s12393_s4 + $0x58] sm:$0xff]  ;;  %v12456_v16 = vld [vmem:[#allocation10_spill] sm:$0xff] }
 0xa15   : > { %7300 = vrsqrt.f32 %v11210_v22  ;;  %v11223_v28 = vadd.f32 %v4774_v63, %v12455_v19  ;;  %5968 = vmatpush.msrb.mxu2 %v7566_v0  ;;  %vm4672_vm1 = vweird.f32 %v7299_v6  ;;  %v4726_v63 = vsub.f32 %v10955_v12, %v11157_v24  ;;  %v7571_v19 = vld [vmem:[%s12393_s4 + $0x40] sm:$0xff]  ;;  %v7572_v24 = vld [vmem:[%s12393_s4 + $0x38] sm:$0xff] }
 0xa16   : > { %v4664_v2 = vsel %vm4663_vm0, %v7297_v50, %v4660_v55  ;;  %v4667_v11 = vmul.f32 %v7299_v6, %v4666_v60  ;;  %7302 = vrsqrt.f32 %v11219_v59  ;;  %v11229_v36 = vpop.f32.mrf.mxu0  ;;  %v7567_v50 = vld [vmem:[%s12393_s4 + $0x60] sm:$0xff]  ;;  %vm4673_vm3 = vmor %vm4671_vm2, %vm4672_vm1  ;;  %vm4681_vm6 = vweird.f32 %v11210_v22 }
 0xa17   : > { %v4742_v49 = vmul.f32 %v10983_v43, %v4664_v2  ;;  %v4520_v20 = vmul.f32 %v11229_v36, %v11229_v36  ;;  %v11238_v23 = vmul.f32 %v11223_v28, %v11223_v28  ;;  %5969 = vmatpush.msrb.mxu2 %v7567_v50  ;;  %vm4868_vm8 = vweird.f32 %v11219_v59 }
 0xa18   : > { %v4668_v4 = vmul.f32 0.5, %v4667_v11  ;;  %v4498_v30 = vpop.f32.mrf.mxu1 }
 0xa19   : > { %v4536_v54 = vsub.f32 %v4498_v30, %v4520_v20  ;;  %4832 = vrot.lane.b32.xlu2 %v11238_v23, %s7608_s30  ;;  %v4758_v10 = vmul.f32 %v4742_v49, %v4725_v53  ;;  %5970 = vmatpush.msrb.mxu2 %v7568_v5  ;;  %v11293_v5 = vstv %s11256_s24 }
 0xa1a   : > { %v4669_v8 = vsub.f32 1.5, %v4668_v4 }
 0xa1b   : > { %v7301_v9 = vpop.eup %7300  ;;  %v11248_v44 = vadd.f32 1e-05, %v4536_v54  ;;  %v4775_v47 = vadd.f32 %v10990_v39, %v4758_v10  ;;  %5971 = vmatpush.msrb.mxu2 %v7569_v40  ;;  %v7573_v54 = vld [vmem:[%s12393_s4 + $0x30] sm:$0xff] }
 0xa1c   : > { %v7303_v57 = vpop.eup %7302  ;;  %v4670_v34 = vmul.f32 %v7299_v6, %v4669_v8  ;;  %v4676_v27 = vmul.f32 %v7301_v9, %v11210_v22  ;;  %vm4682_vm4 = vweird.f32 %v7301_v9  ;;  %v12457_v40 = vld [vmem:[#allocation11_spill] sm:$0xff] }
 0xa1d   : > { %v4863_v52 = vmul.f32 %v7303_v57, %v11219_v59  ;;  %7304 = vrsqrt.f32 %v11248_v44  ;;  %5972 = vmatpush.msrb.mxu2 %v7570_v42  ;;  %v11266_v37 = vadd.f32 %v4775_v47, %v12456_v16  ;;  %vm4869_vm5 = vweird.f32 %v7303_v57  ;;  %vm4683_vm7 = vmor %vm4681_vm6, %vm4682_vm4 }
 0xa1e   : > { %v4674_v18 = vsel %vm4673_vm3, %v7299_v6, %v4670_v34  ;;  %v4677_v14 = vmul.f32 %v7301_v9, %v4676_v27  ;;  %v11263_v41 = vpop.f32.mrf.mxu0  ;;  %v7574_v27 = vld [vmem:[%s12393_s4 + $0x28] sm:$0xff]  ;;  %vm4870_vm9 = vmor %vm4868_vm8, %vm4869_vm5  ;;  %vm4691_vm11 = vweird.f32 %v11248_v44 }
 0xa1f   : > { %v4743_v31 = vmul.f32 %v10983_v43, %v4674_v18  ;;  %v4864_v55 = vmul.f32 %v7303_v57, %v4863_v52  ;;  %v4521_v60 = vmul.f32 %v11263_v41, %v11263_v41  ;;  %5973 = vmatpush.msrb.mxu2 %v7571_v19  ;;  %v11278_v2 = vmul.f32 %v11266_v37, %v11266_v37 }
 0xa20   : > { %v4678_v6 = vmul.f32 0.5, %v4677_v14  ;;  %v4501_v0 = vpop.f32.mrf.mxu1  ;;  %v4727_v18 = vsub.f32 %v10960_v61, %v11191_v38 }
 0xa21   : > { %v4865_v11 = vmul.f32 0.5, %v4864_v55  ;;  %v4537_v53 = vsub.f32 %v4501_v0, %v4521_v60  ;;  %v4759_v12 = vmul.f32 %v4743_v31, %v4726_v63  ;;  %5974 = vmatpush.msrb.mxu2 %v7572_v24  ;;  %4834 = vrot.lane.b32.xlu0 %v11278_v2, %s7608_s30  ;;  %v7575_v63 = vld [vmem:[%s12393_s4 + $0x20] sm:$0xff] }
 0xa22   : > { %v4679_v49 = vsub.f32 1.5, %v4678_v6 }
 0xa23   : > { %v7305_v20 = vpop.eup %7304  ;;  %v4866_v50 = vsub.f32 1.5, %v4865_v11  ;;  %v11285_v4 = vadd.f32 1e-05, %v4537_v53  ;;  %v4776_v30 = vadd.f32 %v10990_v39, %v4759_v12  ;;  %5975 = vmatpush.msrb.mxu2 %v7573_v54  ;;  %v7577_v12 = vld [vmem:[%s12393_s4 + $0x10] sm:$0xff] }
 0xa24   : > { %v4680_v10 = vmul.f32 %v7301_v9, %v4679_v49  ;;  %v4686_v8 = vmul.f32 %v7305_v20, %v11248_v44  ;;  %vm4692_vm10 = vweird.f32 %v7305_v20  ;;  %v4728_v44 = vsub.f32 %v10965_v35, %v11229_v36 }
 0xa25   : > { %v4867_v47 = vmul.f32 %v7303_v57, %v4866_v50  ;;  %7306 = vrsqrt.f32 %v11285_v4  ;;  %v11299_v34 = vadd.f32 %v4776_v30, %v12457_v40  ;;  %5976 = vmatpush.msrb.mxu2 %v7574_v27  ;;  %vm4693_vm12 = vmor %vm4691_vm11, %vm4692_vm10  ;;  %v12458_v30 = vld [vmem:[#allocation12_spill] sm:$0xff]  ;;  %vm4701_vm14 = vweird.f32 %v11285_v4 }
 0xa26   : > { %v4684_v52 = vsel %vm4683_vm7, %v7301_v9, %v4680_v10  ;;  %v4687_v22 = vmul.f32 %v7305_v20, %v4686_v8  ;;  %v11305_v42 = vpop.f32.mrf.mxu0  ;;  %v7578_v10 = vld [vmem:[%s12393_s4 + $0x8] sm:$0xff] }
 0xa27   : > { %v4744_v59 = vmul.f32 %v10983_v43, %v4684_v52  ;;  %v4871_v14 = vsel %vm4870_vm9, %v7303_v57, %v4867_v47  ;;  %v4522_v16 = vmul.f32 %v11305_v42, %v11305_v42  ;;  %5977 = vmatpush.msrb.mxu2 %v7575_v63  ;;  %v11318_v60 = vmul.f32 %v11299_v34, %v11299_v34  ;;  %v7576_v57 = vld [vmem:[%s12393_s4 + $0x18] sm:$0xff] }
 0xa28   : > { %v5023_v9 = vmul.f32 %v11293_v5, %v4871_v14  ;;  %v4688_v31 = vmul.f32 0.5, %v4687_v22  ;;  %v4504_v55 = vpop.f32.mrf.mxu1  ;;  %v7579_v22 = vld [vmem:[%s12393_s4] sm:$0xff] }
 0xa29   : > { %v4538_v61 = vsub.f32 %v4504_v55, %v4522_v16  ;;  %v4760_v38 = vmul.f32 %v4744_v59, %v4727_v18  ;;  %5978 = vmatpush.msrb.mxu2 %v7576_v57  ;;  %4836 = vrot.lane.b32.xlu1 %v11318_v60, %s7608_s30 }
 0xa2a   : > { %v5039_v19 = vsub.f32 1.0, %v5023_v9  ;;  %v4689_v6 = vsub.f32 1.5, %v4688_v31  ;;  %v12459_v9 = vld [vmem:[#allocation13_spill] sm:$0xff] }
 0xa2b   : > { %v7307_v0 = vpop.eup %7306  ;;  %v4554_v11 = vadd.f32 1e-05, %v4538_v61  ;;  %v4777_v53 = vadd.f32 %v10990_v39, %v4760_v38  ;;  %5979 = vmatpush.msrb.mxu2 %v7577_v12  ;;  %v4729_v38 = vsub.f32 %v10970_v3, %v11263_v41  ;;  %v12460_v41 = vld [vmem:[#allocation14_spill] sm:$0xff] }
 0xa2c   : > { %v5055_v24 = vmax.f32 %v5039_v19, 0.0  ;;  %v4690_v49 = vmul.f32 %v7305_v20, %v4689_v6  ;;  %v4696_v50 = vmul.f32 %v7307_v0, %v11285_v4  ;;  %vm4702_vm13 = vweird.f32 %v7307_v0 }
 0xa2d   : > { %7308 = vrsqrt.f32 %v4554_v11  ;;  %v11332_v54 = vadd.f32 %v4777_v53, %v12458_v30  ;;  %5980 = vmatpush.msrb.mxu2 %v7578_v10  ;;  %vm4703_vm15 = vmor %vm4701_vm14, %vm4702_vm13  ;;  %vm4711_vm1 = vweird.f32 %v4554_v11 }
 0xa2e   : > { %v4694_v8 = vsel %vm4693_vm12, %v7305_v20, %v4690_v49  ;;  %v4697_v47 = vmul.f32 %v7307_v0, %v4696_v50  ;;  %v11338_v40 = vmul.f32 %v5055_v24, %v10994_v51  ;;  %v4730_v50 = vsub.f32 %v10975_v33, %v11305_v42  ;;  %v12461_v33 = vld [vmem:[#allocation15_spill] sm:$0xff] }
 0xa2f   : > { %v4745_v27 = vmul.f32 %v10983_v43, %v4694_v8  ;;  %v11345_v52 = vmul.f32 %v11332_v54, %v11332_v54  ;;  %5981 = vmatpush.msrb.mxu2 %v7579_v22 }
 0xa30   : > { %v4698_v18 = vmul.f32 0.5, %v4697_v47  ;;  %5120 = vmatmul.f32.vlgmr.msra.gmra.mxu2 %v11338_v40 }
 0xa31   : > { %4838 = vrot.lane.b32.xlu2 %v11345_v52, %s7608_s30  ;;  %v4761_v51 = vmul.f32 %v4745_v27, %v4728_v44 }
 0xa32   : > { %v4699_v20 = vsub.f32 1.5, %v4698_v18 }
 0xa33   : > { %v7309_v35 = vpop.eup %7308  ;;  %v4817_v36 = vpop.permute.xlu0 %4816  ;;  %v4778_v59 = vadd.f32 %v10990_v39, %v4761_v51 }
 0xa34   : > { %v4700_v14 = vmul.f32 %v7307_v0, %v4699_v20  ;;  %v4706_v16 = vmul.f32 %v7309_v35, %v4554_v11  ;;  %v4847_v63 = vadd.f32 %v4817_v36, %v11010_v17  ;;  %vm4712_vm0 = vweird.f32 %v7309_v35 }
 0xa35   : > { %v11357_v31 = vadd.f32 %v4778_v59, %v12459_v9  ;;  %vm4713_vm2 = vmor %vm4711_vm1, %vm4712_vm0 }
 0xa36   : > { %v4704_v55 = vsel %vm4703_vm15, %v7307_v0, %v4700_v14  ;;  %v4707_v61 = vmul.f32 %v7309_v35, %v4706_v16  ;;  %7310 = vrsqrt.f32 %v4847_v63  ;;  %vm4878_vm4 = vweird.f32 %v4847_v63 }
 0xa37   : > { %v4746_v57 = vmul.f32 %v10983_v43, %v4704_v55  ;;  %v11364_v19 = vmul.f32 %v11357_v31, %v11357_v31 }
 0xa38   : > { %v4708_v4 = vmul.f32 0.5, %v4707_v61 }
 0xa39   : > { %4840 = vrot.lane.b32.xlu0 %v11364_v19, %s7608_s30  ;;  %v4762_v17 = vmul.f32 %v4746_v57, %v4729_v38 }
 0xa3a   : > { %v4709_v6 = vsub.f32 1.5, %v4708_v4 }
 0xa3b   : > { %v4779_v0 = vadd.f32 %v10990_v39, %v4762_v17 }
 0xa3c   : > { %v7311_v53 = vpop.eup %7310  ;;  %v4710_v12 = vmul.f32 %v7309_v35, %v4709_v6 }
 0xa3d   : > { %v4873_v3 = vmul.f32 %v7311_v53, %v4847_v63  ;;  %v11370_v24 = vadd.f32 %v4779_v0, %v12460_v41  ;;  %vm4879_vm3 = vweird.f32 %v7311_v53 }
 0xa3e   : > { %v4714_v49 = vsel %vm4713_vm2, %v7309_v35, %v4710_v12  ;;  %vm4880_vm5 = vmor %vm4878_vm4, %vm4879_vm3 }
 0xa3f   : > { %v4747_v30 = vmul.f32 %v10983_v43, %v4714_v49  ;;  %v4874_v10 = vmul.f32 %v7311_v53, %v4873_v3  ;;  %v11377_v8 = vmul.f32 %v11370_v24, %v11370_v24 }
 0xa41   : > { %v4875_v47 = vmul.f32 0.5, %v4874_v10  ;;  %4842 = vrot.lane.b32.xlu1 %v11377_v8, %s7608_s30  ;;  %v4763_v11 = vmul.f32 %v4747_v30, %v4730_v50 }
 0xa43   : > { %v4876_v44 = vsub.f32 1.5, %v4875_v47  ;;  %v4821_v27 = vpop.permute.xlu2 %4820  ;;  %v4780_v22 = vadd.f32 %v10990_v39, %v4763_v11 }
 0xa44   : > { %v4849_v43 = vadd.f32 %v4821_v27, %v11059_v13 }
 0xa45   : > { %v4877_v18 = vmul.f32 %v7311_v53, %v4876_v44  ;;  %v11383_v42 = vadd.f32 %v4780_v22, %v12461_v33 }
 0xa46   : > { %7312 = vrsqrt.f32 %v4849_v43  ;;  %vm4898_vm8 = vweird.f32 %v4849_v43 }
 0xa47   : > { %v11388_v51 = vmul.f32 %v11383_v42, %v11383_v42  ;;  %v4881_v20 = vsel %vm4880_vm5, %v7311_v53, %v4877_v18 }
 0xa48   : > { %v5024_v35 = vmul.f32 %v11293_v5, %v4881_v20 }
 0xa49   : > { %4844 = vrot.lane.b32.xlu2 %v11388_v51, %s7608_s30 }
 0xa4a   : > { %v5040_v39 = vsub.f32 1.0, %v5024_v35 }
 0xa4c   : > { %v5056_v36 = vmax.f32 %v5040_v39, 0.0  ;;  %v7313_v14 = vpop.eup %7312 }
 0xa4d   : > { %v4893_v13 = vmul.f32 %v7313_v14, %v4849_v43  ;;  %vm4899_vm6 = vweird.f32 %v7313_v14 }
 0xa4e   : > { %v11394_v59 = vmul.f32 %v5056_v36, %v11006_v48  ;;  %vm4900_vm9 = vmor %vm4898_vm8, %vm4899_vm6 }
 0xa4f   : > { %v4894_v9 = vmul.f32 %v7313_v14, %v4893_v13 }
 0xa50   : > { %5123 = vmatmul.f32.gmra.mxu2 %v11394_v59 }
 0xa51   : > { %v4895_v55 = vmul.f32 0.5, %v4894_v9 }
 0xa53   : > { %v4819_v16 = vpop.permute.xlu1 %4818  ;;  %v4896_v17 = vsub.f32 1.5, %v4895_v55 }
 0xa54   : > { %v4848_v63 = vadd.f32 %v4819_v16, %v11039_v32 }
 0xa55   : > { %v4897_v0 = vmul.f32 %v7313_v14, %v4896_v17 }
 0xa56   : > { %7314 = vrsqrt.f32 %v4848_v63  ;;  %vm4888_vm10 = vweird.f32 %v4848_v63 }
 0xa57   : > { %v4901_v41 = vsel %vm4900_vm9, %v7313_v14, %v4897_v0 }
 0xa58   : > { %v5026_v10 = vmul.f32 %v11293_v5, %v4901_v41 }
 0xa5a   : > { %v5042_v33 = vsub.f32 1.0, %v5026_v10 }
 0xa5b   : > { %v4827_v61 = vpop.permute.xlu2 %4826 }
 0xa5c   : > { %v7315_v38 = vpop.eup %7314  ;;  %v11399_v4 = vadd.f32 %v4827_v61, %v11132_v56  ;;  %v5058_v39 = vmax.f32 %v5042_v33, 0.0 }
 0xa5d   : > { %v4883_v57 = vmul.f32 %v7315_v38, %v4848_v63  ;;  %vm4889_vm7 = vweird.f32 %v7315_v38 }
 0xa5e   : > { %7316 = vrsqrt.f32 %v11399_v4  ;;  %vm4890_vm11 = vmor %vm4888_vm10, %vm4889_vm7  ;;  %vm4928_vm1 = vweird.f32 %v11399_v4 }
 0xa5f   : > { %v4884_v6 = vmul.f32 %v7315_v38, %v4883_v57 }
 0xa61   : > { %v4885_v48 = vmul.f32 0.5, %v4884_v6 }
 0xa63   : > { %v4886_v53 = vsub.f32 1.5, %v4885_v48  ;;  %v4823_v12 = vpop.permute.xlu0 %4822 }
 0xa64   : > { %v4850_v32 = vadd.f32 %v4823_v12, %v11079_v46  ;;  %v7317_v49 = vpop.eup %7316 }
 0xa65   : > { %v4887_v3 = vmul.f32 %v7315_v38, %v4886_v53  ;;  %v4923_v47 = vmul.f32 %v7317_v49, %v11399_v4  ;;  %vm4929_vm15 = vweird.f32 %v7317_v49 }
 0xa66   : > { %7318 = vrsqrt.f32 %v4850_v32  ;;  %vm4908_vm13 = vweird.f32 %v4850_v32  ;;  %vm4930_vm2 = vmor %vm4928_vm1, %vm4929_vm15 }
 0xa67   : > { %v4891_v56 = vsel %vm4890_vm11, %v7315_v38, %v4887_v3  ;;  %v4924_v43 = vmul.f32 %v7317_v49, %v4923_v47 }
 0xa68   : > { %v5025_v50 = vmul.f32 %v11293_v5, %v4891_v56 }
 0xa69   : > { %v4925_v36 = vmul.f32 0.5, %v4924_v43 }
 0xa6a   : > { %v5041_v30 = vsub.f32 1.0, %v5025_v50 }
 0xa6b   : > { %v4825_v11 = vpop.permute.xlu1 %4824  ;;  %v4926_v55 = vsub.f32 1.5, %v4925_v36 }
 0xa6c   : > { %v7319_v44 = vpop.eup %7318  ;;  %v4851_v27 = vadd.f32 %v4825_v11, %v11102_v58  ;;  %v5057_v46 = vmax.f32 %v5041_v30, 0.0 }
 0xa6d   : > { %v4903_v22 = vmul.f32 %v7319_v44, %v4850_v32  ;;  %vm4909_vm12 = vweird.f32 %v7319_v44  ;;  %v4927_v48 = vmul.f32 %v7317_v49, %v4926_v55 }
 0xa6e   : > { %7320 = vrsqrt.f32 %v4851_v27  ;;  %v11408_v18 = vmul.f32 %v5057_v46, %v11029_v62  ;;  %vm4910_vm14 = vmor %vm4908_vm13, %vm4909_vm12  ;;  %v11415_v62 = vmul.f32 %v5058_v39, %v11048_v25  ;;  %vm4918_vm3 = vweird.f32 %v4851_v27 }
 0xa6f   : > { %v4904_v20 = vmul.f32 %v7319_v44, %v4903_v22  ;;  %v4931_v56 = vsel %vm4930_vm2, %v7317_v49, %v4927_v48 }
 0xa70   : > { %5126 = vmatmul.f32.gmra.mxu2 %v11408_v18  ;;  %v5029_v4 = vmul.f32 %v11293_v5, %v4931_v56 }
 0xa71   : > { %v4905_v35 = vmul.f32 0.5, %v4904_v20 }
 0xa72   : > { %v5045_v49 = vsub.f32 1.0, %v5029_v4 }
 0xa73   : > { %v4906_v14 = vsub.f32 1.5, %v4905_v35  ;;  %v4833_v13 = vpop.permute.xlu2 %4832 }
 0xa74   : > { %v7321_v16 = vpop.eup %7320  ;;  %v11412_v9 = vadd.f32 %v4833_v13, %v11238_v23  ;;  %v5061_v43 = vmax.f32 %v5045_v49, 0.0 }
 0xa75   : > { %v4907_v63 = vmul.f32 %v7319_v44, %v4906_v14  ;;  %v4913_v58 = vmul.f32 %v7321_v16, %v4851_v27  ;;  %vm4919_vm0 = vweird.f32 %v7321_v16 }
 0xa76   : > { %7322 = vrsqrt.f32 %v11412_v9  ;;  %vm4920_vm4 = vmor %vm4918_vm3, %vm4919_vm0  ;;  %v11435_v13 = vmul.f32 %v5061_v43, %v11118_v15  ;;  %vm4958_vm10 = vweird.f32 %v11412_v9 }
 0xa77   : > { %v4914_v61 = vmul.f32 %v7321_v16, %v4913_v58  ;;  %v4911_v38 = vsel %vm4910_vm14, %v7319_v44, %v4907_v63 }
 0xa78   : > { %5129 = vmatmul.f32.gmra.mxu2 %v11415_v62  ;;  %v5027_v57 = vmul.f32 %v11293_v5, %v4911_v38 }
 0xa79   : > { %v4915_v17 = vmul.f32 0.5, %v4914_v61 }
 0xa7a   : > { %v5043_v6 = vsub.f32 1.0, %v5027_v57 }
 0xa7b   : > { %v4916_v0 = vsub.f32 1.5, %v4915_v17  ;;  %v4829_v23 = vpop.permute.xlu0 %4828 }
 0xa7c   : > { %v4853_v25 = vadd.f32 %v4829_v23, %v11166_v1  ;;  %v5059_v53 = vmax.f32 %v5043_v6, 0.0  ;;  %v7323_v41 = vpop.eup %7322 }
 0xa7d   : > { %v4917_v12 = vmul.f32 %v7321_v16, %v4916_v0  ;;  %v4953_v1 = vmul.f32 %v7323_v41, %v11412_v9  ;;  %vm4959_vm8 = vweird.f32 %v7323_v41 }
 0xa7e   : > { %7324 = vrsqrt.f32 %v4853_v25  ;;  %v11423_v32 = vmul.f32 %v5059_v53, %v11068_v21  ;;  %vm4938_vm6 = vweird.f32 %v4853_v25  ;;  %vm4960_vm11 = vmor %vm4958_vm10, %vm4959_vm8 }
 0xa7f   : > { %v4921_v3 = vsel %vm4920_vm4, %v7321_v16, %v4917_v12  ;;  %v4954_v46 = vmul.f32 %v7323_v41, %v4953_v1 }
 0xa80   : > { %5132 = vmatmul.f32.gmra.mxu2 %v11423_v32  ;;  %v5028_v50 = vmul.f32 %v11293_v5, %v4921_v3 }
 0xa81   : > { %v4955_v20 = vmul.f32 0.5, %v4954_v46 }
 0xa82   : > { %v5044_v30 = vsub.f32 1.0, %v5028_v50 }
 0xa83   : > { %v4831_v10 = vpop.permute.xlu1 %4830 }
 0xa84   : > { %v7325_v47 = vpop.eup %7324  ;;  %v4854_v11 = vadd.f32 %v4831_v10, %v11200_v29  ;;  %v5060_v44 = vmax.f32 %v5044_v30, 0.0 }
 0xa85   : > { %v4933_v27 = vmul.f32 %v7325_v47, %v4853_v25  ;;  %vm4939_vm5 = vweird.f32 %v7325_v47 }
 0xa86   : > { %7326 = vrsqrt.f32 %v4854_v11  ;;  %v11431_v21 = vmul.f32 %v5060_v44, %v11091_v26  ;;  %vm4940_vm7 = vmor %vm4938_vm6, %vm4939_vm5  ;;  %v4956_v26 = vsub.f32 1.5, %v4955_v20  ;;  %vm4948_vm12 = vweird.f32 %v4854_v11 }
 0xa87   : > { %v4934_v22 = vmul.f32 %v7325_v47, %v4933_v27 }
 0xa88   : > { %5135 = vmatmul.f32.gmra.mxu2 %v11431_v21  ;;  %v4957_v57 = vmul.f32 %v7323_v41, %v4956_v26 }
 0xa89   : > { %v4935_v33 = vmul.f32 0.5, %v4934_v22 }
 0xa8a   : > { %v4961_v25 = vsel %vm4960_vm11, %v7323_v41, %v4957_v57 }
 0xa8b   : > { %v4936_v35 = vsub.f32 1.5, %v4935_v33  ;;  %v4839_v36 = vpop.permute.xlu2 %4838  ;;  %v5032_v3 = vmul.f32 %v11293_v5, %v4961_v25 }
 0xa8c   : > { %v7327_v39 = vpop.eup %7326  ;;  %v11438_v63 = vadd.f32 %v4839_v36, %v11345_v52 }
 0xa8d   : > { %v4937_v14 = vmul.f32 %v7325_v47, %v4936_v35  ;;  %v4943_v29 = vmul.f32 %v7327_v39, %v4854_v11  ;;  %vm4949_vm9 = vweird.f32 %v7327_v39  ;;  %v5048_v41 = vsub.f32 1.0, %v5032_v3 }
 0xa8e   : > { %7328 = vrsqrt.f32 %v11438_v63  ;;  %vm4950_vm13 = vmor %vm4948_vm12, %vm4949_vm9  ;;  %vm4988_vm3 = vweird.f32 %v11438_v63 }
 0xa8f   : > { %v4944_v16 = vmul.f32 %v7327_v39, %v4943_v29  ;;  %v4941_v58 = vsel %vm4940_vm7, %v7325_v47, %v4937_v14  ;;  %v5064_v44 = vmax.f32 %v5048_v41, 0.0 }
 0xa90   : > { %5138 = vmatmul.f32.gmra.mxu2 %v11435_v13  ;;  %v5030_v55 = vmul.f32 %v11293_v5, %v4941_v58 }
 0xa91   : > { %v4945_v61 = vmul.f32 0.5, %v4944_v16  ;;  %v11458_v43 = vmul.f32 %v5064_v44, %v11223_v28 }
 0xa92   : > { %v5046_v38 = vsub.f32 1.0, %v5030_v55 }
 0xa93   : > { %v4946_v17 = vsub.f32 1.5, %v4945_v61  ;;  %v4835_v15 = vpop.permute.xlu0 %4834 }
 0xa94   : > { %v5062_v6 = vmax.f32 %v5046_v38, 0.0  ;;  %v4856_v48 = vadd.f32 %v4835_v15, %v11278_v2  ;;  %v7329_v12 = vpop.eup %7328 }
 0xa95   : > { %v4947_v52 = vmul.f32 %v7327_v39, %v4946_v17  ;;  %v4983_v56 = vmul.f32 %v7329_v12, %v11438_v63  ;;  %vm4989_vm1 = vweird.f32 %v7329_v12 }
 0xa96   : > { %v11446_v0 = vmul.f32 %v5062_v6, %v11152_v7  ;;  %7330 = vrsqrt.f32 %v4856_v48  ;;  %vm4968_vm15 = vweird.f32 %v4856_v48  ;;  %vm4990_vm4 = vmor %vm4988_vm3, %vm4989_vm1 }
 0xa97   : > { %v4951_v23 = vsel %vm4950_vm13, %v7327_v39, %v4947_v52  ;;  %v4984_v10 = vmul.f32 %v7329_v12, %v4983_v56 }
 0xa98   : > { %5141 = vmatmul.f32.gmra.mxu2 %v11446_v0  ;;  %v5031_v53 = vmul.f32 %v11293_v5, %v4951_v23 }
 0xa99   : > { %v4985_v27 = vmul.f32 0.5, %v4984_v10 }
 0xa9a   : > { %v5047_v9 = vsub.f32 1.0, %v5031_v53 }
 0xa9b   : > { %v4837_v50 = vpop.permute.xlu1 %4836  ;;  %v4986_v20 = vsub.f32 1.5, %v4985_v27 }
 0xa9c   : > { %v5063_v30 = vmax.f32 %v5047_v9, 0.0  ;;  %v7331_v2 = vpop.eup %7330  ;;  %v4857_v4 = vadd.f32 %v4837_v50, %v11318_v60 }
 0xa9d   : > { %v4963_v7 = vmul.f32 %v7331_v2, %v4856_v48  ;;  %vm4969_vm14 = vweird.f32 %v7331_v2  ;;  %v4987_v16 = vmul.f32 %v7329_v12, %v4986_v20 }
 0xa9e   : > { %v11454_v1 = vmul.f32 %v5063_v30, %v11186_v45  ;;  %7332 = vrsqrt.f32 %v4857_v4  ;;  %vm4970_vm0 = vmor %vm4968_vm15, %vm4969_vm14  ;;  %vm4978_vm5 = vweird.f32 %v4857_v4 }
 0xa9f   : > { %v4964_v47 = vmul.f32 %v7331_v2, %v4963_v7  ;;  %v4991_v57 = vsel %vm4990_vm4, %v7329_v12, %v4987_v16 }
 0xaa0   : > { %5144 = vmatmul.f32.gmra.mxu2 %v11454_v1  ;;  %v5035_v52 = vmul.f32 %v11293_v5, %v4991_v57 }
 0xaa1   : > { %v4965_v11 = vmul.f32 0.5, %v4964_v47 }
 0xaa2   : > { %v5051_v56 = vsub.f32 1.0, %v5035_v52 }
 0xaa3   : > { %v4966_v49 = vsub.f32 1.5, %v4965_v11  ;;  %v4845_v46 = vpop.permute.xlu2 %4844 }
 0xaa4   : > { %v7333_v22 = vpop.eup %7332  ;;  %v11461_v45 = vadd.f32 %v4845_v46, %v11388_v51 }
 0xaa5   : > { %v4967_v33 = vmul.f32 %v7331_v2, %v4966_v49  ;;  %v4973_v60 = vmul.f32 %v7333_v22, %v4857_v4  ;;  %vm4979_vm2 = vweird.f32 %v7333_v22  ;;  %v5067_v4 = vmax.f32 %v5051_v56, 0.0 }
 0xaa6   : > { %7334 = vrsqrt.f32 %v11461_v45  ;;  %vm4980_vm6 = vmor %vm4978_vm5, %vm4979_vm2  ;;  %vm5018_vm13 = vweird.f32 %v11461_v45 }
 0xaa7   : > { %v4974_v35 = vmul.f32 %v7333_v22, %v4973_v60  ;;  %v4971_v39 = vsel %vm4970_vm0, %v7331_v2, %v4967_v33  ;;  %v11486_v11 = vmul.f32 %v5067_v4, %v11332_v54 }
 0xaa8   : > { %5147 = vmatmul.f32.gmra.mxu2 %v11458_v43  ;;  %v5033_v36 = vmul.f32 %v11293_v5, %v4971_v39 }
 0xaa9   : > { %v4975_v14 = vmul.f32 0.5, %v4974_v35  ;;  %12463 = vst [vmem:[#allocation6_spill] sm:$0xff] %v11486_v11 }
 0xaaa   : > { %v5049_v26 = vsub.f32 1.0, %v5033_v36 }
 0xaab   : > { %v4841_v29 = vpop.permute.xlu0 %4840  ;;  %v4976_v28 = vsub.f32 1.5, %v4975_v14 }
 0xaac   : > { %v4859_v58 = vadd.f32 %v4841_v29, %v11364_v19  ;;  %v5065_v51 = vmax.f32 %v5049_v26, 0.0  ;;  %v7335_v17 = vpop.eup %7334 }
 0xaad   : > { %v4977_v55 = vmul.f32 %v7333_v22, %v4976_v28  ;;  %v5013_v23 = vmul.f32 %v7335_v17, %v11461_v45  ;;  %vm5019_vm11 = vweird.f32 %v7335_v17 }
 0xaae   : > { %7336 = vrsqrt.f32 %v4859_v58  ;;  %v11469_v61 = vmul.f32 %v5065_v51, %v11266_v37  ;;  %vm4998_vm8 = vweird.f32 %v4859_v58  ;;  %vm5020_vm15 = vmor %vm5018_vm13, %vm5019_vm11 }
 0xaaf   : > { %v4981_v38 = vsel %vm4980_vm6, %v7333_v22, %v4977_v55  ;;  %v5014_v50 = vmul.f32 %v7335_v17, %v5013_v23 }
 0xab0   : > { %5150 = vmatmul.f32.gmra.mxu2 %v11469_v61  ;;  %v5034_v15 = vmul.f32 %v11293_v5, %v4981_v38 }
 0xab2   : > { %v5050_v63 = vsub.f32 1.0, %v5034_v15 }
 0xab3   : > { %v11473_v6 = vpop.f32.mrf.mxu2  ;;  %v4843_v19 = vpop.permute.xlu1 %4842 }
 0xab4   : > { %v7337_v48 = vpop.eup %7336  ;;  %v5237_v37 = vmul.f32 %v11473_v6, %v11473_v6  ;;  %v4860_v25 = vadd.f32 %v4843_v19, %v11377_v8  ;;  %5188 = vmatmul.f32.vlgmr.msra.gmra.mxu3 %v11473_v6  ;;  %v5066_v12 = vmax.f32 %v5050_v63, 0.0  ;;  %v5015_v8 = vmul.f32 0.5, %v5014_v50 }
 0xab5   : > { %v4993_v53 = vmul.f32 %v7337_v48, %v4859_v58  ;;  %vm4999_vm7 = vweird.f32 %v7337_v48 }
 0xab6   : > { %7338 = vrsqrt.f32 %v4860_v25  ;;  %5269 = vmatmul.f32.vlgmr.msrb.gmra.mxu0 %v5237_v37  ;;  %v11482_v3 = vmul.f32 %v5066_v12, %v11299_v34  ;;  %vm5000_vm9 = vmor %vm4998_vm8, %vm4999_vm7  ;;  %v5016_v44 = vsub.f32 1.5, %v5015_v8  ;;  %vm5008_vm12 = vweird.f32 %v4860_v25 }
 0xab7   : > { %v4994_v9 = vmul.f32 %v7337_v48, %v4993_v53 }
 0xab8   : > { %12462 = vst [vmem:[#allocation5_spill] sm:$0xff] %v11482_v3  ;;  %5153 = vmatmul.f32.gmra.mxu2 %v11482_v3  ;;  %v5017_v33 = vmul.f32 %v7335_v17, %v5016_v44 }
 0xab9   : > { %v4995_v30 = vmul.f32 0.5, %v4994_v9 }
 0xaba   : > { %v5021_v36 = vsel %vm5020_vm15, %v7335_v17, %v5017_v33 }
 0xabb   : > { %v4996_v2 = vsub.f32 1.5, %v4995_v30  ;;  %v5038_v29 = vmul.f32 %v11293_v5, %v5021_v36  ;;  %v11580_v36 = vld [vmem:[%s12392_s3 + $0xd] ss:$0 sm:$0xff] }
 0xabc   : > { %v7339_v7 = vpop.eup %7338 }
 0xabd   : > { %v4997_v41 = vmul.f32 %v7337_v48, %v4996_v2  ;;  %v5003_v10 = vmul.f32 %v7339_v7, %v4860_v25  ;;  %vm5009_vm10 = vweird.f32 %v7339_v7  ;;  %v5054_v28 = vsub.f32 1.0, %v5038_v29 }
 0xabe   : > { %vm5010_vm14 = vmor %vm5008_vm12, %vm5009_vm10 }
 0xabf   : > { %v5004_v47 = vmul.f32 %v7339_v7, %v5003_v10  ;;  %v5001_v34 = vsel %vm5000_vm9, %v7337_v48, %v4997_v41 }
 0xac0   : > { %v5036_v27 = vmul.f32 %v11293_v5, %v5001_v34  ;;  %5156 = vmatmul.f32.gmra.mxu2 %v11486_v11 }
 0xac1   : > { %v5005_v49 = vmul.f32 0.5, %v5004_v47 }
 0xac2   : > { %v5052_v46 = vsub.f32 1.0, %v5036_v27 }
 0xac3   : > { %v5006_v22 = vsub.f32 1.5, %v5005_v49 }
 0xac4   : > { %v5068_v60 = vmax.f32 %v5052_v46, 0.0  ;;  %v11568_v46 = vld [vmem:[%s12392_s3 + $0xc] ss:$0 sm:$0xff] }
 0xac5   : > { %v5007_v20 = vmul.f32 %v7339_v7, %v5006_v22 }
 0xac6   : > { %v11492_v54 = vmul.f32 %v5068_v60, %v11357_v31  ;;  %v5070_v31 = vmax.f32 %v5054_v28, 0.0 }
 0xac7   : > { %v5011_v35 = vsel %vm5010_vm14, %v7339_v7, %v5007_v20 }
 0xac8   : > { %12464 = vst [vmem:[#allocation7_spill] sm:$0xff] %v11492_v54  ;;  %v5037_v39 = vmul.f32 %v11293_v5, %v5011_v35  ;;  %5159 = vmatmul.f32.gmra.mxu2 %v11492_v54  ;;  %v11507_v51 = vmul.f32 %v5070_v31, %v11383_v42 }
 0xaca   : > { %v5053_v14 = vsub.f32 1.0, %v5037_v39  ;;  %12466 = vst [vmem:[#allocation9_spill] sm:$0xff] %v11507_v51 }
 0xacc   : > { %v5069_v26 = vmax.f32 %v5053_v14, 0.0 }
 0xace   : > { %v11498_v16 = vmul.f32 %v5069_v26, %v11370_v24 }
 0xad0   : > { %12465 = vst [vmem:[#allocation8_spill] sm:$0xff] %v11498_v16  ;;  %5162 = vmatmul.f32.gmra.mxu2 %v11498_v16 }
 0xad3   : > { %v11501_v45 = vpop.f32.mrf.mxu2 }
 0xad4   : > { %5191 = vmatmul.f32.gmra.mxu3 %v11501_v45  ;;  %v5238_v58 = vmul.f32 %v11501_v45, %v11501_v45 }
 0xad6   : > { %5272 = vmatmul.f32.gmra.mxu0 %v5238_v58 }
 0xad8   : > { %5165 = vmatmul.f32.gmra.mxu2 %v11507_v51 }
 0xaf3   : > { %v11510_v5 = vpop.f32.mrf.mxu2 }
 0xaf4   : > { %5194 = vmatmul.f32.gmra.mxu3 %v11510_v5  ;;  %v5239_v24 = vmul.f32 %v11510_v5, %v11510_v5 }
 0xaf6   : > { %5275 = vmatmul.f32.gmra.mxu0 %v5239_v24 }
 0xafb   : > { %v11515_v55 = vpop.f32.mrf.mxu2 }
 0xafc   : > { %5197 = vmatmul.f32.gmra.mxu3 %v11515_v55  ;;  %v5240_v38 = vmul.f32 %v11515_v55, %v11515_v55 }
 0xafe   : > { %5278 = vmatmul.f32.gmra.mxu0 %v5240_v38 }
 0xb03   : > { %v11520_v42 = vpop.f32.mrf.mxu2 }
 0xb04   : > { %5200 = vmatmul.f32.gmra.mxu3 %v11520_v42  ;;  %v5241_v57 = vmul.f32 %v11520_v42, %v11520_v42 }
 0xb06   : > { %5281 = vmatmul.f32.gmra.mxu0 %v5241_v57 }
 0xb0b   : > { %v11525_v17 = vpop.f32.mrf.mxu2 }
 0xb0c   : > { %5203 = vmatmul.f32.gmra.mxu3 %v11525_v17  ;;  %v5242_v15 = vmul.f32 %v11525_v17, %v11525_v17 }
 0xb0e   : > { %5284 = vmatmul.f32.gmra.mxu0 %v5242_v15 }
 0xb13   : > { %v11530_v19 = vpop.f32.mrf.mxu2 }
 0xb14   : > { %5206 = vmatmul.f32.gmra.mxu3 %v11530_v19  ;;  %v5243_v63 = vmul.f32 %v11530_v19, %v11530_v19 }
 0xb16   : > { %5287 = vmatmul.f32.gmra.mxu0 %v5243_v63 }
 0xb1b   : > { %v11535_v52 = vpop.f32.mrf.mxu2 }
 0xb1c   : > { %5209 = vmatmul.f32.gmra.mxu3 %v11535_v52  ;;  %v5244_v48 = vmul.f32 %v11535_v52, %v11535_v52 }
 0xb1e   : > { %5290 = vmatmul.f32.gmra.mxu0 %v5244_v48 }
 0xb23   : > { %v11540_v23 = vpop.f32.mrf.mxu2 }
 0xb24   : > { %v5245_v37 = vmul.f32 %v11540_v23, %v11540_v23  ;;  %5212 = vmatmul.f32.gmra.mxu3 %v11540_v23 }
 0xb26   : > { %5293 = vmatmul.f32.gmra.mxu0 %v5245_v37 }
 0xb2b   : > { %v11545_v25 = vpop.f32.mrf.mxu2 }
 0xb2c   : > { %v5246_v53 = vmul.f32 %v11545_v25, %v11545_v25  ;;  %5215 = vmatmul.f32.gmra.mxu3 %v11545_v25 }
 0xb2e   : > { %5296 = vmatmul.f32.gmra.mxu0 %v5246_v53 }
 0xb33   : > { %v11550_v12 = vpop.f32.mrf.mxu2  ;;  %v5270_v30 = vpop.f32.mrf.mxu0 }
 0xb34   : > { %v5247_v9 = vmul.f32 %v11550_v12, %v11550_v12  ;;  %5218 = vmatmul.f32.gmra.mxu3 %v11550_v12 }
 0xb36   : > { %5299 = vmatmul.f32.gmra.mxu0 %v5247_v9 }
 0xb37   : > { %v5189_v56 = vpop.f32.mrf.mxu3 }
 0xb38   : > { %v5318_v50 = vmul.f32 %v5189_v56, %v5189_v56  ;;  %v5526_v35 = vsub.f32 %v11473_v6, %v5189_v56 }
 0xb3a   : > { %v5334_v2 = vsub.f32 %v5270_v30, %v5318_v50 }
 0xb3b   : > { %v11555_v7 = vpop.f32.mrf.mxu2 }
 0xb3c   : > { %v5350_v4 = vadd.f32 1e-05, %v5334_v2  ;;  %v5248_v8 = vmul.f32 %v11555_v7, %v11555_v7  ;;  %5221 = vmatmul.f32.gmra.mxu3 %v11555_v7 }
 0xb3e   : > { %7340 = vrsqrt.f32 %v5350_v4  ;;  %5302 = vmatmul.f32.gmra.mxu0 %v5248_v8  ;;  %vm5372_vm1 = vweird.f32 %v5350_v4 }
 0xb43   : > { %v11560_v10 = vpop.f32.mrf.mxu2 }
 0xb44   : > { %v7341_v41 = vpop.eup %7340  ;;  %v5249_v34 = vmul.f32 %v11560_v10, %v11560_v10  ;;  %5224 = vmatmul.f32.gmra.mxu3 %v11560_v10 }
 0xb45   : > { %v5367_v47 = vmul.f32 %v7341_v41, %v5350_v4  ;;  %vm5373_vm0 = vweird.f32 %v7341_v41 }
 0xb46   : > { %5305 = vmatmul.f32.gmra.mxu0 %v5249_v34  ;;  %vm5374_vm2 = vmor %vm5372_vm1, %vm5373_vm0 }
 0xb47   : > { %v5368_v44 = vmul.f32 %v7341_v41, %v5367_v47 }
 0xb49   : > { %v5369_v27 = vmul.f32 0.5, %v5368_v44 }
 0xb4b   : > { %v5370_v49 = vsub.f32 1.5, %v5369_v27  ;;  %v11570_v22 = vpop.f32.mrf.mxu2 }
 0xb4c   : > { %v5250_v60 = vmul.f32 %v11570_v22, %v11570_v22  ;;  %5227 = vmatmul.f32.gmra.mxu3 %v11570_v22 }
 0xb4d   : > { %v5371_v33 = vmul.f32 %v7341_v41, %v5370_v49 }
 0xb4e   : > { %5308 = vmatmul.f32.gmra.mxu0 %v5250_v60 }
 0xb4f   : > { %v5375_v20 = vsel %vm5374_vm2, %v7341_v41, %v5371_v33 }
 0xb50   : > { %v5543_v39 = vmul.f32 %v11568_v46, %v5375_v20 }
 0xb52   : > { %v5559_v14 = vmul.f32 %v5543_v39, %v5526_v35 }
 0xb53   : > { %v11582_v29 = vpop.f32.mrf.mxu2  ;;  %v5273_v24 = vpop.f32.mrf.mxu0 }
 0xb54   : > { %v11585_v26 = vadd.f32 %v11580_v36, %v5559_v14  ;;  %v5251_v28 = vmul.f32 %v11582_v29, %v11582_v29  ;;  %5230 = vmatmul.f32.gmra.mxu3 %v11582_v29 }
 0xb56   : > { %v11592_v6 = vmul.f32 %v11585_v26, %v11585_v26  ;;  %5311 = vmatmul.f32.gmra.mxu0 %v5251_v28 }
 0xb57   : > { %v5192_v31 = vpop.f32.mrf.mxu3 }
 0xb58   : > { %v5319_v58 = vmul.f32 %v5192_v31, %v5192_v31  ;;  %5609 = vrot.lane.b32.xlu0 %v11592_v6, %s7608_s30  ;;  %v5527_v2 = vsub.f32 %v11501_v45, %v5192_v31 }
 0xb5a   : > { %v5335_v38 = vsub.f32 %v5273_v24, %v5319_v58 }
 0xb5b   : > { %v11596_v15 = vpop.f32.mrf.mxu2 }
 0xb5c   : > { %v5351_v57 = vadd.f32 1e-05, %v5335_v38  ;;  %v5252_v63 = vmul.f32 %v11596_v15, %v11596_v15  ;;  %5233 = vmatmul.f32.gmra.mxu3 %v11596_v15 }
 0xb5e   : > { %7342 = vrsqrt.f32 %v5351_v57  ;;  %5314 = vmatmul.f32.gmra.mxu0 %v5252_v63  ;;  %vm5382_vm4 = vweird.f32 %v5351_v57 }
 0xb64   : > { %v7343_v48 = vpop.eup %7342 }
 0xb65   : > { %v5377_v37 = vmul.f32 %v7343_v48, %v5351_v57  ;;  %vm5383_vm3 = vweird.f32 %v7343_v48 }
 0xb66   : > { %vm5384_vm5 = vmor %vm5382_vm4, %vm5383_vm3 }
 0xb67   : > { %v5378_v53 = vmul.f32 %v7343_v48, %v5377_v37 }
 0xb69   : > { %v5379_v9 = vmul.f32 0.5, %v5378_v53 }
 0xb6b   : > { %v5380_v56 = vsub.f32 1.5, %v5379_v9 }
 0xb6d   : > { %v5381_v50 = vmul.f32 %v7343_v48, %v5380_v56 }
 0xb6f   : > { %v5385_v30 = vsel %vm5384_vm5, %v7343_v48, %v5381_v50 }
 0xb70   : > { %v5544_v4 = vmul.f32 %v11568_v46, %v5385_v30 }
 0xb72   : > { %v5560_v8 = vmul.f32 %v5544_v4, %v5527_v2 }
 0xb73   : > { %v5276_v41 = vpop.f32.mrf.mxu0 }
 0xb74   : > { %v11604_v47 = vadd.f32 %v11580_v36, %v5560_v8 }
 0xb76   : > { %v11608_v34 = vmul.f32 %v11604_v47, %v11604_v47 }
 0xb77   : > { %v5195_v44 = vpop.f32.mrf.mxu3 }
 0xb78   : > { %v5320_v27 = vmul.f32 %v5195_v44, %v5195_v44  ;;  %5611 = vrot.lane.b32.xlu1 %v11608_v34, %s7608_s30  ;;  %v5528_v8 = vsub.f32 %v11510_v5, %v5195_v44 }
 0xb7a   : > { %v5336_v49 = vsub.f32 %v5276_v41, %v5320_v27 }
 0xb7b   : > { %v5279_v33 = vpop.f32.mrf.mxu0 }
 0xb7c   : > { %v5352_v60 = vadd.f32 1e-05, %v5336_v49 }
 0xb7e   : > { %7344 = vrsqrt.f32 %v5352_v60  ;;  %vm5392_vm7 = vweird.f32 %v5352_v60 }
 0xb7f   : > { %v5198_v45 = vpop.f32.mrf.mxu3 }
 0xb80   : > { %v5321_v20 = vmul.f32 %v5198_v45, %v5198_v45 }
 0xb82   : > { %v5337_v35 = vsub.f32 %v5279_v33, %v5321_v20 }
 0xb83   : > { %v5282_v39 = vpop.f32.mrf.mxu0 }
 0xb84   : > { %v7345_v14 = vpop.eup %7344  ;;  %v5353_v28 = vadd.f32 1e-05, %v5337_v35 }
 0xb85   : > { %v5387_v31 = vmul.f32 %v7345_v14, %v5352_v60  ;;  %vm5393_vm6 = vweird.f32 %v7345_v14  ;;  %v6914_v60 = vld [vmem:[%s12391_s2 + $0x3f8] sm:$0xff] }
 0xb86   : > { %7346 = vrsqrt.f32 %v5353_v28  ;;  %vm5394_vm8 = vmor %vm5392_vm7, %vm5393_vm6  ;;  %5899 = vmatpush.msrb.mxu1 %v6914_v60  ;;  %vm5402_vm10 = vweird.f32 %v5353_v28 }
 0xb87   : > { %v5388_v58 = vmul.f32 %v7345_v14, %v5387_v31  ;;  %v11612_v24 = vpop.f32.mrf.mxu3 }
 0xb88   : > { %v5322_v38 = vmul.f32 %v11612_v24, %v11612_v24 }
 0xb89   : > { %v5389_v57 = vmul.f32 0.5, %v5388_v58 }
 0xb8a   : > { %v5338_v63 = vsub.f32 %v5282_v39, %v5322_v38 }
 0xb8b   : > { %v5390_v48 = vsub.f32 1.5, %v5389_v57  ;;  %v5285_v37 = vpop.f32.mrf.mxu0 }
 0xb8c   : > { %v7347_v53 = vpop.eup %7346  ;;  %v5354_v9 = vadd.f32 1e-05, %v5338_v63 }
 0xb8d   : > { %v5391_v56 = vmul.f32 %v7345_v14, %v5390_v48  ;;  %v5397_v50 = vmul.f32 %v7347_v53, %v5353_v28  ;;  %vm5403_vm9 = vweird.f32 %v7347_v53 }
 0xb8e   : > { %7348 = vrsqrt.f32 %v5354_v9  ;;  %vm5404_vm11 = vmor %vm5402_vm10, %vm5403_vm9  ;;  %vm5412_vm13 = vweird.f32 %v5354_v9 }
 0xb8f   : > { %v5395_v30 = vsel %vm5394_vm8, %v7345_v14, %v5391_v56  ;;  %v5398_v2 = vmul.f32 %v7347_v53, %v5397_v50  ;;  %v11616_v4 = vpop.f32.mrf.mxu3 }
 0xb90   : > { %v5545_v41 = vmul.f32 %v11568_v46, %v5395_v30  ;;  %v5323_v27 = vmul.f32 %v11616_v4, %v11616_v4 }
 0xb91   : > { %v5399_v49 = vmul.f32 0.5, %v5398_v2 }
 0xb92   : > { %v5561_v33 = vmul.f32 %v5545_v41, %v5528_v8  ;;  %v5339_v20 = vsub.f32 %v5285_v37, %v5323_v27  ;;  %v5529_v37 = vsub.f32 %v11515_v55, %v5198_v45 }
 0xb93   : > { %v5400_v35 = vsub.f32 1.5, %v5399_v49  ;;  %v5288_v39 = vpop.f32.mrf.mxu0 }
 0xb94   : > { %v7349_v14 = vpop.eup %7348  ;;  %v5355_v31 = vadd.f32 1e-05, %v5339_v20  ;;  %v11626_v5 = vadd.f32 %v11580_v36, %v5561_v33 }
 0xb95   : > { %v5401_v44 = vmul.f32 %v7347_v53, %v5400_v35  ;;  %v5407_v58 = vmul.f32 %v7349_v14, %v5354_v9  ;;  %vm5413_vm12 = vweird.f32 %v7349_v14 }
 0xb96   : > { %7350 = vrsqrt.f32 %v5355_v31  ;;  %v11630_v38 = vmul.f32 %v11626_v5, %v11626_v5  ;;  %vm5414_vm14 = vmor %vm5412_vm13, %vm5413_vm12  ;;  %vm5422_vm0 = vweird.f32 %v5355_v31 }
 0xb97   : > { %v5405_v57 = vsel %vm5404_vm11, %v7347_v53, %v5401_v44  ;;  %v5408_v63 = vmul.f32 %v7349_v14, %v5407_v58  ;;  %v11632_v48 = vpop.f32.mrf.mxu3  ;;  %v6913_v53 = vld [vmem:[%s12391_s2 + $0x3f0] sm:$0xff]  ;;  %v5530_v44 = vsub.f32 %v11520_v42, %v11612_v24  ;;  %v6912_v42 = vld [vmem:[%s12391_s2 + $0x3e8] sm:$0xff] }
 0xb98   : > { %v5546_v56 = vmul.f32 %v11568_v46, %v5405_v57  ;;  %v5324_v50 = vmul.f32 %v11632_v48, %v11632_v48  ;;  %5613 = vrot.lane.b32.xlu2 %v11630_v38, %s7608_s30  ;;  %5900 = vmatpush.msrb.mxu1 %v6913_v53 }
 0xb99   : > { %v5409_v28 = vmul.f32 0.5, %v5408_v63 }
 0xb9a   : > { %v5562_v30 = vmul.f32 %v5546_v56, %v5529_v37  ;;  %v5340_v2 = vsub.f32 %v5288_v39, %v5324_v50  ;;  %5901 = vmatpush.msrb.mxu1 %v6912_v42 }
 0xb9b   : > { %v5410_v8 = vsub.f32 1.5, %v5409_v28  ;;  %v5291_v41 = vpop.f32.mrf.mxu0 }
 0xb9c   : > { %v7351_v55 = vpop.eup %7350  ;;  %v5356_v45 = vadd.f32 1e-05, %v5340_v2  ;;  %v11644_v27 = vadd.f32 %v11580_v36, %v5562_v30 }
 0xb9d   : > { %v5411_v49 = vmul.f32 %v7349_v14, %v5410_v8  ;;  %v5417_v33 = vmul.f32 %v7351_v55, %v5355_v31  ;;  %vm5423_vm15 = vweird.f32 %v7351_v55 }
 0xb9e   : > { %7352 = vrsqrt.f32 %v5356_v45  ;;  %v11648_v20 = vmul.f32 %v11644_v27, %v11644_v27  ;;  %vm5424_vm1 = vmor %vm5422_vm0, %vm5423_vm15  ;;  %vm5432_vm3 = vweird.f32 %v5356_v45 }
 0xb9f   : > { %v5415_v60 = vsel %vm5414_vm14, %v7349_v14, %v5411_v49  ;;  %v5418_v35 = vmul.f32 %v7351_v55, %v5417_v33  ;;  %v11650_v39 = vpop.f32.mrf.mxu3  ;;  %v5531_v33 = vsub.f32 %v11525_v17, %v11616_v4  ;;  %v6911_v17 = vld [vmem:[%s12391_s2 + $0x3e0] sm:$0xff] }
 0xba0   : > { %v5547_v58 = vmul.f32 %v11568_v46, %v5415_v60  ;;  %v5325_v57 = vmul.f32 %v11650_v39, %v11650_v39  ;;  %5615 = vrot.lane.b32.xlu0 %v11648_v20, %s7608_s30  ;;  %5902 = vmatpush.msrb.mxu1 %v6911_v17  ;;  %v6908_v17 = vld [vmem:[%s12391_s2 + $0x3c8] sm:$0xff] }
 0xba1   : > { %v5419_v9 = vmul.f32 0.5, %v5418_v35 }
 0xba2   : > { %v5563_v63 = vmul.f32 %v5547_v58, %v5530_v44  ;;  %v5341_v37 = vsub.f32 %v5291_v41, %v5325_v57 }
 0xba3   : > { %v5420_v56 = vsub.f32 1.5, %v5419_v9  ;;  %v5294_v14 = vpop.f32.mrf.mxu0 }
 0xba4   : > { %v7353_v50 = vpop.eup %7352  ;;  %v5357_v28 = vadd.f32 1e-05, %v5341_v37  ;;  %v11663_v24 = vadd.f32 %v11580_v36, %v5563_v63 }
 0xba5   : > { %v5421_v30 = vmul.f32 %v7351_v55, %v5420_v56  ;;  %v5427_v2 = vmul.f32 %v7353_v50, %v5356_v45  ;;  %vm5433_vm2 = vweird.f32 %v7353_v50 }
 0xba6   : > { %7354 = vrsqrt.f32 %v5357_v28  ;;  %v11667_v53 = vmul.f32 %v11663_v24, %v11663_v24  ;;  %vm5434_vm4 = vmor %vm5432_vm3, %vm5433_vm2  ;;  %vm5442_vm6 = vweird.f32 %v5357_v28 }
 0xba7   : > { %v5425_v8 = vsel %vm5424_vm1, %v7351_v55, %v5421_v30  ;;  %v5428_v41 = vmul.f32 %v7353_v50, %v5427_v2  ;;  %v11669_v49 = vpop.f32.mrf.mxu3 }
 0xba8   : > { %v5548_v60 = vmul.f32 %v11568_v46, %v5425_v8  ;;  %v5326_v31 = vmul.f32 %v11669_v49, %v11669_v49  ;;  %5617 = vrot.lane.b32.xlu1 %v11667_v53, %s7608_s30  ;;  %v5532_v8 = vsub.f32 %v11530_v19, %v11632_v48  ;;  %v6909_v19 = vld [vmem:[%s12391_s2 + $0x3d0] sm:$0xff] }
 0xba9   : > { %v5429_v35 = vmul.f32 0.5, %v5428_v41 }
 0xbaa   : > { %v5564_v44 = vmul.f32 %v5548_v60, %v5531_v33  ;;  %v5342_v58 = vsub.f32 %v5294_v14, %v5326_v31  ;;  %v6910_v33 = vld [vmem:[%s12391_s2 + $0x3d8] sm:$0xff] }
 0xbab   : > { %v5430_v57 = vsub.f32 1.5, %v5429_v35  ;;  %v5297_v55 = vpop.f32.mrf.mxu0  ;;  %5903 = vmatpush.msrb.mxu1 %v6910_v33  ;;  %v6906_v33 = vld [vmem:[%s12391_s2 + $0x3b8] sm:$0xff] }
 0xbac   : > { %v7355_v9 = vpop.eup %7354  ;;  %v11678_v63 = vadd.f32 1e-05, %v5342_v58  ;;  %v11684_v4 = vadd.f32 %v11580_v36, %v5564_v44 }
 0xbad   : > { %v5431_v37 = vmul.f32 %v7353_v50, %v5430_v57  ;;  %v5437_v56 = vmul.f32 %v7355_v9, %v5357_v28  ;;  %vm5443_vm5 = vweird.f32 %v7355_v9  ;;  %5904 = vmatpush.msrb.mxu1 %v6909_v19  ;;  %v5533_v28 = vsub.f32 %v11535_v52, %v11650_v39  ;;  %v6905_v52 = vld [vmem:[%s12391_s2 + $0x3b0] sm:$0xff] }
 0xbae   : > { %7356 = vrsqrt.f32 %v11678_v63  ;;  %v11689_v14 = vmul.f32 %v11684_v4, %v11684_v4  ;;  %vm5444_vm7 = vmor %vm5442_vm6, %vm5443_vm5  ;;  %vm5452_vm9 = vweird.f32 %v11678_v63 }
 0xbaf   : > { %v5435_v42 = vsel %vm5434_vm4, %v7353_v50, %v5431_v37  ;;  %v5438_v30 = vmul.f32 %v7355_v9, %v5437_v56  ;;  %v11691_v2 = vpop.f32.mrf.mxu3  ;;  %5905 = vmatpush.msrb.mxu1 %v6908_v17 }
 0xbb0   : > { %v5549_v41 = vmul.f32 %v11568_v46, %v5435_v42  ;;  %v5327_v45 = vmul.f32 %v11691_v2, %v11691_v2  ;;  %5619 = vrot.lane.b32.xlu2 %v11689_v14, %s7608_s30  ;;  %v6907_v42 = vld [vmem:[%s12391_s2 + $0x3c0] sm:$0xff] }
 0xbb1   : > { %v5439_v60 = vmul.f32 0.5, %v5438_v30  ;;  %5906 = vmatpush.msrb.mxu1 %v6907_v42 }
 0xbb2   : > { %v5565_v50 = vmul.f32 %v5549_v41, %v5532_v8  ;;  %v5343_v31 = vsub.f32 %v5297_v55, %v5327_v45 }
 0xbb3   : > { %v5440_v48 = vsub.f32 1.5, %v5439_v60  ;;  %v5300_v58 = vpop.f32.mrf.mxu0  ;;  %5907 = vmatpush.msrb.mxu1 %v6906_v33 }
 0xbb4   : > { %v7357_v35 = vpop.eup %7356  ;;  %v11706_v44 = vadd.f32 1e-05, %v5343_v31  ;;  %v11709_v57 = vadd.f32 %v11580_v36, %v5565_v50 }
 0xbb5   : > { %v5441_v37 = vmul.f32 %v7355_v9, %v5440_v48  ;;  %v5447_v55 = vmul.f32 %v7357_v35, %v11678_v63  ;;  %vm5453_vm8 = vweird.f32 %v7357_v35  ;;  %5908 = vmatpush.msrb.mxu1 %v6905_v52  ;;  %v5534_v63 = vsub.f32 %v11540_v23, %v11669_v49  ;;  %v6901_v23 = vld [vmem:[%s12391_s2 + $0x390] sm:$0xff] }
 0xbb6   : > { %7358 = vrsqrt.f32 %v11706_v44  ;;  %v11718_v56 = vmul.f32 %v11709_v57, %v11709_v57  ;;  %vm5454_vm10 = vmor %vm5452_vm9, %vm5453_vm8  ;;  %vm5462_vm12 = vweird.f32 %v11706_v44 }
 0xbb7   : > { %v5445_v30 = vsel %vm5444_vm7, %v7355_v9, %v5441_v37  ;;  %v5448_v8 = vmul.f32 %v7357_v35, %v5447_v55  ;;  %v11726_v45 = vpop.f32.mrf.mxu3  ;;  %v6904_v37 = vld [vmem:[%s12391_s2 + $0x3a8] sm:$0xff] }
 0xbb8   : > { %v5550_v41 = vmul.f32 %v11568_v46, %v5445_v30  ;;  %5621 = vrot.lane.b32.xlu0 %v11718_v56, %s7608_s30  ;;  %v5328_v9 = vmul.f32 %v11726_v45, %v11726_v45  ;;  %5909 = vmatpush.msrb.mxu1 %v6904_v37 }
 0xbb9   : > { %v5449_v60 = vmul.f32 0.5, %v5448_v8  ;;  %v6903_v8 = vld [vmem:[%s12391_s2 + $0x3a0] sm:$0xff] }
 0xbba   : > { %v5566_v50 = vmul.f32 %v5550_v41, %v5533_v28  ;;  %v5344_v31 = vsub.f32 %v5300_v58, %v5328_v9  ;;  %5910 = vmatpush.msrb.mxu1 %v6903_v8  ;;  %v6902_v9 = vld [vmem:[%s12391_s2 + $0x398] sm:$0xff] }
 0xbbb   : > { %v5450_v39 = vsub.f32 1.5, %v5449_v60  ;;  %v5303_v48 = vpop.f32.mrf.mxu0 }
 0xbbc   : > { %v7359_v19 = vpop.eup %7358  ;;  %v11739_v17 = vadd.f32 %v11580_v36, %v5566_v50  ;;  %v5360_v30 = vadd.f32 1e-05, %v5344_v31  ;;  %5911 = vmatpush.msrb.mxu1 %v6902_v9  ;;  %v5535_v9 = vsub.f32 %v11545_v25, %v11691_v2 }
 0xbbd   : > { %v5451_v55 = vmul.f32 %v7357_v35, %v5450_v39  ;;  %v5457_v42 = vmul.f32 %v7359_v19, %v11706_v44  ;;  %vm5463_vm11 = vweird.f32 %v7359_v19 }
 0xbbe   : > { %v11748_v58 = vmul.f32 %v11739_v17, %v11739_v17  ;;  %7360 = vrsqrt.f32 %v5360_v30  ;;  %5912 = vmatpush.msrb.mxu1 %v6901_v23  ;;  %vm5464_vm13 = vmor %vm5462_vm12, %vm5463_vm11  ;;  %vm5472_vm15 = vweird.f32 %v5360_v30 }
 0xbbf   : > { %v5455_v28 = vsel %vm5454_vm10, %v7357_v35, %v5451_v55  ;;  %v5458_v41 = vmul.f32 %v7359_v19, %v5457_v42  ;;  %v11756_v60 = vpop.f32.mrf.mxu3  ;;  %v6900_v55 = vld [vmem:[%s12391_s2 + $0x388] sm:$0xff] }
 0xbc0   : > { %v5551_v33 = vmul.f32 %v11568_v46, %v5455_v28  ;;  %5623 = vrot.lane.b32.xlu1 %v11748_v58, %s7608_s30  ;;  %v5329_v35 = vmul.f32 %v11756_v60, %v11756_v60  ;;  %5913 = vmatpush.msrb.mxu1 %v6900_v55 }
 0xbc1   : > { %v5459_v50 = vmul.f32 0.5, %v5458_v41 }
 0xbc2   : > { %v5567_v52 = vmul.f32 %v5551_v33, %v5534_v63  ;;  %v5345_v39 = vsub.f32 %v5303_v48, %v5329_v35  ;;  %v6899_v63 = vld [vmem:[%s12391_s2 + $0x380] sm:$0xff] }
 0xbc3   : > { %v5460_v49 = vsub.f32 1.5, %v5459_v50  ;;  %v5306_v37 = vpop.f32.mrf.mxu0  ;;  %5914 = vmatpush.msrb.mxu1 %v6899_v63 }
 0xbc4   : > { %v11769_v31 = vadd.f32 %v11580_v36, %v5567_v52  ;;  %v7361_v42 = vpop.eup %7360  ;;  %v5361_v28 = vadd.f32 1e-05, %v5345_v39 }
 0xbc5   : > { %v5461_v8 = vmul.f32 %v7359_v19, %v5460_v49  ;;  %v5467_v41 = vmul.f32 %v7361_v42, %v5360_v30  ;;  %vm5473_vm14 = vweird.f32 %v7361_v42 }
 0xbc6   : > { %v11777_v48 = vmul.f32 %v11769_v31, %v11769_v31  ;;  %7362 = vrsqrt.f32 %v5361_v28  ;;  %vm5474_vm0 = vmor %vm5472_vm15, %vm5473_vm14  ;;  %vm5482_vm2 = vweird.f32 %v5361_v28 }
 0xbc7   : > { %v5465_v33 = vsel %vm5464_vm13, %v7359_v19, %v5461_v8  ;;  %v5468_v50 = vmul.f32 %v7361_v42, %v5467_v41  ;;  %v11785_v35 = vpop.f32.mrf.mxu3 }
 0xbc8   : > { %v5552_v44 = vmul.f32 %v11568_v46, %v5465_v33  ;;  %5625 = vrot.lane.b32.xlu2 %v11777_v48, %s7608_s30  ;;  %v5330_v52 = vmul.f32 %v11785_v35, %v11785_v35 }
 0xbc9   : > { %v5469_v49 = vmul.f32 0.5, %v5468_v50  ;;  %v5536_v50 = vsub.f32 %v11550_v12, %v11726_v45 }
 0xbca   : > { %v5568_v23 = vmul.f32 %v5552_v44, %v5535_v9  ;;  %v5610_v39 = vpop.permute.xlu0 %5609  ;;  %v5346_v19 = vsub.f32 %v5306_v37, %v5330_v52 }
 0xbcb   : > { %v5641_v55 = vadd.f32 %v5610_v39, %v11592_v6  ;;  %v5470_v25 = vsub.f32 1.5, %v5469_v49  ;;  %v5309_v51 = vpop.f32.mrf.mxu0 }
 0xbcc   : > { %v11793_v8 = vadd.f32 %v11580_v36, %v5568_v23  ;;  %v7363_v2 = vpop.eup %7362  ;;  %v5362_v41 = vadd.f32 1e-05, %v5346_v19 }
 0xbcd   : > { %7364 = vrsqrt.f32 %v5641_v55  ;;  %v5471_v63 = vmul.f32 %v7361_v42, %v5470_v25  ;;  %v5477_v33 = vmul.f32 %v7363_v2, %v5361_v28  ;;  %vm5483_vm1 = vweird.f32 %v7363_v2 }
 0xbce   : > { %v11797_v9 = vmul.f32 %v11793_v8, %v11793_v8  ;;  %7366 = vrsqrt.f32 %v5362_v41  ;;  %vm5484_vm3 = vmor %vm5482_vm2, %vm5483_vm1  ;;  %vm5663_vm6 = vweird.f32 %v5641_v55  ;;  %vm5492_vm8 = vweird.f32 %v5362_v41 }
 0xbcf   : > { %v5475_v37 = vsel %vm5474_vm0, %v7361_v42, %v5471_v63  ;;  %v5478_v6 = vmul.f32 %v7363_v2, %v5477_v33  ;;  %v11799_v44 = vpop.f32.mrf.mxu3 }
 0xbd0   : > { %5627 = vrot.lane.b32.xlu0 %v11797_v9, %s7608_s30  ;;  %v5553_v30 = vmul.f32 %v11568_v46, %v5475_v37  ;;  %v5331_v52 = vmul.f32 %v11799_v44, %v11799_v44 }
 0xbd1   : > { %v5479_v23 = vmul.f32 0.5, %v5478_v6 }
 0xbd2   : > { %v5569_v39 = vmul.f32 %v5553_v30, %v5536_v50  ;;  %v5347_v19 = vsub.f32 %v5309_v51, %v5331_v52 }
 0xbd3   : > { %v7365_v49 = vpop.eup %7364  ;;  %v5480_v42 = vsub.f32 1.5, %v5479_v23  ;;  %v5312_v30 = vpop.f32.mrf.mxu0  ;;  %v5537_v23 = vsub.f32 %v11555_v7, %v11756_v60 }
 0xbd4   : > { %v5658_v25 = vmul.f32 %v7365_v49, %v5641_v55  ;;  %v7367_v63 = vpop.eup %7366  ;;  %v11809_v33 = vadd.f32 %v11580_v36, %v5569_v39  ;;  %v5363_v16 = vadd.f32 1e-05, %v5347_v19  ;;  %vm5664_vm4 = vweird.f32 %v7365_v49 }
 0xbd5   : > { %v5481_v54 = vmul.f32 %v7363_v2, %v5480_v42  ;;  %v5487_v12 = vmul.f32 %v7367_v63, %v5362_v41  ;;  %vm5493_vm5 = vweird.f32 %v7367_v63  ;;  %vm5665_vm7 = vmor %vm5663_vm6, %vm5664_vm4 }
 0xbd6   : > { %v5659_v45 = vmul.f32 %v7365_v49, %v5658_v25  ;;  %7368 = vrsqrt.f32 %v5363_v16  ;;  %v11813_v37 = vmul.f32 %v11809_v33, %v11809_v33  ;;  %vm5494_vm9 = vmor %vm5492_vm8, %vm5493_vm5  ;;  %vm5502_vm11 = vweird.f32 %v5363_v16 }
 0xbd7   : > { %v5485_v6 = vsel %vm5484_vm3, %v7363_v2, %v5481_v54  ;;  %v5488_v51 = vmul.f32 %v7367_v63, %v5487_v12  ;;  %v11815_v52 = vpop.f32.mrf.mxu3  ;;  %v11824_v2 = vstv %s6898_s17 }
 0xbd8   : > { %v5660_v50 = vmul.f32 0.5, %v5659_v45  ;;  %v5554_v39 = vmul.f32 %v11568_v46, %v5485_v6  ;;  %v5332_v28 = vmul.f32 %v11815_v52, %v11815_v52  ;;  %5629 = vrot.lane.b32.xlu1 %v11813_v37, %s7608_s30 }
 0xbd9   : > { %v5489_v19 = vmul.f32 0.5, %v5488_v51 }
 0xbda   : > { %v5661_v42 = vsub.f32 1.5, %v5660_v50  ;;  %v5570_v54 = vmul.f32 %v5554_v39, %v5537_v23  ;;  %v5348_v25 = vsub.f32 %v5312_v30, %v5332_v28  ;;  %v5538_v28 = vsub.f32 %v11560_v10, %v11785_v35 }
 0xbdb   : > { %v5490_v12 = vsub.f32 1.5, %v5489_v19 }
 0xbdc   : > { %v5662_v45 = vmul.f32 %v7365_v49, %v5661_v42  ;;  %v7369_v7 = vpop.eup %7368  ;;  %v11827_v60 = vadd.f32 %v11580_v36, %v5570_v54  ;;  %v5364_v6 = vadd.f32 1e-05, %v5348_v25  ;;  %v5315_v42 = vpop.f32.mrf.mxu0 }
 0xbdd   : > { %v5491_v11 = vmul.f32 %v7367_v63, %v5490_v12  ;;  %v5497_v51 = vmul.f32 %v7369_v7, %v5363_v16  ;;  %vm5503_vm10 = vweird.f32 %v7369_v7 }
 0xbde   : > { %v5666_v3 = vsel %vm5665_vm7, %v7365_v49, %v5662_v45  ;;  %7370 = vrsqrt.f32 %v5364_v6  ;;  %v11832_v30 = vmul.f32 %v11827_v60, %v11827_v60  ;;  %vm5504_vm12 = vmor %vm5502_vm11, %vm5503_vm10  ;;  %vm5512_vm14 = vweird.f32 %v5364_v6 }
 0xbdf   : > { %v5818_v50 = vmul.f32 %v11824_v2, %v5666_v3  ;;  %v5495_v23 = vsel %vm5494_vm9, %v7367_v63, %v5491_v11  ;;  %v5498_v55 = vmul.f32 %v7369_v7, %v5497_v51  ;;  %v11834_v39 = vpop.f32.mrf.mxu3 }
 0xbe0   : > { %v5555_v19 = vmul.f32 %v11568_v46, %v5495_v23  ;;  %v5333_v49 = vmul.f32 %v11834_v39, %v11834_v39  ;;  %5631 = vrot.lane.b32.xlu2 %v11832_v30, %s7608_s30 }
 0xbe1   : > { %v5834_v41 = vsub.f32 1.0, %v5818_v50  ;;  %v5499_v3 = vmul.f32 0.5, %v5498_v55 }
 0xbe2   : > { %v5571_v54 = vmul.f32 %v5555_v19, %v5538_v28  ;;  %v5349_v11 = vsub.f32 %v5315_v42, %v5333_v49  ;;  %v5539_v19 = vsub.f32 %v11570_v22, %v11799_v44 }
 0xbe3   : > { %v5850_v25 = vmax.f32 %v5834_v41, 0.0  ;;  %v5500_v63 = vsub.f32 1.5, %v5499_v3 }
 0xbe4   : > { %v7371_v12 = vpop.eup %7370  ;;  %v11844_v45 = vadd.f32 %v11580_v36, %v5571_v54  ;;  %v5365_v10 = vadd.f32 1e-05, %v5349_v11 }
 0xbe5   : > { %v5866_v35 = vmul.f32 %v5850_v25, %v11585_v26  ;;  %v5501_v51 = vmul.f32 %v7369_v7, %v5500_v63  ;;  %v5507_v50 = vmul.f32 %v7371_v12, %v5364_v6  ;;  %vm5513_vm13 = vweird.f32 %v7371_v12 }
 0xbe6   : > { %7372 = vrsqrt.f32 %v5365_v10  ;;  %v11849_v23 = vmul.f32 %v11844_v45, %v11844_v45  ;;  %vm5514_vm15 = vmor %vm5512_vm14, %vm5513_vm13  ;;  %vm5522_vm1 = vweird.f32 %v5365_v10 }
 0xbe7   : > { %5915 = vmatmul.f32.vlgmr.msrb.gmra.mxu1 %v5866_v35  ;;  %v5505_v55 = vsel %vm5504_vm12, %v7369_v7, %v5501_v51  ;;  %v5508_v28 = vmul.f32 %v7371_v12, %v5507_v50 }
 0xbe8   : > { %v5556_v41 = vmul.f32 %v11568_v46, %v5505_v55  ;;  %5633 = vrot.lane.b32.xlu0 %v11849_v23, %s7608_s30 }
 0xbe9   : > { %v5509_v26 = vmul.f32 0.5, %v5508_v28 }
 0xbea   : > { %v5612_v16 = vpop.permute.xlu1 %5611  ;;  %v5572_v49 = vmul.f32 %v5556_v41, %v5539_v19 }
 0xbeb   : > { %v5642_v3 = vadd.f32 %v5612_v16, %v11608_v34  ;;  %v5510_v42 = vsub.f32 1.5, %v5509_v26  ;;  %v5540_v34 = vsub.f32 %v11582_v29, %v11815_v52 }
 0xbec   : > { %v7373_v54 = vpop.eup %7372  ;;  %v11858_v25 = vadd.f32 %v11580_v36, %v5572_v49 }
 0xbed   : > { %7374 = vrsqrt.f32 %v5642_v3  ;;  %v5511_v7 = vmul.f32 %v7371_v12, %v5510_v42  ;;  %v5517_v22 = vmul.f32 %v7373_v54, %v5365_v10  ;;  %vm5523_vm0 = vweird.f32 %v7373_v54 }
 0xbee   : > { %v11862_v44 = vmul.f32 %v11858_v25, %v11858_v25  ;;  %vm5524_vm2 = vmor %vm5522_vm1, %vm5523_vm0  ;;  %vm5673_vm4 = vweird.f32 %v5642_v3 }
 0xbef   : > { %v5515_v11 = vsel %vm5514_vm15, %v7371_v12, %v5511_v7  ;;  %v5518_v63 = vmul.f32 %v7373_v54, %v5517_v22 }
 0xbf0   : > { %v5557_v35 = vmul.f32 %v11568_v46, %v5515_v11  ;;  %5635 = vrot.lane.b32.xlu1 %v11862_v44, %s7608_s30 }
 0xbf1   : > { %v5519_v51 = vmul.f32 0.5, %v5518_v63 }
 0xbf2   : > { %v5614_v50 = vpop.permute.xlu2 %5613  ;;  %v5573_v6 = vmul.f32 %v5557_v35, %v5540_v34 }
 0xbf3   : > { %v7375_v55 = vpop.eup %7374  ;;  %v5643_v28 = vadd.f32 %v5614_v50, %v11630_v38  ;;  %v5520_v19 = vsub.f32 1.5, %v5519_v51  ;;  %v5541_v38 = vsub.f32 %v11596_v15, %v11834_v39 }
 0xbf4   : > { %v5668_v41 = vmul.f32 %v7375_v55, %v5642_v3  ;;  %v11871_v12 = vadd.f32 %v11580_v36, %v5573_v6  ;;  %vm5674_vm3 = vweird.f32 %v7375_v55 }
 0xbf5   : > { %7376 = vrsqrt.f32 %v5643_v28  ;;  %v5521_v26 = vmul.f32 %v7373_v54, %v5520_v19  ;;  %vm5675_vm5 = vmor %vm5673_vm4, %vm5674_vm3  ;;  %vm5683_vm7 = vweird.f32 %v5643_v28 }
 0xbf6   : > { %v5669_v29 = vmul.f32 %v7375_v55, %v5668_v41  ;;  %v11875_v52 = vmul.f32 %v11871_v12, %v11871_v12 }
 0xbf7   : > { %v5525_v16 = vsel %vm5524_vm2, %v7373_v54, %v5521_v26 }
 0xbf8   : > { %v5670_v49 = vmul.f32 0.5, %v5669_v29  ;;  %v5558_v42 = vmul.f32 %v11568_v46, %v5525_v16  ;;  %5637 = vrot.lane.b32.xlu2 %v11875_v52, %s7608_s30 }
 0xbfa   : > { %v5671_v7 = vsub.f32 1.5, %v5670_v49  ;;  %v5574_v10 = vmul.f32 %v5558_v42, %v5541_v38 }
 0xbfb   : > { %v7377_v22 = vpop.eup %7376 }
 0xbfc   : > { %v5672_v11 = vmul.f32 %v7375_v55, %v5671_v7  ;;  %v5678_v63 = vmul.f32 %v7377_v22, %v5643_v28  ;;  %v11883_v34 = vadd.f32 %v11580_v36, %v5574_v10  ;;  %vm5684_vm6 = vweird.f32 %v7377_v22 }
 0xbfd   : > { %vm5685_vm8 = vmor %vm5683_vm7, %vm5684_vm6 }
 0xbfe   : > { %v5679_v54 = vmul.f32 %v7377_v22, %v5678_v63  ;;  %v5676_v35 = vsel %vm5675_vm5, %v7375_v55, %v5672_v11  ;;  %v11887_v15 = vmul.f32 %v11883_v34, %v11883_v34 }
 0xbff   : > { %v5819_v46 = vmul.f32 %v11824_v2, %v5676_v35 }
 0xc00   : > { %v5680_v39 = vmul.f32 0.5, %v5679_v54  ;;  %5639 = vrot.lane.b32.xlu0 %v11887_v15, %s7608_s30 }
 0xc01   : > { %v5835_v51 = vsub.f32 1.0, %v5819_v46 }
 0xc02   : > { %v5681_v50 = vsub.f32 1.5, %v5680_v39 }
 0xc03   : > { %v5851_v3 = vmax.f32 %v5835_v51, 0.0 }
 0xc04   : > { %v5682_v6 = vmul.f32 %v7377_v22, %v5681_v50 }
 0xc05   : > { %v5867_v36 = vmul.f32 %v5851_v3, %v11604_v47 }
 0xc06   : > { %v5686_v55 = vsel %vm5685_vm8, %v7377_v22, %v5682_v6 }
 0xc07   : > { %5918 = vmatmul.f32.gmra.mxu1 %v5867_v36  ;;  %v5820_v19 = vmul.f32 %v11824_v2, %v5686_v55 }
 0xc09   : > { %v5836_v41 = vsub.f32 1.0, %v5820_v19 }
 0xc0a   : > { %v5620_v26 = vpop.permute.xlu2 %5619 }
 0xc0b   : > { %v5852_v29 = vmax.f32 %v5836_v41, 0.0  ;;  %v5646_v16 = vadd.f32 %v5620_v26, %v11689_v14 }
 0xc0d   : > { %v5868_v49 = vmul.f32 %v5852_v29, %v11626_v5  ;;  %7378 = vrsqrt.f32 %v5646_v16  ;;  %vm5713_vm14 = vweird.f32 %v5646_v16 }
 0xc0f   : > { %5921 = vmatmul.f32.gmra.mxu1 %v5868_v49 }
 0xc12   : > { %v5616_v38 = vpop.permute.xlu0 %5615 }
 0xc13   : > { %v5644_v42 = vadd.f32 %v5616_v38, %v11648_v20  ;;  %v7379_v28 = vpop.eup %7378 }
 0xc14   : > { %v5708_v7 = vmul.f32 %v7379_v28, %v5646_v16  ;;  %vm5714_vm12 = vweird.f32 %v7379_v28 }
 0xc15   : > { %7380 = vrsqrt.f32 %v5644_v42  ;;  %vm5693_vm10 = vweird.f32 %v5644_v42  ;;  %vm5715_vm15 = vmor %vm5713_vm14, %vm5714_vm12 }
 0xc16   : > { %v5709_v63 = vmul.f32 %v7379_v28, %v5708_v7 }
 0xc18   : > { %v5710_v14 = vmul.f32 0.5, %v5709_v63 }
 0xc1a   : > { %v5618_v47 = vpop.permute.xlu1 %5617  ;;  %v5711_v50 = vsub.f32 1.5, %v5710_v14 }
 0xc1b   : > { %v7381_v22 = vpop.eup %7380  ;;  %v5645_v10 = vadd.f32 %v5618_v47, %v11667_v53 }
 0xc1c   : > { %v5688_v11 = vmul.f32 %v7381_v22, %v5644_v42  ;;  %vm5694_vm9 = vweird.f32 %v7381_v22  ;;  %v5712_v41 = vmul.f32 %v7379_v28, %v5711_v50 }
 0xc1d   : > { %7382 = vrsqrt.f32 %v5645_v10  ;;  %vm5695_vm11 = vmor %vm5693_vm10, %vm5694_vm9  ;;  %vm5703_vm0 = vweird.f32 %v5645_v10 }
 0xc1e   : > { %v5689_v54 = vmul.f32 %v7381_v22, %v5688_v11  ;;  %v5716_v47 = vsel %vm5715_vm15, %v7379_v28, %v5712_v41 }
 0xc20   : > { %v5690_v35 = vmul.f32 0.5, %v5689_v54  ;;  %v5823_v54 = vmul.f32 %v11824_v2, %v5716_v47 }
 0xc22   : > { %v5691_v46 = vsub.f32 1.5, %v5690_v35  ;;  %v5626_v39 = vpop.permute.xlu2 %5625 }
 0xc23   : > { %v7383_v5 = vpop.eup %7382  ;;  %v11899_v6 = vadd.f32 %v5626_v39, %v11777_v48 }
 0xc24   : > { %v5692_v51 = vmul.f32 %v7381_v22, %v5691_v46  ;;  %v5698_v20 = vmul.f32 %v7383_v5, %v5645_v10  ;;  %vm5704_vm13 = vweird.f32 %v7383_v5 }
 0xc25   : > { %7384 = vrsqrt.f32 %v11899_v6  ;;  %vm5705_vm1 = vmor %vm5703_vm0, %vm5704_vm13  ;;  %vm5743_vm8 = vweird.f32 %v11899_v6 }
 0xc26   : > { %v5699_v3 = vmul.f32 %v7383_v5, %v5698_v20  ;;  %v5696_v53 = vsel %vm5695_vm11, %v7381_v22, %v5692_v51 }
 0xc27   : > { %v5821_v36 = vmul.f32 %v11824_v2, %v5696_v53 }
 0xc28   : > { %v5700_v55 = vmul.f32 0.5, %v5699_v3 }
 0xc29   : > { %v5837_v19 = vsub.f32 1.0, %v5821_v36 }
 0xc2a   : > { %v5701_v26 = vsub.f32 1.5, %v5700_v55  ;;  %v5622_v29 = vpop.permute.xlu0 %5621 }
 0xc2b   : > { %v5647_v49 = vadd.f32 %v5622_v29, %v11718_v56  ;;  %v5853_v38 = vmax.f32 %v5837_v19, 0.0  ;;  %v7385_v11 = vpop.eup %7384 }
 0xc2c   : > { %v5702_v42 = vmul.f32 %v7383_v5, %v5701_v26  ;;  %v5738_v56 = vmul.f32 %v7385_v11, %v11899_v6  ;;  %vm5744_vm6 = vweird.f32 %v7385_v11 }
 0xc2d   : > { %7386 = vrsqrt.f32 %v5647_v49  ;;  %v5869_v48 = vmul.f32 %v5853_v38, %v11644_v27  ;;  %vm5723_vm3 = vweird.f32 %v5647_v49  ;;  %vm5745_vm10 = vmor %vm5743_vm8, %vm5744_vm6 }
 0xc2e   : > { %v5706_v7 = vsel %vm5705_vm1, %v7383_v5, %v5702_v42  ;;  %v5839_v5 = vsub.f32 1.0, %v5823_v54  ;;  %v5739_v39 = vmul.f32 %v7385_v11, %v5738_v56 }
 0xc2f   : > { %5924 = vmatmul.f32.gmra.mxu1 %v5869_v48  ;;  %v5822_v22 = vmul.f32 %v11824_v2, %v5706_v7 }
 0xc30   : > { %v5855_v20 = vmax.f32 %v5839_v5, 0.0  ;;  %v5740_v53 = vmul.f32 0.5, %v5739_v39 }
 0xc31   : > { %v5838_v63 = vsub.f32 1.0, %v5822_v22 }
 0xc32   : > { %v5624_v16 = vpop.permute.xlu1 %5623  ;;  %v5741_v29 = vsub.f32 1.5, %v5740_v53 }
 0xc33   : > { %v7387_v35 = vpop.eup %7386  ;;  %v5648_v14 = vadd.f32 %v5624_v16, %v11748_v58  ;;  %v5854_v10 = vmax.f32 %v5838_v63, 0.0  ;;  %v5871_v58 = vmul.f32 %v5855_v20, %v11684_v4 }
 0xc34   : > { %v5718_v46 = vmul.f32 %v7387_v35, %v5647_v49  ;;  %vm5724_vm2 = vweird.f32 %v7387_v35  ;;  %v5742_v47 = vmul.f32 %v7385_v11, %v5741_v29 }
 0xc35   : > { %7388 = vrsqrt.f32 %v5648_v14  ;;  %v5870_v27 = vmul.f32 %v5854_v10, %v11663_v24  ;;  %vm5725_vm4 = vmor %vm5723_vm3, %vm5724_vm2  ;;  %vm5733_vm7 = vweird.f32 %v5648_v14 }
 0xc36   : > { %v5719_v28 = vmul.f32 %v7387_v35, %v5718_v46 }
 0xc37   : > { %5927 = vmatmul.f32.gmra.mxu1 %v5870_v27 }
 0xc38   : > { %v5720_v51 = vmul.f32 0.5, %v5719_v28 }
 0xc3a   : > { %v5721_v50 = vsub.f32 1.5, %v5720_v51  ;;  %v5632_v36 = vpop.permute.xlu2 %5631 }
 0xc3b   : > { %v7389_v3 = vpop.eup %7388  ;;  %v11912_v24 = vadd.f32 %v5632_v36, %v11832_v30 }
 0xc3c   : > { %v5722_v55 = vmul.f32 %v7387_v35, %v5721_v50  ;;  %v5728_v19 = vmul.f32 %v7389_v3, %v5648_v14  ;;  %vm5734_vm5 = vweird.f32 %v7389_v3 }
 0xc3d   : > { %7390 = vrsqrt.f32 %v11912_v24  ;;  %vm5735_vm9 = vmor %vm5733_vm7, %vm5734_vm5  ;;  %vm5773_vm0 = vweird.f32 %v11912_v24 }
 0xc3e   : > { %v5729_v41 = vmul.f32 %v7389_v3, %v5728_v19  ;;  %v5726_v26 = vsel %vm5725_vm4, %v7387_v35, %v5722_v55  ;;  %v5746_v35 = vsel %vm5745_vm10, %v7385_v11, %v5742_v47 }
 0xc3f   : > { %5930 = vmatmul.f32.gmra.mxu1 %v5871_v58  ;;  %v5824_v38 = vmul.f32 %v11824_v2, %v5726_v26  ;;  %v5826_v46 = vmul.f32 %v11824_v2, %v5746_v35 }
 0xc40   : > { %v5730_v42 = vmul.f32 0.5, %v5729_v41 }
 0xc41   : > { %v5840_v48 = vsub.f32 1.0, %v5824_v38  ;;  %v5842_v51 = vsub.f32 1.0, %v5826_v46 }
 0xc42   : > { %v5731_v7 = vsub.f32 1.5, %v5730_v42  ;;  %v5628_v49 = vpop.permute.xlu0 %5627 }
 0xc43   : > { %v5650_v4 = vadd.f32 %v5628_v49, %v11797_v9  ;;  %v5856_v22 = vmax.f32 %v5840_v48, 0.0  ;;  %v7391_v56 = vpop.eup %7390 }
 0xc44   : > { %v5732_v63 = vmul.f32 %v7389_v3, %v5731_v7  ;;  %v5768_v27 = vmul.f32 %v7391_v56, %v11912_v24  ;;  %vm5774_vm14 = vweird.f32 %v7391_v56 }
 0xc45   : > { %7392 = vrsqrt.f32 %v5650_v4  ;;  %v5872_v30 = vmul.f32 %v5856_v22, %v11709_v57  ;;  %vm5753_vm12 = vweird.f32 %v5650_v4  ;;  %vm5775_vm1 = vmor %vm5773_vm0, %vm5774_vm14 }
 0xc46   : > { %v5736_v54 = vsel %vm5735_vm9, %v7389_v3, %v5732_v63  ;;  %v5769_v20 = vmul.f32 %v7391_v56, %v5768_v27  ;;  %v5858_v3 = vmax.f32 %v5842_v51, 0.0 }
 0xc47   : > { %v5825_v16 = vmul.f32 %v11824_v2, %v5736_v54  ;;  %5933 = vmatmul.f32.gmra.mxu1 %v5872_v30 }
 0xc48   : > { %v5770_v53 = vmul.f32 0.5, %v5769_v20 }
 0xc49   : > { %v5841_v10 = vsub.f32 1.0, %v5825_v16 }
 0xc4a   : > { %v5630_v14 = vpop.permute.xlu1 %5629  ;;  %v5771_v26 = vsub.f32 1.5, %v5770_v53 }
 0xc4b   : > { %v7393_v9 = vpop.eup %7392  ;;  %v5857_v5 = vmax.f32 %v5841_v10, 0.0  ;;  %v5651_v28 = vadd.f32 %v5630_v14, %v11813_v37 }
 0xc4c   : > { %v5748_v6 = vmul.f32 %v7393_v9, %v5650_v4  ;;  %vm5754_vm11 = vweird.f32 %v7393_v9  ;;  %v5772_v7 = vmul.f32 %v7391_v56, %v5771_v26 }
 0xc4d   : > { %v5873_v39 = vmul.f32 %v5857_v5, %v11739_v17  ;;  %7394 = vrsqrt.f32 %v5651_v28  ;;  %vm5755_vm13 = vmor %vm5753_vm12, %vm5754_vm11  ;;  %v5874_v17 = vmul.f32 %v5858_v3, %v11769_v31  ;;  %vm5763_vm2 = vweird.f32 %v5651_v28 }
 0xc4e   : > { %v5749_v57 = vmul.f32 %v7393_v9, %v5748_v6  ;;  %v5776_v30 = vsel %vm5775_vm1, %v7391_v56, %v5772_v7 }
 0xc4f   : > { %5936 = vmatmul.f32.gmra.mxu1 %v5873_v39  ;;  %v5829_v10 = vmul.f32 %v11824_v2, %v5776_v30 }
 0xc50   : > { %v5750_v11 = vmul.f32 0.5, %v5749_v57 }
 0xc51   : > { %v5845_v6 = vsub.f32 1.0, %v5829_v10 }
 0xc52   : > { %v5751_v50 = vsub.f32 1.5, %v5750_v11  ;;  %v5638_v36 = vpop.permute.xlu2 %5637 }
 0xc53   : > { %v7395_v55 = vpop.eup %7394  ;;  %v11925_v37 = vadd.f32 %v5638_v36, %v11875_v52  ;;  %v5861_v51 = vmax.f32 %v5845_v6, 0.0 }
 0xc54   : > { %v5752_v19 = vmul.f32 %v7393_v9, %v5751_v50  ;;  %v5758_v58 = vmul.f32 %v7395_v55, %v5651_v28  ;;  %vm5764_vm15 = vweird.f32 %v7395_v55 }
 0xc55   : > { %7396 = vrsqrt.f32 %v11925_v37  ;;  %vm5765_vm3 = vmor %vm5763_vm2, %vm5764_vm15  ;;  %v5877_v53 = vmul.f32 %v5861_v51, %v11827_v60  ;;  %vm5803_vm9 = vweird.f32 %v11925_v37 }
 0xc56   : > { %v5756_v41 = vsel %vm5755_vm13, %v7393_v9, %v5752_v19  ;;  %v5759_v29 = vmul.f32 %v7395_v55, %v5758_v58 }
 0xc57   : > { %v5827_v38 = vmul.f32 %v11824_v2, %v5756_v41  ;;  %5939 = vmatmul.f32.gmra.mxu1 %v5874_v17 }
 0xc58   : > { %v5760_v42 = vmul.f32 0.5, %v5759_v29 }
 0xc59   : > { %v5843_v48 = vsub.f32 1.0, %v5827_v38 }
 0xc5a   : > { %v5761_v49 = vsub.f32 1.5, %v5760_v42  ;;  %v5634_v47 = vpop.permute.xlu0 %5633 }
 0xc5b   : > { %v5859_v4 = vmax.f32 %v5843_v48, 0.0  ;;  %v5653_v31 = vadd.f32 %v5634_v47, %v11849_v23  ;;  %v7397_v54 = vpop.eup %7396 }
 0xc5c   : > { %v5762_v52 = vmul.f32 %v7395_v55, %v5761_v49  ;;  %v5798_v24 = vmul.f32 %v7397_v54, %v11925_v37  ;;  %vm5804_vm7 = vweird.f32 %v7397_v54 }
 0xc5d   : > { %v5875_v22 = vmul.f32 %v5859_v4, %v11793_v8  ;;  %7398 = vrsqrt.f32 %v5653_v31  ;;  %vm5783_vm5 = vweird.f32 %v5653_v31  ;;  %vm5805_vm10 = vmor %vm5803_vm9, %vm5804_vm7 }
 0xc5e   : > { %v5766_v63 = vsel %vm5765_vm3, %v7395_v55, %v5762_v52  ;;  %v5799_v28 = vmul.f32 %v7397_v54, %v5798_v24 }
 0xc5f   : > { %5942 = vmatmul.f32.gmra.mxu1 %v5875_v22  ;;  %v5828_v16 = vmul.f32 %v11824_v2, %v5766_v63 }
 0xc61   : > { %v5844_v35 = vsub.f32 1.0, %v5828_v16 }
 0xc62   : > { %v5636_v46 = vpop.permute.xlu1 %5635 }
 0xc63   : > { %v7399_v23 = vpop.eup %7398  ;;  %v5654_v9 = vadd.f32 %v5636_v46, %v11862_v44  ;;  %v5860_v8 = vmax.f32 %v5844_v35, 0.0  ;;  %v5800_v44 = vmul.f32 0.5, %v5799_v28 }
 0xc64   : > { %v11937_v27 = vpop.f32.mrf.mxu1  ;;  %v5778_v14 = vmul.f32 %v7399_v23, %v5653_v31  ;;  %vm5784_vm4 = vweird.f32 %v7399_v23 }
 0xc65   : > { %v6031_v56 = vmul.f32 %v11937_v27, %v11937_v27  ;;  %5982 = vmatmul.f32.vlgmr.msrb.gmra.mxu2 %v11937_v27  ;;  %7400 = vrsqrt.f32 %v5654_v9  ;;  %v5876_v5 = vmul.f32 %v5860_v8, %v11809_v33  ;;  %vm5785_vm6 = vmor %vm5783_vm5, %vm5784_vm4  ;;  %v5801_v36 = vsub.f32 1.5, %v5800_v44 }
 0xc66   : > { %v5779_v39 = vmul.f32 %v7399_v23, %v5778_v14  ;;  %vm5793_vm11 = vweird.f32 %v5654_v9 }
 0xc67   : > { %6063 = vmatmul.f32.vlgmr.msrb.gmra.mxu3 %v6031_v56  ;;  %5945 = vmatmul.f32.gmra.mxu1 %v5876_v5  ;;  %v5802_v41 = vmul.f32 %v7397_v54, %v5801_v36 }
 0xc68   : > { %v5780_v57 = vmul.f32 0.5, %v5779_v39 }
 0xc69   : > { %v5806_v49 = vsel %vm5805_vm10, %v7397_v54, %v5802_v41 }
 0xc6a   : > { %v5781_v20 = vsub.f32 1.5, %v5780_v57  ;;  %v5832_v31 = vmul.f32 %v11824_v2, %v5806_v49 }
 0xc6b   : > { %v7401_v11 = vpop.eup %7400 }
 0xc6c   : > { %v5782_v50 = vmul.f32 %v7399_v23, %v5781_v20  ;;  %v5788_v3 = vmul.f32 %v7401_v11, %v5654_v9  ;;  %vm5794_vm8 = vweird.f32 %v7401_v11  ;;  %v5848_v63 = vsub.f32 1.0, %v5832_v31 }
 0xc6d   : > { %vm5795_vm12 = vmor %vm5793_vm11, %vm5794_vm8 }
 0xc6e   : > { %v5789_v55 = vmul.f32 %v7401_v11, %v5788_v3  ;;  %v5786_v33 = vsel %vm5785_vm6, %v7399_v23, %v5782_v50  ;;  %v5864_v35 = vmax.f32 %v5848_v63, 0.0 }
 0xc6f   : > { %5948 = vmatmul.f32.gmra.mxu1 %v5877_v53  ;;  %v5830_v19 = vmul.f32 %v11824_v2, %v5786_v33 }
 0xc70   : > { %v5790_v58 = vmul.f32 0.5, %v5789_v55  ;;  %v5880_v46 = vmul.f32 %v5864_v35, %v11871_v12 }
 0xc71   : > { %v5846_v17 = vsub.f32 1.0, %v5830_v19 }
 0xc72   : > { %v5791_v26 = vsub.f32 1.5, %v5790_v58  ;;  %v5640_v29 = vpop.permute.xlu0 %5639 }
 0xc73   : > { %v5656_v38 = vadd.f32 %v5640_v29, %v11887_v15  ;;  %v5862_v42 = vmax.f32 %v5846_v17, 0.0 }
 0xc74   : > { %v5792_v60 = vmul.f32 %v7401_v11, %v5791_v26 }
 0xc75   : > { %7402 = vrsqrt.f32 %v5656_v38  ;;  %v5878_v48 = vmul.f32 %v5862_v42, %v11844_v45  ;;  %vm5813_vm14 = vweird.f32 %v5656_v38 }
 0xc76   : > { %v5796_v7 = vsel %vm5795_vm12, %v7401_v11, %v5792_v60 }
 0xc77   : > { %5951 = vmatmul.f32.gmra.mxu1 %v5878_v48  ;;  %v5831_v47 = vmul.f32 %v11824_v2, %v5796_v7 }
 0xc79   : > { %v5847_v4 = vsub.f32 1.0, %v5831_v47 }
 0xc7b   : > { %v7403_v52 = vpop.eup %7402  ;;  %v5863_v37 = vmax.f32 %v5847_v4, 0.0  ;;  %v12017_v4 = vld [vmem:[%s12392_s3 + $0xe] ss:$0 sm:$0xff] }
 0xc7c   : > { %v5808_v22 = vmul.f32 %v7403_v52, %v5656_v38  ;;  %vm5814_vm13 = vweird.f32 %v7403_v52 }
 0xc7d   : > { %v5879_v15 = vmul.f32 %v5863_v37, %v11858_v25  ;;  %vm5815_vm15 = vmor %vm5813_vm14, %vm5814_vm13 }
 0xc7e   : > { %v5809_v30 = vmul.f32 %v7403_v52, %v5808_v22 }
 0xc7f   : > { %5954 = vmatmul.f32.gmra.mxu1 %v5879_v15 }
 0xc80   : > { %v5810_v16 = vmul.f32 0.5, %v5809_v30  ;;  %v12029_v30 = vld [vmem:[%s12392_s3 + $0xf] ss:$0 sm:$0xff] }
 0xc82   : > { %v5811_v10 = vsub.f32 1.5, %v5810_v16 }
 0xc84   : > { %v11951_v45 = vpop.f32.mrf.mxu1  ;;  %v5812_v54 = vmul.f32 %v7403_v52, %v5811_v10 }
 0xc85   : > { %v6032_v24 = vmul.f32 %v11951_v45, %v11951_v45  ;;  %5985 = vmatmul.f32.gmra.mxu2 %v11951_v45 }
 0xc86   : > { %v5816_v25 = vsel %vm5815_vm15, %v7403_v52, %v5812_v54 }
 0xc87   : > { %6066 = vmatmul.f32.gmra.mxu3 %v6032_v24  ;;  %5957 = vmatmul.f32.gmra.mxu1 %v5880_v46  ;;  %v5833_v23 = vmul.f32 %v11824_v2, %v5816_v25 }
 0xc89   : > { %v5849_v9 = vsub.f32 1.0, %v5833_v23 }
 0xc8b   : > { %v5865_v14 = vmax.f32 %v5849_v9, 0.0 }
 0xc8c   : > { %v11958_v8 = vpop.f32.mrf.mxu1 }
 0xc8d   : > { %v6033_v56 = vmul.f32 %v11958_v8, %v11958_v8  ;;  %5988 = vmatmul.f32.gmra.mxu2 %v11958_v8  ;;  %v5881_v5 = vmul.f32 %v5865_v14, %v11883_v34 }
 0xc8f   : > { %6069 = vmatmul.f32.gmra.mxu3 %v6033_v56  ;;  %5960 = vmatmul.f32.gmra.mxu1 %v5881_v5 }
 0xcac   : > { %v11964_v6 = vpop.f32.mrf.mxu1 }
 0xcad   : > { %v6034_v12 = vmul.f32 %v11964_v6, %v11964_v6  ;;  %5991 = vmatmul.f32.gmra.mxu2 %v11964_v6 }
 0xcaf   : > { %6072 = vmatmul.f32.gmra.mxu3 %v6034_v12 }
 0xcb4   : > { %v11969_v2 = vpop.f32.mrf.mxu1 }
 0xcb5   : > { %v6035_v28 = vmul.f32 %v11969_v2, %v11969_v2  ;;  %5994 = vmatmul.f32.gmra.mxu2 %v11969_v2 }
 0xcb7   : > { %6075 = vmatmul.f32.gmra.mxu3 %v6035_v28 }
 0xcbc   : > { %v11974_v39 = vpop.f32.mrf.mxu1 }
 0xcbd   : > { %v6036_v34 = vmul.f32 %v11974_v39, %v11974_v39  ;;  %5997 = vmatmul.f32.gmra.mxu2 %v11974_v39 }
 0xcbf   : > { %6078 = vmatmul.f32.gmra.mxu3 %v6036_v34 }
 0xcc4   : > { %v11979_v57 = vpop.f32.mrf.mxu1 }
 0xcc5   : > { %v6037_v51 = vmul.f32 %v11979_v57, %v11979_v57  ;;  %6000 = vmatmul.f32.gmra.mxu2 %v11979_v57 }
 0xcc7   : > { %6081 = vmatmul.f32.gmra.mxu3 %v6037_v51 }
 0xccc   : > { %v11984_v44 = vpop.f32.mrf.mxu1 }
 0xccd   : > { %v6038_v20 = vmul.f32 %v11984_v44, %v11984_v44  ;;  %6003 = vmatmul.f32.gmra.mxu2 %v11984_v44 }
 0xccf   : > { %6084 = vmatmul.f32.gmra.mxu3 %v6038_v20 }
 0xcd4   : > { %v11989_v11 = vpop.f32.mrf.mxu1 }
 0xcd5   : > { %v6039_v50 = vmul.f32 %v11989_v11, %v11989_v11  ;;  %6006 = vmatmul.f32.gmra.mxu2 %v11989_v11 }
 0xcd7   : > { %6087 = vmatmul.f32.gmra.mxu3 %v6039_v50 }
 0xcdc   : > { %v11994_v3 = vpop.f32.mrf.mxu1 }
 0xcdd   : > { %v6040_v53 = vmul.f32 %v11994_v3, %v11994_v3  ;;  %6009 = vmatmul.f32.gmra.mxu2 %v11994_v3 }
 0xcdf   : > { %6090 = vmatmul.f32.gmra.mxu3 %v6040_v53 }
 0xce4   : > { %v11999_v36 = vpop.f32.mrf.mxu1 }
 0xce5   : > { %v6041_v55 = vmul.f32 %v11999_v36, %v11999_v36  ;;  %6012 = vmatmul.f32.gmra.mxu2 %v11999_v36 }
 0xce7   : > { %6093 = vmatmul.f32.gmra.mxu3 %v6041_v55 }
 0xce8   : > { %v5983_v33 = vpop.f32.mrf.mxu2 }
 0xce9   : > { %v6112_v19 = vmul.f32 %v5983_v33, %v5983_v33  ;;  %v6320_v15 = vsub.f32 %v11937_v27, %v5983_v33 }
 0xcea   : > { %v6064_v58 = vpop.f32.mrf.mxu3 }
 0xceb   : > { %v6128_v17 = vsub.f32 %v6064_v58, %v6112_v19 }
 0xcec   : > { %v12004_v26 = vpop.f32.mrf.mxu1 }
 0xced   : > { %v6144_v41 = vadd.f32 1e-05, %v6128_v17  ;;  %v6042_v29 = vmul.f32 %v12004_v26, %v12004_v26  ;;  %6015 = vmatmul.f32.gmra.mxu2 %v12004_v26 }
 0xcef   : > { %7404 = vrsqrt.f32 %v6144_v41  ;;  %6096 = vmatmul.f32.gmra.mxu3 %v6042_v29  ;;  %vm6166_vm1 = vweird.f32 %v6144_v41 }
 0xcf4   : > { %v12009_v42 = vpop.f32.mrf.mxu1 }
 0xcf5   : > { %v7405_v38 = vpop.eup %7404  ;;  %v6043_v48 = vmul.f32 %v12009_v42, %v12009_v42  ;;  %6018 = vmatmul.f32.gmra.mxu2 %v12009_v42 }
 0xcf6   : > { %v6161_v60 = vmul.f32 %v7405_v38, %v6144_v41  ;;  %vm6167_vm0 = vweird.f32 %v7405_v38 }
 0xcf7   : > { %6099 = vmatmul.f32.gmra.mxu3 %v6043_v48  ;;  %vm6168_vm2 = vmor %vm6166_vm1, %vm6167_vm0 }
 0xcf8   : > { %v6162_v7 = vmul.f32 %v7405_v38, %v6161_v60 }
 0xcfa   : > { %v6163_v49 = vmul.f32 0.5, %v6162_v7 }
 0xcfc   : > { %v6164_v47 = vsub.f32 1.5, %v6163_v49  ;;  %v12019_v31 = vpop.f32.mrf.mxu1 }
 0xcfd   : > { %v6044_v37 = vmul.f32 %v12019_v31, %v12019_v31  ;;  %6021 = vmatmul.f32.gmra.mxu2 %v12019_v31 }
 0xcfe   : > { %v6165_v52 = vmul.f32 %v7405_v38, %v6164_v47 }
 0xcff   : > { %6102 = vmatmul.f32.gmra.mxu3 %v6044_v37 }
 0xd00   : > { %v6169_v22 = vsel %vm6168_vm2, %v7405_v38, %v6165_v52 }
 0xd01   : > { %v6337_v63 = vmul.f32 %v12017_v4, %v6169_v22 }
 0xd03   : > { %v6353_v16 = vmul.f32 %v6337_v63, %v6320_v15 }
 0xd04   : > { %v12031_v35 = vpop.f32.mrf.mxu1 }
 0xd05   : > { %v6370_v10 = vadd.f32 %v12029_v30, %v6353_v16  ;;  %v6045_v54 = vmul.f32 %v12031_v35, %v12031_v35  ;;  %6024 = vmatmul.f32.gmra.mxu2 %v12031_v35 }
 0xd07   : > { %v12038_v24 = vadd.f32 %v6370_v10, %v11338_v40  ;;  %6105 = vmatmul.f32.gmra.mxu3 %v6045_v54 }
 0xd08   : > { %v5986_v27 = vpop.f32.mrf.mxu2 }
 0xd09   : > { %v6113_v46 = vmul.f32 %v5986_v27, %v5986_v27  ;;  %v12042_v25 = vmul.f32 %v12038_v24, %v12038_v24  ;;  %v6321_v38 = vsub.f32 %v11951_v45, %v5986_v27 }
 0xd0a   : > { %v6067_v23 = vpop.f32.mrf.mxu3 }
 0xd0b   : > { %v6129_v9 = vsub.f32 %v6067_v23, %v6113_v46  ;;  %6419 = vrot.lane.b32.xlu1 %v12042_v25, %s7608_s30 }
 0xd0c   : > { %v12046_v56 = vpop.f32.mrf.mxu1 }
 0xd0d   : > { %v6145_v14 = vadd.f32 1e-05, %v6129_v9  ;;  %v6046_v5 = vmul.f32 %v12046_v56, %v12046_v56  ;;  %6027 = vmatmul.f32.gmra.mxu2 %v12046_v56 }
 0xd0f   : > { %7406 = vrsqrt.f32 %v6145_v14  ;;  %6108 = vmatmul.f32.gmra.mxu3 %v6046_v5  ;;  %vm6176_vm4 = vweird.f32 %v6145_v14 }
 0xd10   : > { %v5989_v40 = vpop.f32.mrf.mxu2 }
 0xd11   : > { %v6114_v12 = vmul.f32 %v5989_v40, %v5989_v40  ;;  %v6322_v15 = vsub.f32 %v11958_v8, %v5989_v40 }
 0xd12   : > { %v6070_v28 = vpop.f32.mrf.mxu3 }
 0xd13   : > { %v6130_v34 = vsub.f32 %v6070_v28, %v6114_v12 }
 0xd15   : > { %v7407_v51 = vpop.eup %7406  ;;  %v6146_v20 = vadd.f32 1e-05, %v6130_v34 }
 0xd16   : > { %v6171_v50 = vmul.f32 %v7407_v51, %v6145_v14  ;;  %vm6177_vm3 = vweird.f32 %v7407_v51 }
 0xd17   : > { %7408 = vrsqrt.f32 %v6146_v20  ;;  %vm6178_vm5 = vmor %vm6176_vm4, %vm6177_vm3  ;;  %vm6186_vm7 = vweird.f32 %v6146_v20 }
 0xd18   : > { %v6172_v53 = vmul.f32 %v7407_v51, %v6171_v50 }
 0xd1a   : > { %v6173_v55 = vmul.f32 0.5, %v6172_v53 }
 0xd1c   : > { %v6174_v33 = vsub.f32 1.5, %v6173_v55 }
 0xd1d   : > { %v7409_v19 = vpop.eup %7408 }
 0xd1e   : > { %v6175_v58 = vmul.f32 %v7407_v51, %v6174_v33  ;;  %v6181_v17 = vmul.f32 %v7409_v19, %v6146_v20  ;;  %vm6187_vm6 = vweird.f32 %v7409_v19 }
 0xd1f   : > { %vm6188_vm8 = vmor %vm6186_vm7, %vm6187_vm6 }
 0xd20   : > { %v6179_v41 = vsel %vm6178_vm5, %v7407_v51, %v6175_v58  ;;  %v6182_v29 = vmul.f32 %v7409_v19, %v6181_v17 }
 0xd21   : > { %v6338_v60 = vmul.f32 %v12017_v4, %v6179_v41 }
 0xd22   : > { %v6183_v48 = vmul.f32 0.5, %v6182_v29 }
 0xd23   : > { %v6354_v7 = vmul.f32 %v6338_v60, %v6321_v38 }
 0xd24   : > { %v6184_v49 = vsub.f32 1.5, %v6183_v48 }
 0xd25   : > { %v6371_v47 = vadd.f32 %v12029_v30, %v6354_v7 }
 0xd26   : > { %v6185_v52 = vmul.f32 %v7409_v19, %v6184_v49 }
 0xd27   : > { %v12055_v37 = vadd.f32 %v6371_v47, %v11394_v59 }
 0xd28   : > { %v6189_v22 = vsel %vm6188_vm8, %v7409_v19, %v6185_v52 }
 0xd29   : > { %v6339_v63 = vmul.f32 %v12017_v4, %v6189_v22  ;;  %v12061_v45 = vmul.f32 %v12055_v37, %v12055_v37 }
 0xd2b   : > { %6421 = vrot.lane.b32.xlu2 %v12061_v45, %s7608_s30  ;;  %v6355_v16 = vmul.f32 %v6339_v63, %v6322_v15 }
 0xd2d   : > { %v6372_v10 = vadd.f32 %v12029_v30, %v6355_v16 }
 0xd2f   : > { %v12067_v54 = vadd.f32 %v6372_v10, %v11408_v18 }
 0xd30   : > { %v5992_v59 = vpop.f32.mrf.mxu2 }
 0xd31   : > { %v6115_v27 = vmul.f32 %v5992_v59, %v5992_v59  ;;  %v12071_v8 = vmul.f32 %v12067_v54, %v12067_v54  ;;  %v6323_v48 = vsub.f32 %v11964_v6, %v5992_v59 }
 0xd32   : > { %v6073_v46 = vpop.f32.mrf.mxu3 }
 0xd33   : > { %v6131_v23 = vsub.f32 %v6073_v46, %v6115_v27  ;;  %6423 = vrot.lane.b32.xlu0 %v12071_v8, %s7608_s30 }
 0xd35   : > { %v6147_v9 = vadd.f32 1e-05, %v6131_v23 }
 0xd37   : > { %7410 = vrsqrt.f32 %v6147_v9  ;;  %vm6196_vm10 = vweird.f32 %v6147_v9 }
 0xd38   : > { %v5995_v14 = vpop.f32.mrf.mxu2 }
 0xd39   : > { %v6116_v5 = vmul.f32 %v5995_v14, %v5995_v14 }
 0xd3a   : > { %v6076_v40 = vpop.f32.mrf.mxu3 }
 0xd3b   : > { %v6132_v12 = vsub.f32 %v6076_v40, %v6116_v5  ;;  %v6324_v40 = vsub.f32 %v11969_v2, %v5995_v14 }
 0xd3d   : > { %v7411_v28 = vpop.eup %7410  ;;  %v6148_v18 = vadd.f32 1e-05, %v6132_v12 }
 0xd3e   : > { %v6191_v34 = vmul.f32 %v7411_v28, %v6147_v9  ;;  %vm6197_vm9 = vweird.f32 %v7411_v28 }
 0xd3f   : > { %7412 = vrsqrt.f32 %v6148_v18  ;;  %vm6198_vm11 = vmor %vm6196_vm10, %vm6197_vm9  ;;  %vm6206_vm13 = vweird.f32 %v6148_v18 }
 0xd40   : > { %v6192_v51 = vmul.f32 %v7411_v28, %v6191_v34  ;;  %v12075_v20 = vpop.f32.mrf.mxu2 }
 0xd41   : > { %v6117_v50 = vmul.f32 %v12075_v20, %v12075_v20 }
 0xd42   : > { %v6193_v53 = vmul.f32 0.5, %v6192_v51  ;;  %v6079_v55 = vpop.f32.mrf.mxu3 }
 0xd43   : > { %v6133_v33 = vsub.f32 %v6079_v55, %v6117_v50 }
 0xd44   : > { %v6194_v19 = vsub.f32 1.5, %v6193_v53 }
 0xd45   : > { %v7413_v58 = vpop.eup %7412  ;;  %v6149_v17 = vadd.f32 1e-05, %v6133_v33 }
 0xd46   : > { %v6195_v41 = vmul.f32 %v7411_v28, %v6194_v19  ;;  %v6201_v29 = vmul.f32 %v7413_v58, %v6148_v18  ;;  %vm6207_vm12 = vweird.f32 %v7413_v58 }
 0xd47   : > { %7414 = vrsqrt.f32 %v6149_v17  ;;  %vm6208_vm14 = vmor %vm6206_vm13, %vm6207_vm12  ;;  %vm6216_vm0 = vweird.f32 %v6149_v17 }
 0xd48   : > { %v6199_v38 = vsel %vm6198_vm11, %v7411_v28, %v6195_v41  ;;  %v6202_v60 = vmul.f32 %v7413_v58, %v6201_v29  ;;  %v12081_v49 = vpop.f32.mrf.mxu2 }
 0xd49   : > { %v6340_v7 = vmul.f32 %v12017_v4, %v6199_v38  ;;  %v6118_v52 = vmul.f32 %v12081_v49, %v12081_v49  ;;  %v6325_v38 = vsub.f32 %v11974_v39, %v12075_v20 }
 0xd4a   : > { %v6203_v47 = vmul.f32 0.5, %v6202_v60  ;;  %v6082_v22 = vpop.f32.mrf.mxu3 }
 0xd4b   : > { %v6356_v15 = vmul.f32 %v6340_v7, %v6323_v48  ;;  %v6134_v16 = vsub.f32 %v6082_v22, %v6118_v52 }
 0xd4c   : > { %v6204_v63 = vsub.f32 1.5, %v6203_v47 }
 0xd4d   : > { %v7415_v10 = vpop.eup %7414  ;;  %v6373_v27 = vadd.f32 %v12029_v30, %v6356_v15  ;;  %v6150_v6 = vadd.f32 1e-05, %v6134_v16 }
 0xd4e   : > { %v6205_v46 = vmul.f32 %v7413_v58, %v6204_v63  ;;  %v6211_v23 = vmul.f32 %v7415_v10, %v6149_v17  ;;  %vm6217_vm15 = vweird.f32 %v7415_v10 }
 0xd4f   : > { %v12087_v59 = vadd.f32 %v6373_v27, %v11415_v62  ;;  %7416 = vrsqrt.f32 %v6150_v6  ;;  %vm6218_vm1 = vmor %vm6216_vm0, %vm6217_vm15  ;;  %vm6226_vm3 = vweird.f32 %v6150_v6 }
 0xd50   : > { %v6209_v9 = vsel %vm6208_vm14, %v7413_v58, %v6205_v46  ;;  %v6212_v5 = vmul.f32 %v7415_v10, %v6211_v23  ;;  %v12091_v28 = vpop.f32.mrf.mxu2 }
 0xd51   : > { %v6341_v12 = vmul.f32 %v12017_v4, %v6209_v9  ;;  %v12095_v34 = vmul.f32 %v12087_v59, %v12087_v59  ;;  %v6119_v51 = vmul.f32 %v12091_v28, %v12091_v28 }
 0xd52   : > { %v6213_v18 = vmul.f32 0.5, %v6212_v5  ;;  %v6085_v50 = vpop.f32.mrf.mxu3 }
 0xd53   : > { %6425 = vrot.lane.b32.xlu1 %v12095_v34, %s7608_s30  ;;  %v6357_v62 = vmul.f32 %v6341_v12, %v6324_v40  ;;  %v6135_v2 = vsub.f32 %v6085_v50, %v6119_v51  ;;  %v6326_v12 = vsub.f32 %v11979_v57, %v12081_v49 }
 0xd54   : > { %v6214_v53 = vsub.f32 1.5, %v6213_v18 }
 0xd55   : > { %v6374_v14 = vadd.f32 %v12029_v30, %v6357_v62  ;;  %v7417_v55 = vpop.eup %7416  ;;  %v6151_v19 = vadd.f32 1e-05, %v6135_v2 }
 0xd56   : > { %v6215_v33 = vmul.f32 %v7415_v10, %v6214_v53  ;;  %v6221_v58 = vmul.f32 %v7417_v55, %v6150_v6  ;;  %vm6227_vm2 = vweird.f32 %v7417_v55 }
 0xd57   : > { %v12103_v41 = vadd.f32 %v6374_v14, %v11423_v32  ;;  %7418 = vrsqrt.f32 %v6151_v19  ;;  %vm6228_vm4 = vmor %vm6226_vm3, %vm6227_vm2  ;;  %vm6236_vm6 = vweird.f32 %v6151_v19 }
 0xd58   : > { %v6219_v29 = vsel %vm6218_vm1, %v7415_v10, %v6215_v33  ;;  %v6222_v48 = vmul.f32 %v7417_v55, %v6221_v58  ;;  %v12108_v7 = vpop.f32.mrf.mxu2 }
 0xd59   : > { %v6342_v60 = vmul.f32 %v12017_v4, %v6219_v29  ;;  %v12112_v47 = vmul.f32 %v12103_v41, %v12103_v41  ;;  %v6120_v17 = vmul.f32 %v12108_v7, %v12108_v7 }
 0xd5a   : > { %v6223_v52 = vmul.f32 0.5, %v6222_v48  ;;  %v6088_v32 = vpop.f32.mrf.mxu3 }
 0xd5b   : > { %6427 = vrot.lane.b32.xlu2 %v12112_v47, %s7608_s30  ;;  %v6358_v22 = vmul.f32 %v6342_v60, %v6325_v38  ;;  %v6136_v15 = vsub.f32 %v6088_v32, %v6120_v17  ;;  %v6327_v60 = vsub.f32 %v11984_v44, %v12091_v28 }
 0xd5c   : > { %v6224_v39 = vsub.f32 1.5, %v6223_v52 }
 0xd5d   : > { %v6375_v20 = vadd.f32 %v12029_v30, %v6358_v22  ;;  %v7419_v63 = vpop.eup %7418  ;;  %v6152_v16 = vadd.f32 1e-05, %v6136_v15 }
 0xd5e   : > { %v6225_v10 = vmul.f32 %v7417_v55, %v6224_v39  ;;  %v6231_v27 = vmul.f32 %v7419_v63, %v6151_v19  ;;  %vm6237_vm5 = vweird.f32 %v7419_v63 }
 0xd5f   : > { %v12120_v46 = vadd.f32 %v6375_v20, %v11431_v21  ;;  %7420 = vrsqrt.f32 %v6152_v16  ;;  %vm6238_vm7 = vmor %vm6236_vm6, %vm6237_vm5  ;;  %vm6246_vm9 = vweird.f32 %v6152_v16 }
 0xd60   : > { %v6229_v23 = vsel %vm6228_vm4, %v7417_v55, %v6225_v10  ;;  %v6232_v9 = vmul.f32 %v7419_v63, %v6231_v27  ;;  %v12122_v5 = vpop.f32.mrf.mxu2 }
 0xd61   : > { %v12126_v40 = vmul.f32 %v12120_v46, %v12120_v46  ;;  %v6343_v18 = vmul.f32 %v12017_v4, %v6229_v23  ;;  %v6121_v6 = vmul.f32 %v12122_v5, %v12122_v5 }
 0xd62   : > { %v6233_v21 = vmul.f32 0.5, %v6232_v9  ;;  %v6091_v51 = vpop.f32.mrf.mxu3 }
 0xd63   : > { %6429 = vrot.lane.b32.xlu0 %v12126_v40, %s7608_s30  ;;  %v6137_v50 = vsub.f32 %v6091_v51, %v6121_v6  ;;  %v6359_v62 = vmul.f32 %v6343_v18, %v6326_v12  ;;  %v6328_v12 = vsub.f32 %v11989_v11, %v12108_v7 }
 0xd64   : > { %v6234_v53 = vsub.f32 1.5, %v6233_v21 }
 0xd65   : > { %v7421_v2 = vpop.eup %7420  ;;  %v6153_v14 = vadd.f32 1e-05, %v6137_v50  ;;  %v6376_v55 = vadd.f32 %v12029_v30, %v6359_v62 }
 0xd66   : > { %v6235_v33 = vmul.f32 %v7419_v63, %v6234_v53  ;;  %v6241_v57 = vmul.f32 %v7421_v2, %v6152_v16  ;;  %vm6247_vm8 = vweird.f32 %v7421_v2 }
 0xd67   : > { %7422 = vrsqrt.f32 %v6153_v14  ;;  %v12137_v49 = vadd.f32 %v6376_v55, %v11435_v13  ;;  %vm6248_vm10 = vmor %vm6246_vm9, %vm6247_vm8  ;;  %vm6256_vm12 = vweird.f32 %v6153_v14 }
 0xd68   : > { %v6239_v58 = vsel %vm6238_vm7, %v7419_v63, %v6235_v33  ;;  %v6242_v29 = vmul.f32 %v7421_v2, %v6241_v57  ;;  %v12139_v38 = vpop.f32.mrf.mxu2 }
 0xd69   : > { %v6344_v48 = vmul.f32 %v12017_v4, %v6239_v58  ;;  %v6122_v17 = vmul.f32 %v12139_v38, %v12139_v38  ;;  %v12148_v19 = vmul.f32 %v12137_v49, %v12137_v49 }
 0xd6a   : > { %v6243_v52 = vmul.f32 0.5, %v6242_v29  ;;  %v6094_v32 = vpop.f32.mrf.mxu3 }
 0xd6b   : > { %v6138_v13 = vsub.f32 %v6094_v32, %v6122_v17  ;;  %6431 = vrot.lane.b32.xlu1 %v12148_v19, %s7608_s30  ;;  %v6360_v22 = vmul.f32 %v6344_v48, %v6327_v60  ;;  %v6329_v60 = vsub.f32 %v11994_v3, %v12122_v5 }
 0xd6c   : > { %v6244_v15 = vsub.f32 1.5, %v6243_v52 }
 0xd6d   : > { %v7423_v39 = vpop.eup %7422  ;;  %v6154_v44 = vadd.f32 1e-05, %v6138_v13  ;;  %v6377_v28 = vadd.f32 %v12029_v30, %v6360_v22 }
 0xd6e   : > { %v6245_v20 = vmul.f32 %v7421_v2, %v6244_v15  ;;  %v6251_v63 = vmul.f32 %v7423_v39, %v6153_v14  ;;  %vm6257_vm11 = vweird.f32 %v7423_v39 }
 0xd6f   : > { %7424 = vrsqrt.f32 %v6154_v44  ;;  %v12154_v10 = vadd.f32 %v6377_v28, %v11446_v0  ;;  %vm6258_vm13 = vmor %vm6256_vm12, %vm6257_vm11  ;;  %vm6266_vm15 = vweird.f32 %v6154_v44 }
 0xd70   : > { %v6249_v27 = vsel %vm6248_vm10, %v7421_v2, %v6245_v20  ;;  %v6252_v23 = vmul.f32 %v7423_v39, %v6251_v63  ;;  %v12156_v9 = vpop.f32.mrf.mxu2 }
 0xd71   : > { %v6345_v18 = vmul.f32 %v12017_v4, %v6249_v27  ;;  %v6123_v6 = vmul.f32 %v12156_v9, %v12156_v9  ;;  %v12165_v16 = vmul.f32 %v12154_v10, %v12154_v10 }
 0xd72   : > { %v6253_v21 = vmul.f32 0.5, %v6252_v23  ;;  %v6097_v51 = vpop.f32.mrf.mxu3 }
 0xd73   : > { %v6139_v0 = vsub.f32 %v6097_v51, %v6123_v6  ;;  %6433 = vrot.lane.b32.xlu2 %v12165_v16, %s7608_s30  ;;  %v6361_v50 = vmul.f32 %v6345_v18, %v6328_v12 }
 0xd74   : > { %v6254_v62 = vsub.f32 1.5, %v6253_v21 }
 0xd75   : > { %v7425_v53 = vpop.eup %7424  ;;  %v6155_v11 = vadd.f32 1e-05, %v6139_v0  ;;  %v6378_v7 = vadd.f32 %v12029_v30, %v6361_v50 }
 0xd76   : > { %v6255_v2 = vmul.f32 %v7423_v39, %v6254_v62  ;;  %v6261_v55 = vmul.f32 %v7425_v53, %v6154_v44  ;;  %vm6267_vm14 = vweird.f32 %v7425_v53 }
 0xd77   : > { %7426 = vrsqrt.f32 %v6155_v11  ;;  %v12171_v33 = vadd.f32 %v6378_v7, %v11454_v1  ;;  %vm6268_vm0 = vmor %vm6266_vm15, %vm6267_vm14  ;;  %vm6276_vm2 = vweird.f32 %v6155_v11 }
 0xd78   : > { %v6259_v57 = vsel %vm6258_vm13, %v7423_v39, %v6255_v2  ;;  %v6262_v58 = vmul.f32 %v7425_v53, %v6261_v55  ;;  %v12173_v29 = vpop.f32.mrf.mxu2 }
 0xd79   : > { %v6346_v48 = vmul.f32 %v12017_v4, %v6259_v57  ;;  %v6124_v17 = vmul.f32 %v12173_v29, %v12173_v29  ;;  %v12182_v14 = vmul.f32 %v12171_v33, %v12171_v33 }
 0xd7a   : > { %v6263_v52 = vmul.f32 0.5, %v6262_v58  ;;  %v6100_v32 = vpop.f32.mrf.mxu3 }
 0xd7b   : > { %v6140_v1 = vsub.f32 %v6100_v32, %v6124_v17  ;;  %6435 = vrot.lane.b32.xlu0 %v12182_v14, %s7608_s30  ;;  %v6362_v13 = vmul.f32 %v6346_v48, %v6329_v60 }
 0xd7c   : > { %v6264_v22 = vsub.f32 1.5, %v6263_v52 }
 0xd7d   : > { %v6420_v15 = vpop.permute.xlu1 %6419  ;;  %v7427_v3 = vpop.eup %7426  ;;  %v12186_v5 = vadd.f32 1e-05, %v6140_v1  ;;  %v6379_v28 = vadd.f32 %v12029_v30, %v6362_v13 }
 0xd7e   : > { %v12189_v39 = vadd.f32 %v6420_v15, %v12042_v25  ;;  %v6265_v20 = vmul.f32 %v7425_v53, %v6264_v22  ;;  %v6271_v63 = vmul.f32 %v7427_v3, %v6155_v11  ;;  %v6330_v25 = vsub.f32 %v11999_v36, %v12139_v38 }
 0xd7f   : > { %7428 = vrsqrt.f32 %v12186_v5  ;;  %v12194_v27 = vadd.f32 %v6379_v28, %v11458_v43  ;;  %vm6277_vm1 = vweird.f32 %v7427_v3  ;;  %vm6286_vm6 = vweird.f32 %v12186_v5 }
 0xd80   : > { %v6269_v23 = vsel %vm6268_vm0, %v7425_v53, %v6265_v20  ;;  %v6272_v12 = vmul.f32 %v7427_v3, %v6271_v63  ;;  %7430 = vrsqrt.f32 %v12189_v39  ;;  %v12197_v18 = vpop.f32.mrf.mxu2  ;;  %vm6278_vm3 = vmor %vm6276_vm2, %vm6277_vm1  ;;  %vm6473_vm8 = vweird.f32 %v12189_v39 }
 0xd81   : > { %v6347_v6 = vmul.f32 %v12017_v4, %v6269_v23  ;;  %v6125_v44 = vmul.f32 %v12197_v18, %v12197_v18  ;;  %v12206_v21 = vmul.f32 %v12194_v27, %v12194_v27 }
 0xd82   : > { %v6273_v43 = vmul.f32 0.5, %v6272_v12  ;;  %v6103_v51 = vpop.f32.mrf.mxu3 }
 0xd83   : > { %v6141_v0 = vsub.f32 %v6103_v51, %v6125_v44  ;;  %6437 = vrot.lane.b32.xlu1 %v12206_v21, %s7608_s30  ;;  %v6363_v50 = vmul.f32 %v6347_v6, %v6330_v25 }
 0xd84   : > { %v6274_v62 = vsub.f32 1.5, %v6273_v43 }
 0xd85   : > { %v6422_v53 = vpop.permute.xlu2 %6421  ;;  %v7429_v36 = vpop.eup %7428  ;;  %v12210_v38 = vadd.f32 1e-05, %v6141_v0  ;;  %v6380_v58 = vadd.f32 %v12029_v30, %v6363_v50  ;;  %v6332_v50 = vsub.f32 %v12009_v42, %v12173_v29 }
 0xd86   : > { %v12213_v7 = vadd.f32 %v6422_v53, %v12061_v45  ;;  %v7431_v2 = vpop.eup %7430  ;;  %v6275_v55 = vmul.f32 %v7427_v3, %v6274_v62  ;;  %v6281_v57 = vmul.f32 %v7429_v36, %v12186_v5  ;;  %v6331_v45 = vsub.f32 %v12004_v26, %v12156_v9 }
 0xd87   : > { %v6468_v60 = vmul.f32 %v7431_v2, %v12189_v39  ;;  %7432 = vrsqrt.f32 %v12210_v38  ;;  %v12228_v15 = vadd.f32 %v6380_v58, %v11469_v61  ;;  %vm6287_vm4 = vweird.f32 %v7429_v36 }
 0xd88   : > { %v6279_v48 = vsel %vm6278_vm3, %v7427_v3, %v6275_v55  ;;  %v6282_v17 = vmul.f32 %v7429_v36, %v6281_v57  ;;  %7434 = vrsqrt.f32 %v12213_v7  ;;  %v12220_v52 = vpop.f32.mrf.mxu2  ;;  %vm6474_vm5 = vweird.f32 %v7431_v2  ;;  %vm6288_vm7 = vmor %vm6286_vm6, %vm6287_vm4  ;;  %v12467_v55 = vld [vmem:[#allocation5_spill] sm:$0xff] }
 0xd89   : > { %v6348_v11 = vmul.f32 %v12017_v4, %v6279_v48  ;;  %v6469_v32 = vmul.f32 %v7431_v2, %v6468_v60  ;;  %v6126_v1 = vmul.f32 %v12220_v52, %v12220_v52  ;;  %v12232_v23 = vmul.f32 %v12228_v15, %v12228_v15  ;;  %vm6475_vm9 = vmor %vm6473_vm8, %vm6474_vm5 }
 0xd8a   : > { %v6283_v13 = vmul.f32 0.5, %v6282_v17  ;;  %v6106_v22 = vpop.f32.mrf.mxu3  ;;  %v12238_v61 = vstv %s6917_s19  ;;  %vm6296_vm12 = vweird.f32 %v12210_v38  ;;  %vm6483_vm14 = vweird.f32 %v12213_v7 }
 0xd8b   : > { %v6470_v3 = vmul.f32 0.5, %v6469_v32  ;;  %v6142_v28 = vsub.f32 %v6106_v22, %v6126_v1  ;;  %v6364_v20 = vmul.f32 %v6348_v11, %v6331_v45  ;;  %6439 = vrot.lane.b32.xlu2 %v12232_v23, %s7608_s30 }
 0xd8c   : > { %v6284_v63 = vsub.f32 1.5, %v6283_v13 }
 0xd8d   : > { %v7433_v26 = vpop.eup %7432  ;;  %v6471_v9 = vsub.f32 1.5, %v6470_v3  ;;  %v12234_v12 = vadd.f32 1e-05, %v6142_v28  ;;  %v6381_v25 = vadd.f32 %v12029_v30, %v6364_v20 }
 0xd8e   : > { %v7435_v6 = vpop.eup %7434  ;;  %v6285_v44 = vmul.f32 %v7429_v36, %v6284_v63  ;;  %v6291_v43 = vmul.f32 %v7433_v26, %v12210_v38  ;;  %vm6297_vm10 = vweird.f32 %v7433_v26 }
 0xd8f   : > { %v6472_v51 = vmul.f32 %v7431_v2, %v6471_v9  ;;  %v6478_v0 = vmul.f32 %v7435_v6, %v12213_v7  ;;  %7436 = vrsqrt.f32 %v12234_v12  ;;  %v12252_v57 = vadd.f32 %v6381_v25, %v12467_v55  ;;  %vm6298_vm13 = vmor %vm6296_vm12, %vm6297_vm10 }
 0xd90   : > { %v6289_v62 = vsel %vm6288_vm7, %v7429_v36, %v6285_v44  ;;  %v6292_v5 = vmul.f32 %v7433_v26, %v6291_v43  ;;  %v12249_v53 = vpop.f32.mrf.mxu2  ;;  %vm6484_vm11 = vweird.f32 %v7435_v6  ;;  %v12468_v44 = vld [vmem:[#allocation6_spill] sm:$0xff]  ;;  %vm6306_vm1 = vweird.f32 %v12234_v12 }
 0xd91   : > { %v6349_v58 = vmul.f32 %v12017_v4, %v6289_v62  ;;  %v6476_v60 = vsel %vm6475_vm9, %v7431_v2, %v6472_v51  ;;  %v6479_v39 = vmul.f32 %v7435_v6, %v6478_v0  ;;  %v6127_v48 = vmul.f32 %v12249_v53, %v12249_v53  ;;  %vm6485_vm15 = vmor %vm6483_vm14, %vm6484_vm11 }
 0xd92   : > { %v6628_v17 = vmul.f32 %v12238_v61, %v6476_v60  ;;  %v6293_v45 = vmul.f32 0.5, %v6292_v5  ;;  %v6109_v42 = vpop.f32.mrf.mxu3  ;;  %v12260_v29 = vmul.f32 %v12252_v57, %v12252_v57 }
 0xd93   : > { %v6480_v36 = vmul.f32 0.5, %v6479_v39  ;;  %v6143_v11 = vsub.f32 %v6109_v42, %v6127_v48  ;;  %v6365_v32 = vmul.f32 %v6349_v58, %v6332_v50  ;;  %v6333_v50 = vsub.f32 %v12019_v31, %v12197_v18 }
 0xd94   : > { %v6644_v1 = vsub.f32 1.0, %v6628_v17  ;;  %v6294_v13 = vsub.f32 1.5, %v6293_v45  ;;  %6441 = vrot.lane.b32.xlu0 %v12260_v29, %s7608_s30  ;;  %v12469_v17 = vld [vmem:[#allocation7_spill] sm:$0xff] }
 0xd95   : > { %v7437_v2 = vpop.eup %7436  ;;  %v6481_v22 = vsub.f32 1.5, %v6480_v36  ;;  %v6159_v3 = vadd.f32 1e-05, %v6143_v11  ;;  %v6382_v28 = vadd.f32 %v12029_v30, %v6365_v32  ;;  %v6334_v32 = vsub.f32 %v12031_v35, %v12220_v52  ;;  %v12470_v52 = vld [vmem:[#allocation8_spill] sm:$0xff] }
 0xd96   : > { %v6660_v20 = vmax.f32 %v6644_v1, 0.0  ;;  %v6295_v63 = vmul.f32 %v7433_v26, %v6294_v13  ;;  %v6301_v9 = vmul.f32 %v7437_v2, %v12234_v12  ;;  %vm6307_vm0 = vweird.f32 %v7437_v2 }
 0xd97   : > { %v6482_v25 = vmul.f32 %v7435_v6, %v6481_v22  ;;  %7438 = vrsqrt.f32 %v6159_v3  ;;  %v12276_v43 = vadd.f32 %v6382_v28, %v12468_v44  ;;  %vm6308_vm2 = vmor %vm6306_vm1, %vm6307_vm0  ;;  %vm6316_vm4 = vweird.f32 %v6159_v3 }
 0xd98   : > { %v6676_v51 = vmul.f32 %v6660_v20, %v12038_v24  ;;  %v6299_v38 = vsel %vm6298_vm13, %v7433_v26, %v6295_v63  ;;  %v6302_v0 = vmul.f32 %v7437_v2, %v6301_v9 }
 0xd99   : > { %v6350_v62 = vmul.f32 %v12017_v4, %v6299_v38  ;;  %v6486_v5 = vsel %vm6485_vm15, %v7435_v6, %v6482_v25  ;;  %v12285_v55 = vmul.f32 %v12276_v43, %v12276_v43  ;;  %v6335_v25 = vsub.f32 %v12046_v56, %v12249_v53 }
 0xd9a   : > { %6692 = vst [vmem:[%s12272_s26] sm:$0xff] %v6676_v51  ;;  %v6629_v7 = vmul.f32 %v12238_v61, %v6486_v5  ;;  %v6303_v58 = vmul.f32 0.5, %v6302_v0 }
 0xd9b   : > { %6443 = vrot.lane.b32.xlu1 %v12285_v55, %s7608_s30  ;;  %v6366_v24 = vmul.f32 %v6350_v62, %v6333_v50  ;;  %v12471_v50 = vld [vmem:[#allocation9_spill] sm:$0xff] }
 0xd9c   : > { %v6645_v26 = vsub.f32 1.0, %v6629_v7  ;;  %v6304_v60 = vsub.f32 1.5, %v6303_v58 }
 0xd9d   : > { %v7439_v31 = vpop.eup %7438  ;;  %v6383_v18 = vadd.f32 %v12029_v30, %v6366_v24 }
 0xd9e   : > { %v6661_v6 = vmax.f32 %v6645_v26, 0.0  ;;  %v6305_v39 = vmul.f32 %v7437_v2, %v6304_v60  ;;  %v6311_v48 = vmul.f32 %v7439_v31, %v6159_v3  ;;  %vm6317_vm3 = vweird.f32 %v7439_v31 }
 0xd9f   : > { %v12294_v45 = vadd.f32 %v6383_v18, %v12469_v17  ;;  %vm6318_vm5 = vmor %vm6316_vm4, %vm6317_vm3 }
 0xda0   : > { %v6677_v42 = vmul.f32 %v6661_v6, %v12055_v37  ;;  %v6309_v36 = vsel %vm6308_vm2, %v7437_v2, %v6305_v39  ;;  %v6312_v11 = vmul.f32 %v7439_v31, %v6311_v48 }
 0xda1   : > { %v6351_v1 = vmul.f32 %v12017_v4, %v6309_v36  ;;  %v12302_v13 = vmul.f32 %v12294_v45, %v12294_v45 }
 0xda2   : > { %6693 = vst [vmem:[%s12272_s26 + $0x8] sm:$0xff] %v6677_v42  ;;  %v6313_v12 = vmul.f32 0.5, %v6312_v11 }
 0xda3   : > { %6445 = vrot.lane.b32.xlu2 %v12302_v13, %s7608_s30  ;;  %v6367_v22 = vmul.f32 %v6351_v1, %v6334_v32 }
 0xda4   : > { %v6314_v28 = vsub.f32 1.5, %v6313_v12 }
 0xda5   : > { %v6424_v37 = vpop.permute.xlu0 %6423  ;;  %v6384_v20 = vadd.f32 %v12029_v30, %v6367_v22 }
 0xda6   : > { %v6453_v2 = vadd.f32 %v6424_v37, %v12071_v8  ;;  %v6315_v35 = vmul.f32 %v7439_v31, %v6314_v28 }
 0xda7   : > { %v12310_v63 = vadd.f32 %v6384_v20, %v12470_v52 }
 0xda8   : > { %7440 = vrsqrt.f32 %v6453_v2  ;;  %v6319_v9 = vsel %vm6318_vm5, %v7439_v31, %v6315_v35  ;;  %vm6493_vm7 = vweird.f32 %v6453_v2 }
 0xda9   : > { %v6352_v44 = vmul.f32 %v12017_v4, %v6319_v9  ;;  %v12317_v51 = vmul.f32 %v12310_v63, %v12310_v63 }
 0xdab   : > { %6447 = vrot.lane.b32.xlu0 %v12317_v51, %s7608_s30  ;;  %v6368_v8 = vmul.f32 %v6352_v44, %v6335_v25 }
 0xdad   : > { %v6385_v38 = vadd.f32 %v12029_v30, %v6368_v8 }
 0xdae   : > { %v7441_v3 = vpop.eup %7440 }
 0xdaf   : > { %v6488_v0 = vmul.f32 %v7441_v3, %v6453_v2  ;;  %v12323_v62 = vadd.f32 %v6385_v38, %v12471_v50  ;;  %vm6494_vm6 = vweird.f32 %v7441_v3 }
 0xdb0   : > { %vm6495_vm8 = vmor %vm6493_vm7, %vm6494_vm6 }
 0xdb1   : > { %v6489_v5 = vmul.f32 %v7441_v3, %v6488_v0  ;;  %v12327_v56 = vmul.f32 %v12323_v62, %v12323_v62 }
 0xdb3   : > { %v6490_v4 = vmul.f32 0.5, %v6489_v5  ;;  %6449 = vrot.lane.b32.xlu1 %v12327_v56, %s7608_s30 }
 0xdb5   : > { %v6491_v53 = vsub.f32 1.5, %v6490_v4  ;;  %v6428_v7 = vpop.permute.xlu2 %6427 }
 0xdb6   : > { %v6455_v58 = vadd.f32 %v6428_v7, %v12112_v47 }
 0xdb7   : > { %v6492_v30 = vmul.f32 %v7441_v3, %v6491_v53 }
 0xdb8   : > { %7442 = vrsqrt.f32 %v6455_v58  ;;  %vm6513_vm10 = vweird.f32 %v6455_v58 }
 0xdb9   : > { %v6496_v24 = vsel %vm6495_vm8, %v7441_v3, %v6492_v30 }
 0xdba   : > { %v6630_v26 = vmul.f32 %v12238_v61, %v6496_v24 }
 0xdbc   : > { %v6646_v60 = vsub.f32 1.0, %v6630_v26 }
 0xdbe   : > { %v7443_v31 = vpop.eup %7442  ;;  %v6662_v18 = vmax.f32 %v6646_v60, 0.0 }
 0xdbf   : > { %v6508_v6 = vmul.f32 %v7443_v31, %v6455_v58  ;;  %vm6514_vm9 = vweird.f32 %v7443_v31 }
 0xdc0   : > { %v6678_v39 = vmul.f32 %v6662_v18, %v12067_v54  ;;  %vm6515_vm11 = vmor %vm6513_vm10, %vm6514_vm9 }
 0xdc1   : > { %v6509_v48 = vmul.f32 %v7443_v31, %v6508_v6 }
 0xdc2   : > { %6694 = vst [vmem:[%s12272_s26 + $0x10] sm:$0xff] %v6678_v39 }
 0xdc3   : > { %v6510_v17 = vmul.f32 0.5, %v6509_v48 }
 0xdc5   : > { %v6511_v42 = vsub.f32 1.5, %v6510_v17  ;;  %v6426_v36 = vpop.permute.xlu1 %6425 }
 0xdc6   : > { %v6454_v47 = vadd.f32 %v6426_v36, %v12095_v34 }
 0xdc7   : > { %v6512_v11 = vmul.f32 %v7443_v31, %v6511_v42 }
 0xdc8   : > { %7444 = vrsqrt.f32 %v6454_v47  ;;  %vm6503_vm13 = vweird.f32 %v6454_v47 }
 0xdc9   : > { %v6516_v32 = vsel %vm6515_vm11, %v7443_v31, %v6512_v11 }
 0xdca   : > { %v6632_v1 = vmul.f32 %v12238_v61, %v6516_v32 }
 0xdcc   : > { %v6648_v12 = vsub.f32 1.0, %v6632_v1 }
 0xdcd   : > { %v6434_v54 = vpop.permute.xlu2 %6433 }
 0xdce   : > { %v7445_v22 = vpop.eup %7444  ;;  %v6664_v28 = vmax.f32 %v6648_v12, 0.0  ;;  %v6458_v2 = vadd.f32 %v6434_v54, %v12165_v16 }
 0xdcf   : > { %v6498_v37 = vmul.f32 %v7445_v22, %v6454_v47  ;;  %vm6504_vm12 = vweird.f32 %v7445_v22 }
 0xdd0   : > { %v6680_v20 = vmul.f32 %v6664_v28, %v12103_v41  ;;  %7446 = vrsqrt.f32 %v6458_v2  ;;  %vm6505_vm14 = vmor %vm6503_vm13, %vm6504_vm12  ;;  %vm6543_vm0 = vweird.f32 %v6458_v2 }
 0xdd1   : > { %v6499_v35 = vmul.f32 %v7445_v22, %v6498_v37 }
 0xdd2   : > { %6696 = vst [vmem:[%s12272_s26 + $0x20] sm:$0xff] %v6680_v20 }
 0xdd3   : > { %v6500_v34 = vmul.f32 0.5, %v6499_v35 }
 0xdd5   : > { %v6501_v52 = vsub.f32 1.5, %v6500_v34  ;;  %v6430_v9 = vpop.permute.xlu0 %6429 }
 0xdd6   : > { %v6456_v25 = vadd.f32 %v6430_v9, %v12126_v40  ;;  %v7447_v44 = vpop.eup %7446 }
 0xdd7   : > { %v6502_v8 = vmul.f32 %v7445_v22, %v6501_v52  ;;  %v6538_v3 = vmul.f32 %v7447_v44, %v6458_v2  ;;  %vm6544_vm15 = vweird.f32 %v7447_v44 }
 0xdd8   : > { %7448 = vrsqrt.f32 %v6456_v25  ;;  %vm6545_vm1 = vmor %vm6543_vm0, %vm6544_vm15  ;;  %vm6523_vm3 = vweird.f32 %v6456_v25 }
 0xdd9   : > { %v6506_v38 = vsel %vm6505_vm14, %v7445_v22, %v6502_v8  ;;  %v6539_v0 = vmul.f32 %v7447_v44, %v6538_v3 }
 0xdda   : > { %v6631_v16 = vmul.f32 %v12238_v61, %v6506_v38 }
 0xddb   : > { %v6540_v50 = vmul.f32 0.5, %v6539_v0 }
 0xddc   : > { %v6647_v41 = vsub.f32 1.0, %v6631_v16 }
 0xddd   : > { %v6541_v53 = vsub.f32 1.5, %v6540_v50  ;;  %v6432_v7 = vpop.permute.xlu1 %6431 }
 0xdde   : > { %v7449_v5 = vpop.eup %7448  ;;  %v6663_v4 = vmax.f32 %v6647_v41, 0.0  ;;  %v6457_v40 = vadd.f32 %v6432_v7, %v12148_v19 }
 0xddf   : > { %v6518_v58 = vmul.f32 %v7449_v5, %v6456_v25  ;;  %v6542_v24 = vmul.f32 %v7447_v44, %v6541_v53  ;;  %vm6524_vm2 = vweird.f32 %v7449_v5 }
 0xde0   : > { %v6679_v30 = vmul.f32 %v6663_v4, %v12087_v59  ;;  %7450 = vrsqrt.f32 %v6457_v40  ;;  %vm6525_vm4 = vmor %vm6523_vm3, %vm6524_vm2  ;;  %vm6533_vm6 = vweird.f32 %v6457_v40 }
 0xde1   : > { %v6519_v26 = vmul.f32 %v7449_v5, %v6518_v58  ;;  %v6546_v60 = vsel %vm6545_vm1, %v7447_v44, %v6542_v24 }
 0xde2   : > { %6695 = vst [vmem:[%s12272_s26 + $0x18] sm:$0xff] %v6679_v30  ;;  %v6635_v31 = vmul.f32 %v12238_v61, %v6546_v60 }
 0xde3   : > { %v6520_v18 = vmul.f32 0.5, %v6519_v26 }
 0xde4   : > { %v6651_v6 = vsub.f32 1.0, %v6635_v31 }
 0xde5   : > { %v6521_v39 = vsub.f32 1.5, %v6520_v18  ;;  %v6440_v47 = vpop.permute.xlu2 %6439 }
 0xde6   : > { %v7451_v48 = vpop.eup %7450  ;;  %v6667_v17 = vmax.f32 %v6651_v6, 0.0  ;;  %v6461_v1 = vadd.f32 %v6440_v47, %v12232_v23 }
 0xde7   : > { %v6522_v42 = vmul.f32 %v7449_v5, %v6521_v39  ;;  %v6528_v59 = vmul.f32 %v7451_v48, %v6457_v40  ;;  %vm6534_vm5 = vweird.f32 %v7451_v48 }
 0xde8   : > { %v6683_v19 = vmul.f32 %v6667_v17, %v12154_v10  ;;  %7452 = vrsqrt.f32 %v6461_v1  ;;  %vm6535_vm7 = vmor %vm6533_vm6, %vm6534_vm5  ;;  %vm6573_vm9 = vweird.f32 %v6461_v1 }
 0xde9   : > { %v6526_v36 = vsel %vm6525_vm4, %v7449_v5, %v6522_v42  ;;  %v6529_v32 = vmul.f32 %v7451_v48, %v6528_v59 }
 0xdea   : > { %v6633_v11 = vmul.f32 %v12238_v61, %v6526_v36  ;;  %6699 = vst [vmem:[%s12272_s26 + $0x38] sm:$0xff] %v6683_v19 }
 0xdeb   : > { %v6530_v22 = vmul.f32 0.5, %v6529_v32 }
 0xdec   : > { %v6649_v12 = vsub.f32 1.0, %v6633_v11 }
 0xded   : > { %v6531_v54 = vsub.f32 1.5, %v6530_v22  ;;  %v6436_v37 = vpop.permute.xlu0 %6435 }
 0xdee   : > { %v6665_v28 = vmax.f32 %v6649_v12, 0.0  ;;  %v6459_v2 = vadd.f32 %v6436_v37, %v12182_v14  ;;  %v7453_v35 = vpop.eup %7452 }
 0xdef   : > { %v6532_v20 = vmul.f32 %v7451_v48, %v6531_v54  ;;  %v6568_v52 = vmul.f32 %v7453_v35, %v6461_v1  ;;  %vm6574_vm8 = vweird.f32 %v7453_v35 }
 0xdf0   : > { %v6681_v10 = vmul.f32 %v6665_v28, %v12120_v46  ;;  %7454 = vrsqrt.f32 %v6459_v2  ;;  %vm6575_vm10 = vmor %vm6573_vm9, %vm6574_vm8  ;;  %vm6553_vm12 = vweird.f32 %v6459_v2 }
 0xdf1   : > { %v6536_v23 = vsel %vm6535_vm7, %v7451_v48, %v6532_v20  ;;  %v6569_v25 = vmul.f32 %v7453_v35, %v6568_v52 }
 0xdf2   : > { %6697 = vst [vmem:[%s12272_s26 + $0x28] sm:$0xff] %v6681_v10  ;;  %v6634_v34 = vmul.f32 %v12238_v61, %v6536_v23 }
 0xdf3   : > { %v6570_v38 = vmul.f32 0.5, %v6569_v25 }
 0xdf4   : > { %v6650_v9 = vsub.f32 1.0, %v6634_v34 }
 0xdf5   : > { %v6438_v44 = vpop.permute.xlu1 %6437  ;;  %v6571_v0 = vsub.f32 1.5, %v6570_v38 }
 0xdf6   : > { %v7455_v8 = vpop.eup %7454  ;;  %v6666_v3 = vmax.f32 %v6650_v9, 0.0  ;;  %v6460_v14 = vadd.f32 %v6438_v44, %v12206_v21 }
 0xdf7   : > { %v6548_v46 = vmul.f32 %v7455_v8, %v6459_v2  ;;  %v6572_v50 = vmul.f32 %v7453_v35, %v6571_v0  ;;  %vm6554_vm11 = vweird.f32 %v7455_v8 }
 0xdf8   : > { %v6682_v16 = vmul.f32 %v6666_v3, %v12137_v49  ;;  %7456 = vrsqrt.f32 %v6460_v14  ;;  %vm6555_vm13 = vmor %vm6553_vm12, %vm6554_vm11  ;;  %vm6563_vm15 = vweird.f32 %v6460_v14 }
 0xdf9   : > { %v6549_v41 = vmul.f32 %v7455_v8, %v6548_v46  ;;  %v6576_v4 = vsel %vm6575_vm10, %v7453_v35, %v6572_v50 }
 0xdfa   : > { %6698 = vst [vmem:[%s12272_s26 + $0x30] sm:$0xff] %v6682_v16  ;;  %v6638_v53 = vmul.f32 %v12238_v61, %v6576_v4 }
 0xdfb   : > { %v6550_v5 = vmul.f32 0.5, %v6549_v41 }
 0xdfc   : > { %v6654_v49 = vsub.f32 1.0, %v6638_v53 }
 0xdfd   : > { %v6551_v7 = vsub.f32 1.5, %v6550_v5  ;;  %v6446_v58 = vpop.permute.xlu2 %6445 }
 0xdfe   : > { %v7457_v21 = vpop.eup %7456  ;;  %v6464_v40 = vadd.f32 %v6446_v58, %v12302_v13  ;;  %v6670_v26 = vmax.f32 %v6654_v49, 0.0 }
 0xdff   : > { %v6552_v30 = vmul.f32 %v7455_v8, %v6551_v7  ;;  %v6558_v24 = vmul.f32 %v7457_v21, %v6460_v14  ;;  %vm6564_vm14 = vweird.f32 %v7457_v21 }
 0xe00   : > { %7458 = vrsqrt.f32 %v6464_v40  ;;  %v6686_v6 = vmul.f32 %v6670_v26, %v12228_v15  ;;  %vm6565_vm0 = vmor %vm6563_vm15, %vm6564_vm14  ;;  %vm6603_vm2 = vweird.f32 %v6464_v40 }
 0xe01   : > { %v6556_v60 = vsel %vm6555_vm13, %v7455_v8, %v6552_v30  ;;  %v6559_v31 = vmul.f32 %v7457_v21, %v6558_v24 }
 0xe02   : > { %v6636_v18 = vmul.f32 %v12238_v61, %v6556_v60  ;;  %6702 = vst [vmem:[%s12272_s26 + $0x50] sm:$0xff] %v6686_v6 }
 0xe03   : > { %v6560_v39 = vmul.f32 0.5, %v6559_v31 }
 0xe04   : > { %v6652_v48 = vsub.f32 1.0, %v6636_v18 }
 0xe05   : > { %v6561_v17 = vsub.f32 1.5, %v6560_v39 }
 0xe06   : > { %v7459_v13 = vpop.eup %7458  ;;  %v6668_v42 = vmax.f32 %v6652_v48, 0.0  ;;  %v6442_v59 = vpop.permute.xlu0 %6441 }
 0xe07   : > { %v6562_v19 = vmul.f32 %v7457_v21, %v6561_v17  ;;  %v6598_v36 = vmul.f32 %v7459_v13, %v6464_v40  ;;  %v6462_v47 = vadd.f32 %v6442_v59, %v12260_v29  ;;  %vm6604_vm1 = vweird.f32 %v7459_v13 }
 0xe08   : > { %v6684_v11 = vmul.f32 %v6668_v42, %v12171_v33  ;;  %vm6605_vm3 = vmor %vm6603_vm2, %vm6604_vm1 }
 0xe09   : > { %v6566_v32 = vsel %vm6565_vm0, %v7457_v21, %v6562_v19  ;;  %v6599_v1 = vmul.f32 %v7459_v13, %v6598_v36  ;;  %7460 = vrsqrt.f32 %v6462_v47  ;;  %vm6583_vm5 = vweird.f32 %v6462_v47 }
 0xe0a   : > { %6700 = vst [vmem:[%s12272_s26 + $0x40] sm:$0xff] %v6684_v11  ;;  %v6637_v15 = vmul.f32 %v12238_v61, %v6566_v32 }
 0xe0b   : > { %v6600_v12 = vmul.f32 0.5, %v6599_v1 }
 0xe0c   : > { %v6653_v22 = vsub.f32 1.0, %v6637_v15 }
 0xe0d   : > { %v6601_v28 = vsub.f32 1.5, %v6600_v12  ;;  %v6444_v54 = vpop.permute.xlu1 %6443 }
 0xe0e   : > { %v6669_v37 = vmax.f32 %v6653_v22, 0.0  ;;  %v6463_v2 = vadd.f32 %v6444_v54, %v12285_v55 }
 0xe0f   : > { %v7461_v10 = vpop.eup %7460  ;;  %v6602_v29 = vmul.f32 %v7459_v13, %v6601_v28 }
 0xe10   : > { %v6685_v33 = vmul.f32 %v6669_v37, %v12194_v27  ;;  %v6578_v20 = vmul.f32 %v7461_v10, %v6462_v47  ;;  %7462 = vrsqrt.f32 %v6463_v2  ;;  %vm6584_vm4 = vweird.f32 %v7461_v10 }
 0xe11   : > { %v6606_v35 = vsel %vm6605_vm3, %v7459_v13, %v6602_v29  ;;  %vm6585_vm6 = vmor %vm6583_vm5, %vm6584_vm4  ;;  %vm6593_vm8 = vweird.f32 %v6463_v2 }
 0xe12   : > { %6701 = vst [vmem:[%s12272_s26 + $0x48] sm:$0xff] %v6685_v33  ;;  %v6641_v23 = vmul.f32 %v12238_v61, %v6606_v35  ;;  %v6579_v34 = vmul.f32 %v7461_v10, %v6578_v20 }
 0xe14   : > { %v6657_v52 = vsub.f32 1.0, %v6641_v23  ;;  %v6580_v9 = vmul.f32 0.5, %v6579_v34 }
 0xe16   : > { %v7463_v25 = vpop.eup %7462  ;;  %v6673_v44 = vmax.f32 %v6657_v52, 0.0  ;;  %v6581_v8 = vsub.f32 1.5, %v6580_v9 }
 0xe17   : > { %v6588_v55 = vmul.f32 %v7463_v25, %v6463_v2  ;;  %vm6594_vm7 = vweird.f32 %v7463_v25 }
 0xe18   : > { %v6689_v3 = vmul.f32 %v6673_v44, %v12294_v45  ;;  %v6582_v38 = vmul.f32 %v7461_v10, %v6581_v8  ;;  %vm6595_vm9 = vmor %vm6593_vm8, %vm6594_vm7 }
 0xe19   : > { %v6589_v27 = vmul.f32 %v7463_v25, %v6588_v55 }
 0xe1a   : > { %6705 = vst [vmem:[%s12272_s26 + $0x68] sm:$0xff] %v6689_v3  ;;  %v6586_v14 = vsel %vm6585_vm6, %v7461_v10, %v6582_v38 }
 0xe1b   : > { %v6639_v46 = vmul.f32 %v12238_v61, %v6586_v14  ;;  %v6590_v16 = vmul.f32 0.5, %v6589_v27 }
 0xe1d   : > { %v6655_v0 = vsub.f32 1.0, %v6639_v46  ;;  %v6591_v41 = vsub.f32 1.5, %v6590_v16  ;;  %v6448_v50 = vpop.permute.xlu0 %6447 }
 0xe1e   : > { %v6465_v5 = vadd.f32 %v6448_v50, %v12317_v51 }
 0xe1f   : > { %v6671_v4 = vmax.f32 %v6655_v0, 0.0  ;;  %v6592_v53 = vmul.f32 %v7463_v25, %v6591_v41 }
 0xe20   : > { %7464 = vrsqrt.f32 %v6465_v5  ;;  %vm6613_vm11 = vweird.f32 %v6465_v5 }
 0xe21   : > { %v6687_v45 = vmul.f32 %v6671_v4, %v12252_v57  ;;  %v6596_v7 = vsel %vm6595_vm9, %v7463_v25, %v6592_v53 }
 0xe22   : > { %v6640_v58 = vmul.f32 %v12238_v61, %v6596_v7 }
 0xe23   : > { %6703 = vst [vmem:[%s12272_s26 + $0x58] sm:$0xff] %v6687_v45 }
 0xe24   : > { %v6656_v21 = vsub.f32 1.0, %v6640_v58 }
 0xe25   : > { %v6450_v40 = vpop.permute.xlu1 %6449 }
 0xe26   : > { %v7465_v49 = vpop.eup %7464  ;;  %v6672_v30 = vmax.f32 %v6656_v21, 0.0  ;;  %v6466_v24 = vadd.f32 %v6450_v40, %v12327_v56 }
 0xe27   : > { %v6608_v26 = vmul.f32 %v7465_v49, %v6465_v5  ;;  %vm6614_vm10 = vweird.f32 %v7465_v49 }
 0xe28   : > { %v6688_v51 = vmul.f32 %v6672_v30, %v12276_v43  ;;  %7466 = vrsqrt.f32 %v6466_v24  ;;  %vm6615_vm12 = vmor %vm6613_vm11, %vm6614_vm10  ;;  %vm6623_vm14 = vweird.f32 %v6466_v24 }
 0xe29   : > { %v6609_v60 = vmul.f32 %v7465_v49, %v6608_v26 }
 0xe2a   : > { %6704 = vst [vmem:[%s12272_s26 + $0x60] sm:$0xff] %v6688_v51 }
 0xe2b   : > { %v6610_v31 = vmul.f32 0.5, %v6609_v60 }
 0xe2d   : > { %v6611_v18 = vsub.f32 1.5, %v6610_v31 }
 0xe2e   : > { %v7467_v57 = vpop.eup %7466 }
 0xe2f   : > { %v6612_v6 = vmul.f32 %v7465_v49, %v6611_v18  ;;  %v6618_v39 = vmul.f32 %v7467_v57, %v6466_v24  ;;  %vm6624_vm13 = vweird.f32 %v7467_v57 }
 0xe30   : > { %vm6625_vm15 = vmor %vm6623_vm14, %vm6624_vm13 }
 0xe31   : > { %v6616_v48 = vsel %vm6615_vm12, %v7465_v49, %v6612_v6  ;;  %v6619_v17 = vmul.f32 %v7467_v57, %v6618_v39 }
 0xe32   : > { %v6642_v13 = vmul.f32 %v12238_v61, %v6616_v48 }
 0xe33   : > { %v6620_v56 = vmul.f32 0.5, %v6619_v17 }
 0xe34   : > { %v6658_v42 = vsub.f32 1.0, %v6642_v13 }
 0xe35   : > { %v6621_v43 = vsub.f32 1.5, %v6620_v56 }
 0xe36   : > { %v6674_v59 = vmax.f32 %v6658_v42, 0.0 }
 0xe37   : > { %v6622_v19 = vmul.f32 %v7467_v57, %v6621_v43 }
 0xe38   : > { %v6690_v36 = vmul.f32 %v6674_v59, %v12310_v63 }
 0xe39   : > { %v6626_v47 = vsel %vm6625_vm15, %v7467_v57, %v6622_v19 }
 0xe3a   : > { %6706 = vst [vmem:[%s12272_s26 + $0x70] sm:$0xff] %v6690_v36  ;;  %v6643_v11 = vmul.f32 %v12238_v61, %v6626_v47 }
 0xe3c   : > { %v6659_v32 = vsub.f32 1.0, %v6643_v11 }
 0xe3e   : > { %v6675_v1 = vmax.f32 %v6659_v32, 0.0 }
 0xe40   : > { %v6691_v15 = vmul.f32 %v6675_v1, %v12323_v62 }
 0xe42   : > { %6707 = vst [vmem:[%s12272_s26 + $0x78] sm:$0xff] %v6691_v15 }
 0xe43 PF: > { %s16_s18 = sadd.s32 1, %s7605_s18  }
 0xe44   : > { %p13_p7 = scmp.ge.s32.totalorder %s16_s18, 4  }
 0xe46   :  { %15 = sbr.rel (!%p13_p7) target bundleno = 1 (0x1), region = 85 }
 0xe4b   :  { %6730 = vsyncpa [#allocation3], 1 }
 0xe4c   :  { %6732 = vsyncpa [#allocation3 + $0x1], 1 }

</bundles_post_ra>
